<compile_context>
chip_gen: v7x
topology: tpu7x:2x2x1
jax: 0.10.0
libtpu: 0.0.40
codegen_flags: <defaults>
</compile_context>

<pallas_src>
import jax
import jax.numpy as jnp
from jax import lax
from jax.experimental import pallas as pl
from jax.experimental.pallas import tpu as pltpu

# ----------------------------- static geometry (from the module) -----------------------------
IN_H = IN_W = 32                 # input spatial size fixed by fc1 in_features = 16*5*5
KS = 5                           # conv kernel size
C0, C1, C2 = 3, 6, 16            # channels: input, conv1, conv2
OH1 = IN_H - KS + 1              # 28  conv1 output H/W
PH1 = OH1 // 2                   # 14  pooled conv1 H
PW1 = PH1                        # 14  pooled conv1 W
OH2 = PH1 - KS + 1               # 10  conv2 output H/W (valid region)
PH2 = OH2 // 2                   # 5   pooled conv2 H
PW2 = PH2                        # 5   pooled conv2 W
F_IN = C2 * PH2 * PW2            # 400
F1, F2, F3 = 120, 84, 10

P1_ROWS = OH1 * OH1                                # 784 conv1 patches per image
A1_ROWS = PH1 * PW1 + (KS - 1) * PW1 + (KS - 1)    # 256 = 196 valid rows + shift padding


# ----------------------------------- the fused Pallas kernel ---------------------------------
def _net_kernel(p1_ref, w1_ref, b1_ref, w2_ref, b2_ref,
                fc1w_ref, fc1b_ref, fc2w_ref, fc2b_ref, fc3w_ref, fc3b_ref,
                o_ref, c1_ref, wp_ref, a1_ref, c2_ref):
    # ---- conv1 + ReLU: one (784, 75) @ (75, 6) MXU matmul; rows = oh*28 + ow ----
    y1 = jnp.dot(p1_ref[...], w1_ref[...], preferred_element_type=jnp.float32)
    c1_ref[...] = jnp.maximum(y1 + b1_ref[...], 0.0)

    # ---- maxpool 2x2, stage 1: pairs along W via stride-2 sublane reads ----
    even = c1_ref[pl.ds(0, OH1 * PW1, stride=2), :]
    odd = c1_ref[pl.ds(1, OH1 * PW1, stride=2), :]
    wp_ref[...] = jnp.maximum(even, odd)                    # rows = oh*14 + pw

    # ---- maxpool 2x2, stage 2: pairs along H, compacted into a1 (rows = ph*14 + pw) ----
    a1_ref[...] = jnp.zeros((A1_ROWS, C1), jnp.float32)     # also zeroes the pad rows
    for ph in range(PH1):
        src = (2 * ph) * PW1
        strip = jnp.maximum(wp_ref[pl.ds(src, PW1), :],
                            wp_ref[pl.ds(src + PW1, PW1), :])
        a1_ref[pl.ds(ph * PW1, PW1), :] = strip

    # ---- conv2 + ReLU: in-VMEM im2col -- each 5x5 tap is a shifted row-slice of a1;
    #      25 (196, 6) @ (6, 16) matmuls accumulate into the conv2 output. The output is
    #      computed on the full 14x14 grid; only its valid 10x10 corner is read below. ----
    y2 = None
    for di in range(KS):
        for dj in range(KS):
            t = di * KS + dj
            part = jnp.dot(a1_ref[pl.ds(di * PW1 + dj, PH1 * PW1), :],
                           w2_ref[pl.ds(t * C1, C1), :],
                           preferred_element_type=jnp.float32)
            y2 = part if y2 is None else y2 + part
    c2_ref[...] = jnp.maximum(y2 + b2_ref[...], 0.0)        # rows = oh2*14 + ow2

    # ---- maxpool 2x2 + flatten + fc1 -> relu -> fc2 -> relu -> fc3 ----
    # The flatten is folded into fc1: each pooled 5x5 position contributes a
    # (1, 16) @ (16, 120) matmul against the matching 16-row slice of the permuted fc1 weight.
    h1 = jnp.zeros((1, F1), jnp.float32)
    for ph2 in range(PH2):
        for pw2 in range(PW2):
            t = ph2 * PW2 + pw2
            base = (2 * ph2) * PW1 + 2 * pw2
            v = jnp.maximum(
                jnp.maximum(c2_ref[pl.ds(base, 1), :],
                            c2_ref[pl.ds(base + 1, 1), :]),
                jnp.maximum(c2_ref[pl.ds(base + PW1, 1), :],
                            c2_ref[pl.ds(base + PW1 + 1, 1), :]))
            h1 = h1 + jnp.dot(v, fc1w_ref[pl.ds(t * C2, C2), :],
                              preferred_element_type=jnp.float32)
    h1 = jnp.maximum(h1 + fc1b_ref[...], 0.0)
    h2 = jnp.maximum(
        jnp.dot(h1, fc2w_ref[...], preferred_element_type=jnp.float32) + fc2b_ref[...], 0.0)
    o_ref[0] = (jnp.dot(h2, fc3w_ref[...], preferred_element_type=jnp.float32)
                + fc3b_ref[...])


# ----------------------------------------- wrapper -------------------------------------------
@jax.jit
def net_forward(prep, x_nchw):
    B = x_nchw.shape[0]
    xh = jnp.transpose(x_nchw, (0, 2, 3, 1))                # NHWC
    # im2col for conv1 only (tiny at these sizes); conv2's im2col happens inside the kernel.
    taps = [xh[:, i:i + OH1, j:j + OH1, :] for i in range(KS) for j in range(KS)]
    p1 = jnp.stack(taps, axis=3).reshape(B * P1_ROWS, KS * KS * C0)

    out = pl.pallas_call(
        _net_kernel,
        grid=(B,),
        out_shape=jax.ShapeDtypeStruct((B, 1, F3), jnp.float32),
        in_specs=[
            pl.BlockSpec((P1_ROWS, KS * KS * C0), lambda b: (b, 0)),  # per-image patches
            pl.BlockSpec((KS * KS * C0, C1), lambda b: (0, 0)),       # conv1 weight
            pl.BlockSpec((1, C1), lambda b: (0, 0)),                  # conv1 bias
            pl.BlockSpec((KS * KS * C1, C2), lambda b: (0, 0)),       # conv2 weight
            pl.BlockSpec((1, C2), lambda b: (0, 0)),                  # conv2 bias
            pl.BlockSpec((F_IN, F1), lambda b: (0, 0)),               # fc1 weight (permuted)
            pl.BlockSpec((1, F1), lambda b: (0, 0)),                  # fc1 bias
            pl.BlockSpec((F1, F2), lambda b: (0, 0)),                 # fc2 weight
            pl.BlockSpec((1, F2), lambda b: (0, 0)),                  # fc2 bias
            pl.BlockSpec((F2, F3), lambda b: (0, 0)),                 # fc3 weight
            pl.BlockSpec((1, F3), lambda b: (0, 0)),                  # fc3 bias
        ],
        out_specs=pl.BlockSpec((1, 1, F3), lambda b: (b, 0, 0)),
        scratch_shapes=[
            pltpu.VMEM((P1_ROWS, C1), jnp.float32),        # relu(conv1), rows = oh*28+ow
            pltpu.VMEM((OH1 * PW1, C1), jnp.float32),      # W-pooled conv1
            pltpu.VMEM((A1_ROWS, C1), jnp.float32),        # pooled layer-1 act (+pad rows)
            pltpu.VMEM((PH1 * PW1, C2), jnp.float32),      # relu(conv2) on full 14x14 grid
        ],
        compiler_params=pltpu.CompilerParams(dimension_semantics=("parallel",)),
    )(p1, prep["w1"], prep["b1"], prep["w2"], prep["b2"],
      prep["fc1w"], prep["fc1b"], prep["fc2w"], prep["fc2b"],
      prep["fc3w"], prep["fc3b"])
    return out.reshape(B, F3)


# ----------------------------------- params & reference --------------------------------------
def init_params(key):
    """Deterministic synthetic params matching the PyTorch module's shapes/init."""
    ks = jax.random.split(key, 10)

    def u(k, shape, fan_in):
        b = 1.0 / jnp.sqrt(jnp.float32(fan_in))
        return jax.random.uniform(k, shape, jnp.float32, -b, b)

    return {
        "conv1_w": u(ks[0], (C1, C0, KS, KS), C0 * KS * KS),
        "conv1_b": u(ks[1], (C1,), C0 * KS * KS),
        "conv2_w": u(ks[2], (C2, C1, KS, KS), C1 * KS * KS),
        "conv2_b": u(ks[3], (C2,), C1 * KS * KS),
        "fc1_w": u(ks[4], (F1, F_IN), F_IN),
        "fc1_b": u(ks[5], (F1,), F_IN),
        "fc2_w": u(ks[6], (F2, F1), F1),
        "fc2_b": u(ks[7], (F2,), F1),
        "fc3_w": u(ks[8], (F3, F2), F2),
        "fc3_b": u(ks[9], (F3,), F2),
    }


def prepare_kernel_params(params):
    """One-time re-layout of PyTorch-layout params into kernel-friendly layouts."""
    w1 = jnp.transpose(params["conv1_w"], (2, 3, 1, 0)).reshape(KS * KS * C0, C1)
    w2 = jnp.transpose(params["conv2_w"], (2, 3, 1, 0)).reshape(KS * KS * C1, C2)
    # PyTorch flattens the pooled conv2 output as (c, ph, pw); the kernel flattens it as
    # (ph, pw, c) -- permute fc1's input axis to match, and store every fc weight as (in, out).
    fc1 = jnp.transpose(params["fc1_w"].reshape(F1, C2, PH2, PW2), (2, 3, 1, 0)).reshape(F_IN, F1)
    return {
        "w1": w1, "b1": params["conv1_b"].reshape(1, C1),
        "w2": w2, "b2": params["conv2_b"].reshape(1, C2),
        "fc1w": fc1, "fc1b": params["fc1_b"].reshape(1, F1),
        "fc2w": params["fc2_w"].T, "fc2b": params["fc2_b"].reshape(1, F2),
        "fc3w": params["fc3_w"].T, "fc3b": params["fc3_b"].reshape(1, F3),
    }


def net_reference(params, x):
    """Pure-JAX reference matching the PyTorch module's forward exactly."""
    dn = ("NCHW", "OIHW", "NCHW")
    y = lax.conv_general_dilated(x, params["conv1_w"], (1, 1), "VALID", dimension_numbers=dn)
    y = jnp.maximum(y + params["conv1_b"][None, :, None, None], 0.0)
    y = lax.reduce_window(y, -jnp.inf, lax.max, (1, 1, 2, 2), (1, 1, 2, 2), "VALID")
    y = lax.conv_general_dilated(y, params["conv2_w"], (1, 1), "VALID", dimension_numbers=dn)
    y = jnp.maximum(y + params["conv2_b"][None, :, None, None], 0.0)
    y = lax.reduce_window(y, -jnp.inf, lax.max, (1, 1, 2, 2), (1, 1, 2, 2), "VALID")
    y = y.reshape(y.shape[0], -1)
    y = jnp.maximum(y @ params["fc1_w"].T + params["fc1_b"], 0.0)
    y = jnp.maximum(y @ params["fc2_w"].T + params["fc2_b"], 0.0)
    return y @ params["fc3_w"].T + params["fc3_b"]


if __name__ == "__main__":
    # Input spatial size is fixed to 32x32 by fc1's in_features = 16*5*5.
    x = jax.random.normal(jax.random.PRNGKey(0), (2, 3, 32, 32), jnp.float32)
    params = init_params(jax.random.PRNGKey(42))
    prep = prepare_kernel_params(params)     # weights re-laid-out once, not per call

    out = net_forward(prep, x)
    jax.block_until_ready(out)
    assert out.shape == (2, F3), out.shape

    ref = net_reference(params, x)
    err = float(jnp.max(jnp.abs(out - ref)))
    assert err < 2e-2, f"kernel/reference mismatch: max|diff| = {err}"
    print("KERNEL_OK")
</pallas_src>

<mosaic_0001>
module attributes {stable_mosaic.version = 11 : i64} {
  func.func @_net_kernel(%arg0: i32, %arg1: memref<784x75xf32, #tpu.memory_space<vmem>>, %arg2: memref<75x6xf32, #tpu.memory_space<vmem>>, %arg3: memref<1x6xf32, #tpu.memory_space<vmem>>, %arg4: memref<150x16xf32, #tpu.memory_space<vmem>>, %arg5: memref<1x16xf32, #tpu.memory_space<vmem>>, %arg6: memref<400x120xf32, #tpu.memory_space<vmem>>, %arg7: memref<1x120xf32, #tpu.memory_space<vmem>>, %arg8: memref<120x84xf32, #tpu.memory_space<vmem>>, %arg9: memref<1x84xf32, #tpu.memory_space<vmem>>, %arg10: memref<84x10xf32, #tpu.memory_space<vmem>>, %arg11: memref<1x10xf32, #tpu.memory_space<vmem>>, %arg12: memref<1x1x10xf32, #tpu.memory_space<vmem>>, %arg13: memref<784x6xf32, #tpu.memory_space<vmem>>, %arg14: memref<392x6xf32, #tpu.memory_space<vmem>>, %arg15: memref<256x6xf32, #tpu.memory_space<vmem>>, %arg16: memref<196x16xf32, #tpu.memory_space<vmem>>) attributes {dimension_semantics = [#tpu.dimension_semantics<parallel>], iteration_bounds = array<i64: 2>, scalar_prefetch = 0 : i64, scratch_operands = 4 : i64, tpu.core_type = #tpu.core_type<tc>, window_params = [{transform_indices = @transform_0, window_bounds = array<i64: 784, 75>}, {pipeline_mode = #tpu.pipeline_mode<synchronous>, transform_indices = @transform_1, window_bounds = array<i64: 75, 6>}, {pipeline_mode = #tpu.pipeline_mode<synchronous>, transform_indices = @transform_2, window_bounds = array<i64: 1, 6>}, {pipeline_mode = #tpu.pipeline_mode<synchronous>, transform_indices = @transform_3, window_bounds = array<i64: 150, 16>}, {pipeline_mode = #tpu.pipeline_mode<synchronous>, transform_indices = @transform_4, window_bounds = array<i64: 1, 16>}, {pipeline_mode = #tpu.pipeline_mode<synchronous>, transform_indices = @transform_5, window_bounds = array<i64: 400, 120>}, {pipeline_mode = #tpu.pipeline_mode<synchronous>, transform_indices = @transform_6, window_bounds = array<i64: 1, 120>}, {pipeline_mode = #tpu.pipeline_mode<synchronous>, transform_indices = @transform_7, window_bounds = array<i64: 120, 84>}, {pipeline_mode = #tpu.pipeline_mode<synchronous>, transform_indices = @transform_8, window_bounds = array<i64: 1, 84>}, {pipeline_mode = #tpu.pipeline_mode<synchronous>, transform_indices = @transform_9, window_bounds = array<i64: 84, 10>}, {pipeline_mode = #tpu.pipeline_mode<synchronous>, transform_indices = @transform_10, window_bounds = array<i64: 1, 10>}, {transform_indices = @transform_11, window_bounds = array<i64: 1, 1, 10>}]} {
    %c0 = arith.constant 0 : index
    %c0_0 = arith.constant 0 : index
    %0 = vector.load %arg1[%c0, %c0_0] : memref<784x75xf32, #tpu.memory_space<vmem>>, vector<784x75xf32>
    %c0_1 = arith.constant 0 : index
    %c0_2 = arith.constant 0 : index
    %1 = vector.load %arg2[%c0_1, %c0_2] : memref<75x6xf32, #tpu.memory_space<vmem>>, vector<75x6xf32>
    %cst = arith.constant dense<0.000000e+00> : vector<784x6xf32>
    %2 = tpu.matmul %0, %1, %cst {dimension_numbers = #tpu.dot_dimension_numbers<[1], [0], [0], [1], [0, 0, 1, 1], [], []>} : vector<784x75xf32>, vector<75x6xf32>, vector<784x6xf32> -> vector<784x6xf32>
    %c0_3 = arith.constant 0 : index
    %c0_4 = arith.constant 0 : index
    %3 = vector.load %arg3[%c0_3, %c0_4] : memref<1x6xf32, #tpu.memory_space<vmem>>, vector<1x6xf32>
    %4 = vector.broadcast %3 : vector<1x6xf32> to vector<784x6xf32>
    %5 = arith.addf %2, %4 : vector<784x6xf32>
    %cst_5 = arith.constant 0.000000e+00 : f32
    %6 = vector.broadcast %cst_5 : f32 to vector<784x6xf32>
    %7 = arith.maximumf %5, %6 : vector<784x6xf32>
    %c0_6 = arith.constant 0 : index
    %c0_7 = arith.constant 0 : index
    %8 = vector.load %arg13[%c0_6, %c0_7] : memref<784x6xf32, #tpu.memory_space<vmem>>, vector<784x6xf32>
    tpu.vector_store %arg13[%c0_6, %c0_7], %7 {strides = array<i32>} : memref<784x6xf32, #tpu.memory_space<vmem>>, vector<784x6xf32>,
    %c0_8 = arith.constant 0 : index
    %c0_9 = arith.constant 0 : index
    %9 = tpu.strided_load %arg13[%c0_8, %c0_9] {strides = array<i32: 2, 1>} : memref<784x6xf32, #tpu.memory_space<vmem>>, vector<392x6xf32>
    %c1 = arith.constant 1 : index
    %c0_10 = arith.constant 0 : index
    %10 = tpu.strided_load %arg13[%c1, %c0_10] {strides = array<i32: 2, 1>} : memref<784x6xf32, #tpu.memory_space<vmem>>, vector<392x6xf32>
    %11 = arith.maximumf %9, %10 : vector<392x6xf32>
    %c0_11 = arith.constant 0 : index
    %c0_12 = arith.constant 0 : index
    %12 = vector.load %arg14[%c0_11, %c0_12] : memref<392x6xf32, #tpu.memory_space<vmem>>, vector<392x6xf32>
    tpu.vector_store %arg14[%c0_11, %c0_12], %11 {strides = array<i32>} : memref<392x6xf32, #tpu.memory_space<vmem>>, vector<392x6xf32>,
    %cst_13 = arith.constant 0.000000e+00 : f32
    %13 = vector.broadcast %cst_13 : f32 to vector<256x6xf32>
    %c0_14 = arith.constant 0 : index
    %c0_15 = arith.constant 0 : index
    %14 = vector.load %arg15[%c0_14, %c0_15] : memref<256x6xf32, #tpu.memory_space<vmem>>, vector<256x6xf32>
    tpu.vector_store %arg15[%c0_14, %c0_15], %13 {strides = array<i32>} : memref<256x6xf32, #tpu.memory_space<vmem>>, vector<256x6xf32>,
    %c0_16 = arith.constant 0 : index
    %c0_17 = arith.constant 0 : index
    %15 = vector.load %arg14[%c0_16, %c0_17] : memref<392x6xf32, #tpu.memory_space<vmem>>, vector<14x6xf32>
    %c14 = arith.constant 14 : index
    %c0_18 = arith.constant 0 : index
    %16 = vector.load %arg14[%c14, %c0_18] : memref<392x6xf32, #tpu.memory_space<vmem>>, vector<14x6xf32>
    %17 = arith.maximumf %15, %16 : vector<14x6xf32>
    %c0_19 = arith.constant 0 : index
    %c0_20 = arith.constant 0 : index
    %18 = vector.load %arg15[%c0_19, %c0_20] : memref<256x6xf32, #tpu.memory_space<vmem>>, vector<14x6xf32>
    tpu.vector_store %arg15[%c0_19, %c0_20], %17 {strides = array<i32>} : memref<256x6xf32, #tpu.memory_space<vmem>>, vector<14x6xf32>,
    %c28 = arith.constant 28 : index
    %c0_21 = arith.constant 0 : index
    %19 = vector.load %arg14[%c28, %c0_21] : memref<392x6xf32, #tpu.memory_space<vmem>>, vector<14x6xf32>
    %c42 = arith.constant 42 : index
    %c0_22 = arith.constant 0 : index
    %20 = vector.load %arg14[%c42, %c0_22] : memref<392x6xf32, #tpu.memory_space<vmem>>, vector<14x6xf32>
    %21 = arith.maximumf %19, %20 : vector<14x6xf32>
    %c14_23 = arith.constant 14 : index
    %c0_24 = arith.constant 0 : index
    %22 = vector.load %arg15[%c14_23, %c0_24] : memref<256x6xf32, #tpu.memory_space<vmem>>, vector<14x6xf32>
    tpu.vector_store %arg15[%c14_23, %c0_24], %21 {strides = array<i32>} : memref<256x6xf32, #tpu.memory_space<vmem>>, vector<14x6xf32>,
    %c56 = arith.constant 56 : index
    %c0_25 = arith.constant 0 : index
    %23 = vector.load %arg14[%c56, %c0_25] : memref<392x6xf32, #tpu.memory_space<vmem>>, vector<14x6xf32>
    %c70 = arith.constant 70 : index
    %c0_26 = arith.constant 0 : index
    %24 = vector.load %arg14[%c70, %c0_26] : memref<392x6xf32, #tpu.memory_space<vmem>>, vector<14x6xf32>
    %25 = arith.maximumf %23, %24 : vector<14x6xf32>
    %c28_27 = arith.constant 28 : index
    %c0_28 = arith.constant 0 : index
    %26 = vector.load %arg15[%c28_27, %c0_28] : memref<256x6xf32, #tpu.memory_space<vmem>>, vector<14x6xf32>
    tpu.vector_store %arg15[%c28_27, %c0_28], %25 {strides = array<i32>} : memref<256x6xf32, #tpu.memory_space<vmem>>, vector<14x6xf32>,
    %c84 = arith.constant 84 : index
    %c0_29 = arith.constant 0 : index
    %27 = vector.load %arg14[%c84, %c0_29] : memref<392x6xf32, #tpu.memory_space<vmem>>, vector<14x6xf32>
    %c98 = arith.constant 98 : index
    %c0_30 = arith.constant 0 : index
    %28 = vector.load %arg14[%c98, %c0_30] : memref<392x6xf32, #tpu.memory_space<vmem>>, vector<14x6xf32>
    %29 = arith.maximumf %27, %28 : vector<14x6xf32>
    %c42_31 = arith.constant 42 : index
    %c0_32 = arith.constant 0 : index
    %30 = vector.load %arg15[%c42_31, %c0_32] : memref<256x6xf32, #tpu.memory_space<vmem>>, vector<14x6xf32>
    tpu.vector_store %arg15[%c42_31, %c0_32], %29 {strides = array<i32>} : memref<256x6xf32, #tpu.memory_space<vmem>>, vector<14x6xf32>,
    %c112 = arith.constant 112 : index
    %c0_33 = arith.constant 0 : index
    %31 = vector.load %arg14[%c112, %c0_33] : memref<392x6xf32, #tpu.memory_space<vmem>>, vector<14x6xf32>
    %c126 = arith.constant 126 : index
    %c0_34 = arith.constant 0 : index
    %32 = vector.load %arg14[%c126, %c0_34] : memref<392x6xf32, #tpu.memory_space<vmem>>, vector<14x6xf32>
    %33 = arith.maximumf %31, %32 : vector<14x6xf32>
    %c56_35 = arith.constant 56 : index
    %c0_36 = arith.constant 0 : index
    %34 = vector.load %arg15[%c56_35, %c0_36] : memref<256x6xf32, #tpu.memory_space<vmem>>, vector<14x6xf32>
    tpu.vector_store %arg15[%c56_35, %c0_36], %33 {strides = array<i32>} : memref<256x6xf32, #tpu.memory_space<vmem>>, vector<14x6xf32>,
    %c140 = arith.constant 140 : index
    %c0_37 = arith.constant 0 : index
    %35 = vector.load %arg14[%c140, %c0_37] : memref<392x6xf32, #tpu.memory_space<vmem>>, vector<14x6xf32>
    %c154 = arith.constant 154 : index
    %c0_38 = arith.constant 0 : index
    %36 = vector.load %arg14[%c154, %c0_38] : memref<392x6xf32, #tpu.memory_space<vmem>>, vector<14x6xf32>
    %37 = arith.maximumf %35, %36 : vector<14x6xf32>
    %c70_39 = arith.constant 70 : index
    %c0_40 = arith.constant 0 : index
    %38 = vector.load %arg15[%c70_39, %c0_40] : memref<256x6xf32, #tpu.memory_space<vmem>>, vector<14x6xf32>
    tpu.vector_store %arg15[%c70_39, %c0_40], %37 {strides = array<i32>} : memref<256x6xf32, #tpu.memory_space<vmem>>, vector<14x6xf32>,
    %c168 = arith.constant 168 : index
    %c0_41 = arith.constant 0 : index
    %39 = vector.load %arg14[%c168, %c0_41] : memref<392x6xf32, #tpu.memory_space<vmem>>, vector<14x6xf32>
    %c182 = arith.constant 182 : index
    %c0_42 = arith.constant 0 : index
    %40 = vector.load %arg14[%c182, %c0_42] : memref<392x6xf32, #tpu.memory_space<vmem>>, vector<14x6xf32>
    %41 = arith.maximumf %39, %40 : vector<14x6xf32>
    %c84_43 = arith.constant 84 : index
    %c0_44 = arith.constant 0 : index
    %42 = vector.load %arg15[%c84_43, %c0_44] : memref<256x6xf32, #tpu.memory_space<vmem>>, vector<14x6xf32>
    tpu.vector_store %arg15[%c84_43, %c0_44], %41 {strides = array<i32>} : memref<256x6xf32, #tpu.memory_space<vmem>>, vector<14x6xf32>,
    %c196 = arith.constant 196 : index
    %c0_45 = arith.constant 0 : index
    %43 = vector.load %arg14[%c196, %c0_45] : memref<392x6xf32, #tpu.memory_space<vmem>>, vector<14x6xf32>
    %c210 = arith.constant 210 : index
    %c0_46 = arith.constant 0 : index
    %44 = vector.load %arg14[%c210, %c0_46] : memref<392x6xf32, #tpu.memory_space<vmem>>, vector<14x6xf32>
    %45 = arith.maximumf %43, %44 : vector<14x6xf32>
    %c98_47 = arith.constant 98 : index
    %c0_48 = arith.constant 0 : index
    %46 = vector.load %arg15[%c98_47, %c0_48] : memref<256x6xf32, #tpu.memory_space<vmem>>, vector<14x6xf32>
    tpu.vector_store %arg15[%c98_47, %c0_48], %45 {strides = array<i32>} : memref<256x6xf32, #tpu.memory_space<vmem>>, vector<14x6xf32>,
    %c224 = arith.constant 224 : index
    %c0_49 = arith.constant 0 : index
    %47 = vector.load %arg14[%c224, %c0_49] : memref<392x6xf32, #tpu.memory_space<vmem>>, vector<14x6xf32>
    %c238 = arith.constant 238 : index
    %c0_50 = arith.constant 0 : index
    %48 = vector.load %arg14[%c238, %c0_50] : memref<392x6xf32, #tpu.memory_space<vmem>>, vector<14x6xf32>
    %49 = arith.maximumf %47, %48 : vector<14x6xf32>
    %c112_51 = arith.constant 112 : index
    %c0_52 = arith.constant 0 : index
    %50 = vector.load %arg15[%c112_51, %c0_52] : memref<256x6xf32, #tpu.memory_space<vmem>>, vector<14x6xf32>
    tpu.vector_store %arg15[%c112_51, %c0_52], %49 {strides = array<i32>} : memref<256x6xf32, #tpu.memory_space<vmem>>, vector<14x6xf32>,
    %c252 = arith.constant 252 : index
    %c0_53 = arith.constant 0 : index
    %51 = vector.load %arg14[%c252, %c0_53] : memref<392x6xf32, #tpu.memory_space<vmem>>, vector<14x6xf32>
    %c266 = arith.constant 266 : index
    %c0_54 = arith.constant 0 : index
    %52 = vector.load %arg14[%c266, %c0_54] : memref<392x6xf32, #tpu.memory_space<vmem>>, vector<14x6xf32>
    %53 = arith.maximumf %51, %52 : vector<14x6xf32>
    %c126_55 = arith.constant 126 : index
    %c0_56 = arith.constant 0 : index
    %54 = vector.load %arg15[%c126_55, %c0_56] : memref<256x6xf32, #tpu.memory_space<vmem>>, vector<14x6xf32>
    tpu.vector_store %arg15[%c126_55, %c0_56], %53 {strides = array<i32>} : memref<256x6xf32, #tpu.memory_space<vmem>>, vector<14x6xf32>,
    %c280 = arith.constant 280 : index
    %c0_57 = arith.constant 0 : index
    %55 = vector.load %arg14[%c280, %c0_57] : memref<392x6xf32, #tpu.memory_space<vmem>>, vector<14x6xf32>
    %c294 = arith.constant 294 : index
    %c0_58 = arith.constant 0 : index
    %56 = vector.load %arg14[%c294, %c0_58] : memref<392x6xf32, #tpu.memory_space<vmem>>, vector<14x6xf32>
    %57 = arith.maximumf %55, %56 : vector<14x6xf32>
    %c140_59 = arith.constant 140 : index
    %c0_60 = arith.constant 0 : index
    %58 = vector.load %arg15[%c140_59, %c0_60] : memref<256x6xf32, #tpu.memory_space<vmem>>, vector<14x6xf32>
    tpu.vector_store %arg15[%c140_59, %c0_60], %57 {strides = array<i32>} : memref<256x6xf32, #tpu.memory_space<vmem>>, vector<14x6xf32>,
    %c308 = arith.constant 308 : index
    %c0_61 = arith.constant 0 : index
    %59 = vector.load %arg14[%c308, %c0_61] : memref<392x6xf32, #tpu.memory_space<vmem>>, vector<14x6xf32>
    %c322 = arith.constant 322 : index
    %c0_62 = arith.constant 0 : index
    %60 = vector.load %arg14[%c322, %c0_62] : memref<392x6xf32, #tpu.memory_space<vmem>>, vector<14x6xf32>
    %61 = arith.maximumf %59, %60 : vector<14x6xf32>
    %c154_63 = arith.constant 154 : index
    %c0_64 = arith.constant 0 : index
    %62 = vector.load %arg15[%c154_63, %c0_64] : memref<256x6xf32, #tpu.memory_space<vmem>>, vector<14x6xf32>
    tpu.vector_store %arg15[%c154_63, %c0_64], %61 {strides = array<i32>} : memref<256x6xf32, #tpu.memory_space<vmem>>, vector<14x6xf32>,
    %c336 = arith.constant 336 : index
    %c0_65 = arith.constant 0 : index
    %63 = vector.load %arg14[%c336, %c0_65] : memref<392x6xf32, #tpu.memory_space<vmem>>, vector<14x6xf32>
    %c350 = arith.constant 350 : index
    %c0_66 = arith.constant 0 : index
    %64 = vector.load %arg14[%c350, %c0_66] : memref<392x6xf32, #tpu.memory_space<vmem>>, vector<14x6xf32>
    %65 = arith.maximumf %63, %64 : vector<14x6xf32>
    %c168_67 = arith.constant 168 : index
    %c0_68 = arith.constant 0 : index
    %66 = vector.load %arg15[%c168_67, %c0_68] : memref<256x6xf32, #tpu.memory_space<vmem>>, vector<14x6xf32>
    tpu.vector_store %arg15[%c168_67, %c0_68], %65 {strides = array<i32>} : memref<256x6xf32, #tpu.memory_space<vmem>>, vector<14x6xf32>,
    %c364 = arith.constant 364 : index
    %c0_69 = arith.constant 0 : index
    %67 = vector.load %arg14[%c364, %c0_69] : memref<392x6xf32, #tpu.memory_space<vmem>>, vector<14x6xf32>
    %c378 = arith.constant 378 : index
    %c0_70 = arith.constant 0 : index
    %68 = vector.load %arg14[%c378, %c0_70] : memref<392x6xf32, #tpu.memory_space<vmem>>, vector<14x6xf32>
    %69 = arith.maximumf %67, %68 : vector<14x6xf32>
    %c182_71 = arith.constant 182 : index
    %c0_72 = arith.constant 0 : index
    %70 = vector.load %arg15[%c182_71, %c0_72] : memref<256x6xf32, #tpu.memory_space<vmem>>, vector<14x6xf32>
    tpu.vector_store %arg15[%c182_71, %c0_72], %69 {strides = array<i32>} : memref<256x6xf32, #tpu.memory_space<vmem>>, vector<14x6xf32>,
    %c0_73 = arith.constant 0 : index
    %c0_74 = arith.constant 0 : index
    %71 = vector.load %arg15[%c0_73, %c0_74] : memref<256x6xf32, #tpu.memory_space<vmem>>, vector<196x6xf32>
    %c0_75 = arith.constant 0 : index
    %c0_76 = arith.constant 0 : index
    %72 = vector.load %arg4[%c0_75, %c0_76] : memref<150x16xf32, #tpu.memory_space<vmem>>, vector<6x16xf32>
    %cst_77 = arith.constant dense<0.000000e+00> : vector<196x16xf32>
    %73 = tpu.matmul %71, %72, %cst_77 {dimension_numbers = #tpu.dot_dimension_numbers<[1], [0], [0], [1], [0, 0, 1, 1], [], []>} : vector<196x6xf32>, vector<6x16xf32>, vector<196x16xf32> -> vector<196x16xf32>
    %c1_78 = arith.constant 1 : index
    %c0_79 = arith.constant 0 : index
    %74 = vector.load %arg15[%c1_78, %c0_79] : memref<256x6xf32, #tpu.memory_space<vmem>>, vector<196x6xf32>
    %c6 = arith.constant 6 : index
    %c0_80 = arith.constant 0 : index
    %75 = vector.load %arg4[%c6, %c0_80] : memref<150x16xf32, #tpu.memory_space<vmem>>, vector<6x16xf32>
    %cst_81 = arith.constant dense<0.000000e+00> : vector<196x16xf32>
    %76 = tpu.matmul %74, %75, %cst_81 {dimension_numbers = #tpu.dot_dimension_numbers<[1], [0], [0], [1], [0, 0, 1, 1], [], []>} : vector<196x6xf32>, vector<6x16xf32>, vector<196x16xf32> -> vector<196x16xf32>
    %77 = arith.addf %73, %76 : vector<196x16xf32>
    %c2 = arith.constant 2 : index
    %c0_82 = arith.constant 0 : index
    %78 = vector.load %arg15[%c2, %c0_82] : memref<256x6xf32, #tpu.memory_space<vmem>>, vector<196x6xf32>
    %c12 = arith.constant 12 : index
    %c0_83 = arith.constant 0 : index
    %79 = vector.load %arg4[%c12, %c0_83] : memref<150x16xf32, #tpu.memory_space<vmem>>, vector<6x16xf32>
    %cst_84 = arith.constant dense<0.000000e+00> : vector<196x16xf32>
    %80 = tpu.matmul %78, %79, %cst_84 {dimension_numbers = #tpu.dot_dimension_numbers<[1], [0], [0], [1], [0, 0, 1, 1], [], []>} : vector<196x6xf32>, vector<6x16xf32>, vector<196x16xf32> -> vector<196x16xf32>
    %81 = arith.addf %77, %80 : vector<196x16xf32>
    %c3 = arith.constant 3 : index
    %c0_85 = arith.constant 0 : index
    %82 = vector.load %arg15[%c3, %c0_85] : memref<256x6xf32, #tpu.memory_space<vmem>>, vector<196x6xf32>
    %c18 = arith.constant 18 : index
    %c0_86 = arith.constant 0 : index
    %83 = vector.load %arg4[%c18, %c0_86] : memref<150x16xf32, #tpu.memory_space<vmem>>, vector<6x16xf32>
    %cst_87 = arith.constant dense<0.000000e+00> : vector<196x16xf32>
    %84 = tpu.matmul %82, %83, %cst_87 {dimension_numbers = #tpu.dot_dimension_numbers<[1], [0], [0], [1], [0, 0, 1, 1], [], []>} : vector<196x6xf32>, vector<6x16xf32>, vector<196x16xf32> -> vector<196x16xf32>
    %85 = arith.addf %81, %84 : vector<196x16xf32>
    %c4 = arith.constant 4 : index
    %c0_88 = arith.constant 0 : index
    %86 = vector.load %arg15[%c4, %c0_88] : memref<256x6xf32, #tpu.memory_space<vmem>>, vector<196x6xf32>
    %c24 = arith.constant 24 : index
    %c0_89 = arith.constant 0 : index
    %87 = vector.load %arg4[%c24, %c0_89] : memref<150x16xf32, #tpu.memory_space<vmem>>, vector<6x16xf32>
    %cst_90 = arith.constant dense<0.000000e+00> : vector<196x16xf32>
    %88 = tpu.matmul %86, %87, %cst_90 {dimension_numbers = #tpu.dot_dimension_numbers<[1], [0], [0], [1], [0, 0, 1, 1], [], []>} : vector<196x6xf32>, vector<6x16xf32>, vector<196x16xf32> -> vector<196x16xf32>
    %89 = arith.addf %85, %88 : vector<196x16xf32>
    %c14_91 = arith.constant 14 : index
    %c0_92 = arith.constant 0 : index
    %90 = vector.load %arg15[%c14_91, %c0_92] : memref<256x6xf32, #tpu.memory_space<vmem>>, vector<196x6xf32>
    %c30 = arith.constant 30 : index
    %c0_93 = arith.constant 0 : index
    %91 = vector.load %arg4[%c30, %c0_93] : memref<150x16xf32, #tpu.memory_space<vmem>>, vector<6x16xf32>
    %cst_94 = arith.constant dense<0.000000e+00> : vector<196x16xf32>
    %92 = tpu.matmul %90, %91, %cst_94 {dimension_numbers = #tpu.dot_dimension_numbers<[1], [0], [0], [1], [0, 0, 1, 1], [], []>} : vector<196x6xf32>, vector<6x16xf32>, vector<196x16xf32> -> vector<196x16xf32>
    %93 = arith.addf %89, %92 : vector<196x16xf32>
    %c15 = arith.constant 15 : index
    %c0_95 = arith.constant 0 : index
    %94 = vector.load %arg15[%c15, %c0_95] : memref<256x6xf32, #tpu.memory_space<vmem>>, vector<196x6xf32>
    %c36 = arith.constant 36 : index
    %c0_96 = arith.constant 0 : index
    %95 = vector.load %arg4[%c36, %c0_96] : memref<150x16xf32, #tpu.memory_space<vmem>>, vector<6x16xf32>
    %cst_97 = arith.constant dense<0.000000e+00> : vector<196x16xf32>
    %96 = tpu.matmul %94, %95, %cst_97 {dimension_numbers = #tpu.dot_dimension_numbers<[1], [0], [0], [1], [0, 0, 1, 1], [], []>} : vector<196x6xf32>, vector<6x16xf32>, vector<196x16xf32> -> vector<196x16xf32>
    %97 = arith.addf %93, %96 : vector<196x16xf32>
    %c16 = arith.constant 16 : index
    %c0_98 = arith.constant 0 : index
    %98 = vector.load %arg15[%c16, %c0_98] : memref<256x6xf32, #tpu.memory_space<vmem>>, vector<196x6xf32>
    %c42_99 = arith.constant 42 : index
    %c0_100 = arith.constant 0 : index
    %99 = vector.load %arg4[%c42_99, %c0_100] : memref<150x16xf32, #tpu.memory_space<vmem>>, vector<6x16xf32>
    %cst_101 = arith.constant dense<0.000000e+00> : vector<196x16xf32>
    %100 = tpu.matmul %98, %99, %cst_101 {dimension_numbers = #tpu.dot_dimension_numbers<[1], [0], [0], [1], [0, 0, 1, 1], [], []>} : vector<196x6xf32>, vector<6x16xf32>, vector<196x16xf32> -> vector<196x16xf32>
    %101 = arith.addf %97, %100 : vector<196x16xf32>
    %c17 = arith.constant 17 : index
    %c0_102 = arith.constant 0 : index
    %102 = vector.load %arg15[%c17, %c0_102] : memref<256x6xf32, #tpu.memory_space<vmem>>, vector<196x6xf32>
    %c48 = arith.constant 48 : index
    %c0_103 = arith.constant 0 : index
    %103 = vector.load %arg4[%c48, %c0_103] : memref<150x16xf32, #tpu.memory_space<vmem>>, vector<6x16xf32>
    %cst_104 = arith.constant dense<0.000000e+00> : vector<196x16xf32>
    %104 = tpu.matmul %102, %103, %cst_104 {dimension_numbers = #tpu.dot_dimension_numbers<[1], [0], [0], [1], [0, 0, 1, 1], [], []>} : vector<196x6xf32>, vector<6x16xf32>, vector<196x16xf32> -> vector<196x16xf32>
    %105 = arith.addf %101, %104 : vector<196x16xf32>
    %c18_105 = arith.constant 18 : index
    %c0_106 = arith.constant 0 : index
    %106 = vector.load %arg15[%c18_105, %c0_106] : memref<256x6xf32, #tpu.memory_space<vmem>>, vector<196x6xf32>
    %c54 = arith.constant 54 : index
    %c0_107 = arith.constant 0 : index
    %107 = vector.load %arg4[%c54, %c0_107] : memref<150x16xf32, #tpu.memory_space<vmem>>, vector<6x16xf32>
    %cst_108 = arith.constant dense<0.000000e+00> : vector<196x16xf32>
    %108 = tpu.matmul %106, %107, %cst_108 {dimension_numbers = #tpu.dot_dimension_numbers<[1], [0], [0], [1], [0, 0, 1, 1], [], []>} : vector<196x6xf32>, vector<6x16xf32>, vector<196x16xf32> -> vector<196x16xf32>
    %109 = arith.addf %105, %108 : vector<196x16xf32>
    %c28_109 = arith.constant 28 : index
    %c0_110 = arith.constant 0 : index
    %110 = vector.load %arg15[%c28_109, %c0_110] : memref<256x6xf32, #tpu.memory_space<vmem>>, vector<196x6xf32>
    %c60 = arith.constant 60 : index
    %c0_111 = arith.constant 0 : index
    %111 = vector.load %arg4[%c60, %c0_111] : memref<150x16xf32, #tpu.memory_space<vmem>>, vector<6x16xf32>
    %cst_112 = arith.constant dense<0.000000e+00> : vector<196x16xf32>
    %112 = tpu.matmul %110, %111, %cst_112 {dimension_numbers = #tpu.dot_dimension_numbers<[1], [0], [0], [1], [0, 0, 1, 1], [], []>} : vector<196x6xf32>, vector<6x16xf32>, vector<196x16xf32> -> vector<196x16xf32>
    %113 = arith.addf %109, %112 : vector<196x16xf32>
    %c29 = arith.constant 29 : index
    %c0_113 = arith.constant 0 : index
    %114 = vector.load %arg15[%c29, %c0_113] : memref<256x6xf32, #tpu.memory_space<vmem>>, vector<196x6xf32>
    %c66 = arith.constant 66 : index
    %c0_114 = arith.constant 0 : index
    %115 = vector.load %arg4[%c66, %c0_114] : memref<150x16xf32, #tpu.memory_space<vmem>>, vector<6x16xf32>
    %cst_115 = arith.constant dense<0.000000e+00> : vector<196x16xf32>
    %116 = tpu.matmul %114, %115, %cst_115 {dimension_numbers = #tpu.dot_dimension_numbers<[1], [0], [0], [1], [0, 0, 1, 1], [], []>} : vector<196x6xf32>, vector<6x16xf32>, vector<196x16xf32> -> vector<196x16xf32>
    %117 = arith.addf %113, %116 : vector<196x16xf32>
    %c30_116 = arith.constant 30 : index
    %c0_117 = arith.constant 0 : index
    %118 = vector.load %arg15[%c30_116, %c0_117] : memref<256x6xf32, #tpu.memory_space<vmem>>, vector<196x6xf32>
    %c72 = arith.constant 72 : index
    %c0_118 = arith.constant 0 : index
    %119 = vector.load %arg4[%c72, %c0_118] : memref<150x16xf32, #tpu.memory_space<vmem>>, vector<6x16xf32>
    %cst_119 = arith.constant dense<0.000000e+00> : vector<196x16xf32>
    %120 = tpu.matmul %118, %119, %cst_119 {dimension_numbers = #tpu.dot_dimension_numbers<[1], [0], [0], [1], [0, 0, 1, 1], [], []>} : vector<196x6xf32>, vector<6x16xf32>, vector<196x16xf32> -> vector<196x16xf32>
    %121 = arith.addf %117, %120 : vector<196x16xf32>
    %c31 = arith.constant 31 : index
    %c0_120 = arith.constant 0 : index
    %122 = vector.load %arg15[%c31, %c0_120] : memref<256x6xf32, #tpu.memory_space<vmem>>, vector<196x6xf32>
    %c78 = arith.constant 78 : index
    %c0_121 = arith.constant 0 : index
    %123 = vector.load %arg4[%c78, %c0_121] : memref<150x16xf32, #tpu.memory_space<vmem>>, vector<6x16xf32>
    %cst_122 = arith.constant dense<0.000000e+00> : vector<196x16xf32>
    %124 = tpu.matmul %122, %123, %cst_122 {dimension_numbers = #tpu.dot_dimension_numbers<[1], [0], [0], [1], [0, 0, 1, 1], [], []>} : vector<196x6xf32>, vector<6x16xf32>, vector<196x16xf32> -> vector<196x16xf32>
    %125 = arith.addf %121, %124 : vector<196x16xf32>
    %c32 = arith.constant 32 : index
    %c0_123 = arith.constant 0 : index
    %126 = vector.load %arg15[%c32, %c0_123] : memref<256x6xf32, #tpu.memory_space<vmem>>, vector<196x6xf32>
    %c84_124 = arith.constant 84 : index
    %c0_125 = arith.constant 0 : index
    %127 = vector.load %arg4[%c84_124, %c0_125] : memref<150x16xf32, #tpu.memory_space<vmem>>, vector<6x16xf32>
    %cst_126 = arith.constant dense<0.000000e+00> : vector<196x16xf32>
    %128 = tpu.matmul %126, %127, %cst_126 {dimension_numbers = #tpu.dot_dimension_numbers<[1], [0], [0], [1], [0, 0, 1, 1], [], []>} : vector<196x6xf32>, vector<6x16xf32>, vector<196x16xf32> -> vector<196x16xf32>
    %129 = arith.addf %125, %128 : vector<196x16xf32>
    %c42_127 = arith.constant 42 : index
    %c0_128 = arith.constant 0 : index
    %130 = vector.load %arg15[%c42_127, %c0_128] : memref<256x6xf32, #tpu.memory_space<vmem>>, vector<196x6xf32>
    %c90 = arith.constant 90 : index
    %c0_129 = arith.constant 0 : index
    %131 = vector.load %arg4[%c90, %c0_129] : memref<150x16xf32, #tpu.memory_space<vmem>>, vector<6x16xf32>
    %cst_130 = arith.constant dense<0.000000e+00> : vector<196x16xf32>
    %132 = tpu.matmul %130, %131, %cst_130 {dimension_numbers = #tpu.dot_dimension_numbers<[1], [0], [0], [1], [0, 0, 1, 1], [], []>} : vector<196x6xf32>, vector<6x16xf32>, vector<196x16xf32> -> vector<196x16xf32>
    %133 = arith.addf %129, %132 : vector<196x16xf32>
    %c43 = arith.constant 43 : index
    %c0_131 = arith.constant 0 : index
    %134 = vector.load %arg15[%c43, %c0_131] : memref<256x6xf32, #tpu.memory_space<vmem>>, vector<196x6xf32>
    %c96 = arith.constant 96 : index
    %c0_132 = arith.constant 0 : index
    %135 = vector.load %arg4[%c96, %c0_132] : memref<150x16xf32, #tpu.memory_space<vmem>>, vector<6x16xf32>
    %cst_133 = arith.constant dense<0.000000e+00> : vector<196x16xf32>
    %136 = tpu.matmul %134, %135, %cst_133 {dimension_numbers = #tpu.dot_dimension_numbers<[1], [0], [0], [1], [0, 0, 1, 1], [], []>} : vector<196x6xf32>, vector<6x16xf32>, vector<196x16xf32> -> vector<196x16xf32>
    %137 = arith.addf %133, %136 : vector<196x16xf32>
    %c44 = arith.constant 44 : index
    %c0_134 = arith.constant 0 : index
    %138 = vector.load %arg15[%c44, %c0_134] : memref<256x6xf32, #tpu.memory_space<vmem>>, vector<196x6xf32>
    %c102 = arith.constant 102 : index
    %c0_135 = arith.constant 0 : index
    %139 = vector.load %arg4[%c102, %c0_135] : memref<150x16xf32, #tpu.memory_space<vmem>>, vector<6x16xf32>
    %cst_136 = arith.constant dense<0.000000e+00> : vector<196x16xf32>
    %140 = tpu.matmul %138, %139, %cst_136 {dimension_numbers = #tpu.dot_dimension_numbers<[1], [0], [0], [1], [0, 0, 1, 1], [], []>} : vector<196x6xf32>, vector<6x16xf32>, vector<196x16xf32> -> vector<196x16xf32>
    %141 = arith.addf %137, %140 : vector<196x16xf32>
    %c45 = arith.constant 45 : index
    %c0_137 = arith.constant 0 : index
    %142 = vector.load %arg15[%c45, %c0_137] : memref<256x6xf32, #tpu.memory_space<vmem>>, vector<196x6xf32>
    %c108 = arith.constant 108 : index
    %c0_138 = arith.constant 0 : index
    %143 = vector.load %arg4[%c108, %c0_138] : memref<150x16xf32, #tpu.memory_space<vmem>>, vector<6x16xf32>
    %cst_139 = arith.constant dense<0.000000e+00> : vector<196x16xf32>
    %144 = tpu.matmul %142, %143, %cst_139 {dimension_numbers = #tpu.dot_dimension_numbers<[1], [0], [0], [1], [0, 0, 1, 1], [], []>} : vector<196x6xf32>, vector<6x16xf32>, vector<196x16xf32> -> vector<196x16xf32>
    %145 = arith.addf %141, %144 : vector<196x16xf32>
    %c46 = arith.constant 46 : index
    %c0_140 = arith.constant 0 : index
    %146 = vector.load %arg15[%c46, %c0_140] : memref<256x6xf32, #tpu.memory_space<vmem>>, vector<196x6xf32>
    %c114 = arith.constant 114 : index
    %c0_141 = arith.constant 0 : index
    %147 = vector.load %arg4[%c114, %c0_141] : memref<150x16xf32, #tpu.memory_space<vmem>>, vector<6x16xf32>
    %cst_142 = arith.constant dense<0.000000e+00> : vector<196x16xf32>
    %148 = tpu.matmul %146, %147, %cst_142 {dimension_numbers = #tpu.dot_dimension_numbers<[1], [0], [0], [1], [0, 0, 1, 1], [], []>} : vector<196x6xf32>, vector<6x16xf32>, vector<196x16xf32> -> vector<196x16xf32>
    %149 = arith.addf %145, %148 : vector<196x16xf32>
    %c56_143 = arith.constant 56 : index
    %c0_144 = arith.constant 0 : index
    %150 = vector.load %arg15[%c56_143, %c0_144] : memref<256x6xf32, #tpu.memory_space<vmem>>, vector<196x6xf32>
    %c120 = arith.constant 120 : index
    %c0_145 = arith.constant 0 : index
    %151 = vector.load %arg4[%c120, %c0_145] : memref<150x16xf32, #tpu.memory_space<vmem>>, vector<6x16xf32>
    %cst_146 = arith.constant dense<0.000000e+00> : vector<196x16xf32>
    %152 = tpu.matmul %150, %151, %cst_146 {dimension_numbers = #tpu.dot_dimension_numbers<[1], [0], [0], [1], [0, 0, 1, 1], [], []>} : vector<196x6xf32>, vector<6x16xf32>, vector<196x16xf32> -> vector<196x16xf32>
    %153 = arith.addf %149, %152 : vector<196x16xf32>
    %c57 = arith.constant 57 : index
    %c0_147 = arith.constant 0 : index
    %154 = vector.load %arg15[%c57, %c0_147] : memref<256x6xf32, #tpu.memory_space<vmem>>, vector<196x6xf32>
    %c126_148 = arith.constant 126 : index
    %c0_149 = arith.constant 0 : index
    %155 = vector.load %arg4[%c126_148, %c0_149] : memref<150x16xf32, #tpu.memory_space<vmem>>, vector<6x16xf32>
    %cst_150 = arith.constant dense<0.000000e+00> : vector<196x16xf32>
    %156 = tpu.matmul %154, %155, %cst_150 {dimension_numbers = #tpu.dot_dimension_numbers<[1], [0], [0], [1], [0, 0, 1, 1], [], []>} : vector<196x6xf32>, vector<6x16xf32>, vector<196x16xf32> -> vector<196x16xf32>
    %157 = arith.addf %153, %156 : vector<196x16xf32>
    %c58 = arith.constant 58 : index
    %c0_151 = arith.constant 0 : index
    %158 = vector.load %arg15[%c58, %c0_151] : memref<256x6xf32, #tpu.memory_space<vmem>>, vector<196x6xf32>
    %c132 = arith.constant 132 : index
    %c0_152 = arith.constant 0 : index
    %159 = vector.load %arg4[%c132, %c0_152] : memref<150x16xf32, #tpu.memory_space<vmem>>, vector<6x16xf32>
    %cst_153 = arith.constant dense<0.000000e+00> : vector<196x16xf32>
    %160 = tpu.matmul %158, %159, %cst_153 {dimension_numbers = #tpu.dot_dimension_numbers<[1], [0], [0], [1], [0, 0, 1, 1], [], []>} : vector<196x6xf32>, vector<6x16xf32>, vector<196x16xf32> -> vector<196x16xf32>
    %161 = arith.addf %157, %160 : vector<196x16xf32>
    %c59 = arith.constant 59 : index
    %c0_154 = arith.constant 0 : index
    %162 = vector.load %arg15[%c59, %c0_154] : memref<256x6xf32, #tpu.memory_space<vmem>>, vector<196x6xf32>
    %c138 = arith.constant 138 : index
    %c0_155 = arith.constant 0 : index
    %163 = vector.load %arg4[%c138, %c0_155] : memref<150x16xf32, #tpu.memory_space<vmem>>, vector<6x16xf32>
    %cst_156 = arith.constant dense<0.000000e+00> : vector<196x16xf32>
    %164 = tpu.matmul %162, %163, %cst_156 {dimension_numbers = #tpu.dot_dimension_numbers<[1], [0], [0], [1], [0, 0, 1, 1], [], []>} : vector<196x6xf32>, vector<6x16xf32>, vector<196x16xf32> -> vector<196x16xf32>
    %165 = arith.addf %161, %164 : vector<196x16xf32>
    %c60_157 = arith.constant 60 : index
    %c0_158 = arith.constant 0 : index
    %166 = vector.load %arg15[%c60_157, %c0_158] : memref<256x6xf32, #tpu.memory_space<vmem>>, vector<196x6xf32>
    %c144 = arith.constant 144 : index
    %c0_159 = arith.constant 0 : index
    %167 = vector.load %arg4[%c144, %c0_159] : memref<150x16xf32, #tpu.memory_space<vmem>>, vector<6x16xf32>
    %cst_160 = arith.constant dense<0.000000e+00> : vector<196x16xf32>
    %168 = tpu.matmul %166, %167, %cst_160 {dimension_numbers = #tpu.dot_dimension_numbers<[1], [0], [0], [1], [0, 0, 1, 1], [], []>} : vector<196x6xf32>, vector<6x16xf32>, vector<196x16xf32> -> vector<196x16xf32>
    %169 = arith.addf %165, %168 : vector<196x16xf32>
    %c0_161 = arith.constant 0 : index
    %c0_162 = arith.constant 0 : index
    %170 = vector.load %arg5[%c0_161, %c0_162] : memref<1x16xf32, #tpu.memory_space<vmem>>, vector<1x16xf32>
    %171 = vector.broadcast %170 : vector<1x16xf32> to vector<196x16xf32>
    %172 = arith.addf %169, %171 : vector<196x16xf32>
    %cst_163 = arith.constant 0.000000e+00 : f32
    %173 = vector.broadcast %cst_163 : f32 to vector<196x16xf32>
    %174 = arith.maximumf %172, %173 : vector<196x16xf32>
    %c0_164 = arith.constant 0 : index
    %c0_165 = arith.constant 0 : index
    %175 = vector.load %arg16[%c0_164, %c0_165] : memref<196x16xf32, #tpu.memory_space<vmem>>, vector<196x16xf32>
    tpu.vector_store %arg16[%c0_164, %c0_165], %174 {strides = array<i32>} : memref<196x16xf32, #tpu.memory_space<vmem>>, vector<196x16xf32>,
    %cst_166 = arith.constant 0.000000e+00 : f32
    %176 = vector.broadcast %cst_166 : f32 to vector<1x120xf32>
    %c0_167 = arith.constant 0 : index
    %c0_168 = arith.constant 0 : index
    %177 = vector.load %arg16[%c0_167, %c0_168] : memref<196x16xf32, #tpu.memory_space<vmem>>, vector<1x16xf32>
    %c1_169 = arith.constant 1 : index
    %c0_170 = arith.constant 0 : index
    %178 = vector.load %arg16[%c1_169, %c0_170] : memref<196x16xf32, #tpu.memory_space<vmem>>, vector<1x16xf32>
    %179 = arith.maximumf %177, %178 : vector<1x16xf32>
    %c14_171 = arith.constant 14 : index
    %c0_172 = arith.constant 0 : index
    %180 = vector.load %arg16[%c14_171, %c0_172] : memref<196x16xf32, #tpu.memory_space<vmem>>, vector<1x16xf32>
    %c15_173 = arith.constant 15 : index
    %c0_174 = arith.constant 0 : index
    %181 = vector.load %arg16[%c15_173, %c0_174] : memref<196x16xf32, #tpu.memory_space<vmem>>, vector<1x16xf32>
    %182 = arith.maximumf %180, %181 : vector<1x16xf32>
    %183 = arith.maximumf %179, %182 : vector<1x16xf32>
    %c0_175 = arith.constant 0 : index
    %c0_176 = arith.constant 0 : index
    %184 = vector.load %arg6[%c0_175, %c0_176] : memref<400x120xf32, #tpu.memory_space<vmem>>, vector<16x120xf32>
    %cst_177 = arith.constant dense<0.000000e+00> : vector<1x120xf32>
    %185 = tpu.matmul %183, %184, %cst_177 {dimension_numbers = #tpu.dot_dimension_numbers<[1], [0], [0], [1], [0, 0, 1, 1], [], []>} : vector<1x16xf32>, vector<16x120xf32>, vector<1x120xf32> -> vector<1x120xf32>
    %186 = arith.addf %176, %185 : vector<1x120xf32>
    %c2_178 = arith.constant 2 : index
    %c0_179 = arith.constant 0 : index
    %187 = vector.load %arg16[%c2_178, %c0_179] : memref<196x16xf32, #tpu.memory_space<vmem>>, vector<1x16xf32>
    %c3_180 = arith.constant 3 : index
    %c0_181 = arith.constant 0 : index
    %188 = vector.load %arg16[%c3_180, %c0_181] : memref<196x16xf32, #tpu.memory_space<vmem>>, vector<1x16xf32>
    %189 = arith.maximumf %187, %188 : vector<1x16xf32>
    %c16_182 = arith.constant 16 : index
    %c0_183 = arith.constant 0 : index
    %190 = vector.load %arg16[%c16_182, %c0_183] : memref<196x16xf32, #tpu.memory_space<vmem>>, vector<1x16xf32>
    %c17_184 = arith.constant 17 : index
    %c0_185 = arith.constant 0 : index
    %191 = vector.load %arg16[%c17_184, %c0_185] : memref<196x16xf32, #tpu.memory_space<vmem>>, vector<1x16xf32>
    %192 = arith.maximumf %190, %191 : vector<1x16xf32>
    %193 = arith.maximumf %189, %192 : vector<1x16xf32>
    %c16_186 = arith.constant 16 : index
    %c0_187 = arith.constant 0 : index
    %194 = vector.load %arg6[%c16_186, %c0_187] : memref<400x120xf32, #tpu.memory_space<vmem>>, vector<16x120xf32>
    %cst_188 = arith.constant dense<0.000000e+00> : vector<1x120xf32>
    %195 = tpu.matmul %193, %194, %cst_188 {dimension_numbers = #tpu.dot_dimension_numbers<[1], [0], [0], [1], [0, 0, 1, 1], [], []>} : vector<1x16xf32>, vector<16x120xf32>, vector<1x120xf32> -> vector<1x120xf32>
    %196 = arith.addf %186, %195 : vector<1x120xf32>
    %c4_189 = arith.constant 4 : index
    %c0_190 = arith.constant 0 : index
    %197 = vector.load %arg16[%c4_189, %c0_190] : memref<196x16xf32, #tpu.memory_space<vmem>>, vector<1x16xf32>
    %c5 = arith.constant 5 : index
    %c0_191 = arith.constant 0 : index
    %198 = vector.load %arg16[%c5, %c0_191] : memref<196x16xf32, #tpu.memory_space<vmem>>, vector<1x16xf32>
    %199 = arith.maximumf %197, %198 : vector<1x16xf32>
    %c18_192 = arith.constant 18 : index
    %c0_193 = arith.constant 0 : index
    %200 = vector.load %arg16[%c18_192, %c0_193] : memref<196x16xf32, #tpu.memory_space<vmem>>, vector<1x16xf32>
    %c19 = arith.constant 19 : index
    %c0_194 = arith.constant 0 : index
    %201 = vector.load %arg16[%c19, %c0_194] : memref<196x16xf32, #tpu.memory_space<vmem>>, vector<1x16xf32>
    %202 = arith.maximumf %200, %201 : vector<1x16xf32>
    %203 = arith.maximumf %199, %202 : vector<1x16xf32>
    %c32_195 = arith.constant 32 : index
    %c0_196 = arith.constant 0 : index
    %204 = vector.load %arg6[%c32_195, %c0_196] : memref<400x120xf32, #tpu.memory_space<vmem>>, vector<16x120xf32>
    %cst_197 = arith.constant dense<0.000000e+00> : vector<1x120xf32>
    %205 = tpu.matmul %203, %204, %cst_197 {dimension_numbers = #tpu.dot_dimension_numbers<[1], [0], [0], [1], [0, 0, 1, 1], [], []>} : vector<1x16xf32>, vector<16x120xf32>, vector<1x120xf32> -> vector<1x120xf32>
    %206 = arith.addf %196, %205 : vector<1x120xf32>
    %c6_198 = arith.constant 6 : index
    %c0_199 = arith.constant 0 : index
    %207 = vector.load %arg16[%c6_198, %c0_199] : memref<196x16xf32, #tpu.memory_space<vmem>>, vector<1x16xf32>
    %c7 = arith.constant 7 : index
    %c0_200 = arith.constant 0 : index
    %208 = vector.load %arg16[%c7, %c0_200] : memref<196x16xf32, #tpu.memory_space<vmem>>, vector<1x16xf32>
    %209 = arith.maximumf %207, %208 : vector<1x16xf32>
    %c20 = arith.constant 20 : index
    %c0_201 = arith.constant 0 : index
    %210 = vector.load %arg16[%c20, %c0_201] : memref<196x16xf32, #tpu.memory_space<vmem>>, vector<1x16xf32>
    %c21 = arith.constant 21 : index
    %c0_202 = arith.constant 0 : index
    %211 = vector.load %arg16[%c21, %c0_202] : memref<196x16xf32, #tpu.memory_space<vmem>>, vector<1x16xf32>
    %212 = arith.maximumf %210, %211 : vector<1x16xf32>
    %213 = arith.maximumf %209, %212 : vector<1x16xf32>
    %c48_203 = arith.constant 48 : index
    %c0_204 = arith.constant 0 : index
    %214 = vector.load %arg6[%c48_203, %c0_204] : memref<400x120xf32, #tpu.memory_space<vmem>>, vector<16x120xf32>
    %cst_205 = arith.constant dense<0.000000e+00> : vector<1x120xf32>
    %215 = tpu.matmul %213, %214, %cst_205 {dimension_numbers = #tpu.dot_dimension_numbers<[1], [0], [0], [1], [0, 0, 1, 1], [], []>} : vector<1x16xf32>, vector<16x120xf32>, vector<1x120xf32> -> vector<1x120xf32>
    %216 = arith.addf %206, %215 : vector<1x120xf32>
    %c8 = arith.constant 8 : index
    %c0_206 = arith.constant 0 : index
    %217 = vector.load %arg16[%c8, %c0_206] : memref<196x16xf32, #tpu.memory_space<vmem>>, vector<1x16xf32>
    %c9 = arith.constant 9 : index
    %c0_207 = arith.constant 0 : index
    %218 = vector.load %arg16[%c9, %c0_207] : memref<196x16xf32, #tpu.memory_space<vmem>>, vector<1x16xf32>
    %219 = arith.maximumf %217, %218 : vector<1x16xf32>
    %c22 = arith.constant 22 : index
    %c0_208 = arith.constant 0 : index
    %220 = vector.load %arg16[%c22, %c0_208] : memref<196x16xf32, #tpu.memory_space<vmem>>, vector<1x16xf32>
    %c23 = arith.constant 23 : index
    %c0_209 = arith.constant 0 : index
    %221 = vector.load %arg16[%c23, %c0_209] : memref<196x16xf32, #tpu.memory_space<vmem>>, vector<1x16xf32>
    %222 = arith.maximumf %220, %221 : vector<1x16xf32>
    %223 = arith.maximumf %219, %222 : vector<1x16xf32>
    %c64 = arith.constant 64 : index
    %c0_210 = arith.constant 0 : index
    %224 = vector.load %arg6[%c64, %c0_210] : memref<400x120xf32, #tpu.memory_space<vmem>>, vector<16x120xf32>
    %cst_211 = arith.constant dense<0.000000e+00> : vector<1x120xf32>
    %225 = tpu.matmul %223, %224, %cst_211 {dimension_numbers = #tpu.dot_dimension_numbers<[1], [0], [0], [1], [0, 0, 1, 1], [], []>} : vector<1x16xf32>, vector<16x120xf32>, vector<1x120xf32> -> vector<1x120xf32>
    %226 = arith.addf %216, %225 : vector<1x120xf32>
    %c28_212 = arith.constant 28 : index
    %c0_213 = arith.constant 0 : index
    %227 = vector.load %arg16[%c28_212, %c0_213] : memref<196x16xf32, #tpu.memory_space<vmem>>, vector<1x16xf32>
    %c29_214 = arith.constant 29 : index
    %c0_215 = arith.constant 0 : index
    %228 = vector.load %arg16[%c29_214, %c0_215] : memref<196x16xf32, #tpu.memory_space<vmem>>, vector<1x16xf32>
    %229 = arith.maximumf %227, %228 : vector<1x16xf32>
    %c42_216 = arith.constant 42 : index
    %c0_217 = arith.constant 0 : index
    %230 = vector.load %arg16[%c42_216, %c0_217] : memref<196x16xf32, #tpu.memory_space<vmem>>, vector<1x16xf32>
    %c43_218 = arith.constant 43 : index
    %c0_219 = arith.constant 0 : index
    %231 = vector.load %arg16[%c43_218, %c0_219] : memref<196x16xf32, #tpu.memory_space<vmem>>, vector<1x16xf32>
    %232 = arith.maximumf %230, %231 : vector<1x16xf32>
    %233 = arith.maximumf %229, %232 : vector<1x16xf32>
    %c80 = arith.constant 80 : index
    %c0_220 = arith.constant 0 : index
    %234 = vector.load %arg6[%c80, %c0_220] : memref<400x120xf32, #tpu.memory_space<vmem>>, vector<16x120xf32>
    %cst_221 = arith.constant dense<0.000000e+00> : vector<1x120xf32>
    %235 = tpu.matmul %233, %234, %cst_221 {dimension_numbers = #tpu.dot_dimension_numbers<[1], [0], [0], [1], [0, 0, 1, 1], [], []>} : vector<1x16xf32>, vector<16x120xf32>, vector<1x120xf32> -> vector<1x120xf32>
    %236 = arith.addf %226, %235 : vector<1x120xf32>
    %c30_222 = arith.constant 30 : index
    %c0_223 = arith.constant 0 : index
    %237 = vector.load %arg16[%c30_222, %c0_223] : memref<196x16xf32, #tpu.memory_space<vmem>>, vector<1x16xf32>
    %c31_224 = arith.constant 31 : index
    %c0_225 = arith.constant 0 : index
    %238 = vector.load %arg16[%c31_224, %c0_225] : memref<196x16xf32, #tpu.memory_space<vmem>>, vector<1x16xf32>
    %239 = arith.maximumf %237, %238 : vector<1x16xf32>
    %c44_226 = arith.constant 44 : index
    %c0_227 = arith.constant 0 : index
    %240 = vector.load %arg16[%c44_226, %c0_227] : memref<196x16xf32, #tpu.memory_space<vmem>>, vector<1x16xf32>
    %c45_228 = arith.constant 45 : index
    %c0_229 = arith.constant 0 : index
    %241 = vector.load %arg16[%c45_228, %c0_229] : memref<196x16xf32, #tpu.memory_space<vmem>>, vector<1x16xf32>
    %242 = arith.maximumf %240, %241 : vector<1x16xf32>
    %243 = arith.maximumf %239, %242 : vector<1x16xf32>
    %c96_230 = arith.constant 96 : index
    %c0_231 = arith.constant 0 : index
    %244 = vector.load %arg6[%c96_230, %c0_231] : memref<400x120xf32, #tpu.memory_space<vmem>>, vector<16x120xf32>
    %cst_232 = arith.constant dense<0.000000e+00> : vector<1x120xf32>
    %245 = tpu.matmul %243, %244, %cst_232 {dimension_numbers = #tpu.dot_dimension_numbers<[1], [0], [0], [1], [0, 0, 1, 1], [], []>} : vector<1x16xf32>, vector<16x120xf32>, vector<1x120xf32> -> vector<1x120xf32>
    %246 = arith.addf %236, %245 : vector<1x120xf32>
    %c32_233 = arith.constant 32 : index
    %c0_234 = arith.constant 0 : index
    %247 = vector.load %arg16[%c32_233, %c0_234] : memref<196x16xf32, #tpu.memory_space<vmem>>, vector<1x16xf32>
    %c33 = arith.constant 33 : index
    %c0_235 = arith.constant 0 : index
    %248 = vector.load %arg16[%c33, %c0_235] : memref<196x16xf32, #tpu.memory_space<vmem>>, vector<1x16xf32>
    %249 = arith.maximumf %247, %248 : vector<1x16xf32>
    %c46_236 = arith.constant 46 : index
    %c0_237 = arith.constant 0 : index
    %250 = vector.load %arg16[%c46_236, %c0_237] : memref<196x16xf32, #tpu.memory_space<vmem>>, vector<1x16xf32>
    %c47 = arith.constant 47 : index
    %c0_238 = arith.constant 0 : index
    %251 = vector.load %arg16[%c47, %c0_238] : memref<196x16xf32, #tpu.memory_space<vmem>>, vector<1x16xf32>
    %252 = arith.maximumf %250, %251 : vector<1x16xf32>
    %253 = arith.maximumf %249, %252 : vector<1x16xf32>
    %c112_239 = arith.constant 112 : index
    %c0_240 = arith.constant 0 : index
    %254 = vector.load %arg6[%c112_239, %c0_240] : memref<400x120xf32, #tpu.memory_space<vmem>>, vector<16x120xf32>
    %cst_241 = arith.constant dense<0.000000e+00> : vector<1x120xf32>
    %255 = tpu.matmul %253, %254, %cst_241 {dimension_numbers = #tpu.dot_dimension_numbers<[1], [0], [0], [1], [0, 0, 1, 1], [], []>} : vector<1x16xf32>, vector<16x120xf32>, vector<1x120xf32> -> vector<1x120xf32>
    %256 = arith.addf %246, %255 : vector<1x120xf32>
    %c34 = arith.constant 34 : index
    %c0_242 = arith.constant 0 : index
    %257 = vector.load %arg16[%c34, %c0_242] : memref<196x16xf32, #tpu.memory_space<vmem>>, vector<1x16xf32>
    %c35 = arith.constant 35 : index
    %c0_243 = arith.constant 0 : index
    %258 = vector.load %arg16[%c35, %c0_243] : memref<196x16xf32, #tpu.memory_space<vmem>>, vector<1x16xf32>
    %259 = arith.maximumf %257, %258 : vector<1x16xf32>
    %c48_244 = arith.constant 48 : index
    %c0_245 = arith.constant 0 : index
    %260 = vector.load %arg16[%c48_244, %c0_245] : memref<196x16xf32, #tpu.memory_space<vmem>>, vector<1x16xf32>
    %c49 = arith.constant 49 : index
    %c0_246 = arith.constant 0 : index
    %261 = vector.load %arg16[%c49, %c0_246] : memref<196x16xf32, #tpu.memory_space<vmem>>, vector<1x16xf32>
    %262 = arith.maximumf %260, %261 : vector<1x16xf32>
    %263 = arith.maximumf %259, %262 : vector<1x16xf32>
    %c128 = arith.constant 128 : index
    %c0_247 = arith.constant 0 : index
    %264 = vector.load %arg6[%c128, %c0_247] : memref<400x120xf32, #tpu.memory_space<vmem>>, vector<16x120xf32>
    %cst_248 = arith.constant dense<0.000000e+00> : vector<1x120xf32>
    %265 = tpu.matmul %263, %264, %cst_248 {dimension_numbers = #tpu.dot_dimension_numbers<[1], [0], [0], [1], [0, 0, 1, 1], [], []>} : vector<1x16xf32>, vector<16x120xf32>, vector<1x120xf32> -> vector<1x120xf32>
    %266 = arith.addf %256, %265 : vector<1x120xf32>
    %c36_249 = arith.constant 36 : index
    %c0_250 = arith.constant 0 : index
    %267 = vector.load %arg16[%c36_249, %c0_250] : memref<196x16xf32, #tpu.memory_space<vmem>>, vector<1x16xf32>
    %c37 = arith.constant 37 : index
    %c0_251 = arith.constant 0 : index
    %268 = vector.load %arg16[%c37, %c0_251] : memref<196x16xf32, #tpu.memory_space<vmem>>, vector<1x16xf32>
    %269 = arith.maximumf %267, %268 : vector<1x16xf32>
    %c50 = arith.constant 50 : index
    %c0_252 = arith.constant 0 : index
    %270 = vector.load %arg16[%c50, %c0_252] : memref<196x16xf32, #tpu.memory_space<vmem>>, vector<1x16xf32>
    %c51 = arith.constant 51 : index
    %c0_253 = arith.constant 0 : index
    %271 = vector.load %arg16[%c51, %c0_253] : memref<196x16xf32, #tpu.memory_space<vmem>>, vector<1x16xf32>
    %272 = arith.maximumf %270, %271 : vector<1x16xf32>
    %273 = arith.maximumf %269, %272 : vector<1x16xf32>
    %c144_254 = arith.constant 144 : index
    %c0_255 = arith.constant 0 : index
    %274 = vector.load %arg6[%c144_254, %c0_255] : memref<400x120xf32, #tpu.memory_space<vmem>>, vector<16x120xf32>
    %cst_256 = arith.constant dense<0.000000e+00> : vector<1x120xf32>
    %275 = tpu.matmul %273, %274, %cst_256 {dimension_numbers = #tpu.dot_dimension_numbers<[1], [0], [0], [1], [0, 0, 1, 1], [], []>} : vector<1x16xf32>, vector<16x120xf32>, vector<1x120xf32> -> vector<1x120xf32>
    %276 = arith.addf %266, %275 : vector<1x120xf32>
    %c56_257 = arith.constant 56 : index
    %c0_258 = arith.constant 0 : index
    %277 = vector.load %arg16[%c56_257, %c0_258] : memref<196x16xf32, #tpu.memory_space<vmem>>, vector<1x16xf32>
    %c57_259 = arith.constant 57 : index
    %c0_260 = arith.constant 0 : index
    %278 = vector.load %arg16[%c57_259, %c0_260] : memref<196x16xf32, #tpu.memory_space<vmem>>, vector<1x16xf32>
    %279 = arith.maximumf %277, %278 : vector<1x16xf32>
    %c70_261 = arith.constant 70 : index
    %c0_262 = arith.constant 0 : index
    %280 = vector.load %arg16[%c70_261, %c0_262] : memref<196x16xf32, #tpu.memory_space<vmem>>, vector<1x16xf32>
    %c71 = arith.constant 71 : index
    %c0_263 = arith.constant 0 : index
    %281 = vector.load %arg16[%c71, %c0_263] : memref<196x16xf32, #tpu.memory_space<vmem>>, vector<1x16xf32>
    %282 = arith.maximumf %280, %281 : vector<1x16xf32>
    %283 = arith.maximumf %279, %282 : vector<1x16xf32>
    %c160 = arith.constant 160 : index
    %c0_264 = arith.constant 0 : index
    %284 = vector.load %arg6[%c160, %c0_264] : memref<400x120xf32, #tpu.memory_space<vmem>>, vector<16x120xf32>
    %cst_265 = arith.constant dense<0.000000e+00> : vector<1x120xf32>
    %285 = tpu.matmul %283, %284, %cst_265 {dimension_numbers = #tpu.dot_dimension_numbers<[1], [0], [0], [1], [0, 0, 1, 1], [], []>} : vector<1x16xf32>, vector<16x120xf32>, vector<1x120xf32> -> vector<1x120xf32>
    %286 = arith.addf %276, %285 : vector<1x120xf32>
    %c58_266 = arith.constant 58 : index
    %c0_267 = arith.constant 0 : index
    %287 = vector.load %arg16[%c58_266, %c0_267] : memref<196x16xf32, #tpu.memory_space<vmem>>, vector<1x16xf32>
    %c59_268 = arith.constant 59 : index
    %c0_269 = arith.constant 0 : index
    %288 = vector.load %arg16[%c59_268, %c0_269] : memref<196x16xf32, #tpu.memory_space<vmem>>, vector<1x16xf32>
    %289 = arith.maximumf %287, %288 : vector<1x16xf32>
    %c72_270 = arith.constant 72 : index
    %c0_271 = arith.constant 0 : index
    %290 = vector.load %arg16[%c72_270, %c0_271] : memref<196x16xf32, #tpu.memory_space<vmem>>, vector<1x16xf32>
    %c73 = arith.constant 73 : index
    %c0_272 = arith.constant 0 : index
    %291 = vector.load %arg16[%c73, %c0_272] : memref<196x16xf32, #tpu.memory_space<vmem>>, vector<1x16xf32>
    %292 = arith.maximumf %290, %291 : vector<1x16xf32>
    %293 = arith.maximumf %289, %292 : vector<1x16xf32>
    %c176 = arith.constant 176 : index
    %c0_273 = arith.constant 0 : index
    %294 = vector.load %arg6[%c176, %c0_273] : memref<400x120xf32, #tpu.memory_space<vmem>>, vector<16x120xf32>
    %cst_274 = arith.constant dense<0.000000e+00> : vector<1x120xf32>
    %295 = tpu.matmul %293, %294, %cst_274 {dimension_numbers = #tpu.dot_dimension_numbers<[1], [0], [0], [1], [0, 0, 1, 1], [], []>} : vector<1x16xf32>, vector<16x120xf32>, vector<1x120xf32> -> vector<1x120xf32>
    %296 = arith.addf %286, %295 : vector<1x120xf32>
    %c60_275 = arith.constant 60 : index
    %c0_276 = arith.constant 0 : index
    %297 = vector.load %arg16[%c60_275, %c0_276] : memref<196x16xf32, #tpu.memory_space<vmem>>, vector<1x16xf32>
    %c61 = arith.constant 61 : index
    %c0_277 = arith.constant 0 : index
    %298 = vector.load %arg16[%c61, %c0_277] : memref<196x16xf32, #tpu.memory_space<vmem>>, vector<1x16xf32>
    %299 = arith.maximumf %297, %298 : vector<1x16xf32>
    %c74 = arith.constant 74 : index
    %c0_278 = arith.constant 0 : index
    %300 = vector.load %arg16[%c74, %c0_278] : memref<196x16xf32, #tpu.memory_space<vmem>>, vector<1x16xf32>
    %c75 = arith.constant 75 : index
    %c0_279 = arith.constant 0 : index
    %301 = vector.load %arg16[%c75, %c0_279] : memref<196x16xf32, #tpu.memory_space<vmem>>, vector<1x16xf32>
    %302 = arith.maximumf %300, %301 : vector<1x16xf32>
    %303 = arith.maximumf %299, %302 : vector<1x16xf32>
    %c192 = arith.constant 192 : index
    %c0_280 = arith.constant 0 : index
    %304 = vector.load %arg6[%c192, %c0_280] : memref<400x120xf32, #tpu.memory_space<vmem>>, vector<16x120xf32>
    %cst_281 = arith.constant dense<0.000000e+00> : vector<1x120xf32>
    %305 = tpu.matmul %303, %304, %cst_281 {dimension_numbers = #tpu.dot_dimension_numbers<[1], [0], [0], [1], [0, 0, 1, 1], [], []>} : vector<1x16xf32>, vector<16x120xf32>, vector<1x120xf32> -> vector<1x120xf32>
    %306 = arith.addf %296, %305 : vector<1x120xf32>
    %c62 = arith.constant 62 : index
    %c0_282 = arith.constant 0 : index
    %307 = vector.load %arg16[%c62, %c0_282] : memref<196x16xf32, #tpu.memory_space<vmem>>, vector<1x16xf32>
    %c63 = arith.constant 63 : index
    %c0_283 = arith.constant 0 : index
    %308 = vector.load %arg16[%c63, %c0_283] : memref<196x16xf32, #tpu.memory_space<vmem>>, vector<1x16xf32>
    %309 = arith.maximumf %307, %308 : vector<1x16xf32>
    %c76 = arith.constant 76 : index
    %c0_284 = arith.constant 0 : index
    %310 = vector.load %arg16[%c76, %c0_284] : memref<196x16xf32, #tpu.memory_space<vmem>>, vector<1x16xf32>
    %c77 = arith.constant 77 : index
    %c0_285 = arith.constant 0 : index
    %311 = vector.load %arg16[%c77, %c0_285] : memref<196x16xf32, #tpu.memory_space<vmem>>, vector<1x16xf32>
    %312 = arith.maximumf %310, %311 : vector<1x16xf32>
    %313 = arith.maximumf %309, %312 : vector<1x16xf32>
    %c208 = arith.constant 208 : index
    %c0_286 = arith.constant 0 : index
    %314 = vector.load %arg6[%c208, %c0_286] : memref<400x120xf32, #tpu.memory_space<vmem>>, vector<16x120xf32>
    %cst_287 = arith.constant dense<0.000000e+00> : vector<1x120xf32>
    %315 = tpu.matmul %313, %314, %cst_287 {dimension_numbers = #tpu.dot_dimension_numbers<[1], [0], [0], [1], [0, 0, 1, 1], [], []>} : vector<1x16xf32>, vector<16x120xf32>, vector<1x120xf32> -> vector<1x120xf32>
    %316 = arith.addf %306, %315 : vector<1x120xf32>
    %c64_288 = arith.constant 64 : index
    %c0_289 = arith.constant 0 : index
    %317 = vector.load %arg16[%c64_288, %c0_289] : memref<196x16xf32, #tpu.memory_space<vmem>>, vector<1x16xf32>
    %c65 = arith.constant 65 : index
    %c0_290 = arith.constant 0 : index
    %318 = vector.load %arg16[%c65, %c0_290] : memref<196x16xf32, #tpu.memory_space<vmem>>, vector<1x16xf32>
    %319 = arith.maximumf %317, %318 : vector<1x16xf32>
    %c78_291 = arith.constant 78 : index
    %c0_292 = arith.constant 0 : index
    %320 = vector.load %arg16[%c78_291, %c0_292] : memref<196x16xf32, #tpu.memory_space<vmem>>, vector<1x16xf32>
    %c79 = arith.constant 79 : index
    %c0_293 = arith.constant 0 : index
    %321 = vector.load %arg16[%c79, %c0_293] : memref<196x16xf32, #tpu.memory_space<vmem>>, vector<1x16xf32>
    %322 = arith.maximumf %320, %321 : vector<1x16xf32>
    %323 = arith.maximumf %319, %322 : vector<1x16xf32>
    %c224_294 = arith.constant 224 : index
    %c0_295 = arith.constant 0 : index
    %324 = vector.load %arg6[%c224_294, %c0_295] : memref<400x120xf32, #tpu.memory_space<vmem>>, vector<16x120xf32>
    %cst_296 = arith.constant dense<0.000000e+00> : vector<1x120xf32>
    %325 = tpu.matmul %323, %324, %cst_296 {dimension_numbers = #tpu.dot_dimension_numbers<[1], [0], [0], [1], [0, 0, 1, 1], [], []>} : vector<1x16xf32>, vector<16x120xf32>, vector<1x120xf32> -> vector<1x120xf32>
    %326 = arith.addf %316, %325 : vector<1x120xf32>
    %c84_297 = arith.constant 84 : index
    %c0_298 = arith.constant 0 : index
    %327 = vector.load %arg16[%c84_297, %c0_298] : memref<196x16xf32, #tpu.memory_space<vmem>>, vector<1x16xf32>
    %c85 = arith.constant 85 : index
    %c0_299 = arith.constant 0 : index
    %328 = vector.load %arg16[%c85, %c0_299] : memref<196x16xf32, #tpu.memory_space<vmem>>, vector<1x16xf32>
    %329 = arith.maximumf %327, %328 : vector<1x16xf32>
    %c98_300 = arith.constant 98 : index
    %c0_301 = arith.constant 0 : index
    %330 = vector.load %arg16[%c98_300, %c0_301] : memref<196x16xf32, #tpu.memory_space<vmem>>, vector<1x16xf32>
    %c99 = arith.constant 99 : index
    %c0_302 = arith.constant 0 : index
    %331 = vector.load %arg16[%c99, %c0_302] : memref<196x16xf32, #tpu.memory_space<vmem>>, vector<1x16xf32>
    %332 = arith.maximumf %330, %331 : vector<1x16xf32>
    %333 = arith.maximumf %329, %332 : vector<1x16xf32>
    %c240 = arith.constant 240 : index
    %c0_303 = arith.constant 0 : index
    %334 = vector.load %arg6[%c240, %c0_303] : memref<400x120xf32, #tpu.memory_space<vmem>>, vector<16x120xf32>
    %cst_304 = arith.constant dense<0.000000e+00> : vector<1x120xf32>
    %335 = tpu.matmul %333, %334, %cst_304 {dimension_numbers = #tpu.dot_dimension_numbers<[1], [0], [0], [1], [0, 0, 1, 1], [], []>} : vector<1x16xf32>, vector<16x120xf32>, vector<1x120xf32> -> vector<1x120xf32>
    %336 = arith.addf %326, %335 : vector<1x120xf32>
    %c86 = arith.constant 86 : index
    %c0_305 = arith.constant 0 : index
    %337 = vector.load %arg16[%c86, %c0_305] : memref<196x16xf32, #tpu.memory_space<vmem>>, vector<1x16xf32>
    %c87 = arith.constant 87 : index
    %c0_306 = arith.constant 0 : index
    %338 = vector.load %arg16[%c87, %c0_306] : memref<196x16xf32, #tpu.memory_space<vmem>>, vector<1x16xf32>
    %339 = arith.maximumf %337, %338 : vector<1x16xf32>
    %c100 = arith.constant 100 : index
    %c0_307 = arith.constant 0 : index
    %340 = vector.load %arg16[%c100, %c0_307] : memref<196x16xf32, #tpu.memory_space<vmem>>, vector<1x16xf32>
    %c101 = arith.constant 101 : index
    %c0_308 = arith.constant 0 : index
    %341 = vector.load %arg16[%c101, %c0_308] : memref<196x16xf32, #tpu.memory_space<vmem>>, vector<1x16xf32>
    %342 = arith.maximumf %340, %341 : vector<1x16xf32>
    %343 = arith.maximumf %339, %342 : vector<1x16xf32>
    %c256 = arith.constant 256 : index
    %c0_309 = arith.constant 0 : index
    %344 = vector.load %arg6[%c256, %c0_309] : memref<400x120xf32, #tpu.memory_space<vmem>>, vector<16x120xf32>
    %cst_310 = arith.constant dense<0.000000e+00> : vector<1x120xf32>
    %345 = tpu.matmul %343, %344, %cst_310 {dimension_numbers = #tpu.dot_dimension_numbers<[1], [0], [0], [1], [0, 0, 1, 1], [], []>} : vector<1x16xf32>, vector<16x120xf32>, vector<1x120xf32> -> vector<1x120xf32>
    %346 = arith.addf %336, %345 : vector<1x120xf32>
    %c88 = arith.constant 88 : index
    %c0_311 = arith.constant 0 : index
    %347 = vector.load %arg16[%c88, %c0_311] : memref<196x16xf32, #tpu.memory_space<vmem>>, vector<1x16xf32>
    %c89 = arith.constant 89 : index
    %c0_312 = arith.constant 0 : index
    %348 = vector.load %arg16[%c89, %c0_312] : memref<196x16xf32, #tpu.memory_space<vmem>>, vector<1x16xf32>
    %349 = arith.maximumf %347, %348 : vector<1x16xf32>
    %c102_313 = arith.constant 102 : index
    %c0_314 = arith.constant 0 : index
    %350 = vector.load %arg16[%c102_313, %c0_314] : memref<196x16xf32, #tpu.memory_space<vmem>>, vector<1x16xf32>
    %c103 = arith.constant 103 : index
    %c0_315 = arith.constant 0 : index
    %351 = vector.load %arg16[%c103, %c0_315] : memref<196x16xf32, #tpu.memory_space<vmem>>, vector<1x16xf32>
    %352 = arith.maximumf %350, %351 : vector<1x16xf32>
    %353 = arith.maximumf %349, %352 : vector<1x16xf32>
    %c272 = arith.constant 272 : index
    %c0_316 = arith.constant 0 : index
    %354 = vector.load %arg6[%c272, %c0_316] : memref<400x120xf32, #tpu.memory_space<vmem>>, vector<16x120xf32>
    %cst_317 = arith.constant dense<0.000000e+00> : vector<1x120xf32>
    %355 = tpu.matmul %353, %354, %cst_317 {dimension_numbers = #tpu.dot_dimension_numbers<[1], [0], [0], [1], [0, 0, 1, 1], [], []>} : vector<1x16xf32>, vector<16x120xf32>, vector<1x120xf32> -> vector<1x120xf32>
    %356 = arith.addf %346, %355 : vector<1x120xf32>
    %c90_318 = arith.constant 90 : index
    %c0_319 = arith.constant 0 : index
    %357 = vector.load %arg16[%c90_318, %c0_319] : memref<196x16xf32, #tpu.memory_space<vmem>>, vector<1x16xf32>
    %c91 = arith.constant 91 : index
    %c0_320 = arith.constant 0 : index
    %358 = vector.load %arg16[%c91, %c0_320] : memref<196x16xf32, #tpu.memory_space<vmem>>, vector<1x16xf32>
    %359 = arith.maximumf %357, %358 : vector<1x16xf32>
    %c104 = arith.constant 104 : index
    %c0_321 = arith.constant 0 : index
    %360 = vector.load %arg16[%c104, %c0_321] : memref<196x16xf32, #tpu.memory_space<vmem>>, vector<1x16xf32>
    %c105 = arith.constant 105 : index
    %c0_322 = arith.constant 0 : index
    %361 = vector.load %arg16[%c105, %c0_322] : memref<196x16xf32, #tpu.memory_space<vmem>>, vector<1x16xf32>
    %362 = arith.maximumf %360, %361 : vector<1x16xf32>
    %363 = arith.maximumf %359, %362 : vector<1x16xf32>
    %c288 = arith.constant 288 : index
    %c0_323 = arith.constant 0 : index
    %364 = vector.load %arg6[%c288, %c0_323] : memref<400x120xf32, #tpu.memory_space<vmem>>, vector<16x120xf32>
    %cst_324 = arith.constant dense<0.000000e+00> : vector<1x120xf32>
    %365 = tpu.matmul %363, %364, %cst_324 {dimension_numbers = #tpu.dot_dimension_numbers<[1], [0], [0], [1], [0, 0, 1, 1], [], []>} : vector<1x16xf32>, vector<16x120xf32>, vector<1x120xf32> -> vector<1x120xf32>
    %366 = arith.addf %356, %365 : vector<1x120xf32>
    %c92 = arith.constant 92 : index
    %c0_325 = arith.constant 0 : index
    %367 = vector.load %arg16[%c92, %c0_325] : memref<196x16xf32, #tpu.memory_space<vmem>>, vector<1x16xf32>
    %c93 = arith.constant 93 : index
    %c0_326 = arith.constant 0 : index
    %368 = vector.load %arg16[%c93, %c0_326] : memref<196x16xf32, #tpu.memory_space<vmem>>, vector<1x16xf32>
    %369 = arith.maximumf %367, %368 : vector<1x16xf32>
    %c106 = arith.constant 106 : index
    %c0_327 = arith.constant 0 : index
    %370 = vector.load %arg16[%c106, %c0_327] : memref<196x16xf32, #tpu.memory_space<vmem>>, vector<1x16xf32>
    %c107 = arith.constant 107 : index
    %c0_328 = arith.constant 0 : index
    %371 = vector.load %arg16[%c107, %c0_328] : memref<196x16xf32, #tpu.memory_space<vmem>>, vector<1x16xf32>
    %372 = arith.maximumf %370, %371 : vector<1x16xf32>
    %373 = arith.maximumf %369, %372 : vector<1x16xf32>
    %c304 = arith.constant 304 : index
    %c0_329 = arith.constant 0 : index
    %374 = vector.load %arg6[%c304, %c0_329] : memref<400x120xf32, #tpu.memory_space<vmem>>, vector<16x120xf32>
    %cst_330 = arith.constant dense<0.000000e+00> : vector<1x120xf32>
    %375 = tpu.matmul %373, %374, %cst_330 {dimension_numbers = #tpu.dot_dimension_numbers<[1], [0], [0], [1], [0, 0, 1, 1], [], []>} : vector<1x16xf32>, vector<16x120xf32>, vector<1x120xf32> -> vector<1x120xf32>
    %376 = arith.addf %366, %375 : vector<1x120xf32>
    %c112_331 = arith.constant 112 : index
    %c0_332 = arith.constant 0 : index
    %377 = vector.load %arg16[%c112_331, %c0_332] : memref<196x16xf32, #tpu.memory_space<vmem>>, vector<1x16xf32>
    %c113 = arith.constant 113 : index
    %c0_333 = arith.constant 0 : index
    %378 = vector.load %arg16[%c113, %c0_333] : memref<196x16xf32, #tpu.memory_space<vmem>>, vector<1x16xf32>
    %379 = arith.maximumf %377, %378 : vector<1x16xf32>
    %c126_334 = arith.constant 126 : index
    %c0_335 = arith.constant 0 : index
    %380 = vector.load %arg16[%c126_334, %c0_335] : memref<196x16xf32, #tpu.memory_space<vmem>>, vector<1x16xf32>
    %c127 = arith.constant 127 : index
    %c0_336 = arith.constant 0 : index
    %381 = vector.load %arg16[%c127, %c0_336] : memref<196x16xf32, #tpu.memory_space<vmem>>, vector<1x16xf32>
    %382 = arith.maximumf %380, %381 : vector<1x16xf32>
    %383 = arith.maximumf %379, %382 : vector<1x16xf32>
    %c320 = arith.constant 320 : index
    %c0_337 = arith.constant 0 : index
    %384 = vector.load %arg6[%c320, %c0_337] : memref<400x120xf32, #tpu.memory_space<vmem>>, vector<16x120xf32>
    %cst_338 = arith.constant dense<0.000000e+00> : vector<1x120xf32>
    %385 = tpu.matmul %383, %384, %cst_338 {dimension_numbers = #tpu.dot_dimension_numbers<[1], [0], [0], [1], [0, 0, 1, 1], [], []>} : vector<1x16xf32>, vector<16x120xf32>, vector<1x120xf32> -> vector<1x120xf32>
    %386 = arith.addf %376, %385 : vector<1x120xf32>
    %c114_339 = arith.constant 114 : index
    %c0_340 = arith.constant 0 : index
    %387 = vector.load %arg16[%c114_339, %c0_340] : memref<196x16xf32, #tpu.memory_space<vmem>>, vector<1x16xf32>
    %c115 = arith.constant 115 : index
    %c0_341 = arith.constant 0 : index
    %388 = vector.load %arg16[%c115, %c0_341] : memref<196x16xf32, #tpu.memory_space<vmem>>, vector<1x16xf32>
    %389 = arith.maximumf %387, %388 : vector<1x16xf32>
    %c128_342 = arith.constant 128 : index
    %c0_343 = arith.constant 0 : index
    %390 = vector.load %arg16[%c128_342, %c0_343] : memref<196x16xf32, #tpu.memory_space<vmem>>, vector<1x16xf32>
    %c129 = arith.constant 129 : index
    %c0_344 = arith.constant 0 : index
    %391 = vector.load %arg16[%c129, %c0_344] : memref<196x16xf32, #tpu.memory_space<vmem>>, vector<1x16xf32>
    %392 = arith.maximumf %390, %391 : vector<1x16xf32>
    %393 = arith.maximumf %389, %392 : vector<1x16xf32>
    %c336_345 = arith.constant 336 : index
    %c0_346 = arith.constant 0 : index
    %394 = vector.load %arg6[%c336_345, %c0_346] : memref<400x120xf32, #tpu.memory_space<vmem>>, vector<16x120xf32>
    %cst_347 = arith.constant dense<0.000000e+00> : vector<1x120xf32>
    %395 = tpu.matmul %393, %394, %cst_347 {dimension_numbers = #tpu.dot_dimension_numbers<[1], [0], [0], [1], [0, 0, 1, 1], [], []>} : vector<1x16xf32>, vector<16x120xf32>, vector<1x120xf32> -> vector<1x120xf32>
    %396 = arith.addf %386, %395 : vector<1x120xf32>
    %c116 = arith.constant 116 : index
    %c0_348 = arith.constant 0 : index
    %397 = vector.load %arg16[%c116, %c0_348] : memref<196x16xf32, #tpu.memory_space<vmem>>, vector<1x16xf32>
    %c117 = arith.constant 117 : index
    %c0_349 = arith.constant 0 : index
    %398 = vector.load %arg16[%c117, %c0_349] : memref<196x16xf32, #tpu.memory_space<vmem>>, vector<1x16xf32>
    %399 = arith.maximumf %397, %398 : vector<1x16xf32>
    %c130 = arith.constant 130 : index
    %c0_350 = arith.constant 0 : index
    %400 = vector.load %arg16[%c130, %c0_350] : memref<196x16xf32, #tpu.memory_space<vmem>>, vector<1x16xf32>
    %c131 = arith.constant 131 : index
    %c0_351 = arith.constant 0 : index
    %401 = vector.load %arg16[%c131, %c0_351] : memref<196x16xf32, #tpu.memory_space<vmem>>, vector<1x16xf32>
    %402 = arith.maximumf %400, %401 : vector<1x16xf32>
    %403 = arith.maximumf %399, %402 : vector<1x16xf32>
    %c352 = arith.constant 352 : index
    %c0_352 = arith.constant 0 : index
    %404 = vector.load %arg6[%c352, %c0_352] : memref<400x120xf32, #tpu.memory_space<vmem>>, vector<16x120xf32>
    %cst_353 = arith.constant dense<0.000000e+00> : vector<1x120xf32>
    %405 = tpu.matmul %403, %404, %cst_353 {dimension_numbers = #tpu.dot_dimension_numbers<[1], [0], [0], [1], [0, 0, 1, 1], [], []>} : vector<1x16xf32>, vector<16x120xf32>, vector<1x120xf32> -> vector<1x120xf32>
    %406 = arith.addf %396, %405 : vector<1x120xf32>
    %c118 = arith.constant 118 : index
    %c0_354 = arith.constant 0 : index
    %407 = vector.load %arg16[%c118, %c0_354] : memref<196x16xf32, #tpu.memory_space<vmem>>, vector<1x16xf32>
    %c119 = arith.constant 119 : index
    %c0_355 = arith.constant 0 : index
    %408 = vector.load %arg16[%c119, %c0_355] : memref<196x16xf32, #tpu.memory_space<vmem>>, vector<1x16xf32>
    %409 = arith.maximumf %407, %408 : vector<1x16xf32>
    %c132_356 = arith.constant 132 : index
    %c0_357 = arith.constant 0 : index
    %410 = vector.load %arg16[%c132_356, %c0_357] : memref<196x16xf32, #tpu.memory_space<vmem>>, vector<1x16xf32>
    %c133 = arith.constant 133 : index
    %c0_358 = arith.constant 0 : index
    %411 = vector.load %arg16[%c133, %c0_358] : memref<196x16xf32, #tpu.memory_space<vmem>>, vector<1x16xf32>
    %412 = arith.maximumf %410, %411 : vector<1x16xf32>
    %413 = arith.maximumf %409, %412 : vector<1x16xf32>
    %c368 = arith.constant 368 : index
    %c0_359 = arith.constant 0 : index
    %414 = vector.load %arg6[%c368, %c0_359] : memref<400x120xf32, #tpu.memory_space<vmem>>, vector<16x120xf32>
    %cst_360 = arith.constant dense<0.000000e+00> : vector<1x120xf32>
    %415 = tpu.matmul %413, %414, %cst_360 {dimension_numbers = #tpu.dot_dimension_numbers<[1], [0], [0], [1], [0, 0, 1, 1], [], []>} : vector<1x16xf32>, vector<16x120xf32>, vector<1x120xf32> -> vector<1x120xf32>
    %416 = arith.addf %406, %415 : vector<1x120xf32>
    %c120_361 = arith.constant 120 : index
    %c0_362 = arith.constant 0 : index
    %417 = vector.load %arg16[%c120_361, %c0_362] : memref<196x16xf32, #tpu.memory_space<vmem>>, vector<1x16xf32>
    %c121 = arith.constant 121 : index
    %c0_363 = arith.constant 0 : index
    %418 = vector.load %arg16[%c121, %c0_363] : memref<196x16xf32, #tpu.memory_space<vmem>>, vector<1x16xf32>
    %419 = arith.maximumf %417, %418 : vector<1x16xf32>
    %c134 = arith.constant 134 : index
    %c0_364 = arith.constant 0 : index
    %420 = vector.load %arg16[%c134, %c0_364] : memref<196x16xf32, #tpu.memory_space<vmem>>, vector<1x16xf32>
    %c135 = arith.constant 135 : index
    %c0_365 = arith.constant 0 : index
    %421 = vector.load %arg16[%c135, %c0_365] : memref<196x16xf32, #tpu.memory_space<vmem>>, vector<1x16xf32>
    %422 = arith.maximumf %420, %421 : vector<1x16xf32>
    %423 = arith.maximumf %419, %422 : vector<1x16xf32>
    %c384 = arith.constant 384 : index
    %c0_366 = arith.constant 0 : index
    %424 = vector.load %arg6[%c384, %c0_366] : memref<400x120xf32, #tpu.memory_space<vmem>>, vector<16x120xf32>
    %cst_367 = arith.constant dense<0.000000e+00> : vector<1x120xf32>
    %425 = tpu.matmul %423, %424, %cst_367 {dimension_numbers = #tpu.dot_dimension_numbers<[1], [0], [0], [1], [0, 0, 1, 1], [], []>} : vector<1x16xf32>, vector<16x120xf32>, vector<1x120xf32> -> vector<1x120xf32>
    %426 = arith.addf %416, %425 : vector<1x120xf32>
    %c0_368 = arith.constant 0 : index
    %c0_369 = arith.constant 0 : index
    %427 = vector.load %arg7[%c0_368, %c0_369] : memref<1x120xf32, #tpu.memory_space<vmem>>, vector<1x120xf32>
    %428 = arith.addf %426, %427 : vector<1x120xf32>
    %cst_370 = arith.constant 0.000000e+00 : f32
    %429 = vector.broadcast %cst_370 : f32 to vector<1x120xf32>
    %430 = arith.maximumf %428, %429 : vector<1x120xf32>
    %c0_371 = arith.constant 0 : index
    %c0_372 = arith.constant 0 : index
    %431 = vector.load %arg8[%c0_371, %c0_372] : memref<120x84xf32, #tpu.memory_space<vmem>>, vector<120x84xf32>
    %cst_373 = arith.constant dense<0.000000e+00> : vector<1x84xf32>
    %432 = tpu.matmul %430, %431, %cst_373 {dimension_numbers = #tpu.dot_dimension_numbers<[1], [0], [0], [1], [0, 0, 1, 1], [], []>} : vector<1x120xf32>, vector<120x84xf32>, vector<1x84xf32> -> vector<1x84xf32>
    %c0_374 = arith.constant 0 : index
    %c0_375 = arith.constant 0 : index
    %433 = vector.load %arg9[%c0_374, %c0_375] : memref<1x84xf32, #tpu.memory_space<vmem>>, vector<1x84xf32>
    %434 = arith.addf %432, %433 : vector<1x84xf32>
    %cst_376 = arith.constant 0.000000e+00 : f32
    %435 = vector.broadcast %cst_376 : f32 to vector<1x84xf32>
    %436 = arith.maximumf %434, %435 : vector<1x84xf32>
    %c0_377 = arith.constant 0 : index
    %c0_378 = arith.constant 0 : index
    %437 = vector.load %arg10[%c0_377, %c0_378] : memref<84x10xf32, #tpu.memory_space<vmem>>, vector<84x10xf32>
    %cst_379 = arith.constant dense<0.000000e+00> : vector<1x10xf32>
    %438 = tpu.matmul %436, %437, %cst_379 {dimension_numbers = #tpu.dot_dimension_numbers<[1], [0], [0], [1], [0, 0, 1, 1], [], []>} : vector<1x84xf32>, vector<84x10xf32>, vector<1x10xf32> -> vector<1x10xf32>
    %c0_380 = arith.constant 0 : index
    %c0_381 = arith.constant 0 : index
    %439 = vector.load %arg11[%c0_380, %c0_381] : memref<1x10xf32, #tpu.memory_space<vmem>>, vector<1x10xf32>
    %440 = arith.addf %438, %439 : vector<1x10xf32>
    %c0_382 = arith.constant 0 : index
    %c0_383 = arith.constant 0 : index
    %c0_384 = arith.constant 0 : index
    %441 = vector.load %arg12[%c0_382, %c0_383, %c0_384] : memref<1x1x10xf32, #tpu.memory_space<vmem>>, vector<1x1x10xf32>
    %442 = vector.shape_cast %441 : vector<1x1x10xf32> to vector<1x10xf32>
    %443 = vector.shape_cast %440 : vector<1x10xf32> to vector<1x1x10xf32>
    tpu.vector_store %arg12[%c0_382, %c0_383, %c0_384], %443 {strides = array<i32>} : memref<1x1x10xf32, #tpu.memory_space<vmem>>, vector<1x1x10xf32>,
    return
  }
  func.func @transform_0(%arg0: i32) -> (i32, i32) {
    %c0_i32 = arith.constant 0 : i32
    %c0_i32_0 = arith.constant 0 : i32
    return %arg0, %c0_i32 : i32, i32
  }
  func.func @transform_1(%arg0: i32) -> (i32, i32) {
    %c0_i32 = arith.constant 0 : i32
    %c0_i32_0 = arith.constant 0 : i32
    %c0_i32_1 = arith.constant 0 : i32
    return %c0_i32, %c0_i32_0 : i32, i32
  }
  func.func @transform_2(%arg0: i32) -> (i32, i32) {
    %c0_i32 = arith.constant 0 : i32
    %c0_i32_0 = arith.constant 0 : i32
    %c0_i32_1 = arith.constant 0 : i32
    return %c0_i32, %c0_i32_0 : i32, i32
  }
  func.func @transform_3(%arg0: i32) -> (i32, i32) {
    %c0_i32 = arith.constant 0 : i32
    %c0_i32_0 = arith.constant 0 : i32
    %c0_i32_1 = arith.constant 0 : i32
    return %c0_i32, %c0_i32_0 : i32, i32
  }
  func.func @transform_4(%arg0: i32) -> (i32, i32) {
    %c0_i32 = arith.constant 0 : i32
    %c0_i32_0 = arith.constant 0 : i32
    %c0_i32_1 = arith.constant 0 : i32
    return %c0_i32, %c0_i32_0 : i32, i32
  }
  func.func @transform_5(%arg0: i32) -> (i32, i32) {
    %c0_i32 = arith.constant 0 : i32
    %c0_i32_0 = arith.constant 0 : i32
    %c0_i32_1 = arith.constant 0 : i32
    return %c0_i32, %c0_i32_0 : i32, i32
  }
  func.func @transform_6(%arg0: i32) -> (i32, i32) {
    %c0_i32 = arith.constant 0 : i32
    %c0_i32_0 = arith.constant 0 : i32
    %c0_i32_1 = arith.constant 0 : i32
    return %c0_i32, %c0_i32_0 : i32, i32
  }
  func.func @transform_7(%arg0: i32) -> (i32, i32) {
    %c0_i32 = arith.constant 0 : i32
    %c0_i32_0 = arith.constant 0 : i32
    %c0_i32_1 = arith.constant 0 : i32
    return %c0_i32, %c0_i32_0 : i32, i32
  }
  func.func @transform_8(%arg0: i32) -> (i32, i32) {
    %c0_i32 = arith.constant 0 : i32
    %c0_i32_0 = arith.constant 0 : i32
    %c0_i32_1 = arith.constant 0 : i32
    return %c0_i32, %c0_i32_0 : i32, i32
  }
  func.func @transform_9(%arg0: i32) -> (i32, i32) {
    %c0_i32 = arith.constant 0 : i32
    %c0_i32_0 = arith.constant 0 : i32
    %c0_i32_1 = arith.constant 0 : i32
    return %c0_i32, %c0_i32_0 : i32, i32
  }
  func.func @transform_10(%arg0: i32) -> (i32, i32) {
    %c0_i32 = arith.constant 0 : i32
    %c0_i32_0 = arith.constant 0 : i32
    %c0_i32_1 = arith.constant 0 : i32
    return %c0_i32, %c0_i32_0 : i32, i32
  }
  func.func @transform_11(%arg0: i32) -> (i32, i32, i32) {
    %c0_i32 = arith.constant 0 : i32
    %c0_i32_0 = arith.constant 0 : i32
    %c0_i32_1 = arith.constant 0 : i32
    return %arg0, %c0_i32, %c0_i32_0 : i32, i32, i32
  }
}

</mosaic_0001>

<bundles_post_ra>
// kernel: net_forward.1
= control target key start
LH: loop header
LB: loop body
LE: loop exit
PB: predicated region body
PF: predicated region fallthrough
CT: control target
= control target key end

     0   :  { %16 = vsyncpa [#allocation7], 0  ;;  %s21410_s0 = inlined_call_operand.vmem [shape: f32[1568,75], index: 0, kind: input, shape index: {}]   ;;  %s21411_s1 = inlined_call_operand.vmem [shape: f32[75,6], index: 1, kind: input, shape index: {}]   ;;  %s21412_s2 = inlined_call_operand.vmem [shape: f32[1,6], index: 2, kind: input, shape index: {}]   ;;  %s21413_s3 = inlined_call_operand.vmem [shape: f32[150,16], index: 3, kind: input, shape index: {}]   ;;  %s21414_s4 = inlined_call_operand.vmem [shape: f32[1,16], index: 4, kind: input, shape index: {}]   ;;  %s21415_s5 = inlined_call_operand.vmem [shape: f32[400,120], index: 5, kind: input, shape index: {}]   ;;  %s21416_s6 = inlined_call_operand.vmem [shape: f32[1,120], index: 6, kind: input, shape index: {}]   ;;  %s21417_s7 = inlined_call_operand.vmem [shape: f32[120,84], index: 7, kind: input, shape index: {}]   ;;  %s21418_s8 = inlined_call_operand.vmem [shape: f32[1,84], index: 8, kind: input, shape index: {}]   ;;  %s21419_s9 = inlined_call_operand.vmem [shape: f32[84,10], index: 9, kind: input, shape index: {}]   ;;  %s21420_s10 = inlined_call_operand.vmem [shape: f32[1,10], index: 10, kind: input, shape index: {}]   ;;  %s21421_s11 = inlined_call_operand.hbm [shape: f32[2,1,10], index: 11, kind: output, shape index: {}]  }
   0x1   :  { %18 = vsyncpa [#allocation7 + $0x1], 0  ;;  %s16606_s17 = smov 0   ;;  %s16608_s18 = smov 0  }
   0x2   :  { %s16610_s19 = smov 0   ;;  %s16612_s20 = smov 0  }
   0x3 LB: > { %s16627_s21 = sadd.s32 4294967295, %s16539_s20   ;;  %s12327_s22 = sadd.s32 4294967294, %s16539_s20   ;;  %s16539_s20 = sphi %s16612_s20, %s21557_s20   ;;  %s16535_s19 = sphi %s16610_s19, %s21556_s19   ;;  %s16531_s18 = sphi %s16608_s18, %s21555_s18   ;;  %s16527_s17 = sphi %s16606_s17, %s21554_s17  }
   0x4   : > { %s16631_s23 = sadd.s32 1, %s16539_s20   ;;  %s267_s24 = sadd.s32 1, %s16535_s19 }
   0x5   : > { %s264_s25 = ssub.s32 %s16539_s20, %s16631_s23  ;;  %p277_p0 = scmp.ne.s32.totalorder %s16535_s19, %s16531_s18 }
   0x6   : > { %p265_p1 = scmp.eq.s32.totalorder %s264_s25, 0  ;;  %p278_p2 = scmp.eq.s32.totalorder %s16627_s21, 1 }
   0x7   : > { %p283_p3 = scmp.ne.s32.totalorder %s16531_s18, %s16527_s17  ;;  %p284_p4 = scmp.eq.s32.totalorder %s12327_s22, 1 }
   0x8   : > { %s16642_s26 = scalar_select %p265_p1, %s16535_s19, %s267_s24  }
   0x9   : > { %p16644_p5 = por %p278_p2, %p277_p0  ;;  %p16648_p6 = por %p284_p4, %p283_p3 }
   0xa   : > { %21426 = sst [smem:[#allocation9_spill]] %s16642_s26  ;;  %p12330_p7 = scmp.ge.s32.totalorder %s16539_s20, 1 }
   0xb   : > { %p341_p8 = scmp.lt.s32.totalorder %s16539_s20, 3 }
   0xd   : > { %p342_p9 = pnand %p12330_p7, %p341_p8 }
   0xf   : > { %345 = sbr.rel (%p342_p9) target bundleno = 2677 (0xa75), region = 64 }
  0x16   : > { %v484_v0 = vld [vmem:[%s21411_s1] sm:$0xff]  ;;  %v485_v1 = vld [vmem:[%s21411_s1 + $0x8] sm:$0xff]  ;;  %v486_v2 = vld [vmem:[%s21411_s1 + $0x10] sm:$0xff]  ;;  %s380_s16 = smul.u32 98, %s16627_s21  ;;  %vm501_vm0 = vcmask 613376   ;;  %vm796_vm1 = vcmask 1042432  }
  0x17   : > { %v16300_v3 = vpack.c.bf16 %v485_v1, %v484_v0  ;;  %v487_v4 = vld [vmem:[%s21411_s1 + $0x18] sm:$0xff]  ;;  %v488_v6 = vld [vmem:[%s21411_s1 + $0x20] sm:$0xff]  ;;  %v489_v7 = vld [vmem:[%s21411_s1 + $0x28] sm:$0xff]  ;;  %vm16541_vm2 = vmmov 1   ;;  %vm1453_vm4 = vcmask 48128   ;;  %vm2117_vm5 = vcmask 1045504  }
  0x18   : > { %v16304_v5 = vpack.c.bf16 %v487_v4, %v486_v2  ;;  %p381_p10 = scmp.lt.s32.totalorder %s380_s16, 195  ;;  %v16308_v8 = vpack.c.bf16 %v489_v7, %v488_v6  ;;  %v490_v9 = vld [vmem:[%s21411_s1 + $0x30] sm:$0xff]  ;;  %v491_v10 = vld [vmem:[%s21411_s1 + $0x38] sm:$0xff]  ;;  %v492_v13 = vld [vmem:[%s21411_s1 + $0x40] sm:$0xff]  ;;  %vm16543_vm6 = vmmov 0   ;;  %vm1884_vm7 = vcmask 46080  }
  0x19   : > { %16301 = vmatprep.subr.bf16.mxu0 %v16300_v3  ;;  %v16312_v12 = vpack.c.bf16 %v491_v10, %v490_v9  ;;  %v493_v14 = vld [vmem:[%s21411_s1 + $0x48] sm:$0x7]  ;;  %vm16317_vm3 = vmpackc.low %vm796_vm1, %vm16541_vm2  ;;  %vm9973_vm8 = vcmask 130048   ;;  %vm12092_vm9 = vcmask 982016   ;;  %vm12183_vm10 = vcmask 1043456  }
  0x1a   : > { %16303 = vmatpush3.bf16.msra.mxu0 %v16300_v3  ;;  %s21559_s16 = smov (!%p381_p10, %s380_s16), 195  ;;  %v16316_v15 = vpack.c.bf16 %v493_v14, %v492_v13  ;;  %vm12179_vm11 = vcmask 687104   ;;  %vm12257_vm12 = vcmask 73728  }
  0x1b   : > { %16305 = vmatprep.subr.bf16.mxu0 %v16304_v5  ;;  %s12331_s26 = sshll.u32 %s21559_s16, 3 }
  0x1c   : > { %s16682_s25 = scalar_lea.vmem %s21410_s0, %s12331_s26  ;;  %s378_s26 = sand.u32 1, %s16531_s18  }
  0x1d   : > { %v386_v11 = vld [vmem:[%s16682_s25] sm:$0xff]  ;;  %v387_v16 = vld [vmem:[%s16682_s25 + $0x8] sm:$0xff]  ;;  %v388_v17 = vld [vmem:[%s16682_s25 + $0x10] sm:$0xff]  ;;  %s379_s29 = scalar_lea.vmem [#allocation6], %s378_s26  ;;  %s12260_s14 = scalar_lea.sflag [#allocation7], %s378_s26 }
  0x1e   : > { %16307 = vmatpush3.bf16.msra.mxu0 %v16304_v5  ;;  %13995 = vmatprep.mubr.msk.f32.mxu0 %vm501_vm0, %v386_v11  ;;  %v389_v18 = vld [vmem:[%s16682_s25 + $0x18] sm:$0xff]  ;;  %v390_v19 = vld [vmem:[%s16682_s25 + $0x20] sm:$0xff]  ;;  %v391_v20 = vld [vmem:[%s16682_s25 + $0x28] sm:$0xff]  ;;  %s12272_s30 = sshll.u32 %s379_s29, 4  ;;  %s21370_s30 = int_to_ptr.vmem [resolvable:$true] %s12272_s30 }
  0x1f   : > { %16309 = vmatprep.subr.bf16.mxu0 %v16308_v8  ;;  %v392_v21 = vld [vmem:[%s16682_s25 + $0x30] sm:$0xff]  ;;  %v393_v22 = vld [vmem:[%s16682_s25 + $0x38] sm:$0xff]  ;;  %v394_v23 = vld [vmem:[%s16682_s25 + $0x40] sm:$0xff]  ;;  %s16477_s15 = scalar_lea.vmem %s21370_s30, 16 }
  0x20   : > { %v395_v24 = vld [vmem:[%s16682_s25 + $0x48] sm:$0xff]  ;;  %v396_v25 = vld [vmem:[%s16682_s25 + $0x50] sm:$0xff]  ;;  %v397_v26 = vld [vmem:[%s16682_s25 + $0x58] sm:$0xff]  ;;  %p16478_p11 = scmp.ne.s32.totalorder %s21370_s30, %s16477_s15 }
  0x21   : > { %v398_v27 = vld [vmem:[%s16682_s25 + $0x60] sm:$0xff]  ;;  %v399_v28 = vld [vmem:[%s16682_s25 + $0x68] sm:$0xff]  ;;  %v400_v29 = vld [vmem:[%s16682_s25 + $0x70] sm:$0xff] }
  0x22   : > { %16311 = vmatpush3.bf16.msra.mxu0 %v16308_v8  ;;  %v401_v30 = vld [vmem:[%s16682_s25 + $0x78] sm:$0xff]  ;;  %v402_v31 = vld [vmem:[%s16682_s25 + $0x80] sm:$0xff]  ;;  %v403_v32 = vld [vmem:[%s16682_s25 + $0x88] sm:$0xff]  ;;  %p16479_p12 = pnand %p16478_p11, %p16644_p5 }
  0x23   : > { %16313 = vmatprep.subr.bf16.mxu0 %v16312_v12  ;;  %v404_v33 = vld [vmem:[%s16682_s25 + $0x90] sm:$0xff]  ;;  %v405_v34 = vld [vmem:[%s16682_s25 + $0x98] sm:$0xff]  ;;  %v406_v35 = vld [vmem:[%s16682_s25 + $0xa0] sm:$0xff] }
  0x24   : > { %v407_v36 = vld [vmem:[%s16682_s25 + $0xa8] sm:$0xff]  ;;  %v408_v37 = vld [vmem:[%s16682_s25 + $0xb0] sm:$0xff]  ;;  %v409_v38 = vld [vmem:[%s16682_s25 + $0xb8] sm:$0xff]  ;;  %p16480_p13 = pneg %p16479_p12 }
  0x25   : > { %v410_v39 = vld [vmem:[%s16682_s25 + $0xc0] sm:$0xff]  ;;  %v411_v40 = vld [vmem:[%s16682_s25 + $0xc8] sm:$0xff]  ;;  %v412_v41 = vld [vmem:[%s16682_s25 + $0xd0] sm:$0xff] }
  0x26   : > { %16315 = vmatpush3.bf16.msra.mxu0 %v16312_v12  ;;  %v413_v42 = vld [vmem:[%s16682_s25 + $0xd8] sm:$0xff]  ;;  %v414_v43 = vld [vmem:[%s16682_s25 + $0xe0] sm:$0xff]  ;;  %v415_v44 = vld [vmem:[%s16682_s25 + $0xe8] sm:$0xff]  ;;  %v16542_v12 = vmov 0.0  }
  0x27   : > { %16318 = vmatprep.subr.msk.bf16.mxu0 %vm16317_vm3, %v16316_v15  ;;  %v416_v45 = vld [vmem:[%s16682_s25 + $0xf0] sm:$0xff]  ;;  %v417_v46 = vld [vmem:[%s16682_s25 + $0xf8] sm:$0xff]  ;;  %v418_v47 = vld [vmem:[%s16682_s25 + $0x100] sm:$0xff]  ;;  %14142 = vmatprep.subr.mxu1 %v16542_v12  ;;  %1845 = vst.msk [vmem:[#allocation4] sm:$0xff] %vm1453_vm4, %v16542_v12 }
  0x28   : > { %v419_v48 = vld [vmem:[%s16682_s25 + $0x108] sm:$0xff]  ;;  %v420_v49 = vld [vmem:[%s16682_s25 + $0x110] sm:$0xff]  ;;  %v421_v50 = vld [vmem:[%s16682_s25 + $0x118] sm:$0xff]  ;;  %1846 = vst.msk [vmem:[#allocation4 + $0x8] sm:$0xff] %vm1453_vm4, %v16542_v12  ;;  %14144 = vmatprep.mubr.msk.f32.mxu1 %vm16543_vm6, %v16542_v12 }
  0x29   : > { %v422_v51 = vld [vmem:[%s16682_s25 + $0x120] sm:$0xff]  ;;  %v423_v52 = vld [vmem:[%s16682_s25 + $0x128] sm:$0xff]  ;;  %v424_v53 = vld [vmem:[%s16682_s25 + $0x130] sm:$0xff]  ;;  %1847 = vst.msk [vmem:[#allocation4 + $0x10] sm:$0xff] %vm1453_vm4, %v16542_v12 }
  0x2a   : > { %16321 = vmatpush3.bf16.msk.msra.mxu0 %vm16317_vm3, %v16316_v15  ;;  %v425_v54 = vld [vmem:[%s16682_s25 + $0x138] sm:$0xff]  ;;  %v426_v55 = vld [vmem:[%s16682_s25 + $0x140] sm:$0xff]  ;;  %v427_v56 = vld [vmem:[%s16682_s25 + $0x148] sm:$0xff]  ;;  %1848 = vst.msk [vmem:[#allocation4 + $0x18] sm:$0xff] %vm1453_vm4, %v16542_v12 }
  0x2b   : > { %v428_v57 = vld [vmem:[%s16682_s25 + $0x150] sm:$0xff]  ;;  %v429_v58 = vld [vmem:[%s16682_s25 + $0x158] sm:$0xff]  ;;  %v430_v59 = vld [vmem:[%s16682_s25 + $0x160] sm:$0xff]  ;;  %1849 = vst.msk [vmem:[#allocation4 + $0x20] sm:$0xff] %vm1453_vm4, %v16542_v12  ;;  %14373 = vmatprep.subr.mxu0 %v16542_v12 }
  0x2c   : > { %v431_v60 = vld [vmem:[%s16682_s25 + $0x168] sm:$0xff]  ;;  %v432_v61 = vld [vmem:[%s16682_s25 + $0x170] sm:$0xff]  ;;  %v433_v62 = vld [vmem:[%s16682_s25 + $0x178] sm:$0xff]  ;;  %1850 = vst.msk [vmem:[#allocation4 + $0x28] sm:$0xff] %vm1453_vm4, %v16542_v12 }
  0x2d   : > { %13996 = vmatmul.mubr.msk.f32.vlgmr.msra.gmra.mrb[0].mxu0 %vm501_vm0, %v387_v16  ;;  %v434_v63 = vld [vmem:[%s16682_s25 + $0x180] sm:$0xff]  ;;  %v435_v0 = vld [vmem:[%s16682_s25 + $0x188] sm:$0xff]  ;;  %v436_v1 = vld [vmem:[%s16682_s25 + $0x190] sm:$0xff]  ;;  %1851 = vst.msk [vmem:[#allocation4 + $0x30] sm:$0xff] %vm1453_vm4, %v16542_v12 }
  0x2e   : > { %13998 = vmatprep.mubr.msk.f32.mxu0 %vm501_vm0, %v388_v17  ;;  %v437_v2 = vld [vmem:[%s16682_s25 + $0x198] sm:$0xff]  ;;  %v438_v3 = vld [vmem:[%s16682_s25 + $0x1a0] sm:$0xff]  ;;  %v439_v4 = vld [vmem:[%s16682_s25 + $0x1a8] sm:$0xff]  ;;  %1852 = vst.msk [vmem:[#allocation4 + $0x38] sm:$0xff] %vm1453_vm4, %v16542_v12 }
  0x2f   : > { %v440_v5 = vld [vmem:[%s16682_s25 + $0x1b0] sm:$0xff]  ;;  %v441_v6 = vld [vmem:[%s16682_s25 + $0x1b8] sm:$0xff]  ;;  %v442_v7 = vld [vmem:[%s16682_s25 + $0x1c0] sm:$0xff]  ;;  %1853 = vst.msk [vmem:[#allocation4 + $0x40] sm:$0xff] %vm1453_vm4, %v16542_v12 }
  0x30   : > { %v443_v8 = vld [vmem:[%s16682_s25 + $0x1c8] sm:$0xff]  ;;  %v444_v9 = vld [vmem:[%s16682_s25 + $0x1d0] sm:$0xff]  ;;  %v445_v10 = vld [vmem:[%s16682_s25 + $0x1d8] sm:$0xff]  ;;  %1854 = vst.msk [vmem:[#allocation4 + $0x48] sm:$0xff] %vm1453_vm4, %v16542_v12 }
  0x31   : > { %13999 = vmatmul.mubr.msk.f32.gmra.mrb[2].mxu0 %vm501_vm0, %v389_v18  ;;  %v446_v11 = vld [vmem:[%s16682_s25 + $0x1e0] sm:$0xff]  ;;  %1855 = vst.msk [vmem:[#allocation4 + $0x50] sm:$0xff] %vm1453_vm4, %v16542_v12  ;;  %1856 = vst.msk [vmem:[#allocation4 + $0x58] sm:$0xff] %vm1453_vm4, %v16542_v12  ;;  %v447_v13 = vld [vmem:[%s16682_s25 + $0x1e8] sm:$0xff] }
  0x32   : > { %14001 = vmatprep.mubr.msk.f32.mxu0 %vm501_vm0, %v390_v19  ;;  %1857 = vst.msk [vmem:[#allocation4 + $0x60] sm:$0xff] %vm1453_vm4, %v16542_v12  ;;  %1858 = vst.msk [vmem:[#allocation4 + $0x68] sm:$0xff] %vm1453_vm4, %v16542_v12  ;;  %v448_v14 = vld [vmem:[%s16682_s25 + $0x1f0] sm:$0xff]  ;;  %v449_v15 = vld [vmem:[%s16682_s25 + $0x1f8] sm:$0xff] }
  0x33   : > { %1859 = vst.msk [vmem:[#allocation4 + $0x70] sm:$0xff] %vm1453_vm4, %v16542_v12  ;;  %1860 = vst.msk [vmem:[#allocation4 + $0x78] sm:$0xff] %vm1453_vm4, %v16542_v12  ;;  %v450_v16 = vld [vmem:[%s16682_s25 + $0x200] sm:$0xff]  ;;  %v451_v17 = vld [vmem:[%s16682_s25 + $0x208] sm:$0xff] }
  0x34   : > { %1861 = vst.msk [vmem:[#allocation4 + $0x80] sm:$0xff] %vm1453_vm4, %v16542_v12  ;;  %1862 = vst.msk [vmem:[#allocation4 + $0x88] sm:$0xff] %vm1453_vm4, %v16542_v12  ;;  %v452_v18 = vld [vmem:[%s16682_s25 + $0x210] sm:$0xff]  ;;  %v2041_v19 = vld [vmem:[%s21413_s3 + $0x6] sm:$0x3f] }
  0x35   : > { %14002 = vmatmul.mubr.msk.f32.gmra.mrb[4].mxu0 %vm501_vm0, %v391_v20  ;;  %1863 = vst.msk [vmem:[#allocation4 + $0x90] sm:$0xff] %vm1453_vm4, %v16542_v12  ;;  %1864 = vst.msk [vmem:[#allocation4 + $0x98] sm:$0xff] %vm1453_vm4, %v16542_v12  ;;  %v2923_v20 = vld [vmem:[%s21413_s3 + $0x12] sm:$0x3f]  ;;  %14143 = vmatpush3.msk.msra.mxu1 %vm2117_vm5, %v2041_v19 }
  0x36   : > { %14004 = vmatprep.mubr.msk.f32.mxu0 %vm501_vm0, %v392_v21  ;;  %1865 = vst.msk [vmem:[#allocation4 + $0xa0] sm:$0xff] %vm1453_vm4, %v16542_v12  ;;  %1866 = vst.msk [vmem:[#allocation4 + $0xa8] sm:$0xff] %vm1453_vm4, %v16542_v12  ;;  %v453_v21 = vld [vmem:[%s16682_s25 + $0x218] sm:$0xff]  ;;  %14374 = vmatpush3.msk.msra.mxu0 %vm2117_vm5, %v2923_v20 }
  0x37   : > { %1867 = vst.msk [vmem:[#allocation4 + $0xb0] sm:$0xff] %vm1453_vm4, %v16542_v12  ;;  %1868 = vst.msk [vmem:[#allocation4 + $0xb8] sm:$0xff] %vm1453_vm4, %v16542_v12  ;;  %14219 = vmatprep.subr.mxu1 %v16542_v12  ;;  %14527 = vmatprep.subr.mxu0 %v16542_v12 }
  0x38   : > { %1869 = vst.msk [vmem:[#allocation4 + $0xc0] sm:$0xff] %vm1453_vm4, %v16542_v12  ;;  %1870 = vst.msk [vmem:[#allocation4 + $0xc8] sm:$0xff] %vm1453_vm4, %v16542_v12 }
  0x39   : > { %14005 = vmatmul.mubr.msk.f32.gmra.mrb[6].mxu0 %vm501_vm0, %v393_v22  ;;  %1871 = vst.msk [vmem:[#allocation4 + $0xd0] sm:$0xff] %vm1453_vm4, %v16542_v12  ;;  %1872 = vst.msk [vmem:[#allocation4 + $0xd8] sm:$0xff] %vm1453_vm4, %v16542_v12  ;;  %v454_v22 = vld [vmem:[%s16682_s25 + $0x220] sm:$0xff] }
  0x3a   : > { %14007 = vmatprep.mubr.msk.f32.mxu0 %vm501_vm0, %v394_v23  ;;  %1873 = vst.msk [vmem:[#allocation4 + $0xe0] sm:$0xff] %vm1453_vm4, %v16542_v12  ;;  %1874 = vst.msk [vmem:[#allocation4 + $0xe8] sm:$0xff] %vm1453_vm4, %v16542_v12  ;;  %v455_v23 = vld [vmem:[%s16682_s25 + $0x228] sm:$0xff] }
  0x3b   : > { %1875 = vst.msk [vmem:[#allocation4 + $0xf0] sm:$0xff] %vm1453_vm4, %v16542_v12  ;;  %1876 = vst.msk [vmem:[#allocation4 + $0xf8] sm:$0xff] %vm1453_vm4, %v16542_v12 }
  0x3d   : > { %14008 = vmatmul.mubr.msk.f32.gmra.mrb[8].mxu0 %vm501_vm0, %v395_v24  ;;  %v456_v24 = vld [vmem:[%s16682_s25 + $0x230] sm:$0xff] }
  0x3e   : > { %14010 = vmatprep.mubr.msk.f32.mxu0 %vm501_vm0, %v396_v25  ;;  %v457_v25 = vld [vmem:[%s16682_s25 + $0x238] sm:$0xff] }
  0x41   : > { %14011 = vmatmul.mubr.msk.f32.gmra.mrb[10].mxu0 %vm501_vm0, %v397_v26  ;;  %v458_v26 = vld [vmem:[%s16682_s25 + $0x240] sm:$0xff] }
  0x42   : > { %14013 = vmatprep.mubr.msk.f32.mxu0 %vm501_vm0, %v398_v27  ;;  %v459_v27 = vld [vmem:[%s16682_s25 + $0x248] sm:$0xff] }
  0x45   : > { %14014 = vmatmul.mubr.msk.f32.gmra.mrb[12].mxu0 %vm501_vm0, %v399_v28  ;;  %v460_v28 = vld [vmem:[%s16682_s25 + $0x250] sm:$0xff] }
  0x46   : > { %14016 = vmatprep.mubr.msk.f32.mxu0 %vm501_vm0, %v400_v29  ;;  %v461_v29 = vld [vmem:[%s16682_s25 + $0x258] sm:$0xff] }
  0x49   : > { %14017 = vmatmul.mubr.msk.f32.gmra.mrb[14].mxu0 %vm501_vm0, %v401_v30  ;;  %v462_v30 = vld [vmem:[%s16682_s25 + $0x260] sm:$0xff] }
  0x4a   : > { %14019 = vmatprep.mubr.msk.f32.mxu0 %vm501_vm0, %v402_v31  ;;  %v463_v31 = vld [vmem:[%s16682_s25 + $0x268] sm:$0xff] }
  0x4d   : > { %14020 = vmatmul.mubr.msk.f32.gmra.mrb[16].mxu0 %vm501_vm0, %v403_v32  ;;  %v464_v32 = vld [vmem:[%s16682_s25 + $0x270] sm:$0xff] }
  0x4e   : > { %14022 = vmatprep.mubr.msk.f32.mxu0 %vm501_vm0, %v404_v33  ;;  %v465_v33 = vld [vmem:[%s16682_s25 + $0x278] sm:$0xff] }
  0x51   : > { %14023 = vmatmul.mubr.msk.f32.gmra.mrb[18].mxu0 %vm501_vm0, %v405_v34  ;;  %v466_v34 = vld [vmem:[%s16682_s25 + $0x280] sm:$0xff] }
  0x52   : > { %14025 = vmatprep.mubr.msk.f32.mxu0 %vm501_vm0, %v406_v35  ;;  %v467_v35 = vld [vmem:[%s16682_s25 + $0x288] sm:$0xff] }
  0x55   : > { %14026 = vmatmul.mubr.msk.f32.gmra.mrb[20].mxu0 %vm501_vm0, %v407_v36  ;;  %v468_v36 = vld [vmem:[%s16682_s25 + $0x290] sm:$0xff] }
  0x56   : > { %14028 = vmatprep.mubr.msk.f32.mxu0 %vm501_vm0, %v408_v37  ;;  %v469_v37 = vld [vmem:[%s16682_s25 + $0x298] sm:$0xff] }
  0x59   : > { %14029 = vmatmul.mubr.msk.f32.gmra.mrb[22].mxu0 %vm501_vm0, %v409_v38  ;;  %v470_v38 = vld [vmem:[%s16682_s25 + $0x2a0] sm:$0xff] }
  0x5a   : > { %14031 = vmatprep.mubr.msk.f32.mxu0 %vm501_vm0, %v410_v39  ;;  %v471_v39 = vld [vmem:[%s16682_s25 + $0x2a8] sm:$0xff] }
  0x5d   : > { %14032 = vmatmul.mubr.msk.f32.gmra.mrb[24].mxu0 %vm501_vm0, %v411_v40  ;;  %v472_v40 = vld [vmem:[%s16682_s25 + $0x2b0] sm:$0xff] }
  0x5e   : > { %14034 = vmatprep.mubr.msk.f32.mxu0 %vm501_vm0, %v412_v41  ;;  %v473_v41 = vld [vmem:[%s16682_s25 + $0x2b8] sm:$0xff] }
  0x61   : > { %14035 = vmatmul.mubr.msk.f32.gmra.mrb[26].mxu0 %vm501_vm0, %v413_v42  ;;  %v474_v42 = vld [vmem:[%s16682_s25 + $0x2c0] sm:$0xff] }
  0x62   : > { %14037 = vmatprep.mubr.msk.f32.mxu0 %vm501_vm0, %v414_v43  ;;  %v475_v43 = vld [vmem:[%s16682_s25 + $0x2c8] sm:$0xff] }
  0x65   : > { %14038 = vmatmul.mubr.msk.f32.gmra.mrb[28].mxu0 %vm501_vm0, %v415_v44  ;;  %v476_v44 = vld [vmem:[%s16682_s25 + $0x2d0] sm:$0xff] }
  0x66   : > { %14040 = vmatprep.mubr.msk.f32.mxu0 %vm501_vm0, %v416_v45  ;;  %v477_v45 = vld [vmem:[%s16682_s25 + $0x2d8] sm:$0xff] }
  0x69   : > { %14041 = vmatmul.mubr.msk.f32.gmra.mrb[30].mxu0 %vm501_vm0, %v417_v46  ;;  %v478_v46 = vld [vmem:[%s16682_s25 + $0x2e0] sm:$0xff] }
  0x6a   : > { %14043 = vmatprep.mubr.msk.f32.mxu0 %vm501_vm0, %v418_v47  ;;  %v479_v47 = vld [vmem:[%s16682_s25 + $0x2e8] sm:$0xff] }
  0x6d   : > { %14044 = vmatmul.mubr.msk.f32.gmra.mrb[32].mxu0 %vm501_vm0, %v419_v48  ;;  %v480_v48 = vld [vmem:[%s16682_s25 + $0x2f0] sm:$0xff] }
  0x6e   : > { %14046 = vmatprep.mubr.msk.f32.mxu0 %vm501_vm0, %v420_v49  ;;  %v481_v49 = vld [vmem:[%s16682_s25 + $0x2f8] sm:$0xff] }
  0x71   : > { %14047 = vmatmul.mubr.msk.f32.gmra.mrb[34].mxu0 %vm501_vm0, %v421_v50  ;;  %v482_v50 = vld [vmem:[%s16682_s25 + $0x300] sm:$0xff] }
  0x72   : > { %14049 = vmatprep.mubr.msk.f32.mxu0 %vm501_vm0, %v422_v51  ;;  %v483_v51 = vld [vmem:[%s16682_s25 + $0x308] sm:$0xff]  ;;  %s13111_s25 = sshll.u32 %s16627_s21, 4  ;;  %s16545_s21 = smov [#allocation6]  }
  0x73   : > { %s21368_s13 = scalar_lea.hbm %s21421_s11, %s13111_s25  ;;  %s16481_s22 = sshll.u32 %s16545_s21, 4  ;;  %s16482_s22 = int_to_ptr.vmem [resolvable:$false] %s16481_s22 }
  0x74   : > { %s16483_s24 = scalar_lea.vmem %s16482_s22, 32  ;;  %p16484_p0 = scmp.lt.s32.totalorder %s21370_s30, %s16482_s22 }
  0x75   : > { %14050 = vmatmul.mubr.msk.f32.gmra.mrb[36].mxu0 %vm501_vm0, %v423_v52  ;;  %v16969_v52 = vld [vmem:[%s21412_s2] ss:$0 sm:$0xff]  ;;  %p16485_p1 = scmp.lt.s32.totalorder %s16483_s24, %s16477_s15 }
  0x76   : > { %14052 = vmatprep.mubr.msk.f32.mxu0 %vm501_vm0, %v424_v53 }
  0x77   : > { %p16486_p2 = por %p16485_p1, %p16484_p0 }
  0x79   : > { %14053 = vmatmul.mubr.msk.f32.gmra.mrb[38].mxu0 %vm501_vm0, %v425_v54  ;;  %p16487_p3 = pnand %p16486_p2, %p16480_p13 }
  0x7a   : > { %14055 = vmatprep.mubr.msk.f32.mxu0 %vm501_vm0, %v426_v55 }
  0x7d   : > { %14056 = vmatmul.mubr.msk.f32.gmra.mrb[40].mxu0 %vm501_vm0, %v427_v56 }
  0x7e   : > { %14058 = vmatprep.mubr.msk.f32.mxu0 %vm501_vm0, %v428_v57 }
  0x81   : > { %14059 = vmatmul.mubr.msk.f32.gmra.mrb[42].mxu0 %vm501_vm0, %v429_v58 }
  0x82   : > { %14061 = vmatprep.mubr.msk.f32.mxu0 %vm501_vm0, %v430_v59 }
  0x85   : > { %14062 = vmatmul.mubr.msk.f32.gmra.mrb[44].mxu0 %vm501_vm0, %v431_v60 }
  0x86   : > { %14064 = vmatprep.mubr.msk.f32.mxu0 %vm501_vm0, %v432_v61 }
  0x89   : > { %14065 = vmatmul.mubr.msk.f32.gmra.mrb[46].mxu0 %vm501_vm0, %v433_v62 }
  0x8a   : > { %14067 = vmatprep.mubr.msk.f32.mxu0 %vm501_vm0, %v434_v63 }
  0x8d   : > { %14068 = vmatmul.mubr.msk.f32.gmra.mrb[48].mxu0 %vm501_vm0, %v435_v0 }
  0x8e   : > { %14070 = vmatprep.mubr.msk.f32.mxu0 %vm501_vm0, %v436_v1 }
  0x91   : > { %14071 = vmatmul.mubr.msk.f32.gmra.mrb[50].mxu0 %vm501_vm0, %v437_v2 }
  0x92   : > { %14073 = vmatprep.mubr.msk.f32.mxu0 %vm501_vm0, %v438_v3 }
  0x95   : > { %14074 = vmatmul.mubr.msk.f32.gmra.mrb[52].mxu0 %vm501_vm0, %v439_v4 }
  0x96   : > { %14076 = vmatprep.mubr.msk.f32.mxu0 %vm501_vm0, %v440_v5 }
  0x99   : > { %14077 = vmatmul.mubr.msk.f32.gmra.mrb[54].mxu0 %vm501_vm0, %v441_v6 }
  0x9a   : > { %14079 = vmatprep.mubr.msk.f32.mxu0 %vm501_vm0, %v442_v7 }
  0x9d   : > { %14080 = vmatmul.mubr.msk.f32.gmra.mrb[56].mxu0 %vm501_vm0, %v443_v8 }
  0x9e   : > { %14082 = vmatprep.mubr.msk.f32.mxu0 %vm501_vm0, %v444_v9 }
  0xa1   : > { %14083 = vmatmul.mubr.msk.f32.gmra.mrb[58].mxu0 %vm501_vm0, %v445_v10 }
  0xa2   : > { %14085 = vmatprep.mubr.msk.f32.mxu0 %vm501_vm0, %v446_v11 }
  0xa5   : > { %14086 = vmatmul.mubr.msk.f32.gmra.mrb[60].mxu0 %vm501_vm0, %v447_v13 }
  0xa6   : > { %14088 = vmatprep.mubr.msk.f32.mxu0 %vm501_vm0, %v448_v14 }
  0xa9   : > { %14089 = vmatmul.mubr.msk.f32.gmra.mrb[62].mxu0 %vm501_vm0, %v449_v15 }
  0xaa   : > { %14091 = vmatprep.mubr.msk.f32.mxu0 %vm501_vm0, %v450_v16 }
  0xad   : > { %14092 = vmatmul.mubr.msk.f32.gmra.mrb[64].mxu0 %vm501_vm0, %v451_v17 }
  0xae   : > { %14094 = vmatprep.mubr.msk.f32.mxu0 %vm501_vm0, %v452_v18 }
  0xb1   : > { %14095 = vmatmul.mubr.msk.f32.gmra.mrb[66].mxu0 %vm501_vm0, %v453_v21 }
  0xb2   : > { %14097 = vmatprep.mubr.msk.f32.mxu0 %vm501_vm0, %v454_v22 }
  0xb5   : > { %14098 = vmatmul.mubr.msk.f32.gmra.mrb[68].mxu0 %vm501_vm0, %v455_v23 }
  0xb6   : > { %14100 = vmatprep.mubr.msk.f32.mxu0 %vm501_vm0, %v456_v24 }
  0xb9   : > { %14101 = vmatmul.mubr.msk.f32.gmra.mrb[70].mxu0 %vm501_vm0, %v457_v25 }
  0xba   : > { %14103 = vmatprep.mubr.msk.f32.mxu0 %vm501_vm0, %v458_v26 }
  0xbd   : > { %14104 = vmatmul.mubr.msk.f32.gmra.mrb[72].mxu0 %vm501_vm0, %v459_v27 }
  0xbe   : > { %14106 = vmatprep.mubr.msk.f32.mxu0 %vm501_vm0, %v460_v28 }
  0xc1   : > { %14107 = vmatmul.mubr.msk.f32.gmra.mrb[74].mxu0 %vm501_vm0, %v461_v29 }
  0xc2   : > { %14109 = vmatprep.mubr.msk.f32.mxu0 %vm501_vm0, %v462_v30 }
  0xc5   : > { %14110 = vmatmul.mubr.msk.f32.gmra.mrb[76].mxu0 %vm501_vm0, %v463_v31 }
  0xc6   : > { %14112 = vmatprep.mubr.msk.f32.mxu0 %vm501_vm0, %v464_v32 }
  0xc9   : > { %14113 = vmatmul.mubr.msk.f32.gmra.mrb[78].mxu0 %vm501_vm0, %v465_v33 }
  0xca   : > { %14115 = vmatprep.mubr.msk.f32.mxu0 %vm501_vm0, %v466_v34 }
  0xcd   : > { %14116 = vmatmul.mubr.msk.f32.gmra.mrb[80].mxu0 %vm501_vm0, %v467_v35 }
  0xce   : > { %14118 = vmatprep.mubr.msk.f32.mxu0 %vm501_vm0, %v468_v36 }
  0xd1   : > { %14119 = vmatmul.mubr.msk.f32.gmra.mrb[82].mxu0 %vm501_vm0, %v469_v37 }
  0xd2   : > { %14121 = vmatprep.mubr.msk.f32.mxu0 %vm501_vm0, %v470_v38 }
  0xd5   : > { %14122 = vmatmul.mubr.msk.f32.gmra.mrb[84].mxu0 %vm501_vm0, %v471_v39 }
  0xd6   : > { %14124 = vmatprep.mubr.msk.f32.mxu0 %vm501_vm0, %v472_v40 }
  0xd9   : > { %14125 = vmatmul.mubr.msk.f32.gmra.mrb[86].mxu0 %vm501_vm0, %v473_v41 }
  0xda   : > { %14127 = vmatprep.mubr.msk.f32.mxu0 %vm501_vm0, %v474_v42 }
  0xdd   : > { %14128 = vmatmul.mubr.msk.f32.gmra.mrb[88].mxu0 %vm501_vm0, %v475_v43 }
  0xde   : > { %14130 = vmatprep.mubr.msk.f32.mxu0 %vm501_vm0, %v476_v44 }
  0xe1   : > { %14131 = vmatmul.mubr.msk.f32.gmra.mrb[90].mxu0 %vm501_vm0, %v477_v45 }
  0xe2   : > { %14133 = vmatprep.mubr.msk.f32.mxu0 %vm501_vm0, %v478_v46 }
  0xe5   : > { %14134 = vmatmul.mubr.msk.f32.gmra.mrb[92].mxu0 %vm501_vm0, %v479_v47 }
  0xe6   : > { %14136 = vmatprep.mubr.msk.f32.mxu0 %vm501_vm0, %v480_v48 }
  0xe9   : > { %14137 = vmatmul.mubr.msk.f32.gmra.mrb[94].mxu0 %vm501_vm0, %v481_v49 }
  0xea   : > { %14139 = vmatprep.mubr.msk.f32.mxu0 %vm501_vm0, %v482_v50 }
  0xed   : > { %14140 = vmatmul.mubr.msk.f32.gmra.mrb[96].mxu0 %vm501_vm0, %v483_v51 }
  0xee   : > { %14375 = vmatprep.mubr.msk.f32.mxu0 %vm16543_vm6, %v16542_v12 }
 0x100   : > { %v13997_v53 = vpop.f32.mrb[0].mxu0 }
 0x101   : > { %v872_v54 = vadd.f32 %v13997_v53, %v16969_v52  ;;  %v866_v55 = vpop.f32.mrb[1].mxu0 }
 0x102   : > { %v867_v56 = vadd.f32 %v16969_v52, %v866_v55 }
 0x103   : > { %v1356_v57 = vmax.f32 %v872_v54, 0.0 }
 0x104   : > { %v1355_v58 = vmax.f32 %v867_v56, 0.0  ;;  %v14000_v59 = vpop.f32.mrb[2].mxu0 }
 0x105   : > { %1455 = vst.msk [vmem:[#allocation2 + $0x8] sm:$0xff] %vm1453_vm4, %v1356_v57  ;;  %v882_v60 = vadd.f32 %v14000_v59, %v16969_v52  ;;  %v876_v61 = vpop.f32.mrb[3].mxu0 }
 0x106   : > { %1454 = vst.msk [vmem:[#allocation2] sm:$0xff] %vm1453_vm4, %v1355_v58  ;;  %v877_v62 = vadd.f32 %v16969_v52, %v876_v61 }
 0x107   : > { %v1358_v63 = vmax.f32 %v882_v60, 0.0 }
 0x108   : > { %v1357_v0 = vmax.f32 %v877_v62, 0.0  ;;  %v14003_v1 = vpop.f32.mrb[4].mxu0 }
 0x109   : > { %1457 = vst.msk [vmem:[#allocation2 + $0x18] sm:$0xff] %vm1453_vm4, %v1358_v63  ;;  %v892_v2 = vadd.f32 %v14003_v1, %v16969_v52  ;;  %v886_v3 = vpop.f32.mrb[5].mxu0 }
 0x10a   : > { %1456 = vst.msk [vmem:[#allocation2 + $0x10] sm:$0xff] %vm1453_vm4, %v1357_v0  ;;  %v887_v4 = vadd.f32 %v16969_v52, %v886_v3 }
 0x10b   : > { %v1360_v5 = vmax.f32 %v892_v2, 0.0 }
 0x10c   : > { %v1359_v6 = vmax.f32 %v887_v4, 0.0  ;;  %v14006_v7 = vpop.f32.mrb[6].mxu0 }
 0x10d   : > { %v1552_v8 = vld [vmem:[#allocation2] ss:$2 sm:$0xff]  ;;  %v1650_v9 = vld [vmem:[#allocation2 + $0x1] ss:$2 sm:$0xff]  ;;  %1459 = vst.msk [vmem:[#allocation2 + $0x28] sm:$0xff] %vm1453_vm4, %v1360_v5  ;;  %v902_v10 = vadd.f32 %v14006_v7, %v16969_v52  ;;  %v896_v11 = vpop.f32.mrb[7].mxu0 }
 0x10e   : > { %v1747_v13 = vmax.f32 %v1552_v8, %v1650_v9  ;;  %1458 = vst.msk [vmem:[#allocation2 + $0x20] sm:$0xff] %vm1453_vm4, %v1359_v6  ;;  %v897_v14 = vadd.f32 %v16969_v52, %v896_v11 }
 0x10f   : > { %v1362_v15 = vmax.f32 %v902_v10, 0.0 }
 0x110   : > { %1796 = vst.msk [vmem:[#allocation3] sm:$0xff] %vm1453_vm4, %v1747_v13  ;;  %v1361_v16 = vmax.f32 %v897_v14, 0.0  ;;  %v14009_v17 = vpop.f32.mrb[8].mxu0 }
 0x111   : > { %v1554_v18 = vld [vmem:[#allocation2 + $0x10] ss:$2 sm:$0xff]  ;;  %v1652_v19 = vld [vmem:[#allocation2 + $0x11] ss:$2 sm:$0xff]  ;;  %1461 = vst.msk [vmem:[#allocation2 + $0x38] sm:$0xff] %vm1453_vm4, %v1362_v15  ;;  %v912_v20 = vadd.f32 %v14009_v17, %v16969_v52  ;;  %v906_v21 = vpop.f32.mrb[9].mxu0 }
 0x112   : > { %v1748_v22 = vmax.f32 %v1554_v18, %v1652_v19  ;;  %1460 = vst.msk [vmem:[#allocation2 + $0x30] sm:$0xff] %vm1453_vm4, %v1361_v16  ;;  %v907_v23 = vadd.f32 %v16969_v52, %v906_v21 }
 0x113   : > { %v1364_v24 = vmax.f32 %v912_v20, 0.0 }
 0x114   : > { %1797 = vst.msk [vmem:[#allocation3 + $0x8] sm:$0xff] %vm1453_vm4, %v1748_v22  ;;  %v1363_v25 = vmax.f32 %v907_v23, 0.0  ;;  %v14012_v26 = vpop.f32.mrb[10].mxu0 }
 0x115   : > { %v1556_v27 = vld [vmem:[#allocation2 + $0x20] ss:$2 sm:$0xff]  ;;  %v1654_v28 = vld [vmem:[#allocation2 + $0x21] ss:$2 sm:$0xff]  ;;  %1463 = vst.msk [vmem:[#allocation2 + $0x48] sm:$0xff] %vm1453_vm4, %v1364_v24  ;;  %v922_v29 = vadd.f32 %v14012_v26, %v16969_v52  ;;  %v916_v30 = vpop.f32.mrb[11].mxu0 }
 0x116   : > { %v1749_v31 = vmax.f32 %v1556_v27, %v1654_v28  ;;  %1462 = vst.msk [vmem:[#allocation2 + $0x40] sm:$0xff] %vm1453_vm4, %v1363_v25  ;;  %v917_v32 = vadd.f32 %v16969_v52, %v916_v30  ;;  %v2015_v25 = vld [vmem:[%s21413_s3] sm:$0x3f] }
 0x117   : > { %v1366_v33 = vmax.f32 %v922_v29, 0.0  ;;  %v1877_v53 = vld [vmem:[#allocation3] sm:$0xff] }
 0x118   : > { %1798 = vst.msk [vmem:[#allocation3 + $0x10] sm:$0xff] %vm1453_vm4, %v1749_v31  ;;  %v1365_v34 = vmax.f32 %v917_v32, 0.0  ;;  %v14015_v35 = vpop.f32.mrb[12].mxu0 }
 0x119   : > { %v1558_v36 = vld [vmem:[#allocation2 + $0x30] ss:$2 sm:$0xff]  ;;  %v1656_v37 = vld [vmem:[#allocation2 + $0x31] ss:$2 sm:$0xff]  ;;  %1465 = vst.msk [vmem:[#allocation2 + $0x58] sm:$0xff] %vm1453_vm4, %v1366_v33  ;;  %v932_v38 = vadd.f32 %v14015_v35, %v16969_v52  ;;  %v926_v39 = vpop.f32.mrb[13].mxu0 }
 0x11a   : > { %v1750_v40 = vmax.f32 %v1558_v36, %v1656_v37  ;;  %1464 = vst.msk [vmem:[#allocation2 + $0x50] sm:$0xff] %vm1453_vm4, %v1365_v34  ;;  %v927_v41 = vadd.f32 %v16969_v52, %v926_v39 }
 0x11b   : > { %v1368_v42 = vmax.f32 %v932_v38, 0.0  ;;  %v1878_v1 = vld [vmem:[#allocation3 + $0x8] sm:$0x3f] }
 0x11c   : > { %1799 = vst.msk [vmem:[#allocation3 + $0x18] sm:$0xff] %vm1453_vm4, %v1750_v40  ;;  %v1367_v43 = vmax.f32 %v927_v41, 0.0  ;;  %v14018_v44 = vpop.f32.mrb[14].mxu0 }
 0x11d   : > { %v1560_v45 = vld [vmem:[#allocation2 + $0x40] ss:$2 sm:$0xff]  ;;  %v1658_v46 = vld [vmem:[#allocation2 + $0x41] ss:$2 sm:$0xff]  ;;  %1467 = vst.msk [vmem:[#allocation2 + $0x68] sm:$0xff] %vm1453_vm4, %v1368_v42  ;;  %v942_v47 = vadd.f32 %v14018_v44, %v16969_v52  ;;  %v936_v48 = vpop.f32.mrb[15].mxu0 }
 0x11e   : > { %v1751_v49 = vmax.f32 %v1560_v45, %v1658_v46  ;;  %1466 = vst.msk [vmem:[#allocation2 + $0x60] sm:$0xff] %vm1453_vm4, %v1367_v43  ;;  %v937_v50 = vadd.f32 %v16969_v52, %v936_v48 }
 0x11f   : > { %v1370_v51 = vmax.f32 %v942_v47, 0.0  ;;  %v1879_v54 = vld [vmem:[#allocation3 + $0xe] sm:$0xff] }
 0x120   : > { %1800 = vst.msk [vmem:[#allocation3 + $0x20] sm:$0xff] %vm1453_vm4, %v1751_v49  ;;  %v1369_v55 = vmax.f32 %v937_v50, 0.0  ;;  %v14021_v56 = vpop.f32.mrb[16].mxu0  ;;  %v1881_v57 = vmax.f32 %v1877_v53, %v1879_v54 }
 0x121   : > { %v1562_v58 = vld [vmem:[#allocation2 + $0x50] ss:$2 sm:$0xff]  ;;  %v1660_v59 = vld [vmem:[#allocation2 + $0x51] ss:$2 sm:$0xff]  ;;  %1469 = vst.msk [vmem:[#allocation2 + $0x78] sm:$0xff] %vm1453_vm4, %v1370_v51  ;;  %v952_v60 = vadd.f32 %v14021_v56, %v16969_v52  ;;  %v946_v61 = vpop.f32.mrb[17].mxu0 }
 0x122   : > { %v1752_v62 = vmax.f32 %v1562_v58, %v1660_v59  ;;  %1468 = vst.msk [vmem:[#allocation2 + $0x70] sm:$0xff] %vm1453_vm4, %v1369_v55  ;;  %v947_v63 = vadd.f32 %v16969_v52, %v946_v61  ;;  %1883 = vst.msk [vmem:[#allocation4] sm:$0xff] %vm1453_vm4, %v1881_v57 }
 0x123   : > { %v1372_v0 = vmax.f32 %v952_v60, 0.0  ;;  %v1880_v2 = vld [vmem:[#allocation3 + $0x16] sm:$0x3f] }
 0x124   : > { %1801 = vst.msk [vmem:[#allocation3 + $0x28] sm:$0xff] %vm1453_vm4, %v1752_v62  ;;  %v1371_v3 = vmax.f32 %v947_v63, 0.0  ;;  %v14024_v4 = vpop.f32.mrb[18].mxu0  ;;  %v1882_v5 = vmax.f32 %v1878_v1, %v1880_v2 }
 0x125   : > { %v1564_v6 = vld [vmem:[#allocation2 + $0x60] ss:$2 sm:$0xff]  ;;  %v1662_v7 = vld [vmem:[#allocation2 + $0x61] ss:$2 sm:$0xff]  ;;  %1471 = vst.msk [vmem:[#allocation2 + $0x88] sm:$0xff] %vm1453_vm4, %v1372_v0  ;;  %v962_v8 = vadd.f32 %v14024_v4, %v16969_v52  ;;  %v956_v9 = vpop.f32.mrb[19].mxu0 }
 0x126   : > { %v1753_v10 = vmax.f32 %v1564_v6, %v1662_v7  ;;  %1470 = vst.msk [vmem:[#allocation2 + $0x80] sm:$0xff] %vm1453_vm4, %v1371_v3  ;;  %v957_v11 = vadd.f32 %v16969_v52, %v956_v9 }
 0x127   : > { %1885 = vst.msk [vmem:[#allocation4 + $0x8] sm:$0x3f] %vm1884_vm7, %v1882_v5  ;;  %v1374_v13 = vmax.f32 %v962_v8, 0.0  ;;  %v1886_v34 = vld [vmem:[#allocation3 + $0x1c] sm:$0xff] }
 0x128   : > { %1802 = vst.msk [vmem:[#allocation3 + $0x30] sm:$0xff] %vm1453_vm4, %v1753_v10  ;;  %v1373_v14 = vmax.f32 %v957_v11, 0.0  ;;  %v14027_v15 = vpop.f32.mrb[20].mxu0 }
 0x129   : > { %v1566_v16 = vld [vmem:[#allocation2 + $0x70] ss:$2 sm:$0xff]  ;;  %v1664_v17 = vld [vmem:[#allocation2 + $0x71] ss:$2 sm:$0xff]  ;;  %1473 = vst.msk [vmem:[#allocation2 + $0x98] sm:$0xff] %vm1453_vm4, %v1374_v13  ;;  %v972_v18 = vadd.f32 %v14027_v15, %v16969_v52  ;;  %v966_v19 = vpop.f32.mrb[21].mxu0 }
 0x12a   : > { %v1754_v20 = vmax.f32 %v1566_v16, %v1664_v17  ;;  %1472 = vst.msk [vmem:[#allocation2 + $0x90] sm:$0xff] %vm1453_vm4, %v1373_v14  ;;  %v967_v21 = vadd.f32 %v16969_v52, %v966_v19 }
 0x12b   : > { %v1376_v22 = vmax.f32 %v972_v18, 0.0  ;;  %v1887_v37 = vld [vmem:[#allocation3 + $0x24] sm:$0x3f] }
 0x12c   : > { %1803 = vst.msk [vmem:[#allocation3 + $0x38] sm:$0xff] %vm1453_vm4, %v1754_v20  ;;  %v1375_v23 = vmax.f32 %v967_v21, 0.0  ;;  %v14030_v24 = vpop.f32.mrb[22].mxu0 }
 0x12d   : > { %v1568_v26 = vld [vmem:[#allocation2 + $0x80] ss:$2 sm:$0xff]  ;;  %v1666_v27 = vld [vmem:[#allocation2 + $0x81] ss:$2 sm:$0xff]  ;;  %1475 = vst.msk [vmem:[#allocation2 + $0xa8] sm:$0xff] %vm1453_vm4, %v1376_v22  ;;  %v982_v28 = vadd.f32 %v14030_v24, %v16969_v52  ;;  %v976_v29 = vpop.f32.mrb[23].mxu0 }
 0x12e   : > { %v2016_v30 = vld [vmem:[#allocation4 + $0x1] sm:$0xff]  ;;  %v1755_v31 = vmax.f32 %v1568_v26, %v1666_v27  ;;  %1474 = vst.msk [vmem:[#allocation2 + $0xa0] sm:$0xff] %vm1453_vm4, %v1375_v23  ;;  %v977_v32 = vadd.f32 %v16969_v52, %v976_v29 }
 0x12f   : > { %14145 = vmatmul.mubr.msk.f32.vlgmr.msra.gmra.mrb[0].mxu1 %vm1453_vm4, %v2016_v30  ;;  %v2898_v33 = vld [vmem:[#allocation4 + $0x3] sm:$0xff]  ;;  %v1378_v35 = vmax.f32 %v982_v28, 0.0 }
 0x130   : > { %14376 = vmatmul.mubr.msk.f32.vlgmr.msra.gmra.mrb[98].mxu0 %vm1453_vm4, %v2898_v33  ;;  %14147 = vmatprep.mubr.msk.f32.mxu1 %vm16543_vm6, %v16542_v12  ;;  %v1888_v36 = vld [vmem:[#allocation3 + $0x2a] sm:$0xff]  ;;  %v1889_v38 = vld [vmem:[#allocation3 + $0x32] sm:$0x3f]  ;;  %1804 = vst.msk [vmem:[#allocation3 + $0x40] sm:$0xff] %vm1453_vm4, %v1755_v31  ;;  %v1377_v39 = vmax.f32 %v977_v32, 0.0  ;;  %v14033_v40 = vpop.f32.mrb[24].mxu0 }
 0x131   : > { %14378 = vmatprep.mubr.msk.f32.mxu0 %vm16543_vm6, %v16542_v12  ;;  %v1890_v41 = vmax.f32 %v1886_v34, %v1888_v36  ;;  %v1891_v42 = vmax.f32 %v1887_v37, %v1889_v38  ;;  %14220 = vmatpush3.msk.msra.mxu1 %vm2117_vm5, %v2015_v25  ;;  %v1570_v43 = vld [vmem:[#allocation2 + $0x90] ss:$2 sm:$0xff]  ;;  %v1668_v44 = vld [vmem:[#allocation2 + $0x91] ss:$2 sm:$0xff]  ;;  %1477 = vst.msk [vmem:[#allocation2 + $0xb8] sm:$0xff] %vm1453_vm4, %v1378_v35  ;;  %v986_v46 = vpop.f32.mrb[25].mxu0 }
 0x132   : > { %v992_v45 = vadd.f32 %v14033_v40, %v16969_v52  ;;  %14296 = vmatprep.subr.mxu1 %v16542_v12  ;;  %v1756_v47 = vmax.f32 %v1570_v43, %v1668_v44  ;;  %1476 = vst.msk [vmem:[#allocation2 + $0xb0] sm:$0xff] %vm1453_vm4, %v1377_v39  ;;  %v987_v48 = vadd.f32 %v16969_v52, %v986_v46 }
 0x133   : > { %1892 = vst.msk [vmem:[#allocation4 + $0xe] sm:$0xff] %vm1453_vm4, %v1890_v41  ;;  %v1894_v7 = vld [vmem:[#allocation3 + $0x38] sm:$0xff] }
 0x134   : > { %1893 = vst.msk [vmem:[#allocation4 + $0x16] sm:$0x3f] %vm1884_vm7, %v1891_v42  ;;  %v1380_v49 = vmax.f32 %v992_v45, 0.0  ;;  %v1379_v50 = vmax.f32 %v987_v48, 0.0  ;;  %v14036_v51 = vpop.f32.mrb[26].mxu0 }
 0x135   : > { %1805 = vst.msk [vmem:[#allocation3 + $0x48] sm:$0xff] %vm1453_vm4, %v1756_v47  ;;  %v1572_v53 = vld [vmem:[#allocation2 + $0xa0] ss:$2 sm:$0xff]  ;;  %v1670_v54 = vld [vmem:[#allocation2 + $0xa1] ss:$2 sm:$0xff]  ;;  %v1002_v55 = vadd.f32 %v14036_v51, %v16969_v52  ;;  %v996_v56 = vpop.f32.mrb[27].mxu0 }
 0x136   : > { %1479 = vst.msk [vmem:[#allocation2 + $0xc8] sm:$0xff] %vm1453_vm4, %v1380_v49  ;;  %v1757_v57 = vmax.f32 %v1572_v53, %v1670_v54  ;;  %1478 = vst.msk [vmem:[#allocation2 + $0xc0] sm:$0xff] %vm1453_vm4, %v1379_v50  ;;  %v997_v58 = vadd.f32 %v16969_v52, %v996_v56 }
 0x137   : > { %v1382_v59 = vmax.f32 %v1002_v55, 0.0  ;;  %v1895_v22 = vld [vmem:[#allocation3 + $0x40] sm:$0x3f] }
 0x138   : > { %1806 = vst.msk [vmem:[#allocation3 + $0x50] sm:$0xff] %vm1453_vm4, %v1757_v57  ;;  %v1381_v60 = vmax.f32 %v997_v58, 0.0  ;;  %v14039_v61 = vpop.f32.mrb[28].mxu0 }
 0x139   : > { %v1574_v62 = vld [vmem:[#allocation2 + $0xb0] ss:$2 sm:$0xff]  ;;  %v1672_v63 = vld [vmem:[#allocation2 + $0xb1] ss:$2 sm:$0xff]  ;;  %1481 = vst.msk [vmem:[#allocation2 + $0xd8] sm:$0xff] %vm1453_vm4, %v1382_v59  ;;  %v1012_v0 = vadd.f32 %v14039_v61, %v16969_v52  ;;  %v1006_v1 = vpop.f32.mrb[29].mxu0 }
 0x13a   : > { %v2017_v2 = vld [vmem:[#allocation4 + $0x9] sm:$0xff]  ;;  %v1758_v3 = vmax.f32 %v1574_v62, %v1672_v63  ;;  %1480 = vst.msk [vmem:[#allocation2 + $0xd0] sm:$0xff] %vm1453_vm4, %v1381_v60  ;;  %v1007_v4 = vadd.f32 %v16969_v52, %v1006_v1 }
 0x13b   : > { %14148 = vmatmul.mubr.msk.f32.gmra.mrb[2].mxu1 %vm1453_vm4, %v2017_v2  ;;  %v2899_v5 = vld [vmem:[#allocation4 + $0xb] sm:$0xff]  ;;  %v1384_v6 = vmax.f32 %v1012_v0, 0.0  ;;  %v2900_v20 = vld [vmem:[#allocation4 + $0x13] sm:$0xff] }
 0x13c   : > { %14379 = vmatmul.mubr.msk.f32.gmra.mrb[100].mxu0 %vm1453_vm4, %v2899_v5  ;;  %14150 = vmatprep.mubr.msk.f32.mxu1 %vm16543_vm6, %v16542_v12  ;;  %v1896_v8 = vld [vmem:[#allocation3 + $0x46] sm:$0xff]  ;;  %1807 = vst.msk [vmem:[#allocation3 + $0x58] sm:$0xff] %vm1453_vm4, %v1758_v3  ;;  %v1383_v9 = vmax.f32 %v1007_v4, 0.0  ;;  %v14042_v10 = vpop.f32.mrb[30].mxu0  ;;  %v2018_v17 = vld [vmem:[#allocation4 + $0x11] sm:$0xff] }
 0x13d   : > { %14381 = vmatprep.mubr.msk.f32.mxu0 %vm16543_vm6, %v16542_v12  ;;  %v1898_v11 = vmax.f32 %v1894_v7, %v1896_v8  ;;  %v1576_v13 = vld [vmem:[#allocation2 + $0xc0] ss:$2 sm:$0xff]  ;;  %v1674_v14 = vld [vmem:[#allocation2 + $0xc1] ss:$2 sm:$0xff]  ;;  %1483 = vst.msk [vmem:[#allocation2 + $0xe8] sm:$0xff] %vm1453_vm4, %v1384_v6  ;;  %v1022_v15 = vadd.f32 %v14042_v10, %v16969_v52  ;;  %v1016_v16 = vpop.f32.mrb[31].mxu0 }
 0x13e   : > { %v1759_v18 = vmax.f32 %v1576_v13, %v1674_v14  ;;  %1482 = vst.msk [vmem:[#allocation2 + $0xe0] sm:$0xff] %vm1453_vm4, %v1383_v9  ;;  %v1017_v19 = vadd.f32 %v16969_v52, %v1016_v16 }
 0x13f   : > { %14151 = vmatmul.mubr.msk.f32.gmra.mrb[4].mxu1 %vm1453_vm4, %v2018_v17  ;;  %1900 = vst.msk [vmem:[#allocation4 + $0x1c] sm:$0xff] %vm1453_vm4, %v1898_v11  ;;  %v1386_v21 = vmax.f32 %v1022_v15, 0.0  ;;  %v1897_v23 = vld [vmem:[#allocation3 + $0x4e] sm:$0x3f] }
 0x140   : > { %14382 = vmatmul.mubr.msk.f32.gmra.mrb[102].mxu0 %vm1453_vm4, %v2900_v20  ;;  %14153 = vmatprep.mubr.msk.f32.mxu1 %vm16543_vm6, %v16542_v12  ;;  %1808 = vst.msk [vmem:[#allocation3 + $0x60] sm:$0xff] %vm1453_vm4, %v1759_v18  ;;  %v1385_v24 = vmax.f32 %v1017_v19, 0.0  ;;  %v14045_v25 = vpop.f32.mrb[32].mxu0  ;;  %v1899_v26 = vmax.f32 %v1895_v22, %v1897_v23 }
 0x141   : > { %14384 = vmatprep.mubr.msk.f32.mxu0 %vm16543_vm6, %v16542_v12  ;;  %v1578_v27 = vld [vmem:[#allocation2 + $0xd0] ss:$2 sm:$0xff]  ;;  %v1676_v28 = vld [vmem:[#allocation2 + $0xd1] ss:$2 sm:$0xff]  ;;  %1485 = vst.msk [vmem:[#allocation2 + $0xf8] sm:$0xff] %vm1453_vm4, %v1386_v21  ;;  %v1032_v29 = vadd.f32 %v14045_v25, %v16969_v52  ;;  %v1026_v30 = vpop.f32.mrb[33].mxu0 }
 0x142   : > { %v1760_v31 = vmax.f32 %v1578_v27, %v1676_v28  ;;  %1484 = vst.msk [vmem:[#allocation2 + $0xf0] sm:$0xff] %vm1453_vm4, %v1385_v24  ;;  %v1027_v32 = vadd.f32 %v16969_v52, %v1026_v30 }
 0x143   : > { %1901 = vst.msk [vmem:[#allocation4 + $0x24] sm:$0x3f] %vm1884_vm7, %v1899_v26  ;;  %v1388_v33 = vmax.f32 %v1032_v29, 0.0  ;;  %v1902_v55 = vld [vmem:[#allocation3 + $0x54] sm:$0xff] }
 0x144   : > { %1809 = vst.msk [vmem:[#allocation3 + $0x68] sm:$0xff] %vm1453_vm4, %v1760_v31  ;;  %v1387_v34 = vmax.f32 %v1027_v32, 0.0  ;;  %v14048_v35 = vpop.f32.mrb[34].mxu0 }
 0x145   : > { %v1580_v36 = vld [vmem:[#allocation2 + $0xe0] ss:$2 sm:$0xff]  ;;  %v1678_v37 = vld [vmem:[#allocation2 + $0xe1] ss:$2 sm:$0xff]  ;;  %1487 = vst.msk [vmem:[#allocation2 + $0x108] sm:$0xff] %vm1453_vm4, %v1388_v33  ;;  %v1042_v38 = vadd.f32 %v14048_v35, %v16969_v52  ;;  %v1036_v39 = vpop.f32.mrb[35].mxu0 }
 0x146   : > { %v2019_v40 = vld [vmem:[#allocation4 + $0x19] sm:$0xff]  ;;  %v1761_v41 = vmax.f32 %v1580_v36, %v1678_v37  ;;  %1486 = vst.msk [vmem:[#allocation2 + $0x100] sm:$0xff] %vm1453_vm4, %v1387_v34  ;;  %v1037_v42 = vadd.f32 %v16969_v52, %v1036_v39 }
 0x147   : > { %14154 = vmatmul.mubr.msk.f32.gmra.mrb[6].mxu1 %vm1453_vm4, %v2019_v40  ;;  %v2901_v43 = vld [vmem:[#allocation4 + $0x1b] sm:$0xff]  ;;  %v1390_v44 = vmax.f32 %v1042_v38, 0.0  ;;  %v1903_v58 = vld [vmem:[#allocation3 + $0x5c] sm:$0x3f] }
 0x148   : > { %14385 = vmatmul.mubr.msk.f32.gmra.mrb[104].mxu0 %vm1453_vm4, %v2901_v43  ;;  %14156 = vmatprep.mubr.msk.f32.mxu1 %vm16543_vm6, %v16542_v12  ;;  %1810 = vst.msk [vmem:[#allocation3 + $0x70] sm:$0xff] %vm1453_vm4, %v1761_v41  ;;  %v1389_v45 = vmax.f32 %v1037_v42, 0.0  ;;  %v14051_v46 = vpop.f32.mrb[36].mxu0 }
 0x149   : > { %14387 = vmatprep.mubr.msk.f32.mxu0 %vm16543_vm6, %v16542_v12  ;;  %v1582_v47 = vld [vmem:[#allocation2 + $0xf0] ss:$2 sm:$0xff]  ;;  %v1680_v48 = vld [vmem:[#allocation2 + $0xf1] ss:$2 sm:$0xff]  ;;  %1489 = vst.msk [vmem:[#allocation2 + $0x118] sm:$0xff] %vm1453_vm4, %v1390_v44  ;;  %v1052_v49 = vadd.f32 %v14051_v46, %v16969_v52  ;;  %v1046_v50 = vpop.f32.mrb[37].mxu0 }
 0x14a   : > { %v2020_v51 = vld [vmem:[#allocation4 + $0x21] sm:$0xff]  ;;  %v1762_v53 = vmax.f32 %v1582_v47, %v1680_v48  ;;  %1488 = vst.msk [vmem:[#allocation2 + $0x110] sm:$0xff] %vm1453_vm4, %v1389_v45  ;;  %v1047_v54 = vadd.f32 %v16969_v52, %v1046_v50 }
 0x14b   : > { %14157 = vmatmul.mubr.msk.f32.gmra.mrb[8].mxu1 %vm1453_vm4, %v2020_v51  ;;  %v1392_v56 = vmax.f32 %v1052_v49, 0.0  ;;  %v1904_v57 = vld [vmem:[#allocation3 + $0x62] sm:$0xff]  ;;  %v1905_v59 = vld [vmem:[#allocation3 + $0x6a] sm:$0x3f] }
 0x14c   : > { %14159 = vmatprep.mubr.msk.f32.mxu1 %vm16543_vm6, %v16542_v12  ;;  %1811 = vst.msk [vmem:[#allocation3 + $0x78] sm:$0xff] %vm1453_vm4, %v1762_v53  ;;  %v1391_v60 = vmax.f32 %v1047_v54, 0.0  ;;  %v14054_v61 = vpop.f32.mrb[38].mxu0  ;;  %v1906_v62 = vmax.f32 %v1902_v55, %v1904_v57  ;;  %v1907_v63 = vmax.f32 %v1903_v58, %v1905_v59 }
 0x14d   : > { %v1584_v0 = vld [vmem:[#allocation2 + $0x100] ss:$2 sm:$0xff]  ;;  %v1682_v1 = vld [vmem:[#allocation2 + $0x101] ss:$2 sm:$0xff]  ;;  %1491 = vst.msk [vmem:[#allocation2 + $0x128] sm:$0xff] %vm1453_vm4, %v1392_v56  ;;  %v1062_v2 = vadd.f32 %v14054_v61, %v16969_v52  ;;  %v1056_v3 = vpop.f32.mrb[39].mxu0 }
 0x14e   : > { %v1763_v4 = vmax.f32 %v1584_v0, %v1682_v1  ;;  %1490 = vst.msk [vmem:[#allocation2 + $0x120] sm:$0xff] %vm1453_vm4, %v1391_v60  ;;  %v1057_v5 = vadd.f32 %v16969_v52, %v1056_v3  ;;  %1908 = vst.msk [vmem:[#allocation4 + $0x2a] sm:$0xff] %vm1453_vm4, %v1906_v62 }
 0x14f   : > { %1909 = vst.msk [vmem:[#allocation4 + $0x32] sm:$0x3f] %vm1884_vm7, %v1907_v63  ;;  %v1394_v6 = vmax.f32 %v1062_v2, 0.0  ;;  %v1910_v28 = vld [vmem:[#allocation3 + $0x70] sm:$0xff] }
 0x150   : > { %1812 = vst.msk [vmem:[#allocation3 + $0x80] sm:$0xff] %vm1453_vm4, %v1763_v4  ;;  %v1393_v7 = vmax.f32 %v1057_v5, 0.0  ;;  %v14057_v8 = vpop.f32.mrb[40].mxu0 }
 0x151   : > { %v1586_v9 = vld [vmem:[#allocation2 + $0x110] ss:$2 sm:$0xff]  ;;  %v1684_v10 = vld [vmem:[#allocation2 + $0x111] ss:$2 sm:$0xff]  ;;  %1493 = vst.msk [vmem:[#allocation2 + $0x138] sm:$0xff] %vm1453_vm4, %v1394_v6  ;;  %v1072_v11 = vadd.f32 %v14057_v8, %v16969_v52  ;;  %v1066_v13 = vpop.f32.mrb[41].mxu0 }
 0x152   : > { %v1764_v14 = vmax.f32 %v1586_v9, %v1684_v10  ;;  %1492 = vst.msk [vmem:[#allocation2 + $0x130] sm:$0xff] %vm1453_vm4, %v1393_v7  ;;  %v1067_v15 = vadd.f32 %v16969_v52, %v1066_v13 }
 0x153   : > { %v1396_v16 = vmax.f32 %v1072_v11, 0.0  ;;  %v1911_v41 = vld [vmem:[#allocation3 + $0x78] sm:$0x3f] }
 0x154   : > { %1813 = vst.msk [vmem:[#allocation3 + $0x88] sm:$0xff] %vm1453_vm4, %v1764_v14  ;;  %v1395_v17 = vmax.f32 %v1067_v15, 0.0  ;;  %v14060_v18 = vpop.f32.mrb[42].mxu0 }
 0x155   : > { %v1588_v19 = vld [vmem:[#allocation2 + $0x120] ss:$2 sm:$0xff]  ;;  %v1686_v20 = vld [vmem:[#allocation2 + $0x121] ss:$2 sm:$0xff]  ;;  %1495 = vst.msk [vmem:[#allocation2 + $0x148] sm:$0xff] %vm1453_vm4, %v1396_v16  ;;  %v1082_v21 = vadd.f32 %v14060_v18, %v16969_v52  ;;  %v1076_v22 = vpop.f32.mrb[43].mxu0 }
 0x156   : > { %v2021_v23 = vld [vmem:[#allocation4 + $0x29] sm:$0xff]  ;;  %v1765_v24 = vmax.f32 %v1588_v19, %v1686_v20  ;;  %1494 = vst.msk [vmem:[#allocation2 + $0x140] sm:$0xff] %vm1453_vm4, %v1395_v17  ;;  %v1077_v25 = vadd.f32 %v16969_v52, %v1076_v22 }
 0x157   : > { %14160 = vmatmul.mubr.msk.f32.gmra.mrb[10].mxu1 %vm1453_vm4, %v2021_v23  ;;  %v2902_v26 = vld [vmem:[#allocation4 + $0x23] sm:$0xff]  ;;  %v1398_v27 = vmax.f32 %v1082_v21, 0.0  ;;  %v1912_v29 = vld [vmem:[#allocation3 + $0x7e] sm:$0xff]  ;;  %v2903_v39 = vld [vmem:[#allocation4 + $0x2b] sm:$0xff] }
 0x158   : > { %14388 = vmatmul.mubr.msk.f32.gmra.mrb[106].mxu0 %vm1453_vm4, %v2902_v26  ;;  %14162 = vmatprep.mubr.msk.f32.mxu1 %vm16543_vm6, %v16542_v12  ;;  %1814 = vst.msk [vmem:[#allocation3 + $0x90] sm:$0xff] %vm1453_vm4, %v1765_v24  ;;  %v1397_v30 = vmax.f32 %v1077_v25, 0.0  ;;  %v14063_v31 = vpop.f32.mrb[44].mxu0  ;;  %v1914_v32 = vmax.f32 %v1910_v28, %v1912_v29  ;;  %v3561_v28 = vld [vmem:[%s21413_s3 + $0x1e] sm:$0x3f] }
 0x159   : > { %14390 = vmatprep.mubr.msk.f32.mxu0 %vm16543_vm6, %v16542_v12  ;;  %v1590_v33 = vld [vmem:[#allocation2 + $0x130] ss:$2 sm:$0xff]  ;;  %v1688_v34 = vld [vmem:[#allocation2 + $0x131] ss:$2 sm:$0xff]  ;;  %1497 = vst.msk [vmem:[#allocation2 + $0x158] sm:$0xff] %vm1453_vm4, %v1398_v27  ;;  %v1092_v35 = vadd.f32 %v14063_v31, %v16969_v52  ;;  %v1086_v36 = vpop.f32.mrb[45].mxu0  ;;  %14528 = vmatpush3.msk.msra.mxu0 %vm2117_vm5, %v3561_v28 }
 0x15a   : > { %v1766_v37 = vmax.f32 %v1590_v33, %v1688_v34  ;;  %1496 = vst.msk [vmem:[#allocation2 + $0x150] sm:$0xff] %vm1453_vm4, %v1397_v30  ;;  %v1087_v38 = vadd.f32 %v16969_v52, %v1086_v36  ;;  %1916 = vst.msk [vmem:[#allocation4 + $0x38] sm:$0xff] %vm1453_vm4, %v1914_v32  ;;  %14681 = vmatprep.subr.mxu0 %v16542_v12 }
 0x15b   : > { %v1400_v40 = vmax.f32 %v1092_v35, 0.0  ;;  %v1913_v42 = vld [vmem:[#allocation3 + $0x86] sm:$0x3f] }
 0x15c   : > { %14391 = vmatmul.mubr.msk.f32.gmra.mrb[108].mxu0 %vm1453_vm4, %v2903_v39  ;;  %1815 = vst.msk [vmem:[#allocation3 + $0x98] sm:$0xff] %vm1453_vm4, %v1766_v37  ;;  %v1399_v43 = vmax.f32 %v1087_v38, 0.0  ;;  %v14066_v44 = vpop.f32.mrb[46].mxu0  ;;  %v1915_v45 = vmax.f32 %v1911_v41, %v1913_v42 }
 0x15d   : > { %14393 = vmatprep.mubr.msk.f32.mxu0 %vm16543_vm6, %v16542_v12  ;;  %v1592_v46 = vld [vmem:[#allocation2 + $0x140] ss:$2 sm:$0xff]  ;;  %v1690_v47 = vld [vmem:[#allocation2 + $0x141] ss:$2 sm:$0xff]  ;;  %1499 = vst.msk [vmem:[#allocation2 + $0x168] sm:$0xff] %vm1453_vm4, %v1400_v40  ;;  %v1102_v48 = vadd.f32 %v14066_v44, %v16969_v52  ;;  %v1096_v49 = vpop.f32.mrb[47].mxu0 }
 0x15e   : > { %v1767_v50 = vmax.f32 %v1592_v46, %v1690_v47  ;;  %1498 = vst.msk [vmem:[#allocation2 + $0x160] sm:$0xff] %vm1453_vm4, %v1399_v43  ;;  %v1097_v51 = vadd.f32 %v16969_v52, %v1096_v49 }
 0x15f   : > { %1917 = vst.msk [vmem:[#allocation4 + $0x40] sm:$0x3f] %vm1884_vm7, %v1915_v45  ;;  %v1402_v53 = vmax.f32 %v1102_v48, 0.0  ;;  %v1918_v11 = vld [vmem:[#allocation3 + $0x8c] sm:$0xff] }
 0x160   : > { %1816 = vst.msk [vmem:[#allocation3 + $0xa0] sm:$0xff] %vm1453_vm4, %v1767_v50  ;;  %v1401_v54 = vmax.f32 %v1097_v51, 0.0  ;;  %v14069_v55 = vpop.f32.mrb[48].mxu0 }
 0x161   : > { %v1594_v56 = vld [vmem:[#allocation2 + $0x150] ss:$2 sm:$0xff]  ;;  %v1692_v57 = vld [vmem:[#allocation2 + $0x151] ss:$2 sm:$0xff]  ;;  %1501 = vst.msk [vmem:[#allocation2 + $0x178] sm:$0xff] %vm1453_vm4, %v1402_v53  ;;  %v1112_v58 = vadd.f32 %v14069_v55, %v16969_v52  ;;  %v1106_v59 = vpop.f32.mrb[49].mxu0 }
 0x162   : > { %v2022_v60 = vld [vmem:[#allocation4 + $0x31] sm:$0xff]  ;;  %v1768_v61 = vmax.f32 %v1594_v56, %v1692_v57  ;;  %1500 = vst.msk [vmem:[#allocation2 + $0x170] sm:$0xff] %vm1453_vm4, %v1401_v54  ;;  %v1107_v62 = vadd.f32 %v16969_v52, %v1106_v59 }
 0x163   : > { %14163 = vmatmul.mubr.msk.f32.gmra.mrb[12].mxu1 %vm1453_vm4, %v2022_v60  ;;  %v2904_v63 = vld [vmem:[#allocation4 + $0x33] sm:$0xff]  ;;  %v1404_v0 = vmax.f32 %v1112_v58, 0.0  ;;  %v1919_v15 = vld [vmem:[#allocation3 + $0x94] sm:$0x3f] }
 0x164   : > { %14394 = vmatmul.mubr.msk.f32.gmra.mrb[110].mxu0 %vm1453_vm4, %v2904_v63  ;;  %14165 = vmatprep.mubr.msk.f32.mxu1 %vm16543_vm6, %v16542_v12  ;;  %1817 = vst.msk [vmem:[#allocation3 + $0xa8] sm:$0xff] %vm1453_vm4, %v1768_v61  ;;  %v1403_v1 = vmax.f32 %v1107_v62, 0.0  ;;  %v14072_v2 = vpop.f32.mrb[50].mxu0 }
 0x165   : > { %14396 = vmatprep.mubr.msk.f32.mxu0 %vm16543_vm6, %v16542_v12  ;;  %v1596_v3 = vld [vmem:[#allocation2 + $0x160] ss:$2 sm:$0xff]  ;;  %v1694_v4 = vld [vmem:[#allocation2 + $0x161] ss:$2 sm:$0xff]  ;;  %1503 = vst.msk [vmem:[#allocation2 + $0x188] sm:$0xff] %vm1453_vm4, %v1404_v0  ;;  %v1122_v5 = vadd.f32 %v14072_v2, %v16969_v52  ;;  %v1116_v6 = vpop.f32.mrb[51].mxu0 }
 0x166   : > { %v2023_v7 = vld [vmem:[#allocation4 + $0x39] sm:$0xff]  ;;  %v1769_v8 = vmax.f32 %v1596_v3, %v1694_v4  ;;  %1502 = vst.msk [vmem:[#allocation2 + $0x180] sm:$0xff] %vm1453_vm4, %v1403_v1  ;;  %v1117_v9 = vadd.f32 %v16969_v52, %v1116_v6 }
 0x167   : > { %14166 = vmatmul.mubr.msk.f32.gmra.mrb[14].mxu1 %vm1453_vm4, %v2023_v7  ;;  %v2905_v10 = vld [vmem:[#allocation4 + $0x3b] sm:$0xff]  ;;  %v1406_v13 = vmax.f32 %v1122_v5, 0.0  ;;  %v1920_v14 = vld [vmem:[#allocation3 + $0x9a] sm:$0xff] }
 0x168   : > { %14397 = vmatmul.mubr.msk.f32.gmra.mrb[112].mxu0 %vm1453_vm4, %v2905_v10  ;;  %14168 = vmatprep.mubr.msk.f32.mxu1 %vm16543_vm6, %v16542_v12  ;;  %v1921_v16 = vld [vmem:[#allocation3 + $0xa2] sm:$0x3f]  ;;  %1818 = vst.msk [vmem:[#allocation3 + $0xb0] sm:$0xff] %vm1453_vm4, %v1769_v8  ;;  %v1405_v17 = vmax.f32 %v1117_v9, 0.0  ;;  %v14075_v18 = vpop.f32.mrb[52].mxu0  ;;  %v1922_v19 = vmax.f32 %v1918_v11, %v1920_v14 }
 0x169   : > { %14399 = vmatprep.mubr.msk.f32.mxu0 %vm16543_vm6, %v16542_v12  ;;  %v1923_v20 = vmax.f32 %v1919_v15, %v1921_v16  ;;  %v1598_v21 = vld [vmem:[#allocation2 + $0x170] ss:$2 sm:$0xff]  ;;  %v1696_v22 = vld [vmem:[#allocation2 + $0x171] ss:$2 sm:$0xff]  ;;  %1505 = vst.msk [vmem:[#allocation2 + $0x198] sm:$0xff] %vm1453_vm4, %v1406_v13  ;;  %v1132_v23 = vadd.f32 %v14075_v18, %v16969_v52  ;;  %v1126_v24 = vpop.f32.mrb[53].mxu0 }
 0x16a   : > { %v1770_v25 = vmax.f32 %v1598_v21, %v1696_v22  ;;  %1504 = vst.msk [vmem:[#allocation2 + $0x190] sm:$0xff] %vm1453_vm4, %v1405_v17  ;;  %v1127_v26 = vadd.f32 %v16969_v52, %v1126_v24  ;;  %1924 = vst.msk [vmem:[#allocation4 + $0x46] sm:$0xff] %vm1453_vm4, %v1922_v19 }
 0x16b   : > { %1925 = vst.msk [vmem:[#allocation4 + $0x4e] sm:$0x3f] %vm1884_vm7, %v1923_v20  ;;  %v1408_v27 = vmax.f32 %v1132_v23, 0.0  ;;  %v1926_v49 = vld [vmem:[#allocation3 + $0xa8] sm:$0xff] }
 0x16c   : > { %1819 = vst.msk [vmem:[#allocation3 + $0xb8] sm:$0xff] %vm1453_vm4, %v1770_v25  ;;  %v1407_v29 = vmax.f32 %v1127_v26, 0.0  ;;  %v14078_v30 = vpop.f32.mrb[54].mxu0 }
 0x16d   : > { %v1600_v31 = vld [vmem:[#allocation2 + $0x180] ss:$2 sm:$0xff]  ;;  %v1698_v32 = vld [vmem:[#allocation2 + $0x181] ss:$2 sm:$0xff]  ;;  %1507 = vst.msk [vmem:[#allocation2 + $0x1a8] sm:$0xff] %vm1453_vm4, %v1408_v27  ;;  %v1142_v33 = vadd.f32 %v14078_v30, %v16969_v52  ;;  %v1136_v34 = vpop.f32.mrb[55].mxu0 }
 0x16e   : > { %v1771_v35 = vmax.f32 %v1600_v31, %v1698_v32  ;;  %1506 = vst.msk [vmem:[#allocation2 + $0x1a0] sm:$0xff] %vm1453_vm4, %v1407_v29  ;;  %v1137_v36 = vadd.f32 %v16969_v52, %v1136_v34 }
 0x16f   : > { %v1410_v37 = vmax.f32 %v1142_v33, 0.0  ;;  %v1927_v0 = vld [vmem:[#allocation3 + $0xb0] sm:$0x3f] }
 0x170   : > { %1820 = vst.msk [vmem:[#allocation3 + $0xc0] sm:$0xff] %vm1453_vm4, %v1771_v35  ;;  %v1409_v38 = vmax.f32 %v1137_v36, 0.0  ;;  %v14081_v39 = vpop.f32.mrb[56].mxu0 }
 0x171   : > { %v1602_v40 = vld [vmem:[#allocation2 + $0x190] ss:$2 sm:$0xff]  ;;  %v1700_v41 = vld [vmem:[#allocation2 + $0x191] ss:$2 sm:$0xff]  ;;  %1509 = vst.msk [vmem:[#allocation2 + $0x1b8] sm:$0xff] %vm1453_vm4, %v1410_v37  ;;  %v1152_v42 = vadd.f32 %v14081_v39, %v16969_v52  ;;  %v1146_v43 = vpop.f32.mrb[57].mxu0 }
 0x172   : > { %v2024_v44 = vld [vmem:[#allocation4 + $0x41] sm:$0xff]  ;;  %v1772_v45 = vmax.f32 %v1602_v40, %v1700_v41  ;;  %1508 = vst.msk [vmem:[#allocation2 + $0x1b0] sm:$0xff] %vm1453_vm4, %v1409_v38  ;;  %v1147_v46 = vadd.f32 %v16969_v52, %v1146_v43  ;;  %v2025_v59 = vld [vmem:[#allocation4 + $0x49] sm:$0xff] }
 0x173   : > { %14169 = vmatmul.mubr.msk.f32.gmra.mrb[16].mxu1 %vm1453_vm4, %v2024_v44  ;;  %v2906_v47 = vld [vmem:[#allocation4 + $0x43] sm:$0xff]  ;;  %v1412_v48 = vmax.f32 %v1152_v42, 0.0  ;;  %v1928_v50 = vld [vmem:[#allocation3 + $0xb6] sm:$0xff] }
 0x174   : > { %14400 = vmatmul.mubr.msk.f32.gmra.mrb[114].mxu0 %vm1453_vm4, %v2906_v47  ;;  %14171 = vmatprep.mubr.msk.f32.mxu1 %vm16543_vm6, %v16542_v12  ;;  %1821 = vst.msk [vmem:[#allocation3 + $0xc8] sm:$0xff] %vm1453_vm4, %v1772_v45  ;;  %v1411_v51 = vmax.f32 %v1147_v46, 0.0  ;;  %v14084_v53 = vpop.f32.mrb[58].mxu0  ;;  %v1930_v54 = vmax.f32 %v1926_v49, %v1928_v50  ;;  %v2907_v62 = vld [vmem:[#allocation4 + $0x4b] sm:$0xff] }
 0x175   : > { %14402 = vmatprep.mubr.msk.f32.mxu0 %vm16543_vm6, %v16542_v12  ;;  %v1604_v55 = vld [vmem:[#allocation2 + $0x1a0] ss:$2 sm:$0xff]  ;;  %v1702_v56 = vld [vmem:[#allocation2 + $0x1a1] ss:$2 sm:$0xff]  ;;  %1511 = vst.msk [vmem:[#allocation2 + $0x1c8] sm:$0xff] %vm1453_vm4, %v1412_v48  ;;  %v1162_v57 = vadd.f32 %v14084_v53, %v16969_v52  ;;  %v1156_v58 = vpop.f32.mrb[59].mxu0 }
 0x176   : > { %v1773_v60 = vmax.f32 %v1604_v55, %v1702_v56  ;;  %1510 = vst.msk [vmem:[#allocation2 + $0x1c0] sm:$0xff] %vm1453_vm4, %v1411_v51  ;;  %v1157_v61 = vadd.f32 %v16969_v52, %v1156_v58  ;;  %1932 = vst.msk [vmem:[#allocation4 + $0x54] sm:$0xff] %vm1453_vm4, %v1930_v54 }
 0x177   : > { %14172 = vmatmul.mubr.msk.f32.gmra.mrb[18].mxu1 %vm1453_vm4, %v2025_v59  ;;  %v1414_v63 = vmax.f32 %v1162_v57, 0.0  ;;  %v1929_v1 = vld [vmem:[#allocation3 + $0xbe] sm:$0x3f] }
 0x178   : > { %14403 = vmatmul.mubr.msk.f32.gmra.mrb[116].mxu0 %vm1453_vm4, %v2907_v62  ;;  %14174 = vmatprep.mubr.msk.f32.mxu1 %vm16543_vm6, %v16542_v12  ;;  %1822 = vst.msk [vmem:[#allocation3 + $0xd0] sm:$0xff] %vm1453_vm4, %v1773_v60  ;;  %v1413_v2 = vmax.f32 %v1157_v61, 0.0  ;;  %v14087_v3 = vpop.f32.mrb[60].mxu0  ;;  %v1931_v4 = vmax.f32 %v1927_v0, %v1929_v1 }
 0x179   : > { %14405 = vmatprep.mubr.msk.f32.mxu0 %vm16543_vm6, %v16542_v12  ;;  %v1606_v5 = vld [vmem:[#allocation2 + $0x1b0] ss:$2 sm:$0xff]  ;;  %v1704_v6 = vld [vmem:[#allocation2 + $0x1b1] ss:$2 sm:$0xff]  ;;  %1513 = vst.msk [vmem:[#allocation2 + $0x1d8] sm:$0xff] %vm1453_vm4, %v1414_v63  ;;  %v1172_v7 = vadd.f32 %v14087_v3, %v16969_v52  ;;  %v1166_v8 = vpop.f32.mrb[61].mxu0 }
 0x17a   : > { %v1774_v9 = vmax.f32 %v1606_v5, %v1704_v6  ;;  %1512 = vst.msk [vmem:[#allocation2 + $0x1d0] sm:$0xff] %vm1453_vm4, %v1413_v2  ;;  %v1167_v10 = vadd.f32 %v16969_v52, %v1166_v8 }
 0x17b   : > { %1933 = vst.msk [vmem:[#allocation4 + $0x5c] sm:$0x3f] %vm1884_vm7, %v1931_v4  ;;  %v1416_v11 = vmax.f32 %v1172_v7, 0.0  ;;  %v1934_v33 = vld [vmem:[#allocation3 + $0xc4] sm:$0xff] }
 0x17c   : > { %1823 = vst.msk [vmem:[#allocation3 + $0xd8] sm:$0xff] %vm1453_vm4, %v1774_v9  ;;  %v1415_v13 = vmax.f32 %v1167_v10, 0.0  ;;  %v14090_v14 = vpop.f32.mrb[62].mxu0 }
 0x17d   : > { %v1608_v15 = vld [vmem:[#allocation2 + $0x1c0] ss:$2 sm:$0xff]  ;;  %v1706_v16 = vld [vmem:[#allocation2 + $0x1c1] ss:$2 sm:$0xff]  ;;  %1515 = vst.msk [vmem:[#allocation2 + $0x1e8] sm:$0xff] %vm1453_vm4, %v1416_v11  ;;  %v1182_v17 = vadd.f32 %v14090_v14, %v16969_v52  ;;  %v1176_v18 = vpop.f32.mrb[63].mxu0 }
 0x17e   : > { %v2026_v19 = vld [vmem:[#allocation4 + $0x51] sm:$0xff]  ;;  %v1775_v20 = vmax.f32 %v1608_v15, %v1706_v16  ;;  %1514 = vst.msk [vmem:[#allocation2 + $0x1e0] sm:$0xff] %vm1453_vm4, %v1415_v13  ;;  %v1177_v21 = vadd.f32 %v16969_v52, %v1176_v18 }
 0x17f   : > { %14175 = vmatmul.mubr.msk.f32.gmra.mrb[20].mxu1 %vm1453_vm4, %v2026_v19  ;;  %v2908_v22 = vld [vmem:[#allocation4 + $0x53] sm:$0xff]  ;;  %v1418_v23 = vmax.f32 %v1182_v17, 0.0  ;;  %v1935_v36 = vld [vmem:[#allocation3 + $0xcc] sm:$0x3f] }
 0x180   : > { %14406 = vmatmul.mubr.msk.f32.gmra.mrb[118].mxu0 %vm1453_vm4, %v2908_v22  ;;  %14177 = vmatprep.mubr.msk.f32.mxu1 %vm16543_vm6, %v16542_v12  ;;  %1824 = vst.msk [vmem:[#allocation3 + $0xe0] sm:$0xff] %vm1453_vm4, %v1775_v20  ;;  %v1417_v24 = vmax.f32 %v1177_v21, 0.0  ;;  %v14093_v25 = vpop.f32.mrb[64].mxu0 }
 0x181   : > { %14408 = vmatprep.mubr.msk.f32.mxu0 %vm16543_vm6, %v16542_v12  ;;  %v1610_v26 = vld [vmem:[#allocation2 + $0x1d0] ss:$2 sm:$0xff]  ;;  %v1708_v27 = vld [vmem:[#allocation2 + $0x1d1] ss:$2 sm:$0xff]  ;;  %1517 = vst.msk [vmem:[#allocation2 + $0x1f8] sm:$0xff] %vm1453_vm4, %v1418_v23  ;;  %v1192_v28 = vadd.f32 %v14093_v25, %v16969_v52  ;;  %v1186_v29 = vpop.f32.mrb[65].mxu0 }
 0x182   : > { %v2027_v30 = vld [vmem:[#allocation4 + $0x59] sm:$0xff]  ;;  %v1776_v31 = vmax.f32 %v1610_v26, %v1708_v27  ;;  %1516 = vst.msk [vmem:[#allocation2 + $0x1f0] sm:$0xff] %vm1453_vm4, %v1417_v24  ;;  %v1187_v32 = vadd.f32 %v16969_v52, %v1186_v29  ;;  %v17228_v52 = vld [vmem:[%s21412_s2] ss:$0 sm:$0xff] }
 0x183   : > { %14178 = vmatmul.mubr.msk.f32.gmra.mrb[22].mxu1 %vm1453_vm4, %v2027_v30  ;;  %v1420_v34 = vmax.f32 %v1192_v28, 0.0  ;;  %v1936_v35 = vld [vmem:[#allocation3 + $0xd2] sm:$0xff]  ;;  %v1937_v37 = vld [vmem:[#allocation3 + $0xda] sm:$0x3f] }
 0x184   : > { %14180 = vmatprep.mubr.msk.f32.mxu1 %vm16543_vm6, %v16542_v12  ;;  %1825 = vst.msk [vmem:[#allocation3 + $0xe8] sm:$0xff] %vm1453_vm4, %v1776_v31  ;;  %v1419_v38 = vmax.f32 %v1187_v32, 0.0  ;;  %v14096_v39 = vpop.f32.mrb[66].mxu0  ;;  %v1938_v40 = vmax.f32 %v1934_v33, %v1936_v35  ;;  %v1939_v41 = vmax.f32 %v1935_v36, %v1937_v37 }
 0x185   : > { %v1612_v42 = vld [vmem:[#allocation2 + $0x1e0] ss:$2 sm:$0xff]  ;;  %v1710_v43 = vld [vmem:[#allocation2 + $0x1e1] ss:$2 sm:$0xff]  ;;  %1519 = vst.msk [vmem:[#allocation2 + $0x208] sm:$0xff] %vm1453_vm4, %v1420_v34  ;;  %v1202_v44 = vadd.f32 %v17228_v52, %v14096_v39  ;;  %v1196_v45 = vpop.f32.mrb[67].mxu0 }
 0x186   : > { %v1777_v46 = vmax.f32 %v1612_v42, %v1710_v43  ;;  %1518 = vst.msk [vmem:[#allocation2 + $0x200] sm:$0xff] %vm1453_vm4, %v1419_v38  ;;  %v1197_v47 = vadd.f32 %v17228_v52, %v1196_v45  ;;  %1940 = vst.msk [vmem:[#allocation4 + $0x62] sm:$0xff] %vm1453_vm4, %v1938_v40 }
 0x187   : > { %1941 = vst.msk [vmem:[#allocation4 + $0x6a] sm:$0x3f] %vm1884_vm7, %v1939_v41  ;;  %v1422_v48 = vmax.f32 %v1202_v44, 0.0  ;;  %v1942_v6 = vld [vmem:[#allocation3 + $0xe0] sm:$0xff] }
 0x188   : > { %1826 = vst.msk [vmem:[#allocation3 + $0xf0] sm:$0xff] %vm1453_vm4, %v1777_v46  ;;  %v1421_v49 = vmax.f32 %v1197_v47, 0.0  ;;  %v14099_v50 = vpop.f32.mrb[68].mxu0 }
 0x189   : > { %v1614_v51 = vld [vmem:[#allocation2 + $0x1f0] ss:$2 sm:$0xff]  ;;  %v1712_v53 = vld [vmem:[#allocation2 + $0x1f1] ss:$2 sm:$0xff]  ;;  %1521 = vst.msk [vmem:[#allocation2 + $0x218] sm:$0xff] %vm1453_vm4, %v1422_v48  ;;  %v1212_v54 = vadd.f32 %v17228_v52, %v14099_v50  ;;  %v1206_v55 = vpop.f32.mrb[69].mxu0 }
 0x18a   : > { %v1778_v56 = vmax.f32 %v1614_v51, %v1712_v53  ;;  %1520 = vst.msk [vmem:[#allocation2 + $0x210] sm:$0xff] %vm1453_vm4, %v1421_v49  ;;  %v1207_v57 = vadd.f32 %v17228_v52, %v1206_v55 }
 0x18b   : > { %v1424_v58 = vmax.f32 %v1212_v54, 0.0  ;;  %v1943_v20 = vld [vmem:[#allocation3 + $0xe8] sm:$0x3f] }
 0x18c   : > { %1827 = vst.msk [vmem:[#allocation3 + $0xf8] sm:$0xff] %vm1453_vm4, %v1778_v56  ;;  %v1423_v59 = vmax.f32 %v1207_v57, 0.0  ;;  %v14102_v60 = vpop.f32.mrb[70].mxu0 }
 0x18d   : > { %v1616_v61 = vld [vmem:[#allocation2 + $0x200] ss:$2 sm:$0xff]  ;;  %v1714_v62 = vld [vmem:[#allocation2 + $0x201] ss:$2 sm:$0xff]  ;;  %1523 = vst.msk [vmem:[#allocation2 + $0x228] sm:$0xff] %vm1453_vm4, %v1424_v58  ;;  %v1222_v63 = vadd.f32 %v17228_v52, %v14102_v60  ;;  %v1216_v0 = vpop.f32.mrb[71].mxu0 }
 0x18e   : > { %v2028_v1 = vld [vmem:[#allocation4 + $0x61] sm:$0xff]  ;;  %v1779_v2 = vmax.f32 %v1616_v61, %v1714_v62  ;;  %1522 = vst.msk [vmem:[#allocation2 + $0x220] sm:$0xff] %vm1453_vm4, %v1423_v59  ;;  %v1217_v3 = vadd.f32 %v17228_v52, %v1216_v0 }
 0x18f   : > { %14181 = vmatmul.mubr.msk.f32.gmra.mrb[24].mxu1 %vm1453_vm4, %v2028_v1  ;;  %v2909_v4 = vld [vmem:[#allocation4 + $0x5b] sm:$0xff]  ;;  %v1426_v5 = vmax.f32 %v1222_v63, 0.0  ;;  %v1944_v7 = vld [vmem:[#allocation3 + $0xee] sm:$0xff] }
 0x190   : > { %14409 = vmatmul.mubr.msk.f32.gmra.mrb[120].mxu0 %vm1453_vm4, %v2909_v4  ;;  %14183 = vmatprep.mubr.msk.f32.mxu1 %vm16543_vm6, %v16542_v12  ;;  %1828 = vst.msk [vmem:[#allocation3 + $0x100] sm:$0xff] %vm1453_vm4, %v1779_v2  ;;  %v1425_v8 = vmax.f32 %v1217_v3, 0.0  ;;  %v14105_v9 = vpop.f32.mrb[72].mxu0  ;;  %v1946_v10 = vmax.f32 %v1942_v6, %v1944_v7  ;;  %v2910_v18 = vld [vmem:[#allocation4 + $0x63] sm:$0xff] }
 0x191   : > { %14411 = vmatprep.mubr.msk.f32.mxu0 %vm16543_vm6, %v16542_v12  ;;  %v1618_v11 = vld [vmem:[#allocation2 + $0x210] ss:$2 sm:$0xff]  ;;  %v1716_v13 = vld [vmem:[#allocation2 + $0x211] ss:$2 sm:$0xff]  ;;  %1525 = vst.msk [vmem:[#allocation2 + $0x238] sm:$0xff] %vm1453_vm4, %v1426_v5  ;;  %v1232_v14 = vadd.f32 %v17228_v52, %v14105_v9  ;;  %v1226_v15 = vpop.f32.mrb[73].mxu0 }
 0x192   : > { %v1780_v16 = vmax.f32 %v1618_v11, %v1716_v13  ;;  %1524 = vst.msk [vmem:[#allocation2 + $0x230] sm:$0xff] %vm1453_vm4, %v1425_v8  ;;  %v1227_v17 = vadd.f32 %v17228_v52, %v1226_v15  ;;  %1948 = vst.msk [vmem:[#allocation4 + $0x70] sm:$0xff] %vm1453_vm4, %v1946_v10 }
 0x193   : > { %v1428_v19 = vmax.f32 %v1232_v14, 0.0  ;;  %v1945_v21 = vld [vmem:[#allocation3 + $0xf6] sm:$0x3f] }
 0x194   : > { %14412 = vmatmul.mubr.msk.f32.gmra.mrb[122].mxu0 %vm1453_vm4, %v2910_v18  ;;  %1829 = vst.msk [vmem:[#allocation3 + $0x108] sm:$0xff] %vm1453_vm4, %v1780_v16  ;;  %v1427_v22 = vmax.f32 %v1227_v17, 0.0  ;;  %v14108_v23 = vpop.f32.mrb[74].mxu0  ;;  %v1947_v24 = vmax.f32 %v1943_v20, %v1945_v21 }
 0x195   : > { %14414 = vmatprep.mubr.msk.f32.mxu0 %vm16543_vm6, %v16542_v12  ;;  %v1620_v25 = vld [vmem:[#allocation2 + $0x220] ss:$2 sm:$0xff]  ;;  %v1718_v26 = vld [vmem:[#allocation2 + $0x221] ss:$2 sm:$0xff]  ;;  %1527 = vst.msk [vmem:[#allocation2 + $0x248] sm:$0xff] %vm1453_vm4, %v1428_v19  ;;  %v1242_v27 = vadd.f32 %v17228_v52, %v14108_v23  ;;  %v1236_v28 = vpop.f32.mrb[75].mxu0 }
 0x196   : > { %v1781_v29 = vmax.f32 %v1620_v25, %v1718_v26  ;;  %1526 = vst.msk [vmem:[#allocation2 + $0x240] sm:$0xff] %vm1453_vm4, %v1427_v22  ;;  %v1237_v30 = vadd.f32 %v17228_v52, %v1236_v28 }
 0x197   : > { %1949 = vst.msk [vmem:[#allocation4 + $0x78] sm:$0x3f] %vm1884_vm7, %v1947_v24  ;;  %v1430_v31 = vmax.f32 %v1242_v27, 0.0  ;;  %v1950_v54 = vld [vmem:[#allocation3 + $0xfc] sm:$0xff] }
 0x198   : > { %1830 = vst.msk [vmem:[#allocation3 + $0x110] sm:$0xff] %vm1453_vm4, %v1781_v29  ;;  %v1429_v32 = vmax.f32 %v1237_v30, 0.0  ;;  %v14111_v33 = vpop.f32.mrb[76].mxu0 }
 0x199   : > { %v1622_v34 = vld [vmem:[#allocation2 + $0x230] ss:$2 sm:$0xff]  ;;  %v1720_v35 = vld [vmem:[#allocation2 + $0x231] ss:$2 sm:$0xff]  ;;  %1529 = vst.msk [vmem:[#allocation2 + $0x258] sm:$0xff] %vm1453_vm4, %v1430_v31  ;;  %v1252_v36 = vadd.f32 %v17228_v52, %v14111_v33  ;;  %v1246_v37 = vpop.f32.mrb[77].mxu0 }
 0x19a   : > { %v2029_v38 = vld [vmem:[#allocation4 + $0x69] sm:$0xff]  ;;  %v1782_v39 = vmax.f32 %v1622_v34, %v1720_v35  ;;  %1528 = vst.msk [vmem:[#allocation2 + $0x250] sm:$0xff] %vm1453_vm4, %v1429_v32  ;;  %v1247_v40 = vadd.f32 %v17228_v52, %v1246_v37 }
 0x19b   : > { %14184 = vmatmul.mubr.msk.f32.gmra.mrb[26].mxu1 %vm1453_vm4, %v2029_v38  ;;  %v2911_v41 = vld [vmem:[#allocation4 + $0x6b] sm:$0xff]  ;;  %v1432_v42 = vmax.f32 %v1252_v36, 0.0  ;;  %v1951_v57 = vld [vmem:[#allocation3 + $0x104] sm:$0x3f] }
 0x19c   : > { %14415 = vmatmul.mubr.msk.f32.gmra.mrb[124].mxu0 %vm1453_vm4, %v2911_v41  ;;  %14186 = vmatprep.mubr.msk.f32.mxu1 %vm16543_vm6, %v16542_v12  ;;  %1831 = vst.msk [vmem:[#allocation3 + $0x118] sm:$0xff] %vm1453_vm4, %v1782_v39  ;;  %v1431_v43 = vmax.f32 %v1247_v40, 0.0  ;;  %v14114_v44 = vpop.f32.mrb[78].mxu0 }
 0x19d   : > { %14417 = vmatprep.mubr.msk.f32.mxu0 %vm16543_vm6, %v16542_v12  ;;  %v1624_v45 = vld [vmem:[#allocation2 + $0x240] ss:$2 sm:$0xff]  ;;  %v1722_v46 = vld [vmem:[#allocation2 + $0x241] ss:$2 sm:$0xff]  ;;  %1531 = vst.msk [vmem:[#allocation2 + $0x268] sm:$0xff] %vm1453_vm4, %v1432_v42  ;;  %v1262_v47 = vadd.f32 %v17228_v52, %v14114_v44  ;;  %v1256_v48 = vpop.f32.mrb[79].mxu0 }
 0x19e   : > { %v2030_v49 = vld [vmem:[#allocation4 + $0x71] sm:$0xff]  ;;  %v1783_v50 = vmax.f32 %v1624_v45, %v1722_v46  ;;  %1530 = vst.msk [vmem:[#allocation2 + $0x260] sm:$0xff] %vm1453_vm4, %v1431_v43  ;;  %v1257_v51 = vadd.f32 %v17228_v52, %v1256_v48 }
 0x19f   : > { %14187 = vmatmul.mubr.msk.f32.gmra.mrb[28].mxu1 %vm1453_vm4, %v2030_v49  ;;  %v2912_v53 = vld [vmem:[#allocation4 + $0x73] sm:$0xff]  ;;  %v1434_v55 = vmax.f32 %v1262_v47, 0.0  ;;  %v1952_v56 = vld [vmem:[#allocation3 + $0x10a] sm:$0xff]  ;;  %v1953_v58 = vld [vmem:[#allocation3 + $0x112] sm:$0x3f] }
 0x1a0   : > { %14418 = vmatmul.mubr.msk.f32.gmra.mrb[126].mxu0 %vm1453_vm4, %v2912_v53  ;;  %14189 = vmatprep.mubr.msk.f32.mxu1 %vm16543_vm6, %v16542_v12  ;;  %1832 = vst.msk [vmem:[#allocation3 + $0x120] sm:$0xff] %vm1453_vm4, %v1783_v50  ;;  %v1433_v59 = vmax.f32 %v1257_v51, 0.0  ;;  %v14117_v60 = vpop.f32.mrb[80].mxu0  ;;  %v1954_v61 = vmax.f32 %v1950_v54, %v1952_v56  ;;  %v1955_v62 = vmax.f32 %v1951_v57, %v1953_v58 }
 0x1a1   : > { %14420 = vmatprep.mubr.msk.f32.mxu0 %vm16543_vm6, %v16542_v12  ;;  %v1626_v63 = vld [vmem:[#allocation2 + $0x250] ss:$2 sm:$0xff]  ;;  %v1724_v0 = vld [vmem:[#allocation2 + $0x251] ss:$2 sm:$0xff]  ;;  %1533 = vst.msk [vmem:[#allocation2 + $0x278] sm:$0xff] %vm1453_vm4, %v1434_v55  ;;  %v1272_v1 = vadd.f32 %v17228_v52, %v14117_v60  ;;  %v1266_v2 = vpop.f32.mrb[81].mxu0 }
 0x1a2   : > { %v1784_v3 = vmax.f32 %v1626_v63, %v1724_v0  ;;  %1532 = vst.msk [vmem:[#allocation2 + $0x270] sm:$0xff] %vm1453_vm4, %v1433_v59  ;;  %v1267_v4 = vadd.f32 %v17228_v52, %v1266_v2  ;;  %1956 = vst.msk [vmem:[#allocation4 + $0x7e] sm:$0xff] %vm1453_vm4, %v1954_v61 }
 0x1a3   : > { %1957 = vst.msk [vmem:[#allocation4 + $0x86] sm:$0x3f] %vm1884_vm7, %v1955_v62  ;;  %v1436_v5 = vmax.f32 %v1272_v1, 0.0  ;;  %v1958_v27 = vld [vmem:[#allocation3 + $0x118] sm:$0xff] }
 0x1a4   : > { %1833 = vst.msk [vmem:[#allocation3 + $0x128] sm:$0xff] %vm1453_vm4, %v1784_v3  ;;  %v1435_v6 = vmax.f32 %v1267_v4, 0.0  ;;  %v14120_v7 = vpop.f32.mrb[82].mxu0 }
 0x1a5   : > { %v1628_v8 = vld [vmem:[#allocation2 + $0x260] ss:$2 sm:$0xff]  ;;  %v1726_v9 = vld [vmem:[#allocation2 + $0x261] ss:$2 sm:$0xff]  ;;  %1535 = vst.msk [vmem:[#allocation2 + $0x288] sm:$0xff] %vm1453_vm4, %v1436_v5  ;;  %v1282_v10 = vadd.f32 %v17228_v52, %v14120_v7  ;;  %v1276_v11 = vpop.f32.mrb[83].mxu0 }
 0x1a6   : > { %v1785_v13 = vmax.f32 %v1628_v8, %v1726_v9  ;;  %1534 = vst.msk [vmem:[#allocation2 + $0x280] sm:$0xff] %vm1453_vm4, %v1435_v6  ;;  %v1277_v14 = vadd.f32 %v17228_v52, %v1276_v11 }
 0x1a7   : > { %v1438_v15 = vmax.f32 %v1282_v10, 0.0  ;;  %v1959_v41 = vld [vmem:[#allocation3 + $0x120] sm:$0x3f] }
 0x1a8   : > { %1834 = vst.msk [vmem:[#allocation3 + $0x130] sm:$0xff] %vm1453_vm4, %v1785_v13  ;;  %v1437_v16 = vmax.f32 %v1277_v14, 0.0  ;;  %v14123_v17 = vpop.f32.mrb[84].mxu0 }
 0x1a9   : > { %v1630_v18 = vld [vmem:[#allocation2 + $0x270] ss:$2 sm:$0xff]  ;;  %v1728_v19 = vld [vmem:[#allocation2 + $0x271] ss:$2 sm:$0xff]  ;;  %1537 = vst.msk [vmem:[#allocation2 + $0x298] sm:$0xff] %vm1453_vm4, %v1438_v15  ;;  %v1292_v20 = vadd.f32 %v17228_v52, %v14123_v17  ;;  %v1286_v21 = vpop.f32.mrb[85].mxu0 }
 0x1aa   : > { %v2031_v22 = vld [vmem:[#allocation4 + $0x79] sm:$0xff]  ;;  %v1786_v23 = vmax.f32 %v1630_v18, %v1728_v19  ;;  %1536 = vst.msk [vmem:[#allocation2 + $0x290] sm:$0xff] %vm1453_vm4, %v1437_v16  ;;  %v1287_v24 = vadd.f32 %v17228_v52, %v1286_v21  ;;  %v2032_v36 = vld [vmem:[#allocation4 + $0x81] sm:$0xff] }
 0x1ab   : > { %14190 = vmatmul.mubr.msk.f32.gmra.mrb[30].mxu1 %vm1453_vm4, %v2031_v22  ;;  %v2913_v25 = vld [vmem:[#allocation4 + $0x7b] sm:$0xff]  ;;  %v1440_v26 = vmax.f32 %v1292_v20, 0.0  ;;  %v2914_v39 = vld [vmem:[#allocation4 + $0x83] sm:$0xff] }
 0x1ac   : > { %14421 = vmatmul.mubr.msk.f32.gmra.mrb[128].mxu0 %vm1453_vm4, %v2913_v25  ;;  %14192 = vmatprep.mubr.msk.f32.mxu1 %vm16543_vm6, %v16542_v12  ;;  %v1960_v28 = vld [vmem:[#allocation3 + $0x126] sm:$0xff]  ;;  %1835 = vst.msk [vmem:[#allocation3 + $0x138] sm:$0xff] %vm1453_vm4, %v1786_v23  ;;  %v1439_v29 = vmax.f32 %v1287_v24, 0.0  ;;  %v14126_v30 = vpop.f32.mrb[86].mxu0 }
 0x1ad   : > { %14423 = vmatprep.mubr.msk.f32.mxu0 %vm16543_vm6, %v16542_v12  ;;  %v1962_v31 = vmax.f32 %v1958_v27, %v1960_v28  ;;  %v1632_v32 = vld [vmem:[#allocation2 + $0x280] ss:$2 sm:$0xff]  ;;  %v1730_v33 = vld [vmem:[#allocation2 + $0x281] ss:$2 sm:$0xff]  ;;  %1539 = vst.msk [vmem:[#allocation2 + $0x2a8] sm:$0xff] %vm1453_vm4, %v1440_v26  ;;  %v1302_v34 = vadd.f32 %v17228_v52, %v14126_v30  ;;  %v1296_v35 = vpop.f32.mrb[87].mxu0 }
 0x1ae   : > { %v1787_v37 = vmax.f32 %v1632_v32, %v1730_v33  ;;  %1538 = vst.msk [vmem:[#allocation2 + $0x2a0] sm:$0xff] %vm1453_vm4, %v1439_v29  ;;  %v1297_v38 = vadd.f32 %v17228_v52, %v1296_v35 }
 0x1af   : > { %14193 = vmatmul.mubr.msk.f32.gmra.mrb[32].mxu1 %vm1453_vm4, %v2032_v36  ;;  %1964 = vst.msk [vmem:[#allocation4 + $0x8c] sm:$0xff] %vm1453_vm4, %v1962_v31  ;;  %v1442_v40 = vmax.f32 %v1302_v34, 0.0  ;;  %v1961_v42 = vld [vmem:[#allocation3 + $0x12e] sm:$0x3f] }
 0x1b0   : > { %14424 = vmatmul.mubr.msk.f32.gmra.mrb[130].mxu0 %vm1453_vm4, %v2914_v39  ;;  %14195 = vmatprep.mubr.msk.f32.mxu1 %vm16543_vm6, %v16542_v12  ;;  %1836 = vst.msk [vmem:[#allocation3 + $0x140] sm:$0xff] %vm1453_vm4, %v1787_v37  ;;  %v1441_v43 = vmax.f32 %v1297_v38, 0.0  ;;  %v14129_v44 = vpop.f32.mrb[88].mxu0  ;;  %v1963_v45 = vmax.f32 %v1959_v41, %v1961_v42 }
 0x1b1   : > { %14426 = vmatprep.mubr.msk.f32.mxu0 %vm16543_vm6, %v16542_v12  ;;  %v1634_v46 = vld [vmem:[#allocation2 + $0x290] ss:$2 sm:$0xff]  ;;  %v1732_v47 = vld [vmem:[#allocation2 + $0x291] ss:$2 sm:$0xff]  ;;  %1541 = vst.msk [vmem:[#allocation2 + $0x2b8] sm:$0xff] %vm1453_vm4, %v1442_v40  ;;  %v1312_v48 = vadd.f32 %v17228_v52, %v14129_v44  ;;  %v1306_v49 = vpop.f32.mrb[89].mxu0 }
 0x1b2   : > { %v1788_v50 = vmax.f32 %v1634_v46, %v1732_v47  ;;  %1540 = vst.msk [vmem:[#allocation2 + $0x2b0] sm:$0xff] %vm1453_vm4, %v1441_v43  ;;  %v1307_v51 = vadd.f32 %v17228_v52, %v1306_v49 }
 0x1b3   : > { %1965 = vst.msk [vmem:[#allocation4 + $0x94] sm:$0x3f] %vm1884_vm7, %v1963_v45  ;;  %v1444_v53 = vmax.f32 %v1312_v48, 0.0  ;;  %v1966_v10 = vld [vmem:[#allocation3 + $0x134] sm:$0xff] }
 0x1b4   : > { %1837 = vst.msk [vmem:[#allocation3 + $0x148] sm:$0xff] %vm1453_vm4, %v1788_v50  ;;  %v1443_v54 = vmax.f32 %v1307_v51, 0.0  ;;  %v14132_v55 = vpop.f32.mrb[90].mxu0 }
 0x1b5   : > { %v1636_v56 = vld [vmem:[#allocation2 + $0x2a0] ss:$2 sm:$0xff]  ;;  %v1734_v57 = vld [vmem:[#allocation2 + $0x2a1] ss:$2 sm:$0xff]  ;;  %1543 = vst.msk [vmem:[#allocation2 + $0x2c8] sm:$0xff] %vm1453_vm4, %v1444_v53  ;;  %v1322_v58 = vadd.f32 %v17228_v52, %v14132_v55  ;;  %v1316_v59 = vpop.f32.mrb[91].mxu0 }
 0x1b6   : > { %v2033_v60 = vld [vmem:[#allocation4 + $0x89] sm:$0xff]  ;;  %v1789_v61 = vmax.f32 %v1636_v56, %v1734_v57  ;;  %1542 = vst.msk [vmem:[#allocation2 + $0x2c0] sm:$0xff] %vm1453_vm4, %v1443_v54  ;;  %v1317_v62 = vadd.f32 %v17228_v52, %v1316_v59 }
 0x1b7   : > { %14196 = vmatmul.mubr.msk.f32.gmra.mrb[34].mxu1 %vm1453_vm4, %v2033_v60  ;;  %v2915_v63 = vld [vmem:[#allocation4 + $0x8b] sm:$0xff]  ;;  %v1446_v0 = vmax.f32 %v1322_v58, 0.0  ;;  %v1967_v14 = vld [vmem:[#allocation3 + $0x13c] sm:$0x3f] }
 0x1b8   : > { %14427 = vmatmul.mubr.msk.f32.gmra.mrb[132].mxu0 %vm1453_vm4, %v2915_v63  ;;  %14198 = vmatprep.mubr.msk.f32.mxu1 %vm16543_vm6, %v16542_v12  ;;  %1838 = vst.msk [vmem:[#allocation3 + $0x150] sm:$0xff] %vm1453_vm4, %v1789_v61  ;;  %v1445_v1 = vmax.f32 %v1317_v62, 0.0  ;;  %v14135_v2 = vpop.f32.mrb[92].mxu0 }
 0x1b9   : > { %14429 = vmatprep.mubr.msk.f32.mxu0 %vm16543_vm6, %v16542_v12  ;;  %v1638_v3 = vld [vmem:[#allocation2 + $0x2b0] ss:$2 sm:$0xff]  ;;  %v1736_v4 = vld [vmem:[#allocation2 + $0x2b1] ss:$2 sm:$0xff]  ;;  %1545 = vst.msk [vmem:[#allocation2 + $0x2d8] sm:$0xff] %vm1453_vm4, %v1446_v0  ;;  %v1332_v5 = vadd.f32 %v17228_v52, %v14135_v2  ;;  %v1326_v6 = vpop.f32.mrb[93].mxu0 }
 0x1ba   : > { %v2034_v7 = vld [vmem:[#allocation4 + $0x91] sm:$0xff]  ;;  %v1790_v8 = vmax.f32 %v1638_v3, %v1736_v4  ;;  %1544 = vst.msk [vmem:[#allocation2 + $0x2d0] sm:$0xff] %vm1453_vm4, %v1445_v1  ;;  %v1327_v9 = vadd.f32 %v17228_v52, %v1326_v6 }
 0x1bb   : > { %14199 = vmatmul.mubr.msk.f32.gmra.mrb[36].mxu1 %vm1453_vm4, %v2034_v7  ;;  %v1448_v11 = vmax.f32 %v1332_v5, 0.0  ;;  %v1968_v13 = vld [vmem:[#allocation3 + $0x142] sm:$0xff]  ;;  %v1969_v15 = vld [vmem:[#allocation3 + $0x14a] sm:$0x3f]  ;;  %v2604_v7 = vld [vmem:[%s21413_s3 + $0xc] sm:$0x3f] }
 0x1bc   : > { %14201 = vmatprep.mubr.msk.f32.mxu1 %vm16543_vm6, %v16542_v12  ;;  %1839 = vst.msk [vmem:[#allocation3 + $0x158] sm:$0xff] %vm1453_vm4, %v1790_v8  ;;  %v1447_v16 = vmax.f32 %v1327_v9, 0.0  ;;  %v14138_v17 = vpop.f32.mrb[94].mxu0  ;;  %v1970_v18 = vmax.f32 %v1966_v10, %v1968_v13  ;;  %v1971_v19 = vmax.f32 %v1967_v14, %v1969_v15  ;;  %v1990_v8 = vld [vmem:[#allocation4] sm:$0xff]  ;;  %v3536_v9 = vld [vmem:[#allocation4 + $0xe] sm:$0xff]  ;;  %v3537_v13 = vld [vmem:[#allocation4 + $0x16] sm:$0xff] }
 0x1bd   : > { %v1640_v20 = vld [vmem:[#allocation2 + $0x2c0] ss:$2 sm:$0xff]  ;;  %v1738_v21 = vld [vmem:[#allocation2 + $0x2c1] ss:$2 sm:$0xff]  ;;  %1547 = vst.msk [vmem:[#allocation2 + $0x2e8] sm:$0xff] %vm1453_vm4, %v1448_v11  ;;  %v1342_v22 = vadd.f32 %v17228_v52, %v14138_v17  ;;  %v1336_v23 = vpop.f32.mrb[95].mxu0 }
 0x1be   : > { %v1791_v24 = vmax.f32 %v1640_v20, %v1738_v21  ;;  %1546 = vst.msk [vmem:[#allocation2 + $0x2e0] sm:$0xff] %vm1453_vm4, %v1447_v16  ;;  %v1337_v25 = vadd.f32 %v17228_v52, %v1336_v23  ;;  %1972 = vst.msk [vmem:[#allocation4 + $0x9a] sm:$0xff] %vm1453_vm4, %v1970_v18  ;;  %v4199_v10 = vld [vmem:[%s21413_s3 + $0x2a] sm:$0x3f]  ;;  %v1991_v11 = vld [vmem:[#allocation4 + $0x8] sm:$0xff] }
 0x1bf   : > { %1973 = vst.msk [vmem:[#allocation4 + $0xa2] sm:$0x3f] %vm1884_vm7, %v1971_v19  ;;  %v1450_v26 = vmax.f32 %v1342_v22, 0.0  ;;  %v17431_v14 = vld [vmem:[#allocation4 + $0x10] sm:$0xff]  ;;  %v3538_v15 = vld [vmem:[#allocation4 + $0x1e] sm:$0xff]  ;;  %v3539_v17 = vld [vmem:[#allocation4 + $0x26] sm:$0xff] }
 0x1c0   : > { %1840 = vst.msk [vmem:[#allocation3 + $0x160] sm:$0xff] %vm1453_vm4, %v1791_v24  ;;  %v1449_v27 = vmax.f32 %v1337_v25, 0.0  ;;  %v14141_v28 = vpop.f32.mrb[96].mxu0  ;;  %v17440_v16 = vld [vmem:[#allocation4 + $0x18] sm:$0xff]  ;;  %v17449_v18 = vld [vmem:[#allocation4 + $0x20] sm:$0xff]  ;;  %v3540_v19 = vld [vmem:[#allocation4 + $0x2e] sm:$0xff] }
 0x1c1   : > { %v1642_v29 = vld [vmem:[#allocation2 + $0x2d0] ss:$2 sm:$0xff]  ;;  %v1740_v30 = vld [vmem:[#allocation2 + $0x2d1] ss:$2 sm:$0xff]  ;;  %1549 = vst.msk [vmem:[#allocation2 + $0x2f8] sm:$0xff] %vm1453_vm4, %v1450_v26  ;;  %v1352_v31 = vadd.f32 %v17228_v52, %v14141_v28  ;;  %v1346_v32 = vpop.f32.mrb[97].mxu0 }
 0x1c2   : > { %v1792_v33 = vmax.f32 %v1642_v29, %v1740_v30  ;;  %1548 = vst.msk [vmem:[#allocation2 + $0x2f0] sm:$0xff] %vm1453_vm4, %v1449_v27  ;;  %v1347_v34 = vadd.f32 %v17228_v52, %v1346_v32  ;;  %v1974_v52 = vld [vmem:[#allocation3 + $0x150] sm:$0xff]  ;;  %v3541_v22 = vld [vmem:[#allocation4 + $0x36] sm:$0xff]  ;;  %v3542_v27 = vld [vmem:[#allocation4 + $0x3e] sm:$0xff] }
 0x1c3   : > { %v1452_v35 = vmax.f32 %v1352_v31, 0.0  ;;  %v1975_v48 = vld [vmem:[#allocation3 + $0x158] sm:$0x3f]  ;;  %v17460_v21 = vld [vmem:[#allocation4 + $0x28] sm:$0xff]  ;;  %v17480_v28 = vld [vmem:[#allocation4 + $0x38] sm:$0xff] }
 0x1c4   : > { %1841 = vst.msk [vmem:[#allocation3 + $0x168] sm:$0xff] %vm1453_vm4, %v1792_v33  ;;  %v1451_v36 = vmax.f32 %v1347_v34, 0.0  ;;  %v17471_v26 = vld [vmem:[#allocation4 + $0x30] sm:$0xff]  ;;  %v3543_v29 = vld [vmem:[#allocation4 + $0x46] sm:$0xff] }
 0x1c5   : > { %v1644_v37 = vld [vmem:[#allocation2 + $0x2e0] ss:$2 sm:$0xff]  ;;  %v1742_v38 = vld [vmem:[#allocation2 + $0x2e1] ss:$2 sm:$0xff]  ;;  %1551 = vst.msk [vmem:[#allocation2 + $0x308] sm:$0xff] %vm1453_vm4, %v1452_v35  ;;  %v2035_v39 = vld [vmem:[#allocation4 + $0x99] sm:$0xff] }
 0x1c6   : > { %v1793_v40 = vmax.f32 %v1644_v37, %v1742_v38  ;;  %1550 = vst.msk [vmem:[#allocation2 + $0x300] sm:$0xff] %vm1453_vm4, %v1451_v36  ;;  %14202 = vmatmul.mubr.msk.f32.gmra.mrb[38].mxu1 %vm1453_vm4, %v2035_v39  ;;  %v2916_v41 = vld [vmem:[#allocation4 + $0x93] sm:$0xff]  ;;  %v2917_v47 = vld [vmem:[#allocation4 + $0x9b] sm:$0xff]  ;;  %v17504_v37 = vld [vmem:[#allocation4 + $0x48] sm:$0xff] }
 0x1c7   : > { %14430 = vmatmul.mubr.msk.f32.gmra.mrb[134].mxu0 %vm1453_vm4, %v2916_v41  ;;  %14204 = vmatprep.mubr.msk.f32.mxu1 %vm16543_vm6, %v16542_v12  ;;  %v1976_v42 = vld [vmem:[#allocation3 + $0x15e] sm:$0xff]  ;;  %v17491_v31 = vld [vmem:[#allocation4 + $0x40] sm:$0xff]  ;;  %v3544_v32 = vld [vmem:[#allocation4 + $0x4e] sm:$0xff] }
 0x1c8   : > { %1842 = vst.msk [vmem:[#allocation3 + $0x170] sm:$0xff] %vm1453_vm4, %v1793_v40  ;;  %14432 = vmatprep.mubr.msk.f32.mxu0 %vm16543_vm6, %v16542_v12  ;;  %v1978_v43 = vmax.f32 %v1974_v52, %v1976_v42  ;;  %v3545_v38 = vld [vmem:[#allocation4 + $0x56] sm:$0xff]  ;;  %v3546_v42 = vld [vmem:[#allocation4 + $0x5e] sm:$0xff] }
 0x1c9   : > { %v1646_v44 = vld [vmem:[#allocation2 + $0x2f0] ss:$2 sm:$0xff]  ;;  %v1744_v45 = vld [vmem:[#allocation2 + $0x2f1] ss:$2 sm:$0xff]  ;;  %v17515_v52 = vld [vmem:[#allocation4 + $0x50] sm:$0xff] }
 0x1ca   : > { %v1794_v46 = vmax.f32 %v1646_v44, %v1744_v45  ;;  %1980 = vst.msk [vmem:[#allocation4 + $0xa8] sm:$0xff] %vm1453_vm4, %v1978_v43  ;;  %v17526_v44 = vld [vmem:[#allocation4 + $0x58] sm:$0xff]  ;;  %v3547_v45 = vld [vmem:[#allocation4 + $0x66] sm:$0xff] }
 0x1cb   : > { %14433 = vmatmul.mubr.msk.f32.gmra.mrb[136].mxu0 %vm1453_vm4, %v2917_v47  ;;  %v1977_v49 = vld [vmem:[#allocation3 + $0x166] sm:$0x3f] }
 0x1cc   : > { %1843 = vst.msk [vmem:[#allocation3 + $0x178] sm:$0xff] %vm1453_vm4, %v1794_v46  ;;  %14435 = vmatprep.mubr.msk.f32.mxu0 %vm16543_vm6, %v16542_v12  ;;  %v1979_v50 = vmax.f32 %v1975_v48, %v1977_v49 }
 0x1cd   : > { %v1648_v51 = vld [vmem:[#allocation2 + $0x300] ss:$2 sm:$0xff]  ;;  %v1746_v53 = vld [vmem:[#allocation2 + $0x301] ss:$2 sm:$0xff] }
 0x1ce   : > { %v1795_v54 = vmax.f32 %v1648_v51, %v1746_v53  ;;  %1981 = vst.msk [vmem:[#allocation4 + $0xb0] sm:$0x3f] %vm1884_vm7, %v1979_v50  ;;  %v17539_v50 = vld [vmem:[#allocation4 + $0x60] sm:$0xff]  ;;  %v3548_v51 = vld [vmem:[#allocation4 + $0x6e] sm:$0xff] }
 0x1cf   : > { %v1982_v59 = vld [vmem:[#allocation3 + $0x16c] sm:$0xff] }
 0x1d0   : > { %1844 = vst.msk [vmem:[#allocation3 + $0x180] sm:$0xff] %vm1453_vm4, %v1795_v54  ;;  %v17548_v54 = vld [vmem:[#allocation4 + $0x68] sm:$0xff] }
 0x1d1   : > { %v2036_v55 = vld [vmem:[#allocation4 + $0xa1] sm:$0xff] }
 0x1d2   : > { %v2918_v56 = vld [vmem:[#allocation4 + $0xa3] sm:$0xff]  ;;  %14205 = vmatmul.mubr.msk.f32.gmra.mrb[40].mxu1 %vm1453_vm4, %v2036_v55  ;;  %v3549_v55 = vld [vmem:[#allocation4 + $0x76] sm:$0xff] }
 0x1d3   : > { %14436 = vmatmul.mubr.msk.f32.gmra.mrb[138].mxu0 %vm1453_vm4, %v2918_v56  ;;  %14207 = vmatprep.mubr.msk.f32.mxu1 %vm16543_vm6, %v16542_v12  ;;  %v1983_v61 = vld [vmem:[#allocation3 + $0x174] sm:$0x3f] }
 0x1d4   : > { %14438 = vmatprep.mubr.msk.f32.mxu0 %vm16543_vm6, %v16542_v12  ;;  %v17557_v56 = vld [vmem:[#allocation4 + $0x70] sm:$0xff] }
 0x1d5   : > { %v2037_v57 = vld [vmem:[#allocation4 + $0xa9] sm:$0xff] }
 0x1d6   : > { %v2919_v58 = vld [vmem:[#allocation4 + $0xab] sm:$0xff]  ;;  %14208 = vmatmul.mubr.msk.f32.gmra.mrb[42].mxu1 %vm1453_vm4, %v2037_v57  ;;  %v3550_v57 = vld [vmem:[#allocation4 + $0x7e] sm:$0xff] }
 0x1d7   : > { %14439 = vmatmul.mubr.msk.f32.gmra.mrb[140].mxu0 %vm1453_vm4, %v2919_v58  ;;  %14210 = vmatprep.mubr.msk.f32.mxu1 %vm16543_vm6, %v16542_v12  ;;  %v1984_v60 = vld [vmem:[#allocation3 + $0x17a] sm:$0xff]  ;;  %v1985_v62 = vld [vmem:[#allocation3 + $0x182] sm:$0x3f] }
 0x1d8   : > { %14441 = vmatprep.mubr.msk.f32.mxu0 %vm16543_vm6, %v16542_v12  ;;  %v1986_v63 = vmax.f32 %v1982_v59, %v1984_v60  ;;  %v1987_v0 = vmax.f32 %v1983_v61, %v1985_v62  ;;  %v17568_v59 = vld [vmem:[#allocation4 + $0x78] sm:$0xff]  ;;  %v3551_v60 = vld [vmem:[#allocation4 + $0x86] sm:$0xff] }
 0x1da   : > { %1988 = vst.msk [vmem:[#allocation4 + $0xb6] sm:$0xff] %vm1453_vm4, %v1986_v63 }
 0x1db   : > { %1989 = vst.msk [vmem:[#allocation4 + $0xbe] sm:$0x3f] %vm1884_vm7, %v1987_v0  ;;  %v17579_v0 = vld [vmem:[#allocation4 + $0x80] sm:$0xff] }
 0x1e1   : > { %v2038_v1 = vld [vmem:[#allocation4 + $0xb1] sm:$0xff] }
 0x1e2   : > { %v2920_v2 = vld [vmem:[#allocation4 + $0xb3] sm:$0xff]  ;;  %14211 = vmatmul.mubr.msk.f32.gmra.mrb[44].mxu1 %vm1453_vm4, %v2038_v1  ;;  %v2921_v4 = vld [vmem:[#allocation4 + $0xbb] sm:$0xff]  ;;  %v2922_v6 = vld [vmem:[#allocation4 + $0xc3] sm:$0xf] }
 0x1e3   : > { %14442 = vmatmul.mubr.msk.f32.gmra.mrb[142].mxu0 %vm1453_vm4, %v2920_v2  ;;  %14213 = vmatprep.mubr.msk.f32.mxu1 %vm16543_vm6, %v16542_v12  ;;  %v2039_v3 = vld [vmem:[#allocation4 + $0xb9] sm:$0xff]  ;;  %v2040_v5 = vld [vmem:[#allocation4 + $0xc1] sm:$0xf]  ;;  %v3552_v1 = vld [vmem:[#allocation4 + $0x8e] sm:$0xff] }
 0x1e4   : > { %14444 = vmatprep.mubr.msk.f32.mxu0 %vm16543_vm6, %v16542_v12 }
 0x1e6   : > { %14214 = vmatmul.mubr.msk.f32.gmra.mrb[46].mxu1 %vm1453_vm4, %v2039_v3 }
 0x1e7   : > { %14445 = vmatmul.mubr.msk.f32.gmra.mrb[144].mxu0 %vm1453_vm4, %v2921_v4  ;;  %14216 = vmatprep.mubr.msk.f32.mxu1 %vm16543_vm6, %v16542_v12  ;;  %v17590_v4 = vld [vmem:[#allocation4 + $0x88] sm:$0xff] }
 0x1e8   : > { %14447 = vmatprep.mubr.msk.f32.mxu0 %vm16543_vm6, %v16542_v12 }
 0x1ea   : > { %14217 = vmatmul.mubr.msk.f32.gmra.mrb[48].mxu1 %vm1453_vm4, %v2040_v5  ;;  %v3553_v5 = vld [vmem:[#allocation4 + $0x96] sm:$0xff] }
 0x1eb   : > { %14448 = vmatmul.mubr.msk.f32.gmra.mrb[146].mxu0 %vm1453_vm4, %v2922_v6  ;;  %14221 = vmatprep.mubr.msk.f32.mxu1 %vm16543_vm6, %v16542_v12 }
 0x1ec   : > { %14529 = vmatprep.mubr.msk.f32.mxu0 %vm16543_vm6, %v16542_v12 }
 0x1ee   : > { %14222 = vmatmul.mubr.msk.f32.vlgmr.msra.gmra.mrb[50].mxu1 %vm1453_vm4, %v1990_v8  ;;  %v3554_v8 = vld [vmem:[#allocation4 + $0x9e] sm:$0xff] }
 0x1ef   : > { %14530 = vmatmul.mubr.msk.f32.vlgmr.msra.gmra.mrb[148].mxu0 %vm1453_vm4, %v3536_v9  ;;  %14297 = vmatpush3.msk.msra.mxu1 %vm2117_vm5, %v2604_v7  ;;  %v17601_v7 = vld [vmem:[#allocation4 + $0x90] sm:$0xff] }
 0x1f0   : > { %14224 = vmatprep.mubr.msk.f32.mxu1 %vm16543_vm6, %v16542_v12  ;;  %14532 = vmatprep.mubr.msk.f32.mxu0 %vm16543_vm6, %v16542_v12 }
 0x1f1   : > { %14450 = vmatprep.subr.mxu1 %v16542_v12  ;;  %14682 = vmatpush3.msk.msra.mxu0 %vm2117_vm5, %v4199_v10 }
 0x1f2   : > { %14225 = vmatmul.mubr.msk.f32.gmra.mrb[52].mxu1 %vm1453_vm4, %v1991_v11  ;;  %14835 = vmatprep.subr.mxu0 %v16542_v12 }
 0x1f3   : > { %14533 = vmatmul.mubr.msk.f32.gmra.mrb[150].mxu0 %vm1453_vm4, %v3537_v13  ;;  %14227 = vmatprep.mubr.msk.f32.mxu1 %vm16543_vm6, %v16542_v12 }
 0x1f4   : > { %14535 = vmatprep.mubr.msk.f32.mxu0 %vm16543_vm6, %v16542_v12 }
 0x1f6   : > { %14228 = vmatmul.mubr.msk.f32.gmra.mrb[54].mxu1 %vm1453_vm4, %v17431_v14 }
 0x1f7   : > { %14536 = vmatmul.mubr.msk.f32.gmra.mrb[152].mxu0 %vm1453_vm4, %v3538_v15  ;;  %14230 = vmatprep.mubr.msk.f32.mxu1 %vm16543_vm6, %v16542_v12  ;;  %v17614_v15 = vld [vmem:[#allocation4 + $0x98] sm:$0xff] }
 0x1f8   : > { %14538 = vmatprep.mubr.msk.f32.mxu0 %vm16543_vm6, %v16542_v12 }
 0x1fa   : > { %14231 = vmatmul.mubr.msk.f32.gmra.mrb[56].mxu1 %vm1453_vm4, %v17440_v16 }
 0x1fb   : > { %14539 = vmatmul.mubr.msk.f32.gmra.mrb[154].mxu0 %vm1453_vm4, %v3539_v17  ;;  %14233 = vmatprep.mubr.msk.f32.mxu1 %vm16543_vm6, %v16542_v12  ;;  %v3555_v17 = vld [vmem:[#allocation4 + $0xa6] sm:$0xff] }
 0x1fc   : > { %14541 = vmatprep.mubr.msk.f32.mxu0 %vm16543_vm6, %v16542_v12 }
 0x1fe   : > { %14234 = vmatmul.mubr.msk.f32.gmra.mrb[58].mxu1 %vm1453_vm4, %v17449_v18 }
 0x1ff   : > { %14542 = vmatmul.mubr.msk.f32.gmra.mrb[156].mxu0 %vm1453_vm4, %v3540_v19  ;;  %14236 = vmatprep.mubr.msk.f32.mxu1 %vm16543_vm6, %v16542_v12 }
 0x200   : > { %14544 = vmatprep.mubr.msk.f32.mxu0 %vm16543_vm6, %v16542_v12 }
 0x202   : > { %v17458_v20 = vpop.f32.mrb[0].mxu1  ;;  %14237 = vmatmul.mubr.msk.f32.gmra.mrb[60].mxu1 %vm1453_vm4, %v17460_v21 }
 0x203   : > { %v17462_v23 = vpop.f32.mrb[98].mxu0  ;;  %v14146_v24 = vpop.f32.mrb[1].mxu1  ;;  %14545 = vmatmul.mubr.msk.f32.gmra.mrb[158].mxu0 %vm1453_vm4, %v3541_v22  ;;  %14239 = vmatprep.mubr.msk.f32.mxu1 %vm16543_vm6, %v16542_v12 }
 0x204   : > { %v14377_v25 = vpop.f32.mrb[99].mxu0  ;;  %14547 = vmatprep.mubr.msk.f32.mxu0 %vm16543_vm6, %v16542_v12 }
 0x205   : > { %v17625_v25 = vld [vmem:[#allocation4 + $0xa0] sm:$0xff] }
 0x206   : > { %14240 = vmatmul.mubr.msk.f32.gmra.mrb[62].mxu1 %vm1453_vm4, %v17471_v26 }
 0x207   : > { %14548 = vmatmul.mubr.msk.f32.gmra.mrb[160].mxu0 %vm1453_vm4, %v3542_v27  ;;  %14242 = vmatprep.mubr.msk.f32.mxu1 %vm16543_vm6, %v16542_v12  ;;  %v3556_v27 = vld [vmem:[#allocation4 + $0xae] sm:$0xff] }
 0x208   : > { %14550 = vmatprep.mubr.msk.f32.mxu0 %vm16543_vm6, %v16542_v12 }
 0x20a   : > { %14243 = vmatmul.mubr.msk.f32.gmra.mrb[64].mxu1 %vm1453_vm4, %v17480_v28 }
 0x20b   : > { %14551 = vmatmul.mubr.msk.f32.gmra.mrb[162].mxu0 %vm1453_vm4, %v3543_v29  ;;  %14245 = vmatprep.mubr.msk.f32.mxu1 %vm16543_vm6, %v16542_v12  ;;  %v17634_v29 = vld [vmem:[#allocation4 + $0xa8] sm:$0xff] }
 0x20c   : > { %14553 = vmatprep.mubr.msk.f32.mxu0 %vm16543_vm6, %v16542_v12 }
 0x20e   : > { %v17489_v30 = vpop.f32.mrb[2].mxu1  ;;  %14246 = vmatmul.mubr.msk.f32.gmra.mrb[66].mxu1 %vm1453_vm4, %v17491_v31 }
 0x20f   : > { %v17493_v33 = vpop.f32.mrb[100].mxu0  ;;  %v14149_v34 = vpop.f32.mrb[3].mxu1  ;;  %14554 = vmatmul.mubr.msk.f32.gmra.mrb[164].mxu0 %vm1453_vm4, %v3544_v32  ;;  %14248 = vmatprep.mubr.msk.f32.mxu1 %vm16543_vm6, %v16542_v12  ;;  %v3557_v32 = vld [vmem:[#allocation4 + $0xb6] sm:$0xff] }
 0x210   : > { %v14380_v35 = vpop.f32.mrb[101].mxu0  ;;  %14556 = vmatprep.mubr.msk.f32.mxu0 %vm16543_vm6, %v16542_v12 }
 0x211   : > { %v17645_v35 = vld [vmem:[#allocation4 + $0xb0] sm:$0xff] }
 0x212   : > { %v17502_v36 = vpop.f32.mrb[4].mxu1  ;;  %14249 = vmatmul.mubr.msk.f32.gmra.mrb[68].mxu1 %vm1453_vm4, %v17504_v37 }
 0x213   : > { %v17506_v39 = vpop.f32.mrb[102].mxu0  ;;  %v14152_v40 = vpop.f32.mrb[5].mxu1  ;;  %14557 = vmatmul.mubr.msk.f32.gmra.mrb[166].mxu0 %vm1453_vm4, %v3545_v38  ;;  %14251 = vmatprep.mubr.msk.f32.mxu1 %vm16543_vm6, %v16542_v12  ;;  %v3558_v38 = vld [vmem:[#allocation4 + $0xbe] sm:$0xff] }
 0x214   : > { %v14383_v41 = vpop.f32.mrb[103].mxu0  ;;  %14559 = vmatprep.mubr.msk.f32.mxu0 %vm16543_vm6, %v16542_v12 }
 0x216   : > { %14252 = vmatmul.mubr.msk.f32.gmra.mrb[70].mxu1 %vm1453_vm4, %v17515_v52 }
 0x217   : > { %14560 = vmatmul.mubr.msk.f32.gmra.mrb[168].mxu0 %vm1453_vm4, %v3546_v42  ;;  %14254 = vmatprep.mubr.msk.f32.mxu1 %vm16543_vm6, %v16542_v12 }
 0x218   : > { %14562 = vmatprep.mubr.msk.f32.mxu0 %vm16543_vm6, %v16542_v12 }
 0x21a   : > { %v17524_v43 = vpop.f32.mrb[6].mxu1  ;;  %14255 = vmatmul.mubr.msk.f32.gmra.mrb[72].mxu1 %vm1453_vm4, %v17526_v44 }
 0x21b   : > { %v17528_v46 = vpop.f32.mrb[104].mxu0  ;;  %v14155_v47 = vpop.f32.mrb[7].mxu1  ;;  %14563 = vmatmul.mubr.msk.f32.gmra.mrb[170].mxu0 %vm1453_vm4, %v3547_v45  ;;  %14257 = vmatprep.mubr.msk.f32.mxu1 %vm16543_vm6, %v16542_v12  ;;  %v3559_v45 = vld [vmem:[#allocation4 + $0xc6] sm:$0xff] }
 0x21c   : > { %v14386_v48 = vpop.f32.mrb[105].mxu0  ;;  %14565 = vmatprep.mubr.msk.f32.mxu0 %vm16543_vm6, %v16542_v12 }
 0x21d   : > { %v17658_v48 = vld [vmem:[#allocation4 + $0xb8] sm:$0xff] }
 0x21e   : > { %v17537_v49 = vpop.f32.mrb[8].mxu1  ;;  %14258 = vmatmul.mubr.msk.f32.gmra.mrb[74].mxu1 %vm1453_vm4, %v17539_v50 }
 0x21f   : > { %v14158_v53 = vpop.f32.mrb[9].mxu1  ;;  %14566 = vmatmul.mubr.msk.f32.gmra.mrb[172].mxu0 %vm1453_vm4, %v3548_v51  ;;  %14260 = vmatprep.mubr.msk.f32.mxu1 %vm16543_vm6, %v16542_v12 }
 0x220   : > { %14568 = vmatprep.mubr.msk.f32.mxu0 %vm16543_vm6, %v16542_v12 }
 0x222   : > { %14261 = vmatmul.mubr.msk.f32.gmra.mrb[76].mxu1 %vm1453_vm4, %v17548_v54 }
 0x223   : > { %14569 = vmatmul.mubr.msk.f32.gmra.mrb[174].mxu0 %vm1453_vm4, %v3549_v55  ;;  %14263 = vmatprep.mubr.msk.f32.mxu1 %vm16543_vm6, %v16542_v12 }
 0x224   : > { %14571 = vmatprep.mubr.msk.f32.mxu0 %vm16543_vm6, %v16542_v12 }
 0x226   : > { %14264 = vmatmul.mubr.msk.f32.gmra.mrb[78].mxu1 %vm1453_vm4, %v17557_v56 }
 0x227   : > { %14572 = vmatmul.mubr.msk.f32.gmra.mrb[176].mxu0 %vm1453_vm4, %v3550_v57  ;;  %14266 = vmatprep.mubr.msk.f32.mxu1 %vm16543_vm6, %v16542_v12  ;;  %v3560_v57 = vld [vmem:[#allocation4 + $0xce] sm:$0xf] }
 0x228   : > { %14574 = vmatprep.mubr.msk.f32.mxu0 %vm16543_vm6, %v16542_v12 }
 0x22a   : > { %v17566_v58 = vpop.f32.mrb[10].mxu1  ;;  %14267 = vmatmul.mubr.msk.f32.gmra.mrb[80].mxu1 %vm1453_vm4, %v17568_v59 }
 0x22b   : > { %v17570_v61 = vpop.f32.mrb[106].mxu0  ;;  %v14161_v62 = vpop.f32.mrb[11].mxu1  ;;  %14575 = vmatmul.mubr.msk.f32.gmra.mrb[178].mxu0 %vm1453_vm4, %v3551_v60  ;;  %14269 = vmatprep.mubr.msk.f32.mxu1 %vm16543_vm6, %v16542_v12  ;;  %v2014_v60 = vld [vmem:[#allocation4 + $0xc0] sm:$0xf] }
 0x22c   : > { %v14389_v63 = vpop.f32.mrb[107].mxu0  ;;  %14577 = vmatprep.mubr.msk.f32.mxu0 %vm16543_vm6, %v16542_v12  ;;  %v3242_v62 = vld [vmem:[%s21413_s3 + $0x18] sm:$0x3f] }
 0x22e   : > { %14270 = vmatmul.mubr.msk.f32.gmra.mrb[82].mxu1 %vm1453_vm4, %v17579_v0 }
 0x22f   : > { %v17581_v2 = vpop.f32.mrb[108].mxu0  ;;  %14578 = vmatmul.mubr.msk.f32.gmra.mrb[180].mxu0 %vm1453_vm4, %v3552_v1  ;;  %14272 = vmatprep.mubr.msk.f32.mxu1 %vm16543_vm6, %v16542_v12  ;;  %v2579_v1 = vld [vmem:[#allocation4 + $0x2] sm:$0xff] }
 0x230   : > { %v14392_v3 = vpop.f32.mrb[109].mxu0  ;;  %14580 = vmatprep.mubr.msk.f32.mxu0 %vm16543_vm6, %v16542_v12 }
 0x232   : > { %14273 = vmatmul.mubr.msk.f32.gmra.mrb[84].mxu1 %vm1453_vm4, %v17590_v4 }
 0x233   : > { %14581 = vmatmul.mubr.msk.f32.gmra.mrb[182].mxu0 %vm1453_vm4, %v3553_v5  ;;  %14275 = vmatprep.mubr.msk.f32.mxu1 %vm16543_vm6, %v16542_v12 }
 0x234   : > { %14583 = vmatprep.mubr.msk.f32.mxu0 %vm16543_vm6, %v16542_v12 }
 0x236   : > { %v17599_v6 = vpop.f32.mrb[12].mxu1  ;;  %14276 = vmatmul.mubr.msk.f32.gmra.mrb[86].mxu1 %vm1453_vm4, %v17601_v7 }
 0x237   : > { %v17603_v9 = vpop.f32.mrb[110].mxu0  ;;  %v14164_v10 = vpop.f32.mrb[13].mxu1  ;;  %14584 = vmatmul.mubr.msk.f32.gmra.mrb[184].mxu0 %vm1453_vm4, %v3554_v8  ;;  %14278 = vmatprep.mubr.msk.f32.mxu1 %vm16543_vm6, %v16542_v12  ;;  %v4837_v8 = vld [vmem:[%s21413_s3 + $0x36] sm:$0x3f] }
 0x238   : > { %v14395_v11 = vpop.f32.mrb[111].mxu0  ;;  %14586 = vmatprep.mubr.msk.f32.mxu0 %vm16543_vm6, %v16542_v12 }
 0x23a   : > { %v17612_v13 = vpop.f32.mrb[14].mxu1  ;;  %14279 = vmatmul.mubr.msk.f32.gmra.mrb[88].mxu1 %vm1453_vm4, %v17614_v15 }
 0x23b   : > { %v17616_v19 = vpop.f32.mrb[112].mxu0  ;;  %v14167_v22 = vpop.f32.mrb[15].mxu1  ;;  %14587 = vmatmul.mubr.msk.f32.gmra.mrb[186].mxu0 %vm1453_vm4, %v3555_v17  ;;  %14281 = vmatprep.mubr.msk.f32.mxu1 %vm16543_vm6, %v16542_v12  ;;  %v2580_v17 = vld [vmem:[#allocation4 + $0xa] sm:$0xff] }
 0x23c   : > { %v14398_v24 = vpop.f32.mrb[113].mxu0  ;;  %14589 = vmatprep.mubr.msk.f32.mxu0 %vm16543_vm6, %v16542_v12  ;;  %v17705_v22 = vld [vmem:[#allocation4 + $0x12] sm:$0xff] }
 0x23d   : > { %v17727_v24 = vld [vmem:[#allocation4 + $0x22] sm:$0xff] }
 0x23e   : > { %14282 = vmatmul.mubr.msk.f32.gmra.mrb[90].mxu1 %vm1453_vm4, %v17625_v25 }
 0x23f   : > { %14590 = vmatmul.mubr.msk.f32.gmra.mrb[188].mxu0 %vm1453_vm4, %v3556_v27  ;;  %14284 = vmatprep.mubr.msk.f32.mxu1 %vm16543_vm6, %v16542_v12 }
 0x240   : > { %14592 = vmatprep.mubr.msk.f32.mxu0 %vm16543_vm6, %v16542_v12 }
 0x242   : > { %14285 = vmatmul.mubr.msk.f32.gmra.mrb[92].mxu1 %vm1453_vm4, %v17634_v29 }
 0x243   : > { %14593 = vmatmul.mubr.msk.f32.gmra.mrb[190].mxu0 %vm1453_vm4, %v3557_v32  ;;  %14287 = vmatprep.mubr.msk.f32.mxu1 %vm16543_vm6, %v16542_v12 }
 0x244   : > { %14595 = vmatprep.mubr.msk.f32.mxu0 %vm16543_vm6, %v16542_v12 }
 0x246   : > { %v17643_v34 = vpop.f32.mrb[16].mxu1  ;;  %14288 = vmatmul.mubr.msk.f32.gmra.mrb[94].mxu1 %vm1453_vm4, %v17645_v35 }
 0x247   : > { %v17647_v40 = vpop.f32.mrb[114].mxu0  ;;  %v14170_v41 = vpop.f32.mrb[17].mxu1  ;;  %14596 = vmatmul.mubr.msk.f32.gmra.mrb[192].mxu0 %vm1453_vm4, %v3558_v38  ;;  %14290 = vmatprep.mubr.msk.f32.mxu1 %vm16543_vm6, %v16542_v12  ;;  %v17739_v38 = vld [vmem:[#allocation4 + $0x2a] sm:$0xff] }
 0x248   : > { %v14401_v42 = vpop.f32.mrb[115].mxu0  ;;  %14598 = vmatprep.mubr.msk.f32.mxu0 %vm16543_vm6, %v16542_v12 }
 0x24a   : > { %v17656_v47 = vpop.f32.mrb[18].mxu1  ;;  %14291 = vmatmul.mubr.msk.f32.gmra.mrb[96].mxu1 %vm1453_vm4, %v17658_v48 }
 0x24b   : > { %v17660_v51 = vpop.f32.mrb[116].mxu0  ;;  %v14173_v53 = vpop.f32.mrb[19].mxu1  ;;  %14599 = vmatmul.mubr.msk.f32.gmra.mrb[194].mxu0 %vm1453_vm4, %v3559_v45  ;;  %14293 = vmatprep.mubr.msk.f32.mxu1 %vm16543_vm6, %v16542_v12  ;;  %v17763_v45 = vld [vmem:[#allocation4 + $0x3a] sm:$0xff] }
 0x24c   : > { %v14404_v55 = vpop.f32.mrb[117].mxu0  ;;  %14601 = vmatprep.mubr.msk.f32.mxu0 %vm16543_vm6, %v16542_v12 }
 0x24e   : > { %14294 = vmatmul.mubr.msk.f32.gmra.mrb[98].mxu1 %vm1453_vm4, %v2014_v60  ;;  %v17777_v60 = vld [vmem:[#allocation4 + $0x42] sm:$0xff] }
 0x24f   : > { %14602 = vmatmul.mubr.msk.f32.gmra.mrb[196].mxu0 %vm1453_vm4, %v3560_v57  ;;  %14298 = vmatprep.mubr.msk.f32.mxu1 %vm16543_vm6, %v16542_v12 }
 0x250   : > { %14683 = vmatprep.mubr.msk.f32.mxu0 %vm16543_vm6, %v16542_v12 }
 0x252   : > { %v17678_v63 = vpop.f32.mrb[20].mxu1  ;;  %14299 = vmatmul.mubr.msk.f32.vlgmr.msra.gmra.mrb[100].mxu1 %vm1453_vm4, %v2579_v1 }
 0x253   : > { %v17680_v3 = vpop.f32.mrb[118].mxu0  ;;  %v14176_v5 = vpop.f32.mrb[21].mxu1  ;;  %14684 = vmatmul.mubr.msk.f32.vlgmr.msra.gmra.mrb[198].mxu0 %vm1453_vm4, %v17431_v14  ;;  %14451 = vmatpush3.msk.msra.mxu1 %vm2117_vm5, %v3242_v62 }
 0x254   : > { %v14407_v10 = vpop.f32.mrb[119].mxu0  ;;  %14301 = vmatprep.mubr.msk.f32.mxu1 %vm16543_vm6, %v16542_v12  ;;  %14686 = vmatprep.mubr.msk.f32.mxu0 %vm16543_vm6, %v16542_v12  ;;  %v17789_v5 = vld [vmem:[#allocation4 + $0x4a] sm:$0xff] }
 0x255   : > { %14604 = vmatprep.subr.mxu1 %v16542_v12  ;;  %14836 = vmatpush3.msk.msra.mxu0 %vm2117_vm5, %v4837_v8  ;;  %v17811_v8 = vld [vmem:[#allocation4 + $0x5a] sm:$0xff] }
 0x256   : > { %v17694_v11 = vpop.f32.mrb[22].mxu1  ;;  %14302 = vmatmul.mubr.msk.f32.gmra.mrb[102].mxu1 %vm1453_vm4, %v2580_v17  ;;  %14989 = vmatprep.subr.mxu0 %v16542_v12 }
 0x257   : > { %v14179_v14 = vpop.f32.mrb[23].mxu1  ;;  %14687 = vmatmul.mubr.msk.f32.gmra.mrb[200].mxu0 %vm1453_vm4, %v17440_v16  ;;  %14304 = vmatprep.mubr.msk.f32.mxu1 %vm16543_vm6, %v16542_v12  ;;  %v17715_v16 = vld [vmem:[#allocation4 + $0x1a] sm:$0xff] }
 0x258   : > { %14689 = vmatprep.mubr.msk.f32.mxu0 %vm16543_vm6, %v16542_v12 }
 0x25a   : > { %14305 = vmatmul.mubr.msk.f32.gmra.mrb[104].mxu1 %vm1453_vm4, %v17705_v22 }
 0x25b   : > { %14690 = vmatmul.mubr.msk.f32.gmra.mrb[202].mxu0 %vm1453_vm4, %v17449_v18  ;;  %14307 = vmatprep.mubr.msk.f32.mxu1 %vm16543_vm6, %v16542_v12 }
 0x25c   : > { %14692 = vmatprep.mubr.msk.f32.mxu0 %vm16543_vm6, %v16542_v12 }
 0x25e   : > { %14308 = vmatmul.mubr.msk.f32.gmra.mrb[106].mxu1 %vm1453_vm4, %v17715_v16 }
 0x25f   : > { %14693 = vmatmul.mubr.msk.f32.gmra.mrb[204].mxu0 %vm1453_vm4, %v17460_v21  ;;  %14310 = vmatprep.mubr.msk.f32.mxu1 %vm16543_vm6, %v16542_v12 }
 0x260   : > { %14695 = vmatprep.mubr.msk.f32.mxu0 %vm16543_vm6, %v16542_v12 }
 0x262   : > { %v17725_v18 = vpop.f32.mrb[24].mxu1  ;;  %14311 = vmatmul.mubr.msk.f32.gmra.mrb[108].mxu1 %vm1453_vm4, %v17727_v24 }
 0x263   : > { %v17729_v27 = vpop.f32.mrb[120].mxu0  ;;  %v14182_v32 = vpop.f32.mrb[25].mxu1  ;;  %14696 = vmatmul.mubr.msk.f32.gmra.mrb[206].mxu0 %vm1453_vm4, %v17471_v26  ;;  %14313 = vmatprep.mubr.msk.f32.mxu1 %vm16543_vm6, %v16542_v12  ;;  %v17751_v26 = vld [vmem:[#allocation4 + $0x32] sm:$0xff] }
 0x264   : > { %v14410_v21 = vpop.f32.mrb[121].mxu0  ;;  %14698 = vmatprep.mubr.msk.f32.mxu0 %vm16543_vm6, %v16542_v12  ;;  %v17825_v32 = vld [vmem:[#allocation4 + $0x62] sm:$0xff] }
 0x266   : > { %14314 = vmatmul.mubr.msk.f32.gmra.mrb[110].mxu1 %vm1453_vm4, %v17739_v38 }
 0x267   : > { %v17741_v41 = vpop.f32.mrb[122].mxu0  ;;  %14699 = vmatmul.mubr.msk.f32.gmra.mrb[208].mxu0 %vm1453_vm4, %v17480_v28  ;;  %14316 = vmatprep.mubr.msk.f32.mxu1 %vm16543_vm6, %v16542_v12 }
 0x268   : > { %v14413_v42 = vpop.f32.mrb[123].mxu0  ;;  %14701 = vmatprep.mubr.msk.f32.mxu0 %vm16543_vm6, %v16542_v12 }
 0x26a   : > { %14317 = vmatmul.mubr.msk.f32.gmra.mrb[112].mxu1 %vm1453_vm4, %v17751_v26 }
 0x26b   : > { %14702 = vmatmul.mubr.msk.f32.gmra.mrb[210].mxu0 %vm1453_vm4, %v17491_v31  ;;  %14319 = vmatprep.mubr.msk.f32.mxu1 %vm16543_vm6, %v16542_v12 }
 0x26c   : > { %14704 = vmatprep.mubr.msk.f32.mxu0 %vm16543_vm6, %v16542_v12 }
 0x26e   : > { %v17761_v28 = vpop.f32.mrb[26].mxu1  ;;  %14320 = vmatmul.mubr.msk.f32.gmra.mrb[114].mxu1 %vm1453_vm4, %v17763_v45 }
 0x26f   : > { %v17765_v53 = vpop.f32.mrb[124].mxu0  ;;  %v14185_v55 = vpop.f32.mrb[27].mxu1  ;;  %14705 = vmatmul.mubr.msk.f32.gmra.mrb[212].mxu0 %vm1453_vm4, %v17504_v37  ;;  %14322 = vmatprep.mubr.msk.f32.mxu1 %vm16543_vm6, %v16542_v12 }
 0x270   : > { %v14416_v31 = vpop.f32.mrb[125].mxu0  ;;  %14707 = vmatprep.mubr.msk.f32.mxu0 %vm16543_vm6, %v16542_v12  ;;  %v17837_v55 = vld [vmem:[#allocation4 + $0x6a] sm:$0xff] }
 0x271   : > { %v17847_v31 = vld [vmem:[#allocation4 + $0x72] sm:$0xff] }
 0x272   : > { %v17775_v57 = vpop.f32.mrb[28].mxu1  ;;  %14323 = vmatmul.mubr.msk.f32.gmra.mrb[116].mxu1 %vm1453_vm4, %v17777_v60 }
 0x273   : > { %v17779_v62 = vpop.f32.mrb[126].mxu0  ;;  %v14188_v1 = vpop.f32.mrb[29].mxu1  ;;  %14708 = vmatmul.mubr.msk.f32.gmra.mrb[214].mxu0 %vm1453_vm4, %v17515_v52  ;;  %14325 = vmatprep.mubr.msk.f32.mxu1 %vm16543_vm6, %v16542_v12  ;;  %v17799_v52 = vld [vmem:[#allocation4 + $0x52] sm:$0xff] }
 0x274   : > { %v14419_v37 = vpop.f32.mrb[127].mxu0  ;;  %14710 = vmatprep.mubr.msk.f32.mxu0 %vm16543_vm6, %v16542_v12 }
 0x276   : > { %14326 = vmatmul.mubr.msk.f32.gmra.mrb[118].mxu1 %vm1453_vm4, %v17789_v5 }
 0x277   : > { %14711 = vmatmul.mubr.msk.f32.gmra.mrb[216].mxu0 %vm1453_vm4, %v17526_v44  ;;  %14328 = vmatprep.mubr.msk.f32.mxu1 %vm16543_vm6, %v16542_v12 }
 0x278   : > { %14713 = vmatprep.mubr.msk.f32.mxu0 %vm16543_vm6, %v16542_v12 }
 0x27a   : > { %14329 = vmatmul.mubr.msk.f32.gmra.mrb[120].mxu1 %vm1453_vm4, %v17799_v52 }
 0x27b   : > { %14714 = vmatmul.mubr.msk.f32.gmra.mrb[218].mxu0 %vm1453_vm4, %v17539_v50  ;;  %14331 = vmatprep.mubr.msk.f32.mxu1 %vm16543_vm6, %v16542_v12 }
 0x27c   : > { %14716 = vmatprep.mubr.msk.f32.mxu0 %vm16543_vm6, %v16542_v12 }
 0x27e   : > { %v17809_v44 = vpop.f32.mrb[30].mxu1  ;;  %14332 = vmatmul.mubr.msk.f32.gmra.mrb[122].mxu1 %vm1453_vm4, %v17811_v8 }
 0x27f   : > { %v17813_v10 = vpop.f32.mrb[128].mxu0  ;;  %v14191_v17 = vpop.f32.mrb[31].mxu1  ;;  %14717 = vmatmul.mubr.msk.f32.gmra.mrb[220].mxu0 %vm1453_vm4, %v17548_v54  ;;  %14334 = vmatprep.mubr.msk.f32.mxu1 %vm16543_vm6, %v16542_v12 }
 0x280   : > { %v14422_v50 = vpop.f32.mrb[129].mxu0  ;;  %14719 = vmatprep.mubr.msk.f32.mxu0 %vm16543_vm6, %v16542_v12 }
 0x281   : > { %v17857_v50 = vld [vmem:[#allocation4 + $0x7a] sm:$0xff] }
 0x282   : > { %v17823_v14 = vpop.f32.mrb[32].mxu1  ;;  %14335 = vmatmul.mubr.msk.f32.gmra.mrb[124].mxu1 %vm1453_vm4, %v17825_v32 }
 0x283   : > { %v17827_v21 = vpop.f32.mrb[130].mxu0  ;;  %v14194_v42 = vpop.f32.mrb[33].mxu1  ;;  %14720 = vmatmul.mubr.msk.f32.gmra.mrb[222].mxu0 %vm1453_vm4, %v17557_v56  ;;  %14337 = vmatprep.mubr.msk.f32.mxu1 %vm16543_vm6, %v16542_v12 }
 0x284   : > { %21429 = vst [vmem:[#allocation10_spill] sm:$0xff] %v17827_v21  ;;  %v14425_v54 = vpop.f32.mrb[131].mxu0  ;;  %14722 = vmatprep.mubr.msk.f32.mxu0 %vm16543_vm6, %v16542_v12 }
 0x285   : > { %v17887_v54 = vld [vmem:[#allocation4 + $0x92] sm:$0xff] }
 0x286   : > { %14338 = vmatmul.mubr.msk.f32.gmra.mrb[126].mxu1 %vm1453_vm4, %v17837_v55 }
 0x287   : > { %14723 = vmatmul.mubr.msk.f32.gmra.mrb[224].mxu0 %vm1453_vm4, %v17568_v59  ;;  %14340 = vmatprep.mubr.msk.f32.mxu1 %vm16543_vm6, %v16542_v12 }
 0x288   : > { %14725 = vmatprep.mubr.msk.f32.mxu0 %vm16543_vm6, %v16542_v12 }
 0x28a   : > { %v2272_v56 = vpop.f32.mrb[34].mxu1  ;;  %14341 = vmatmul.mubr.msk.f32.gmra.mrb[128].mxu1 %vm1453_vm4, %v17847_v31 }
 0x28b   : > { %v3153_v1 = vpop.f32.mrb[132].mxu0  ;;  %v14197_v37 = vpop.f32.mrb[35].mxu1  ;;  %14726 = vmatmul.mubr.msk.f32.gmra.mrb[226].mxu0 %vm1453_vm4, %v17579_v0  ;;  %14343 = vmatprep.mubr.msk.f32.mxu1 %vm16543_vm6, %v16542_v12  ;;  %v17867_v0 = vld [vmem:[#allocation4 + $0x82] sm:$0xff] }
 0x28c   : > { %v14428_v17 = vpop.f32.mrb[133].mxu0  ;;  %14728 = vmatprep.mubr.msk.f32.mxu0 %vm16543_vm6, %v16542_v12 }
 0x28e   : > { %v2277_v59 = vpop.f32.mrb[36].mxu1  ;;  %14344 = vmatmul.mubr.msk.f32.gmra.mrb[130].mxu1 %vm1453_vm4, %v17857_v50 }
 0x28f   : > { %v14200_v42 = vpop.f32.mrb[37].mxu1  ;;  %14729 = vmatmul.mubr.msk.f32.gmra.mrb[228].mxu0 %vm1453_vm4, %v17590_v4  ;;  %14346 = vmatprep.mubr.msk.f32.mxu1 %vm16543_vm6, %v16542_v12  ;;  %v17877_v4 = vld [vmem:[#allocation4 + $0x8a] sm:$0xff] }
 0x290   : > { %14731 = vmatprep.mubr.msk.f32.mxu0 %vm16543_vm6, %v16542_v12 }
 0x292   : > { %14347 = vmatmul.mubr.msk.f32.gmra.mrb[132].mxu1 %vm1453_vm4, %v17867_v0 }
 0x293   : > { %14732 = vmatmul.mubr.msk.f32.gmra.mrb[230].mxu0 %vm1453_vm4, %v17601_v7  ;;  %14349 = vmatprep.mubr.msk.f32.mxu1 %vm16543_vm6, %v16542_v12 }
 0x294   : > { %14734 = vmatprep.mubr.msk.f32.mxu0 %vm16543_vm6, %v16542_v12 }
 0x296   : > { %14350 = vmatmul.mubr.msk.f32.gmra.mrb[134].mxu1 %vm1453_vm4, %v17877_v4 }
 0x297   : > { %14735 = vmatmul.mubr.msk.f32.gmra.mrb[232].mxu0 %vm1453_vm4, %v17614_v15  ;;  %14352 = vmatprep.mubr.msk.f32.mxu1 %vm16543_vm6, %v16542_v12  ;;  %v17897_v15 = vld [vmem:[#allocation4 + $0x9a] sm:$0xff] }
 0x298   : > { %14737 = vmatprep.mubr.msk.f32.mxu0 %vm16543_vm6, %v16542_v12 }
 0x299   : > { %v2282_v7 = vpop.f32.mrb[38].mxu1 }
 0x29a   : > { %v3158_v56 = vpop.f32.mrb[134].mxu0  ;;  %v14203_v1 = vpop.f32.mrb[39].mxu1  ;;  %14353 = vmatmul.mubr.msk.f32.gmra.mrb[136].mxu1 %vm1453_vm4, %v17887_v54  ;;  %v17917_v7 = vld [vmem:[#allocation4 + $0xaa] sm:$0xff] }
 0x29b   : > { %14738 = vmatmul.mubr.msk.f32.gmra.mrb[234].mxu0 %vm1453_vm4, %v17625_v25  ;;  %v14431_v37 = vpop.f32.mrb[135].mxu0  ;;  %14355 = vmatprep.mubr.msk.f32.mxu1 %vm16543_vm6, %v16542_v12  ;;  %v17907_v25 = vld [vmem:[#allocation4 + $0xa2] sm:$0xff] }
 0x29c   : > { %14740 = vmatprep.mubr.msk.f32.mxu0 %vm16543_vm6, %v16542_v12 }
 0x29e   : > { %v3163_v17 = vpop.f32.mrb[136].mxu0  ;;  %14356 = vmatmul.mubr.msk.f32.gmra.mrb[138].mxu1 %vm1453_vm4, %v17897_v15 }
 0x29f   : > { %14741 = vmatmul.mubr.msk.f32.gmra.mrb[236].mxu0 %vm1453_vm4, %v17634_v29  ;;  %v14434_v59 = vpop.f32.mrb[137].mxu0  ;;  %14358 = vmatprep.mubr.msk.f32.mxu1 %vm16543_vm6, %v16542_v12  ;;  %v17927_v17 = vld [vmem:[#allocation4 + $0xb2] sm:$0xff] }
 0x2a0   : > { %14743 = vmatprep.mubr.msk.f32.mxu0 %vm16543_vm6, %v16542_v12  ;;  %v4196_v59 = vld [vmem:[#allocation4 + $0xc0] sm:$0xff] }
 0x2a2   : > { %14359 = vmatmul.mubr.msk.f32.gmra.mrb[140].mxu1 %vm1453_vm4, %v17907_v25 }
 0x2a3   : > { %14744 = vmatmul.mubr.msk.f32.gmra.mrb[238].mxu0 %vm1453_vm4, %v17645_v35  ;;  %14361 = vmatprep.mubr.msk.f32.mxu1 %vm16543_vm6, %v16542_v12 }
 0x2a4   : > { %14746 = vmatprep.mubr.msk.f32.mxu0 %vm16543_vm6, %v16542_v12 }
 0x2a5   : > { %v2287_v29 = vpop.f32.mrb[40].mxu1 }
 0x2a6   : > { %v3168_v42 = vpop.f32.mrb[138].mxu0  ;;  %v14206_v56 = vpop.f32.mrb[41].mxu1  ;;  %14362 = vmatmul.mubr.msk.f32.gmra.mrb[142].mxu1 %vm1453_vm4, %v17917_v7 }
 0x2a7   : > { %v14437_v1 = vpop.f32.mrb[139].mxu0  ;;  %14747 = vmatmul.mubr.msk.f32.gmra.mrb[240].mxu0 %vm1453_vm4, %v17658_v48  ;;  %14364 = vmatprep.mubr.msk.f32.mxu1 %vm16543_vm6, %v16542_v12  ;;  %v4197_v48 = vld [vmem:[#allocation4 + $0xc8] sm:$0xff]  ;;  %v17936_v56 = vld [vmem:[#allocation4 + $0xba] sm:$0xff] }
 0x2a8   : > { %14749 = vmatprep.mubr.msk.f32.mxu0 %vm16543_vm6, %v16542_v12  ;;  %v4198_v1 = vld [vmem:[#allocation4 + $0xd0] sm:$0xf] }
 0x2a9   : > { %v2292_v35 = vpop.f32.mrb[42].mxu1 }
 0x2aa   : > { %v3173_v37 = vpop.f32.mrb[140].mxu0  ;;  %v14209_v29 = vpop.f32.mrb[43].mxu1  ;;  %14365 = vmatmul.mubr.msk.f32.gmra.mrb[144].mxu1 %vm1453_vm4, %v17927_v17  ;;  %v2603_v35 = vld [vmem:[#allocation4 + $0xc2] sm:$0xf] }
 0x2ab   : > { %v14440_v42 = vpop.f32.mrb[141].mxu0  ;;  %14750 = vmatmul.mubr.msk.f32.gmra.mrb[242].mxu0 %vm1453_vm4, %v4196_v59  ;;  %14367 = vmatprep.mubr.msk.f32.mxu1 %vm16543_vm6, %v16542_v12  ;;  %v3880_v37 = vld [vmem:[%s21413_s3 + $0x24] sm:$0x3f] }
 0x2ac   : > { %14752 = vmatprep.mubr.msk.f32.mxu0 %vm16543_vm6, %v16542_v12  ;;  %v3217_v42 = vld [vmem:[#allocation4 + $0x4] sm:$0xff] }
 0x2ae   : > { %14368 = vmatmul.mubr.msk.f32.gmra.mrb[146].mxu1 %vm1453_vm4, %v17936_v56 }
 0x2af   : > { %14753 = vmatmul.mubr.msk.f32.gmra.mrb[244].mxu0 %vm1453_vm4, %v4197_v48  ;;  %14370 = vmatprep.mubr.msk.f32.mxu1 %vm16543_vm6, %v16542_v12 }
 0x2b0   : > { %14755 = vmatprep.mubr.msk.f32.mxu0 %vm16543_vm6, %v16542_v12 }
 0x2b2   : > { %14371 = vmatmul.mubr.msk.f32.gmra.mrb[148].mxu1 %vm1453_vm4, %v2603_v35 }
 0x2b3   : > { %14756 = vmatmul.mubr.msk.f32.gmra.mrb[246].mxu0 %vm1453_vm4, %v4198_v1  ;;  %14452 = vmatprep.mubr.msk.f32.mxu1 %vm16543_vm6, %v16542_v12  ;;  %v5475_v1 = vld [vmem:[%s21413_s3 + $0x42] sm:$0x3f] }
 0x2b4   : > { %14837 = vmatprep.mubr.msk.f32.mxu0 %vm16543_vm6, %v16542_v12 }
 0x2b5   : > { %v2297_v59 = vpop.f32.mrb[44].mxu1 }
 0x2b6   : > { %v3178_v29 = vpop.f32.mrb[142].mxu0  ;;  %v14212_v48 = vpop.f32.mrb[45].mxu1  ;;  %14453 = vmatmul.mubr.msk.f32.vlgmr.msra.gmra.mrb[150].mxu1 %vm1453_vm4, %v3217_v42  ;;  %v3218_v59 = vld [vmem:[#allocation4 + $0xc] sm:$0xff] }
 0x2b7   : > { %v14443_v21 = vpop.f32.mrb[143].mxu0  ;;  %14838 = vmatmul.mubr.msk.f32.vlgmr.msra.gmra.mrb[248].mxu0 %vm1453_vm4, %v17705_v22  ;;  %14605 = vmatpush3.msk.msra.mxu1 %vm2117_vm5, %v3880_v37  ;;  %v3219_v48 = vld [vmem:[#allocation4 + $0x14] sm:$0xff] }
 0x2b8   : > { %14455 = vmatprep.mubr.msk.f32.mxu1 %vm16543_vm6, %v16542_v12  ;;  %14840 = vmatprep.mubr.msk.f32.mxu0 %vm16543_vm6, %v16542_v12 }
 0x2b9   : > { %14758 = vmatprep.subr.mxu1 %v16542_v12  ;;  %v2302_v21 = vpop.f32.mrb[46].mxu1  ;;  %14990 = vmatpush3.msk.msra.mxu0 %vm2117_vm5, %v5475_v1 }
 0x2ba   : > { %v3183_v35 = vpop.f32.mrb[144].mxu0  ;;  %v14215_v22 = vpop.f32.mrb[47].mxu1  ;;  %14456 = vmatmul.mubr.msk.f32.gmra.mrb[152].mxu1 %vm1453_vm4, %v3218_v59  ;;  %15143 = vmatprep.subr.mxu0 %v16542_v12  ;;  %v3220_v59 = vld [vmem:[#allocation4 + $0x1c] sm:$0xff] }
 0x2bb   : > { %v14446_v29 = vpop.f32.mrb[145].mxu0  ;;  %14841 = vmatmul.mubr.msk.f32.gmra.mrb[250].mxu0 %vm1453_vm4, %v17715_v16  ;;  %14458 = vmatprep.mubr.msk.f32.mxu1 %vm16543_vm6, %v16542_v12 }
 0x2bc   : > { %14843 = vmatprep.mubr.msk.f32.mxu0 %vm16543_vm6, %v16542_v12 }
 0x2bd   : > { %v2307_v37 = vpop.f32.mrb[48].mxu1 }
 0x2be   : > { %v3188_v42 = vpop.f32.mrb[146].mxu0  ;;  %v14218_v21 = vpop.f32.mrb[49].mxu1  ;;  %14459 = vmatmul.mubr.msk.f32.gmra.mrb[154].mxu1 %vm1453_vm4, %v3219_v48  ;;  %v3221_v48 = vld [vmem:[#allocation4 + $0x24] sm:$0xff] }
 0x2bf   : > { %v14449_v1 = vpop.f32.mrb[147].mxu0  ;;  %14844 = vmatmul.mubr.msk.f32.gmra.mrb[252].mxu0 %vm1453_vm4, %v17727_v24  ;;  %14461 = vmatprep.mubr.msk.f32.mxu1 %vm16543_vm6, %v16542_v12 }
 0x2c0   : > { %14846 = vmatprep.mubr.msk.f32.mxu0 %vm16543_vm6, %v16542_v12 }
 0x2c1   : > { %v2455_v16 = vpop.f32.mrb[50].mxu1 }
 0x2c2   : > { %v17982_v35 = vpop.f32.mrb[148].mxu0  ;;  %v17985_v22 = vadd.f32 %v2455_v16, %v17458_v20  ;;  %v14223_v29 = vpop.f32.mrb[51].mxu1  ;;  %14462 = vmatmul.mubr.msk.f32.gmra.mrb[156].mxu1 %vm1453_vm4, %v3220_v59  ;;  %v3222_v59 = vld [vmem:[#allocation4 + $0x2c] sm:$0xff] }
 0x2c3   : > { %v14531_v37 = vpop.f32.mrb[149].mxu0  ;;  %14847 = vmatmul.mubr.msk.f32.gmra.mrb[254].mxu0 %vm1453_vm4, %v17739_v38  ;;  %14464 = vmatprep.mubr.msk.f32.mxu1 %vm16543_vm6, %v16542_v12 }
 0x2c4   : > { %14849 = vmatprep.mubr.msk.f32.mxu0 %vm16543_vm6, %v16542_v12 }
 0x2c5   : > { %v2460_v24 = vpop.f32.mrb[52].mxu1 }
 0x2c6   : > { %v17994_v42 = vpop.f32.mrb[150].mxu0  ;;  %v17997_v20 = vadd.f32 %v2460_v24, %v17489_v30  ;;  %v14226_v21 = vpop.f32.mrb[53].mxu1  ;;  %14465 = vmatmul.mubr.msk.f32.gmra.mrb[158].mxu1 %vm1453_vm4, %v3221_v48  ;;  %v3223_v48 = vld [vmem:[#allocation4 + $0x34] sm:$0xff] }
 0x2c7   : > { %v14534_v1 = vpop.f32.mrb[151].mxu0  ;;  %14850 = vmatmul.mubr.msk.f32.gmra.mrb[0].mxu0 %vm1453_vm4, %v17751_v26  ;;  %14467 = vmatprep.mubr.msk.f32.mxu1 %vm16543_vm6, %v16542_v12 }
 0x2c8   : > { %14852 = vmatprep.mubr.msk.f32.mxu0 %vm16543_vm6, %v16542_v12 }
 0x2c9   : > { %v2465_v38 = vpop.f32.mrb[54].mxu1 }
 0x2ca   : > { %v18006_v16 = vpop.f32.mrb[152].mxu0  ;;  %v18009_v30 = vadd.f32 %v2465_v38, %v17502_v36  ;;  %v14229_v29 = vpop.f32.mrb[55].mxu1  ;;  %14468 = vmatmul.mubr.msk.f32.gmra.mrb[160].mxu1 %vm1453_vm4, %v3222_v59  ;;  %v3224_v59 = vld [vmem:[#allocation4 + $0x3c] sm:$0xff] }
 0x2cb   : > { %v14537_v37 = vpop.f32.mrb[153].mxu0  ;;  %14853 = vmatmul.mubr.msk.f32.gmra.mrb[2].mxu0 %vm1453_vm4, %v17763_v45  ;;  %14470 = vmatprep.mubr.msk.f32.mxu1 %vm16543_vm6, %v16542_v12 }
 0x2cc   : > { %14855 = vmatprep.mubr.msk.f32.mxu0 %vm16543_vm6, %v16542_v12 }
 0x2cd   : > { %v2470_v26 = vpop.f32.mrb[56].mxu1 }
 0x2ce   : > { %v18018_v24 = vpop.f32.mrb[154].mxu0  ;;  %v18021_v36 = vadd.f32 %v2470_v26, %v17524_v43  ;;  %v14232_v21 = vpop.f32.mrb[57].mxu1  ;;  %14471 = vmatmul.mubr.msk.f32.gmra.mrb[162].mxu1 %vm1453_vm4, %v3223_v48  ;;  %v3225_v48 = vld [vmem:[#allocation4 + $0x44] sm:$0xff] }
 0x2cf   : > { %v14540_v1 = vpop.f32.mrb[155].mxu0  ;;  %14856 = vmatmul.mubr.msk.f32.gmra.mrb[4].mxu0 %vm1453_vm4, %v17777_v60  ;;  %14473 = vmatprep.mubr.msk.f32.mxu1 %vm16543_vm6, %v16542_v12 }
 0x2d0   : > { %14858 = vmatprep.mubr.msk.f32.mxu0 %vm16543_vm6, %v16542_v12 }
 0x2d1   : > { %v2475_v45 = vpop.f32.mrb[58].mxu1 }
 0x2d2   : > { %v18030_v38 = vpop.f32.mrb[156].mxu0  ;;  %v18033_v43 = vadd.f32 %v2475_v45, %v17537_v49  ;;  %v14235_v29 = vpop.f32.mrb[59].mxu1  ;;  %14474 = vmatmul.mubr.msk.f32.gmra.mrb[164].mxu1 %vm1453_vm4, %v3224_v59  ;;  %v3226_v59 = vld [vmem:[#allocation4 + $0x4c] sm:$0xff] }
 0x2d3   : > { %v14543_v37 = vpop.f32.mrb[157].mxu0  ;;  %14859 = vmatmul.mubr.msk.f32.gmra.mrb[6].mxu0 %vm1453_vm4, %v17789_v5  ;;  %14476 = vmatprep.mubr.msk.f32.mxu1 %vm16543_vm6, %v16542_v12 }
 0x2d4   : > { %14861 = vmatprep.mubr.msk.f32.mxu0 %vm16543_vm6, %v16542_v12 }
 0x2d5   : > { %v2480_v60 = vpop.f32.mrb[60].mxu1 }
 0x2d6   : > { %v18042_v26 = vpop.f32.mrb[158].mxu0  ;;  %v18045_v49 = vadd.f32 %v2480_v60, %v17566_v58  ;;  %v14238_v21 = vpop.f32.mrb[61].mxu1  ;;  %14477 = vmatmul.mubr.msk.f32.gmra.mrb[166].mxu1 %vm1453_vm4, %v3225_v48  ;;  %v3227_v48 = vld [vmem:[#allocation4 + $0x54] sm:$0xff] }
 0x2d7   : > { %v14546_v1 = vpop.f32.mrb[159].mxu0  ;;  %14862 = vmatmul.mubr.msk.f32.gmra.mrb[8].mxu0 %vm1453_vm4, %v17799_v52  ;;  %14479 = vmatprep.mubr.msk.f32.mxu1 %vm16543_vm6, %v16542_v12 }
 0x2d8   : > { %14864 = vmatprep.mubr.msk.f32.mxu0 %vm16543_vm6, %v16542_v12 }
 0x2d9   : > { %v2485_v5 = vpop.f32.mrb[62].mxu1 }
 0x2da   : > { %v18054_v45 = vpop.f32.mrb[160].mxu0  ;;  %v18057_v58 = vadd.f32 %v2485_v5, %v17599_v6  ;;  %v14241_v29 = vpop.f32.mrb[63].mxu1  ;;  %14480 = vmatmul.mubr.msk.f32.gmra.mrb[168].mxu1 %vm1453_vm4, %v3226_v59  ;;  %v3228_v59 = vld [vmem:[#allocation4 + $0x5c] sm:$0xff] }
 0x2db   : > { %v14549_v37 = vpop.f32.mrb[161].mxu0  ;;  %14865 = vmatmul.mubr.msk.f32.gmra.mrb[10].mxu0 %vm1453_vm4, %v17811_v8  ;;  %14482 = vmatprep.mubr.msk.f32.mxu1 %vm16543_vm6, %v16542_v12 }
 0x2dc   : > { %14867 = vmatprep.mubr.msk.f32.mxu0 %vm16543_vm6, %v16542_v12 }
 0x2dd   : > { %v2490_v52 = vpop.f32.mrb[64].mxu1 }
 0x2de   : > { %v18066_v60 = vpop.f32.mrb[162].mxu0  ;;  %v18069_v6 = vadd.f32 %v2490_v52, %v17612_v13  ;;  %v14244_v21 = vpop.f32.mrb[65].mxu1  ;;  %14483 = vmatmul.mubr.msk.f32.gmra.mrb[170].mxu1 %vm1453_vm4, %v3227_v48  ;;  %v3229_v48 = vld [vmem:[#allocation4 + $0x64] sm:$0xff] }
 0x2df   : > { %v14552_v1 = vpop.f32.mrb[163].mxu0  ;;  %14868 = vmatmul.mubr.msk.f32.gmra.mrb[12].mxu0 %vm1453_vm4, %v17825_v32  ;;  %14485 = vmatprep.mubr.msk.f32.mxu1 %vm16543_vm6, %v16542_v12 }
 0x2e0   : > { %14870 = vmatprep.mubr.msk.f32.mxu0 %vm16543_vm6, %v16542_v12 }
 0x2e1   : > { %v2495_v8 = vpop.f32.mrb[66].mxu1 }
 0x2e2   : > { %v18078_v5 = vpop.f32.mrb[164].mxu0  ;;  %v18081_v13 = vadd.f32 %v2495_v8, %v17643_v34  ;;  %v14247_v29 = vpop.f32.mrb[67].mxu1  ;;  %14486 = vmatmul.mubr.msk.f32.gmra.mrb[172].mxu1 %vm1453_vm4, %v3228_v59  ;;  %v3230_v59 = vld [vmem:[#allocation4 + $0x6c] sm:$0xff] }
 0x2e3   : > { %v14555_v37 = vpop.f32.mrb[165].mxu0  ;;  %14871 = vmatmul.mubr.msk.f32.gmra.mrb[14].mxu0 %vm1453_vm4, %v17837_v55  ;;  %14488 = vmatprep.mubr.msk.f32.mxu1 %vm16543_vm6, %v16542_v12 }
 0x2e4   : > { %14873 = vmatprep.mubr.msk.f32.mxu0 %vm16543_vm6, %v16542_v12 }
 0x2e5   : > { %v2500_v32 = vpop.f32.mrb[68].mxu1 }
 0x2e6   : > { %v18090_v52 = vpop.f32.mrb[166].mxu0  ;;  %v18093_v34 = vadd.f32 %v2500_v32, %v17656_v47  ;;  %v14250_v21 = vpop.f32.mrb[69].mxu1  ;;  %14489 = vmatmul.mubr.msk.f32.gmra.mrb[174].mxu1 %vm1453_vm4, %v3229_v48  ;;  %v3231_v48 = vld [vmem:[#allocation4 + $0x74] sm:$0xff] }
 0x2e7   : > { %v14558_v1 = vpop.f32.mrb[167].mxu0  ;;  %14874 = vmatmul.mubr.msk.f32.gmra.mrb[16].mxu0 %vm1453_vm4, %v17847_v31  ;;  %14491 = vmatprep.mubr.msk.f32.mxu1 %vm16543_vm6, %v16542_v12 }
 0x2e8   : > { %14876 = vmatprep.mubr.msk.f32.mxu0 %vm16543_vm6, %v16542_v12 }
 0x2e9   : > { %v2505_v55 = vpop.f32.mrb[70].mxu1 }
 0x2ea   : > { %v18102_v8 = vpop.f32.mrb[168].mxu0  ;;  %v18105_v47 = vadd.f32 %v2505_v55, %v17678_v63  ;;  %v14253_v29 = vpop.f32.mrb[71].mxu1  ;;  %14492 = vmatmul.mubr.msk.f32.gmra.mrb[176].mxu1 %vm1453_vm4, %v3230_v59  ;;  %v3232_v59 = vld [vmem:[#allocation4 + $0x7c] sm:$0xff] }
 0x2eb   : > { %v14561_v37 = vpop.f32.mrb[169].mxu0  ;;  %14877 = vmatmul.mubr.msk.f32.gmra.mrb[18].mxu0 %vm1453_vm4, %v17857_v50  ;;  %14494 = vmatprep.mubr.msk.f32.mxu1 %vm16543_vm6, %v16542_v12 }
 0x2ec   : > { %14879 = vmatprep.mubr.msk.f32.mxu0 %vm16543_vm6, %v16542_v12 }
 0x2ed   : > { %v2510_v31 = vpop.f32.mrb[72].mxu1 }
 0x2ee   : > { %v18114_v32 = vpop.f32.mrb[170].mxu0  ;;  %v18117_v63 = vadd.f32 %v2510_v31, %v17694_v11  ;;  %v14256_v21 = vpop.f32.mrb[73].mxu1  ;;  %14495 = vmatmul.mubr.msk.f32.gmra.mrb[178].mxu1 %vm1453_vm4, %v3231_v48  ;;  %v3233_v48 = vld [vmem:[#allocation4 + $0x84] sm:$0xff] }
 0x2ef   : > { %v14564_v1 = vpop.f32.mrb[171].mxu0  ;;  %14880 = vmatmul.mubr.msk.f32.gmra.mrb[20].mxu0 %vm1453_vm4, %v17867_v0  ;;  %14497 = vmatprep.mubr.msk.f32.mxu1 %vm16543_vm6, %v16542_v12 }
 0x2f0   : > { %14882 = vmatprep.mubr.msk.f32.mxu0 %vm16543_vm6, %v16542_v12 }
 0x2f1   : > { %v2515_v50 = vpop.f32.mrb[74].mxu1 }
 0x2f2   : > { %v18126_v55 = vpop.f32.mrb[172].mxu0  ;;  %v18129_v11 = vadd.f32 %v2515_v50, %v17725_v18  ;;  %v14259_v29 = vpop.f32.mrb[75].mxu1  ;;  %14498 = vmatmul.mubr.msk.f32.gmra.mrb[180].mxu1 %vm1453_vm4, %v3232_v59  ;;  %v3234_v59 = vld [vmem:[#allocation4 + $0x8c] sm:$0xff] }
 0x2f3   : > { %v14567_v37 = vpop.f32.mrb[173].mxu0  ;;  %14883 = vmatmul.mubr.msk.f32.gmra.mrb[22].mxu0 %vm1453_vm4, %v17877_v4  ;;  %14500 = vmatprep.mubr.msk.f32.mxu1 %vm16543_vm6, %v16542_v12 }
 0x2f4   : > { %14885 = vmatprep.mubr.msk.f32.mxu0 %vm16543_vm6, %v16542_v12 }
 0x2f5   : > { %v2520_v0 = vpop.f32.mrb[76].mxu1 }
 0x2f6   : > { %v18138_v31 = vpop.f32.mrb[174].mxu0  ;;  %v18141_v18 = vadd.f32 %v2520_v0, %v17761_v28  ;;  %v14262_v21 = vpop.f32.mrb[77].mxu1  ;;  %14501 = vmatmul.mubr.msk.f32.gmra.mrb[182].mxu1 %vm1453_vm4, %v3233_v48  ;;  %v3235_v48 = vld [vmem:[#allocation4 + $0x94] sm:$0xff] }
 0x2f7   : > { %v14570_v1 = vpop.f32.mrb[175].mxu0  ;;  %14886 = vmatmul.mubr.msk.f32.gmra.mrb[24].mxu0 %vm1453_vm4, %v17887_v54  ;;  %14503 = vmatprep.mubr.msk.f32.mxu1 %vm16543_vm6, %v16542_v12 }
 0x2f8   : > { %14888 = vmatprep.mubr.msk.f32.mxu0 %vm16543_vm6, %v16542_v12 }
 0x2f9   : > { %v2525_v4 = vpop.f32.mrb[78].mxu1 }
 0x2fa   : > { %v18150_v50 = vpop.f32.mrb[176].mxu0  ;;  %v18153_v28 = vadd.f32 %v2525_v4, %v17775_v57  ;;  %v14265_v29 = vpop.f32.mrb[79].mxu1  ;;  %14504 = vmatmul.mubr.msk.f32.gmra.mrb[184].mxu1 %vm1453_vm4, %v3234_v59  ;;  %v3236_v59 = vld [vmem:[#allocation4 + $0x9c] sm:$0xff] }
 0x2fb   : > { %v14573_v37 = vpop.f32.mrb[177].mxu0  ;;  %14889 = vmatmul.mubr.msk.f32.gmra.mrb[26].mxu0 %vm1453_vm4, %v17897_v15  ;;  %14506 = vmatprep.mubr.msk.f32.mxu1 %vm16543_vm6, %v16542_v12 }
 0x2fc   : > { %14891 = vmatprep.mubr.msk.f32.mxu0 %vm16543_vm6, %v16542_v12 }
 0x2fd   : > { %v2530_v54 = vpop.f32.mrb[80].mxu1 }
 0x2fe   : > { %v18162_v0 = vpop.f32.mrb[178].mxu0  ;;  %v18165_v57 = vadd.f32 %v2530_v54, %v17809_v44  ;;  %v14268_v21 = vpop.f32.mrb[81].mxu1  ;;  %14507 = vmatmul.mubr.msk.f32.gmra.mrb[186].mxu1 %vm1453_vm4, %v3235_v48  ;;  %v3237_v48 = vld [vmem:[#allocation4 + $0xa4] sm:$0xff] }
 0x2ff   : > { %v14576_v1 = vpop.f32.mrb[179].mxu0  ;;  %14892 = vmatmul.mubr.msk.f32.gmra.mrb[28].mxu0 %vm1453_vm4, %v17907_v25  ;;  %14509 = vmatprep.mubr.msk.f32.mxu1 %vm16543_vm6, %v16542_v12 }
 0x300   : > { %14894 = vmatprep.mubr.msk.f32.mxu0 %vm16543_vm6, %v16542_v12 }
 0x301   : > { %v2535_v15 = vpop.f32.mrb[82].mxu1 }
 0x302   : > { %v18174_v4 = vpop.f32.mrb[180].mxu0  ;;  %v18177_v44 = vadd.f32 %v2535_v15, %v17823_v14  ;;  %v14271_v29 = vpop.f32.mrb[83].mxu1  ;;  %14510 = vmatmul.mubr.msk.f32.gmra.mrb[188].mxu1 %vm1453_vm4, %v3236_v59  ;;  %v3238_v15 = vld [vmem:[#allocation4 + $0xac] sm:$0xff] }
 0x303   : > { %21430 = vst [vmem:[#allocation11_spill] sm:$0xff] %v18174_v4  ;;  %v14579_v37 = vpop.f32.mrb[181].mxu0  ;;  %14895 = vmatmul.mubr.msk.f32.gmra.mrb[30].mxu0 %vm1453_vm4, %v17917_v7  ;;  %14512 = vmatprep.mubr.msk.f32.mxu1 %vm16543_vm6, %v16542_v12 }
 0x304   : > { %14897 = vmatprep.mubr.msk.f32.mxu0 %vm16543_vm6, %v16542_v12 }
 0x305   : > { %v2540_v25 = vpop.f32.mrb[84].mxu1 }
 0x306   : > { %v3791_v54 = vpop.f32.mrb[182].mxu0  ;;  %v14274_v21 = vpop.f32.mrb[85].mxu1  ;;  %14513 = vmatmul.mubr.msk.f32.gmra.mrb[190].mxu1 %vm1453_vm4, %v3237_v48  ;;  %v3239_v25 = vld [vmem:[#allocation4 + $0xb4] sm:$0xff] }
 0x307   : > { %v14582_v14 = vpop.f32.mrb[183].mxu0  ;;  %14898 = vmatmul.mubr.msk.f32.gmra.mrb[32].mxu0 %vm1453_vm4, %v17927_v17  ;;  %14515 = vmatprep.mubr.msk.f32.mxu1 %vm16543_vm6, %v16542_v12  ;;  %v4834_v54 = vld [vmem:[#allocation4 + $0xc2] sm:$0xff] }
 0x308   : > { %14900 = vmatprep.mubr.msk.f32.mxu0 %vm16543_vm6, %v16542_v12 }
 0x309   : > { %v2545_v7 = vpop.f32.mrb[86].mxu1 }
 0x30a   : > { %v3796_v1 = vpop.f32.mrb[184].mxu0  ;;  %v14277_v59 = vpop.f32.mrb[87].mxu1  ;;  %14516 = vmatmul.mubr.msk.f32.gmra.mrb[192].mxu1 %vm1453_vm4, %v3238_v15 }
 0x30b   : > { %v14585_v29 = vpop.f32.mrb[185].mxu0  ;;  %14901 = vmatmul.mubr.msk.f32.gmra.mrb[34].mxu0 %vm1453_vm4, %v17936_v56  ;;  %14518 = vmatprep.mubr.msk.f32.mxu1 %vm16543_vm6, %v16542_v12  ;;  %v4835_v56 = vld [vmem:[#allocation4 + $0xca] sm:$0xff]  ;;  %v3240_v1 = vld [vmem:[#allocation4 + $0xbc] sm:$0xff] }
 0x30c   : > { %14903 = vmatprep.mubr.msk.f32.mxu0 %vm16543_vm6, %v16542_v12  ;;  %v3241_v29 = vld [vmem:[#allocation4 + $0xc4] sm:$0xf] }
 0x30d   : > { %v2550_v17 = vpop.f32.mrb[88].mxu1 }
 0x30e   : > { %v3801_v37 = vpop.f32.mrb[186].mxu0  ;;  %v14280_v48 = vpop.f32.mrb[89].mxu1  ;;  %14519 = vmatmul.mubr.msk.f32.gmra.mrb[194].mxu1 %vm1453_vm4, %v3239_v25  ;;  %v4836_v17 = vld [vmem:[#allocation4 + $0xd2] sm:$0xf] }
 0x30f   : > { %v14588_v21 = vpop.f32.mrb[187].mxu0  ;;  %14904 = vmatmul.mubr.msk.f32.gmra.mrb[36].mxu0 %vm1453_vm4, %v4834_v54  ;;  %14521 = vmatprep.mubr.msk.f32.mxu1 %vm16543_vm6, %v16542_v12 }
 0x310   : > { %14906 = vmatprep.mubr.msk.f32.mxu0 %vm16543_vm6, %v16542_v12  ;;  %v4518_v21 = vld [vmem:[%s21413_s3 + $0x30] sm:$0x3f] }
 0x311   : > { %v2555_v14 = vpop.f32.mrb[90].mxu1 }
 0x312   : > { %v3806_v7 = vpop.f32.mrb[188].mxu0  ;;  %v14283_v15 = vpop.f32.mrb[91].mxu1  ;;  %14522 = vmatmul.mubr.msk.f32.gmra.mrb[196].mxu1 %vm1453_vm4, %v3240_v1  ;;  %v5450_v1 = vld [vmem:[#allocation4 + $0x1d] sm:$0xff] }
 0x313   : > { %v14591_v59 = vpop.f32.mrb[189].mxu0  ;;  %14907 = vmatmul.mubr.msk.f32.gmra.mrb[38].mxu0 %vm1453_vm4, %v4835_v56  ;;  %14524 = vmatprep.mubr.msk.f32.mxu1 %vm16543_vm6, %v16542_v12  ;;  %v3855_v7 = vld [vmem:[#allocation4 + $0xf] sm:$0xff] }
 0x314   : > { %14909 = vmatprep.mubr.msk.f32.mxu0 %vm16543_vm6, %v16542_v12 }
 0x315   : > { %v2560_v37 = vpop.f32.mrb[92].mxu1 }
 0x316   : > { %v3811_v25 = vpop.f32.mrb[190].mxu0  ;;  %v14286_v54 = vpop.f32.mrb[93].mxu1  ;;  %14525 = vmatmul.mubr.msk.f32.gmra.mrb[198].mxu1 %vm1453_vm4, %v3241_v29  ;;  %v6113_v29 = vld [vmem:[%s21413_s3 + $0x4e] sm:$0x3f] }
 0x317   : > { %v14594_v48 = vpop.f32.mrb[191].mxu0  ;;  %14910 = vmatmul.mubr.msk.f32.gmra.mrb[40].mxu0 %vm1453_vm4, %v4836_v17  ;;  %14606 = vmatprep.mubr.msk.f32.mxu1 %vm16543_vm6, %v16542_v12  ;;  %v3856_v37 = vld [vmem:[#allocation4 + $0x17] sm:$0xff]  ;;  %v5451_v25 = vld [vmem:[#allocation4 + $0x25] sm:$0xff] }
 0x318   : > { %14991 = vmatprep.mubr.msk.f32.mxu0 %vm16543_vm6, %v16542_v12 }
 0x319   : > { %v2565_v56 = vpop.f32.mrb[94].mxu1 }
 0x31a   : > { %v3816_v14 = vpop.f32.mrb[192].mxu0  ;;  %v14289_v15 = vpop.f32.mrb[95].mxu1  ;;  %14607 = vmatmul.mubr.msk.f32.vlgmr.msra.gmra.mrb[200].mxu1 %vm1453_vm4, %v3855_v7  ;;  %v5452_v7 = vld [vmem:[#allocation4 + $0x2d] sm:$0xff] }
 0x31b   : > { %v14597_v59 = vpop.f32.mrb[193].mxu0  ;;  %14992 = vmatmul.mubr.msk.f32.vlgmr.msra.gmra.mrb[42].mxu0 %vm1453_vm4, %v5450_v1  ;;  %14759 = vmatpush3.msk.msra.mxu1 %vm2117_vm5, %v4518_v21  ;;  %v18240_v14 = vld [vmem:[#allocation4 + $0x1f] sm:$0xff] }
 0x31c   : > { %14609 = vmatprep.mubr.msk.f32.mxu1 %vm16543_vm6, %v16542_v12  ;;  %14994 = vmatprep.mubr.msk.f32.mxu0 %vm16543_vm6, %v16542_v12 }
 0x31d   : > { %14912 = vmatprep.subr.mxu1 %v16542_v12  ;;  %v2570_v17 = vpop.f32.mrb[96].mxu1  ;;  %15144 = vmatpush3.msk.msra.mxu0 %vm2117_vm5, %v6113_v29 }
 0x31e   : > { %v3821_v54 = vpop.f32.mrb[194].mxu0  ;;  %v14292_v48 = vpop.f32.mrb[97].mxu1  ;;  %14610 = vmatmul.mubr.msk.f32.gmra.mrb[202].mxu1 %vm1453_vm4, %v3856_v37  ;;  %15297 = vmatprep.subr.mxu0 %v16542_v12  ;;  %v18251_v37 = vld [vmem:[#allocation4 + $0x27] sm:$0xff] }
 0x31f   : > { %14995 = vmatmul.mubr.msk.f32.gmra.mrb[44].mxu0 %vm1453_vm4, %v5451_v25  ;;  %v14600_v21 = vpop.f32.mrb[195].mxu0  ;;  %14612 = vmatprep.mubr.msk.f32.mxu1 %vm16543_vm6, %v16542_v12  ;;  %v5453_v25 = vld [vmem:[#allocation4 + $0x35] sm:$0xff] }
 0x320   : > { %14997 = vmatprep.mubr.msk.f32.mxu0 %vm16543_vm6, %v16542_v12 }
 0x321   : > { %v2575_v56 = vpop.f32.mrb[98].mxu1 }
 0x322   : > { %v3826_v1 = vpop.f32.mrb[196].mxu0  ;;  %v14295_v15 = vpop.f32.mrb[99].mxu1  ;;  %14613 = vmatmul.mubr.msk.f32.gmra.mrb[204].mxu1 %vm1453_vm4, %v18240_v14 }
 0x323   : > { %14998 = vmatmul.mubr.msk.f32.gmra.mrb[46].mxu0 %vm1453_vm4, %v5452_v7  ;;  %v14603_v59 = vpop.f32.mrb[197].mxu0  ;;  %14615 = vmatprep.mubr.msk.f32.mxu1 %vm16543_vm6, %v16542_v12  ;;  %v5454_v15 = vld [vmem:[#allocation4 + $0x3d] sm:$0xff] }
 0x324   : > { %15000 = vmatprep.mubr.msk.f32.mxu0 %vm16543_vm6, %v16542_v12 }
 0x325   : > { %v2749_v29 = vpop.f32.mrb[100].mxu1 }
 0x326   : > { %v18249_v17 = vpop.f32.mrb[198].mxu0  ;;  %v2873_v54 = vadd.f32 %v2749_v29, %v17985_v22  ;;  %v14300_v48 = vpop.f32.mrb[101].mxu1  ;;  %14616 = vmatmul.mubr.msk.f32.gmra.mrb[206].mxu1 %vm1453_vm4, %v18251_v37  ;;  %v18266_v22 = vld [vmem:[#allocation4 + $0x2f] sm:$0xff] }
 0x327   : > { %21431 = vst [vmem:[#allocation12_spill] sm:$0xff] %v18249_v17  ;;  %v14685_v21 = vpop.f32.mrb[199].mxu0  ;;  %15001 = vmatmul.mubr.msk.f32.gmra.mrb[48].mxu0 %vm1453_vm4, %v5453_v25  ;;  %14618 = vmatprep.mubr.msk.f32.mxu1 %vm16543_vm6, %v16542_v12 }
 0x328   : > { %15003 = vmatprep.mubr.msk.f32.mxu0 %vm16543_vm6, %v16542_v12  ;;  %v18262_v56 = vadd.f32 %v17462_v23, %v2873_v54  ;;  %v5455_v21 = vld [vmem:[#allocation4 + $0x45] sm:$0xff] }
 0x329   : > { %v2754_v7 = vpop.f32.mrb[102].mxu1 }
 0x32a   : > { %v18264_v1 = vpop.f32.mrb[200].mxu0  ;;  %v2874_v59 = vadd.f32 %v2754_v7, %v17997_v20  ;;  %v14303_v29 = vpop.f32.mrb[103].mxu1  ;;  %14619 = vmatmul.mubr.msk.f32.gmra.mrb[208].mxu1 %vm1453_vm4, %v18266_v22  ;;  %v18281_v20 = vld [vmem:[#allocation4 + $0x37] sm:$0xff] }
 0x32b   : > { %21432 = vst [vmem:[#allocation13_spill] sm:$0xff] %v18264_v1  ;;  %v14688_v25 = vpop.f32.mrb[201].mxu0  ;;  %15004 = vmatmul.mubr.msk.f32.gmra.mrb[50].mxu0 %vm1453_vm4, %v5454_v15  ;;  %14621 = vmatprep.mubr.msk.f32.mxu1 %vm16543_vm6, %v16542_v12  ;;  %v18504_v1 = vld [vmem:[#allocation4 + $0xaf] sm:$0xff] }
 0x32c   : > { %15006 = vmatprep.mubr.msk.f32.mxu0 %vm16543_vm6, %v16542_v12  ;;  %v18277_v23 = vadd.f32 %v17493_v33, %v2874_v59 }
 0x32d   : > { %v2759_v54 = vpop.f32.mrb[104].mxu1 }
 0x32e   : > { %v18279_v48 = vpop.f32.mrb[202].mxu0  ;;  %v2875_v7 = vadd.f32 %v2759_v54, %v18009_v30  ;;  %v14306_v29 = vpop.f32.mrb[105].mxu1  ;;  %14622 = vmatmul.mubr.msk.f32.gmra.mrb[210].mxu1 %vm1453_vm4, %v18281_v20  ;;  %v18296_v30 = vld [vmem:[#allocation4 + $0x3f] sm:$0xff]  ;;  %v5456_v54 = vld [vmem:[#allocation4 + $0x4d] sm:$0xff] }
 0x32f   : > { %21433 = vst [vmem:[#allocation14_spill] sm:$0xff] %v18279_v48  ;;  %v14691_v15 = vpop.f32.mrb[203].mxu0  ;;  %15007 = vmatmul.mubr.msk.f32.gmra.mrb[52].mxu0 %vm1453_vm4, %v5455_v21  ;;  %14624 = vmatprep.mubr.msk.f32.mxu1 %vm16543_vm6, %v16542_v12 }
 0x330   : > { %15009 = vmatprep.mubr.msk.f32.mxu0 %vm16543_vm6, %v16542_v12  ;;  %v18292_v33 = vadd.f32 %v17506_v39, %v2875_v7 }
 0x331   : > { %v2764_v59 = vpop.f32.mrb[106].mxu1 }
 0x332   : > { %v18294_v25 = vpop.f32.mrb[204].mxu0  ;;  %v2876_v29 = vadd.f32 %v2764_v59, %v18021_v36  ;;  %v14309_v15 = vpop.f32.mrb[107].mxu1  ;;  %14625 = vmatmul.mubr.msk.f32.gmra.mrb[212].mxu1 %vm1453_vm4, %v18296_v30  ;;  %v18311_v36 = vld [vmem:[#allocation4 + $0x47] sm:$0xff]  ;;  %v5457_v59 = vld [vmem:[#allocation4 + $0x55] sm:$0xff] }
 0x333   : > { %21434 = vst [vmem:[#allocation15_spill] sm:$0xff] %v18294_v25  ;;  %v14694_v21 = vpop.f32.mrb[205].mxu0  ;;  %15010 = vmatmul.mubr.msk.f32.gmra.mrb[54].mxu0 %vm1453_vm4, %v5456_v54  ;;  %14627 = vmatprep.mubr.msk.f32.mxu1 %vm16543_vm6, %v16542_v12 }
 0x334   : > { %15012 = vmatprep.mubr.msk.f32.mxu0 %vm16543_vm6, %v16542_v12  ;;  %v18307_v39 = vadd.f32 %v17528_v46, %v2876_v29 }
 0x335   : > { %v2769_v7 = vpop.f32.mrb[108].mxu1 }
 0x336   : > { %v18309_v25 = vpop.f32.mrb[206].mxu0  ;;  %v2877_v15 = vadd.f32 %v2769_v7, %v18033_v43  ;;  %v14312_v21 = vpop.f32.mrb[109].mxu1  ;;  %14628 = vmatmul.mubr.msk.f32.gmra.mrb[214].mxu1 %vm1453_vm4, %v18311_v36  ;;  %v18326_v43 = vld [vmem:[#allocation4 + $0x4f] sm:$0xff]  ;;  %v5458_v7 = vld [vmem:[#allocation4 + $0x5d] sm:$0xff] }
 0x337   : > { %21435 = vst [vmem:[#allocation16_spill] sm:$0xff] %v18309_v25  ;;  %v14697_v54 = vpop.f32.mrb[207].mxu0  ;;  %15013 = vmatmul.mubr.msk.f32.gmra.mrb[56].mxu0 %vm1453_vm4, %v5457_v59  ;;  %14630 = vmatprep.mubr.msk.f32.mxu1 %vm16543_vm6, %v16542_v12 }
 0x338   : > { %15015 = vmatprep.mubr.msk.f32.mxu0 %vm16543_vm6, %v16542_v12  ;;  %v18322_v46 = vadd.f32 %v17570_v61, %v2877_v15 }
 0x339   : > { %v2774_v29 = vpop.f32.mrb[110].mxu1 }
 0x33a   : > { %v18324_v25 = vpop.f32.mrb[208].mxu0  ;;  %v2878_v21 = vadd.f32 %v2774_v29, %v18045_v49  ;;  %v14315_v54 = vpop.f32.mrb[111].mxu1  ;;  %14631 = vmatmul.mubr.msk.f32.gmra.mrb[216].mxu1 %vm1453_vm4, %v18326_v43  ;;  %v18341_v49 = vld [vmem:[#allocation4 + $0x57] sm:$0xff]  ;;  %v5459_v29 = vld [vmem:[#allocation4 + $0x65] sm:$0xff] }
 0x33b   : > { %21436 = vst [vmem:[#allocation17_spill] sm:$0xff] %v18324_v25  ;;  %v14700_v59 = vpop.f32.mrb[209].mxu0  ;;  %15016 = vmatmul.mubr.msk.f32.gmra.mrb[58].mxu0 %vm1453_vm4, %v5458_v7  ;;  %14633 = vmatprep.mubr.msk.f32.mxu1 %vm16543_vm6, %v16542_v12 }
 0x33c   : > { %15018 = vmatprep.mubr.msk.f32.mxu0 %vm16543_vm6, %v16542_v12  ;;  %v18337_v61 = vadd.f32 %v17581_v2, %v2878_v21 }
 0x33d   : > { %v2779_v15 = vpop.f32.mrb[112].mxu1 }
 0x33e   : > { %v18339_v25 = vpop.f32.mrb[210].mxu0  ;;  %v2879_v54 = vadd.f32 %v2779_v15, %v18057_v58  ;;  %v14318_v59 = vpop.f32.mrb[113].mxu1  ;;  %14634 = vmatmul.mubr.msk.f32.gmra.mrb[218].mxu1 %vm1453_vm4, %v18341_v49  ;;  %v18356_v58 = vld [vmem:[#allocation4 + $0x5f] sm:$0xff]  ;;  %v5460_v15 = vld [vmem:[#allocation4 + $0x6d] sm:$0xff] }
 0x33f   : > { %21437 = vst [vmem:[#allocation18_spill] sm:$0xff] %v18339_v25  ;;  %v14703_v7 = vpop.f32.mrb[211].mxu0  ;;  %15019 = vmatmul.mubr.msk.f32.gmra.mrb[60].mxu0 %vm1453_vm4, %v5459_v29  ;;  %14636 = vmatprep.mubr.msk.f32.mxu1 %vm16543_vm6, %v16542_v12 }
 0x340   : > { %15021 = vmatprep.mubr.msk.f32.mxu0 %vm16543_vm6, %v16542_v12  ;;  %v18352_v2 = vadd.f32 %v17603_v9, %v2879_v54 }
 0x341   : > { %v2784_v21 = vpop.f32.mrb[114].mxu1 }
 0x342   : > { %v18354_v25 = vpop.f32.mrb[212].mxu0  ;;  %v2880_v59 = vadd.f32 %v2784_v21, %v18069_v6  ;;  %v14321_v7 = vpop.f32.mrb[115].mxu1  ;;  %14637 = vmatmul.mubr.msk.f32.gmra.mrb[220].mxu1 %vm1453_vm4, %v18356_v58  ;;  %v18371_v6 = vld [vmem:[#allocation4 + $0x67] sm:$0xff]  ;;  %v5461_v21 = vld [vmem:[#allocation4 + $0x75] sm:$0xff] }
 0x343   : > { %21438 = vst [vmem:[#allocation19_spill] sm:$0xff] %v18354_v25  ;;  %v14706_v29 = vpop.f32.mrb[213].mxu0  ;;  %15022 = vmatmul.mubr.msk.f32.gmra.mrb[62].mxu0 %vm1453_vm4, %v5460_v15  ;;  %14639 = vmatprep.mubr.msk.f32.mxu1 %vm16543_vm6, %v16542_v12 }
 0x344   : > { %15024 = vmatprep.mubr.msk.f32.mxu0 %vm16543_vm6, %v16542_v12  ;;  %v18367_v9 = vadd.f32 %v17616_v19, %v2880_v59 }
 0x345   : > { %v2789_v54 = vpop.f32.mrb[116].mxu1 }
 0x346   : > { %v18369_v25 = vpop.f32.mrb[214].mxu0  ;;  %v2881_v7 = vadd.f32 %v2789_v54, %v18081_v13  ;;  %v14324_v29 = vpop.f32.mrb[117].mxu1  ;;  %14640 = vmatmul.mubr.msk.f32.gmra.mrb[222].mxu1 %vm1453_vm4, %v18371_v6  ;;  %v18386_v13 = vld [vmem:[#allocation4 + $0x6f] sm:$0xff]  ;;  %v5462_v54 = vld [vmem:[#allocation4 + $0x7d] sm:$0xff] }
 0x347   : > { %21439 = vst [vmem:[#allocation20_spill] sm:$0xff] %v18369_v25  ;;  %v14709_v15 = vpop.f32.mrb[215].mxu0  ;;  %15025 = vmatmul.mubr.msk.f32.gmra.mrb[64].mxu0 %vm1453_vm4, %v5461_v21  ;;  %14642 = vmatprep.mubr.msk.f32.mxu1 %vm16543_vm6, %v16542_v12 }
 0x348   : > { %15027 = vmatprep.mubr.msk.f32.mxu0 %vm16543_vm6, %v16542_v12  ;;  %v18382_v19 = vadd.f32 %v17647_v40, %v2881_v7 }
 0x349   : > { %v2794_v59 = vpop.f32.mrb[118].mxu1 }
 0x34a   : > { %v18384_v25 = vpop.f32.mrb[216].mxu0  ;;  %v2882_v29 = vadd.f32 %v2794_v59, %v18093_v34  ;;  %v14327_v15 = vpop.f32.mrb[119].mxu1  ;;  %14643 = vmatmul.mubr.msk.f32.gmra.mrb[224].mxu1 %vm1453_vm4, %v18386_v13  ;;  %v18401_v34 = vld [vmem:[#allocation4 + $0x77] sm:$0xff]  ;;  %v5463_v59 = vld [vmem:[#allocation4 + $0x85] sm:$0xff] }
 0x34b   : > { %21440 = vst [vmem:[#allocation21_spill] sm:$0xff] %v18384_v25  ;;  %v14712_v21 = vpop.f32.mrb[217].mxu0  ;;  %15028 = vmatmul.mubr.msk.f32.gmra.mrb[66].mxu0 %vm1453_vm4, %v5462_v54  ;;  %14645 = vmatprep.mubr.msk.f32.mxu1 %vm16543_vm6, %v16542_v12 }
 0x34c   : > { %15030 = vmatprep.mubr.msk.f32.mxu0 %vm16543_vm6, %v16542_v12  ;;  %v18397_v40 = vadd.f32 %v17660_v51, %v2882_v29 }
 0x34d   : > { %v2799_v7 = vpop.f32.mrb[120].mxu1 }
 0x34e   : > { %v18399_v25 = vpop.f32.mrb[218].mxu0  ;;  %v2883_v15 = vadd.f32 %v2799_v7, %v18105_v47  ;;  %v14330_v21 = vpop.f32.mrb[121].mxu1  ;;  %14646 = vmatmul.mubr.msk.f32.gmra.mrb[226].mxu1 %vm1453_vm4, %v18401_v34  ;;  %v18416_v47 = vld [vmem:[#allocation4 + $0x7f] sm:$0xff]  ;;  %v5464_v7 = vld [vmem:[#allocation4 + $0x8d] sm:$0xff] }
 0x34f   : > { %21441 = vst [vmem:[#allocation22_spill] sm:$0xff] %v18399_v25  ;;  %v14715_v54 = vpop.f32.mrb[219].mxu0  ;;  %15031 = vmatmul.mubr.msk.f32.gmra.mrb[68].mxu0 %vm1453_vm4, %v5463_v59  ;;  %14648 = vmatprep.mubr.msk.f32.mxu1 %vm16543_vm6, %v16542_v12 }
 0x350   : > { %15033 = vmatprep.mubr.msk.f32.mxu0 %vm16543_vm6, %v16542_v12  ;;  %v18412_v51 = vadd.f32 %v17680_v3, %v2883_v15 }
 0x351   : > { %v2804_v29 = vpop.f32.mrb[122].mxu1 }
 0x352   : > { %v18414_v25 = vpop.f32.mrb[220].mxu0  ;;  %v2884_v21 = vadd.f32 %v2804_v29, %v18117_v63  ;;  %v14333_v54 = vpop.f32.mrb[123].mxu1  ;;  %14649 = vmatmul.mubr.msk.f32.gmra.mrb[228].mxu1 %vm1453_vm4, %v18416_v47  ;;  %v18431_v63 = vld [vmem:[#allocation4 + $0x87] sm:$0xff]  ;;  %v5465_v29 = vld [vmem:[#allocation4 + $0x95] sm:$0xff] }
 0x353   : > { %21442 = vst [vmem:[#allocation23_spill] sm:$0xff] %v18414_v25  ;;  %v14718_v59 = vpop.f32.mrb[221].mxu0  ;;  %15034 = vmatmul.mubr.msk.f32.gmra.mrb[70].mxu0 %vm1453_vm4, %v5464_v7  ;;  %14651 = vmatprep.mubr.msk.f32.mxu1 %vm16543_vm6, %v16542_v12 }
 0x354   : > { %15036 = vmatprep.mubr.msk.f32.mxu0 %vm16543_vm6, %v16542_v12  ;;  %v18427_v3 = vadd.f32 %v17729_v27, %v2884_v21 }
 0x355   : > { %v2809_v15 = vpop.f32.mrb[124].mxu1 }
 0x356   : > { %v18429_v25 = vpop.f32.mrb[222].mxu0  ;;  %v2885_v54 = vadd.f32 %v2809_v15, %v18129_v11  ;;  %v14336_v59 = vpop.f32.mrb[125].mxu1  ;;  %14652 = vmatmul.mubr.msk.f32.gmra.mrb[230].mxu1 %vm1453_vm4, %v18431_v63  ;;  %v18446_v11 = vld [vmem:[#allocation4 + $0x8f] sm:$0xff]  ;;  %v5466_v15 = vld [vmem:[#allocation4 + $0x9d] sm:$0xff] }
 0x357   : > { %21443 = vst [vmem:[#allocation24_spill] sm:$0xff] %v18429_v25  ;;  %v14721_v7 = vpop.f32.mrb[223].mxu0  ;;  %15037 = vmatmul.mubr.msk.f32.gmra.mrb[72].mxu0 %vm1453_vm4, %v5465_v29  ;;  %14654 = vmatprep.mubr.msk.f32.mxu1 %vm16543_vm6, %v16542_v12 }
 0x358   : > { %15039 = vmatprep.mubr.msk.f32.mxu0 %vm16543_vm6, %v16542_v12  ;;  %v18442_v27 = vadd.f32 %v17741_v41, %v2885_v54 }
 0x359   : > { %v2814_v21 = vpop.f32.mrb[126].mxu1 }
 0x35a   : > { %v18444_v25 = vpop.f32.mrb[224].mxu0  ;;  %v2886_v59 = vadd.f32 %v2814_v21, %v18141_v18  ;;  %v14339_v7 = vpop.f32.mrb[127].mxu1  ;;  %14655 = vmatmul.mubr.msk.f32.gmra.mrb[232].mxu1 %vm1453_vm4, %v18446_v11  ;;  %v18461_v18 = vld [vmem:[#allocation4 + $0x97] sm:$0xff]  ;;  %v5467_v21 = vld [vmem:[#allocation4 + $0xa5] sm:$0xff] }
 0x35b   : > { %21444 = vst [vmem:[#allocation25_spill] sm:$0xff] %v18444_v25  ;;  %v14724_v29 = vpop.f32.mrb[225].mxu0  ;;  %15040 = vmatmul.mubr.msk.f32.gmra.mrb[74].mxu0 %vm1453_vm4, %v5466_v15  ;;  %14657 = vmatprep.mubr.msk.f32.mxu1 %vm16543_vm6, %v16542_v12 }
 0x35c   : > { %15042 = vmatprep.mubr.msk.f32.mxu0 %vm16543_vm6, %v16542_v12  ;;  %v18457_v41 = vadd.f32 %v17765_v53, %v2886_v59 }
 0x35d   : > { %v2819_v54 = vpop.f32.mrb[128].mxu1 }
 0x35e   : > { %v18459_v25 = vpop.f32.mrb[226].mxu0  ;;  %v2887_v7 = vadd.f32 %v2819_v54, %v18153_v28  ;;  %v14342_v29 = vpop.f32.mrb[129].mxu1  ;;  %14658 = vmatmul.mubr.msk.f32.gmra.mrb[234].mxu1 %vm1453_vm4, %v18461_v18  ;;  %v18476_v28 = vld [vmem:[#allocation4 + $0x9f] sm:$0xff]  ;;  %v5468_v54 = vld [vmem:[#allocation4 + $0xad] sm:$0xff] }
 0x35f   : > { %21445 = vst [vmem:[#allocation26_spill] sm:$0xff] %v18459_v25  ;;  %v14727_v15 = vpop.f32.mrb[227].mxu0  ;;  %15043 = vmatmul.mubr.msk.f32.gmra.mrb[76].mxu0 %vm1453_vm4, %v5467_v21  ;;  %14660 = vmatprep.mubr.msk.f32.mxu1 %vm16543_vm6, %v16542_v12 }
 0x360   : > { %15045 = vmatprep.mubr.msk.f32.mxu0 %vm16543_vm6, %v16542_v12  ;;  %v18472_v53 = vadd.f32 %v17779_v62, %v2887_v7 }
 0x361   : > { %v2824_v59 = vpop.f32.mrb[130].mxu1 }
 0x362   : > { %v18474_v25 = vpop.f32.mrb[228].mxu0  ;;  %v2888_v29 = vadd.f32 %v2824_v59, %v18165_v57  ;;  %v14345_v15 = vpop.f32.mrb[131].mxu1  ;;  %14661 = vmatmul.mubr.msk.f32.gmra.mrb[236].mxu1 %vm1453_vm4, %v18476_v28  ;;  %v18491_v57 = vld [vmem:[#allocation4 + $0xa7] sm:$0xff]  ;;  %v5469_v59 = vld [vmem:[#allocation4 + $0xb5] sm:$0xff] }
 0x363   : > { %21446 = vst [vmem:[#allocation27_spill] sm:$0xff] %v18474_v25  ;;  %v14730_v21 = vpop.f32.mrb[229].mxu0  ;;  %15046 = vmatmul.mubr.msk.f32.gmra.mrb[78].mxu0 %vm1453_vm4, %v5468_v54  ;;  %14663 = vmatprep.mubr.msk.f32.mxu1 %vm16543_vm6, %v16542_v12 }
 0x364   : > { %15048 = vmatprep.mubr.msk.f32.mxu0 %vm16543_vm6, %v16542_v12  ;;  %v18487_v62 = vadd.f32 %v17813_v10, %v2888_v29  ;;  %v21448_v10 = vld [vmem:[#allocation10_spill] sm:$0xff] }
 0x365   : > { %v2829_v7 = vpop.f32.mrb[132].mxu1 }
 0x366   : > { %v18489_v25 = vpop.f32.mrb[230].mxu0  ;;  %v2889_v15 = vadd.f32 %v2829_v7, %v18177_v44  ;;  %v14348_v21 = vpop.f32.mrb[133].mxu1  ;;  %14664 = vmatmul.mubr.msk.f32.gmra.mrb[238].mxu1 %vm1453_vm4, %v18491_v57  ;;  %v5470_v44 = vld [vmem:[#allocation4 + $0xbd] sm:$0xff] }
 0x367   : > { %21447 = vst [vmem:[#allocation28_spill] sm:$0xff] %v18489_v25  ;;  %v14733_v54 = vpop.f32.mrb[231].mxu0  ;;  %15049 = vmatmul.mubr.msk.f32.gmra.mrb[80].mxu0 %vm1453_vm4, %v5469_v59  ;;  %14666 = vmatprep.mubr.msk.f32.mxu1 %vm16543_vm6, %v16542_v12  ;;  %v5471_v59 = vld [vmem:[#allocation4 + $0xc5] sm:$0xff] }
 0x368   : > { %15051 = vmatprep.mubr.msk.f32.mxu0 %vm16543_vm6, %v16542_v12  ;;  %v18502_v29 = vadd.f32 %v21448_v10, %v2889_v15 }
 0x369   : > { %v2834_v25 = vpop.f32.mrb[134].mxu1 }
 0x36a   : > { %v4429_v48 = vpop.f32.mrb[232].mxu0  ;;  %v14351_v7 = vpop.f32.mrb[135].mxu1  ;;  %14667 = vmatmul.mubr.msk.f32.gmra.mrb[240].mxu1 %vm1453_vm4, %v18504_v1 }
 0x36b   : > { %v14736_v21 = vpop.f32.mrb[233].mxu0  ;;  %15052 = vmatmul.mubr.msk.f32.gmra.mrb[82].mxu0 %vm1453_vm4, %v5470_v44  ;;  %14669 = vmatprep.mubr.msk.f32.mxu1 %vm16543_vm6, %v16542_v12  ;;  %v18513_v48 = vld [vmem:[#allocation4 + $0xb7] sm:$0xff]  ;;  %v5472_v44 = vld [vmem:[#allocation4 + $0xcd] sm:$0xff] }
 0x36c   : > { %15054 = vmatprep.mubr.msk.f32.mxu0 %vm16543_vm6, %v16542_v12  ;;  %21449 = vst [vmem:[#allocation10_spill] sm:$0xff] %v18513_v48 }
 0x36d   : > { %v2839_v15 = vpop.f32.mrb[136].mxu1 }
 0x36e   : > { %v4434_v25 = vpop.f32.mrb[234].mxu0  ;;  %v14354_v54 = vpop.f32.mrb[137].mxu1  ;;  %14670 = vmatmul.mubr.msk.f32.gmra.mrb[242].mxu1 %vm1453_vm4, %v18513_v48  ;;  %v18522_v15 = vld [vmem:[#allocation4 + $0xbf] sm:$0xff] }
 0x36f   : > { %v14739_v10 = vpop.f32.mrb[235].mxu0  ;;  %15055 = vmatmul.mubr.msk.f32.gmra.mrb[84].mxu0 %vm1453_vm4, %v5471_v59  ;;  %14672 = vmatprep.mubr.msk.f32.mxu1 %vm16543_vm6, %v16542_v12  ;;  %21450 = vst [vmem:[#allocation29_spill] sm:$0xff] %v18522_v15  ;;  %v18531_v59 = vld [vmem:[#allocation4 + $0xc7] sm:$0xff] }
 0x370   : > { %15057 = vmatprep.mubr.msk.f32.mxu0 %vm16543_vm6, %v16542_v12  ;;  %v5473_v10 = vld [vmem:[#allocation4 + $0xd5] sm:$0xff] }
 0x371   : > { %v2844_v7 = vpop.f32.mrb[138].mxu1 }
 0x372   : > { %v4439_v21 = vpop.f32.mrb[236].mxu0  ;;  %v14357_v25 = vpop.f32.mrb[139].mxu1  ;;  %14673 = vmatmul.mubr.msk.f32.gmra.mrb[244].mxu1 %vm1453_vm4, %v18522_v15 }
 0x373   : > { %v14742_v54 = vpop.f32.mrb[237].mxu0  ;;  %15058 = vmatmul.mubr.msk.f32.gmra.mrb[86].mxu0 %vm1453_vm4, %v5472_v44  ;;  %14675 = vmatprep.mubr.msk.f32.mxu1 %vm16543_vm6, %v16542_v12  ;;  %v3879_v44 = vld [vmem:[#allocation4 + $0xcf] sm:$0xf] }
 0x374   : > { %15060 = vmatprep.mubr.msk.f32.mxu0 %vm16543_vm6, %v16542_v12  ;;  %v5474_v54 = vld [vmem:[#allocation4 + $0xdd] sm:$0xf] }
 0x375   : > { %v2849_v7 = vpop.f32.mrb[140].mxu1 }
 0x376   : > { %v4444_v21 = vpop.f32.mrb[238].mxu0  ;;  %v14360_v17 = vpop.f32.mrb[141].mxu1  ;;  %14676 = vmatmul.mubr.msk.f32.gmra.mrb[246].mxu1 %vm1453_vm4, %v18531_v59 }
 0x377   : > { %v14745_v25 = vpop.f32.mrb[239].mxu0  ;;  %15061 = vmatmul.mubr.msk.f32.gmra.mrb[88].mxu0 %vm1453_vm4, %v5473_v10  ;;  %14678 = vmatprep.mubr.msk.f32.mxu1 %vm16543_vm6, %v16542_v12  ;;  %v5156_v10 = vld [vmem:[%s21413_s3 + $0x3c] sm:$0x3f] }
 0x378   : > { %15063 = vmatprep.mubr.msk.f32.mxu0 %vm16543_vm6, %v16542_v12  ;;  %v6751_v25 = vld [vmem:[%s21413_s3 + $0x5a] sm:$0x3f] }
 0x379   : > { %v2854_v15 = vpop.f32.mrb[142].mxu1 }
 0x37a   : > { %v4449_v4 = vpop.f32.mrb[240].mxu0  ;;  %v14363_v48 = vpop.f32.mrb[143].mxu1  ;;  %14679 = vmatmul.mubr.msk.f32.gmra.mrb[248].mxu1 %vm1453_vm4, %v3879_v44  ;;  %v4493_v15 = vld [vmem:[#allocation4 + $0x11] sm:$0xff] }
 0x37b   : > { %v14748_v17 = vpop.f32.mrb[241].mxu0  ;;  %15064 = vmatmul.mubr.msk.f32.gmra.mrb[90].mxu0 %vm1453_vm4, %v5474_v54  ;;  %14760 = vmatprep.mubr.msk.f32.mxu1 %vm16543_vm6, %v16542_v12  ;;  %v4494_v54 = vld [vmem:[#allocation4 + $0x19] sm:$0xff] }
 0x37c   : > { %15145 = vmatprep.mubr.msk.f32.mxu0 %vm16543_vm6, %v16542_v12 }
 0x37d   : > { %v2859_v7 = vpop.f32.mrb[144].mxu1 }
 0x37e   : > { %v4454_v21 = vpop.f32.mrb[242].mxu0  ;;  %v14366_v4 = vpop.f32.mrb[145].mxu1  ;;  %14761 = vmatmul.mubr.msk.f32.vlgmr.msra.gmra.mrb[250].mxu1 %vm1453_vm4, %v4493_v15 }
 0x37f   : > { %v14751_v48 = vpop.f32.mrb[243].mxu0  ;;  %15146 = vmatmul.mubr.msk.f32.vlgmr.msra.gmra.mrb[92].mxu0 %vm1453_vm4, %v18240_v14  ;;  %14913 = vmatpush3.msk.msra.mxu1 %vm2117_vm5, %v5156_v10  ;;  %v4495_v21 = vld [vmem:[#allocation4 + $0x21] sm:$0xff] }
 0x380   : > { %14763 = vmatprep.mubr.msk.f32.mxu1 %vm16543_vm6, %v16542_v12  ;;  %15148 = vmatprep.mubr.msk.f32.mxu0 %vm16543_vm6, %v16542_v12 }
 0x381   : > { %15066 = vmatprep.subr.mxu1 %v16542_v12  ;;  %v2864_v44 = vpop.f32.mrb[146].mxu1  ;;  %15298 = vmatpush3.msk.msra.mxu0 %vm2117_vm5, %v6751_v25 }
 0x382   : > { %v4459_v17 = vpop.f32.mrb[244].mxu0  ;;  %v14369_v14 = vpop.f32.mrb[147].mxu1  ;;  %14764 = vmatmul.mubr.msk.f32.gmra.mrb[252].mxu1 %vm1453_vm4, %v4494_v54  ;;  %15451 = vmatprep.subr.mxu0 %v16542_v12  ;;  %v4496_v44 = vld [vmem:[#allocation4 + $0x29] sm:$0xff] }
 0x383   : > { %15149 = vmatmul.mubr.msk.f32.gmra.mrb[94].mxu0 %vm1453_vm4, %v18251_v37  ;;  %v14754_v10 = vpop.f32.mrb[245].mxu0  ;;  %14766 = vmatprep.mubr.msk.f32.mxu1 %vm16543_vm6, %v16542_v12 }
 0x384   : > { %15151 = vmatprep.mubr.msk.f32.mxu0 %vm16543_vm6, %v16542_v12 }
 0x385   : > { %v2869_v7 = vpop.f32.mrb[148].mxu1 }
 0x386   : > { %v4464_v15 = vpop.f32.mrb[246].mxu0  ;;  %v14372_v4 = vpop.f32.mrb[149].mxu1  ;;  %14767 = vmatmul.mubr.msk.f32.gmra.mrb[254].mxu1 %vm1453_vm4, %v4495_v21 }
 0x387   : > { %15152 = vmatmul.mubr.msk.f32.gmra.mrb[96].mxu0 %vm1453_vm4, %v18266_v22  ;;  %v14757_v48 = vpop.f32.mrb[247].mxu0  ;;  %14769 = vmatprep.mubr.msk.f32.mxu1 %vm16543_vm6, %v16542_v12 }
 0x388   : > { %15154 = vmatprep.mubr.msk.f32.mxu0 %vm16543_vm6, %v16542_v12 }
 0x389   : > { %v3387_v37 = vpop.f32.mrb[150].mxu1 }
 0x38a   : > { %v18577_v25 = vpop.f32.mrb[248].mxu0  ;;  %v3511_v54 = vadd.f32 %v3387_v37, %v18262_v56  ;;  %v14454_v17 = vpop.f32.mrb[151].mxu1  ;;  %14770 = vmatmul.mubr.msk.f32.gmra.mrb[0].mxu1 %vm1453_vm4, %v4496_v44  ;;  %v4497_v56 = vld [vmem:[#allocation4 + $0x31] sm:$0xff] }
 0x38b   : > { %v14839_v14 = vpop.f32.mrb[249].mxu0  ;;  %15155 = vmatmul.mubr.msk.f32.gmra.mrb[98].mxu0 %vm1453_vm4, %v18281_v20  ;;  %14772 = vmatprep.mubr.msk.f32.mxu1 %vm16543_vm6, %v16542_v12 }
 0x38c   : > { %15157 = vmatprep.mubr.msk.f32.mxu0 %vm16543_vm6, %v16542_v12  ;;  %v18588_v22 = vadd.f32 %v17982_v35, %v3511_v54 }
 0x38d   : > { %v3392_v10 = vpop.f32.mrb[152].mxu1 }
 0x38e   : > { %v18590_v7 = vpop.f32.mrb[250].mxu0  ;;  %v3512_v21 = vadd.f32 %v3392_v10, %v18277_v23  ;;  %v14457_v15 = vpop.f32.mrb[153].mxu1  ;;  %14773 = vmatmul.mubr.msk.f32.gmra.mrb[2].mxu1 %vm1453_vm4, %v4497_v56  ;;  %v4498_v23 = vld [vmem:[#allocation4 + $0x39] sm:$0xff] }
 0x38f   : > { %v14842_v4 = vpop.f32.mrb[251].mxu0  ;;  %15158 = vmatmul.mubr.msk.f32.gmra.mrb[100].mxu0 %vm1453_vm4, %v18296_v30  ;;  %14775 = vmatprep.mubr.msk.f32.mxu1 %vm16543_vm6, %v16542_v12 }
 0x390   : > { %15160 = vmatprep.mubr.msk.f32.mxu0 %vm16543_vm6, %v16542_v12  ;;  %v18601_v35 = vadd.f32 %v17994_v42, %v3512_v21 }
 0x391   : > { %v3397_v20 = vpop.f32.mrb[154].mxu1 }
 0x392   : > { %v18603_v48 = vpop.f32.mrb[252].mxu0  ;;  %v3513_v37 = vadd.f32 %v3397_v20, %v18292_v33  ;;  %v14460_v44 = vpop.f32.mrb[155].mxu1  ;;  %14776 = vmatmul.mubr.msk.f32.gmra.mrb[4].mxu1 %vm1453_vm4, %v4498_v23  ;;  %v4499_v33 = vld [vmem:[#allocation4 + $0x41] sm:$0xff] }
 0x393   : > { %v14845_v54 = vpop.f32.mrb[253].mxu0  ;;  %15161 = vmatmul.mubr.msk.f32.gmra.mrb[102].mxu0 %vm1453_vm4, %v18311_v36  ;;  %14778 = vmatprep.mubr.msk.f32.mxu1 %vm16543_vm6, %v16542_v12 }
 0x394   : > { %15163 = vmatprep.mubr.msk.f32.mxu0 %vm16543_vm6, %v16542_v12  ;;  %v18614_v42 = vadd.f32 %v18006_v16, %v3513_v37 }
 0x395   : > { %v3402_v30 = vpop.f32.mrb[156].mxu1 }
 0x396   : > { %v18616_v17 = vpop.f32.mrb[254].mxu0  ;;  %v3514_v14 = vadd.f32 %v3402_v30, %v18307_v39  ;;  %v14463_v10 = vpop.f32.mrb[157].mxu1  ;;  %14779 = vmatmul.mubr.msk.f32.gmra.mrb[6].mxu1 %vm1453_vm4, %v4499_v33  ;;  %v4500_v39 = vld [vmem:[#allocation4 + $0x49] sm:$0xff] }
 0x397   : > { %v14848_v56 = vpop.f32.mrb[255].mxu0  ;;  %15164 = vmatmul.mubr.msk.f32.gmra.mrb[104].mxu0 %vm1453_vm4, %v18326_v43  ;;  %14781 = vmatprep.mubr.msk.f32.mxu1 %vm16543_vm6, %v16542_v12 }
 0x398   : > { %15166 = vmatprep.mubr.msk.f32.mxu0 %vm16543_vm6, %v16542_v12  ;;  %v18627_v16 = vadd.f32 %v18018_v24, %v3514_v14 }
 0x399   : > { %v3407_v36 = vpop.f32.mrb[158].mxu1 }
 0x39a   : > { %v18629_v21 = vpop.f32.mrb[0].mxu0  ;;  %v3515_v15 = vadd.f32 %v3407_v36, %v18322_v46  ;;  %v14466_v4 = vpop.f32.mrb[159].mxu1  ;;  %14782 = vmatmul.mubr.msk.f32.gmra.mrb[8].mxu1 %vm1453_vm4, %v4500_v39  ;;  %v4501_v46 = vld [vmem:[#allocation4 + $0x51] sm:$0xff] }
 0x39b   : > { %v14851_v20 = vpop.f32.mrb[1].mxu0  ;;  %15167 = vmatmul.mubr.msk.f32.gmra.mrb[106].mxu0 %vm1453_vm4, %v18341_v49  ;;  %14784 = vmatprep.mubr.msk.f32.mxu1 %vm16543_vm6, %v16542_v12 }
 0x39c   : > { %15169 = vmatprep.mubr.msk.f32.mxu0 %vm16543_vm6, %v16542_v12  ;;  %v18640_v24 = vadd.f32 %v18030_v38, %v3515_v15 }
 0x39d   : > { %v3412_v43 = vpop.f32.mrb[160].mxu1 }
 0x39e   : > { %v18642_v23 = vpop.f32.mrb[2].mxu0  ;;  %v3516_v37 = vadd.f32 %v3412_v43, %v18337_v61  ;;  %v14469_v44 = vpop.f32.mrb[161].mxu1  ;;  %14785 = vmatmul.mubr.msk.f32.gmra.mrb[10].mxu1 %vm1453_vm4, %v4501_v46  ;;  %v4502_v61 = vld [vmem:[#allocation4 + $0x59] sm:$0xff] }
 0x39f   : > { %v14854_v54 = vpop.f32.mrb[3].mxu0  ;;  %15170 = vmatmul.mubr.msk.f32.gmra.mrb[108].mxu0 %vm1453_vm4, %v18356_v58  ;;  %14787 = vmatprep.mubr.msk.f32.mxu1 %vm16543_vm6, %v16542_v12 }
 0x3a0   : > { %15172 = vmatprep.mubr.msk.f32.mxu0 %vm16543_vm6, %v16542_v12  ;;  %v18653_v38 = vadd.f32 %v18042_v26, %v3516_v37 }
 0x3a1   : > { %v3417_v49 = vpop.f32.mrb[162].mxu1 }
 0x3a2   : > { %v18655_v30 = vpop.f32.mrb[4].mxu0  ;;  %v3517_v33 = vadd.f32 %v3417_v49, %v18352_v2  ;;  %v14472_v14 = vpop.f32.mrb[163].mxu1  ;;  %14788 = vmatmul.mubr.msk.f32.gmra.mrb[12].mxu1 %vm1453_vm4, %v4502_v61  ;;  %v4503_v2 = vld [vmem:[#allocation4 + $0x61] sm:$0xff] }
 0x3a3   : > { %v14857_v10 = vpop.f32.mrb[5].mxu0  ;;  %15173 = vmatmul.mubr.msk.f32.gmra.mrb[110].mxu0 %vm1453_vm4, %v18371_v6  ;;  %14790 = vmatprep.mubr.msk.f32.mxu1 %vm16543_vm6, %v16542_v12 }
 0x3a4   : > { %15175 = vmatprep.mubr.msk.f32.mxu0 %vm16543_vm6, %v16542_v12  ;;  %v18666_v26 = vadd.f32 %v18054_v45, %v3517_v33 }
 0x3a5   : > { %v3422_v58 = vpop.f32.mrb[164].mxu1 }
 0x3a6   : > { %v18668_v56 = vpop.f32.mrb[6].mxu0  ;;  %v3518_v36 = vadd.f32 %v3422_v58, %v18367_v9  ;;  %v14475_v39 = vpop.f32.mrb[165].mxu1  ;;  %14791 = vmatmul.mubr.msk.f32.gmra.mrb[14].mxu1 %vm1453_vm4, %v4503_v2  ;;  %v4504_v9 = vld [vmem:[#allocation4 + $0x69] sm:$0xff] }
 0x3a7   : > { %v14860_v15 = vpop.f32.mrb[7].mxu0  ;;  %15176 = vmatmul.mubr.msk.f32.gmra.mrb[112].mxu0 %vm1453_vm4, %v18386_v13  ;;  %14793 = vmatprep.mubr.msk.f32.mxu1 %vm16543_vm6, %v16542_v12 }
 0x3a8   : > { %15178 = vmatprep.mubr.msk.f32.mxu0 %vm16543_vm6, %v16542_v12  ;;  %v18679_v45 = vadd.f32 %v18066_v60, %v3518_v36 }
 0x3a9   : > { %v3427_v6 = vpop.f32.mrb[166].mxu1 }
 0x3aa   : > { %v18681_v4 = vpop.f32.mrb[8].mxu0  ;;  %v3519_v20 = vadd.f32 %v3427_v6, %v18382_v19  ;;  %v14478_v43 = vpop.f32.mrb[167].mxu1  ;;  %14794 = vmatmul.mubr.msk.f32.gmra.mrb[16].mxu1 %vm1453_vm4, %v4504_v9  ;;  %v4505_v19 = vld [vmem:[#allocation4 + $0x71] sm:$0xff] }
 0x3ab   : > { %v14863_v46 = vpop.f32.mrb[9].mxu0  ;;  %15179 = vmatmul.mubr.msk.f32.gmra.mrb[114].mxu0 %vm1453_vm4, %v18401_v34  ;;  %14796 = vmatprep.mubr.msk.f32.mxu1 %vm16543_vm6, %v16542_v12 }
 0x3ac   : > { %15181 = vmatprep.mubr.msk.f32.mxu0 %vm16543_vm6, %v16542_v12  ;;  %v18692_v60 = vadd.f32 %v18078_v5, %v3519_v20 }
 0x3ad   : > { %v3432_v13 = vpop.f32.mrb[168].mxu1 }
 0x3ae   : > { %v18694_v37 = vpop.f32.mrb[10].mxu0  ;;  %v3520_v44 = vadd.f32 %v3432_v13, %v18397_v40  ;;  %v14481_v54 = vpop.f32.mrb[169].mxu1  ;;  %14797 = vmatmul.mubr.msk.f32.gmra.mrb[18].mxu1 %vm1453_vm4, %v4505_v19  ;;  %v4506_v40 = vld [vmem:[#allocation4 + $0x79] sm:$0xff] }
 0x3af   : > { %v14866_v49 = vpop.f32.mrb[11].mxu0  ;;  %15182 = vmatmul.mubr.msk.f32.gmra.mrb[116].mxu0 %vm1453_vm4, %v18416_v47  ;;  %14799 = vmatprep.mubr.msk.f32.mxu1 %vm16543_vm6, %v16542_v12 }
 0x3b0   : > { %15184 = vmatprep.mubr.msk.f32.mxu0 %vm16543_vm6, %v16542_v12  ;;  %v18705_v5 = vadd.f32 %v18090_v52, %v3520_v44 }
 0x3b1   : > { %v3437_v34 = vpop.f32.mrb[170].mxu1 }
 0x3b2   : > { %v18707_v61 = vpop.f32.mrb[12].mxu0  ;;  %v3521_v33 = vadd.f32 %v3437_v34, %v18412_v51  ;;  %v14484_v14 = vpop.f32.mrb[171].mxu1  ;;  %14800 = vmatmul.mubr.msk.f32.gmra.mrb[20].mxu1 %vm1453_vm4, %v4506_v40  ;;  %v4507_v51 = vld [vmem:[#allocation4 + $0x81] sm:$0xff] }
 0x3b3   : > { %v14869_v10 = vpop.f32.mrb[13].mxu0  ;;  %15185 = vmatmul.mubr.msk.f32.gmra.mrb[118].mxu0 %vm1453_vm4, %v18431_v63  ;;  %14802 = vmatprep.mubr.msk.f32.mxu1 %vm16543_vm6, %v16542_v12 }
 0x3b4   : > { %15187 = vmatprep.mubr.msk.f32.mxu0 %vm16543_vm6, %v16542_v12  ;;  %v18718_v52 = vadd.f32 %v18102_v8, %v3521_v33 }
 0x3b5   : > { %v3442_v47 = vpop.f32.mrb[172].mxu1 }
 0x3b6   : > { %v18720_v58 = vpop.f32.mrb[14].mxu0  ;;  %v3522_v2 = vadd.f32 %v3442_v47, %v18427_v3  ;;  %v14487_v36 = vpop.f32.mrb[173].mxu1  ;;  %14803 = vmatmul.mubr.msk.f32.gmra.mrb[22].mxu1 %vm1453_vm4, %v4507_v51  ;;  %v4508_v3 = vld [vmem:[#allocation4 + $0x89] sm:$0xff] }
 0x3b7   : > { %v14872_v39 = vpop.f32.mrb[15].mxu0  ;;  %15188 = vmatmul.mubr.msk.f32.gmra.mrb[120].mxu0 %vm1453_vm4, %v18446_v11  ;;  %14805 = vmatprep.mubr.msk.f32.mxu1 %vm16543_vm6, %v16542_v12 }
 0x3b8   : > { %15190 = vmatprep.mubr.msk.f32.mxu0 %vm16543_vm6, %v16542_v12  ;;  %v18731_v8 = vadd.f32 %v18114_v32, %v3522_v2 }
 0x3b9   : > { %v3447_v63 = vpop.f32.mrb[174].mxu1 }
 0x3ba   : > { %v18733_v15 = vpop.f32.mrb[16].mxu0  ;;  %v3523_v6 = vadd.f32 %v3447_v63, %v18442_v27  ;;  %v14490_v9 = vpop.f32.mrb[175].mxu1  ;;  %14806 = vmatmul.mubr.msk.f32.gmra.mrb[24].mxu1 %vm1453_vm4, %v4508_v3  ;;  %v4509_v27 = vld [vmem:[#allocation4 + $0x91] sm:$0xff] }
 0x3bb   : > { %v14875_v20 = vpop.f32.mrb[17].mxu0  ;;  %15191 = vmatmul.mubr.msk.f32.gmra.mrb[122].mxu0 %vm1453_vm4, %v18461_v18  ;;  %14808 = vmatprep.mubr.msk.f32.mxu1 %vm16543_vm6, %v16542_v12 }
 0x3bc   : > { %15193 = vmatprep.mubr.msk.f32.mxu0 %vm16543_vm6, %v16542_v12  ;;  %v18744_v32 = vadd.f32 %v18126_v55, %v3523_v6  ;;  %v4513_v6 = vld [vmem:[#allocation4 + $0xb1] sm:$0xff]  ;;  %v21454_v20 = vld [vmem:[#allocation29_spill] sm:$0xff] }
 0x3bd   : > { %v3452_v11 = vpop.f32.mrb[176].mxu1 }
 0x3be   : > { %v18746_v43 = vpop.f32.mrb[18].mxu0  ;;  %v3524_v46 = vadd.f32 %v3452_v11, %v18457_v41  ;;  %v14493_v13 = vpop.f32.mrb[177].mxu1  ;;  %14809 = vmatmul.mubr.msk.f32.gmra.mrb[26].mxu1 %vm1453_vm4, %v4509_v27  ;;  %v4510_v41 = vld [vmem:[#allocation4 + $0x99] sm:$0xff] }
 0x3bf   : > { %v14878_v19 = vpop.f32.mrb[19].mxu0  ;;  %15194 = vmatmul.mubr.msk.f32.gmra.mrb[124].mxu0 %vm1453_vm4, %v18476_v28  ;;  %14811 = vmatprep.mubr.msk.f32.mxu1 %vm16543_vm6, %v16542_v12 }
 0x3c0   : > { %15196 = vmatprep.mubr.msk.f32.mxu0 %vm16543_vm6, %v16542_v12  ;;  %v18757_v55 = vadd.f32 %v18138_v31, %v3524_v46  ;;  %v4514_v46 = vld [vmem:[#allocation4 + $0xb9] sm:$0xff] }
 0x3c1   : > { %v3457_v18 = vpop.f32.mrb[178].mxu1 }
 0x3c2   : > { %v18759_v44 = vpop.f32.mrb[20].mxu0  ;;  %v3525_v54 = vadd.f32 %v3457_v18, %v18472_v53  ;;  %v14496_v49 = vpop.f32.mrb[179].mxu1  ;;  %14812 = vmatmul.mubr.msk.f32.gmra.mrb[28].mxu1 %vm1453_vm4, %v4510_v41  ;;  %v4511_v53 = vld [vmem:[#allocation4 + $0xa1] sm:$0xff]  ;;  %v6110_v18 = vld [vmem:[#allocation4 + $0xcf] sm:$0xff] }
 0x3c3   : > { %v14881_v34 = vpop.f32.mrb[21].mxu0  ;;  %15197 = vmatmul.mubr.msk.f32.gmra.mrb[126].mxu0 %vm1453_vm4, %v18491_v57  ;;  %14814 = vmatprep.mubr.msk.f32.mxu1 %vm16543_vm6, %v16542_v12  ;;  %v4515_v49 = vld [vmem:[#allocation4 + $0xc1] sm:$0xff] }
 0x3c4   : > { %15199 = vmatprep.mubr.msk.f32.mxu0 %vm16543_vm6, %v16542_v12  ;;  %v18770_v31 = vadd.f32 %v18150_v50, %v3525_v54 }
 0x3c5   : > { %v3462_v28 = vpop.f32.mrb[180].mxu1 }
 0x3c6   : > { %v18772_v40 = vpop.f32.mrb[22].mxu0  ;;  %v3526_v33 = vadd.f32 %v3462_v28, %v18487_v62  ;;  %v14499_v14 = vpop.f32.mrb[181].mxu1  ;;  %14815 = vmatmul.mubr.msk.f32.gmra.mrb[30].mxu1 %vm1453_vm4, %v4511_v53  ;;  %v4512_v62 = vld [vmem:[#allocation4 + $0xa9] sm:$0xff]  ;;  %v6111_v53 = vld [vmem:[#allocation4 + $0xd7] sm:$0xff] }
 0x3c7   : > { %v14884_v10 = vpop.f32.mrb[23].mxu0  ;;  %15200 = vmatmul.mubr.msk.f32.gmra.mrb[128].mxu0 %vm1453_vm4, %v18504_v1  ;;  %14817 = vmatprep.mubr.msk.f32.mxu1 %vm16543_vm6, %v16542_v12  ;;  %v21452_v1 = vld [vmem:[#allocation10_spill] sm:$0xff] }
 0x3c8   : > { %15202 = vmatprep.mubr.msk.f32.mxu0 %vm16543_vm6, %v16542_v12  ;;  %v18783_v50 = vadd.f32 %v18162_v0, %v3526_v33  ;;  %v21453_v0 = vld [vmem:[#allocation11_spill] sm:$0xff] }
 0x3c9   : > { %v3467_v57 = vpop.f32.mrb[182].mxu1 }
 0x3ca   : > { %v18785_v47 = vpop.f32.mrb[24].mxu0  ;;  %v3527_v51 = vadd.f32 %v3467_v57, %v18502_v29  ;;  %v14502_v2 = vpop.f32.mrb[183].mxu1  ;;  %14818 = vmatmul.mubr.msk.f32.gmra.mrb[32].mxu1 %vm1453_vm4, %v4512_v62  ;;  %v4517_v62 = vld [vmem:[#allocation4 + $0xd1] sm:$0xf] }
 0x3cb   : > { %21451 = vst [vmem:[#allocation30_spill] sm:$0xff] %v18785_v47  ;;  %v14887_v36 = vpop.f32.mrb[25].mxu0  ;;  %15203 = vmatmul.mubr.msk.f32.gmra.mrb[130].mxu0 %vm1453_vm4, %v21452_v1  ;;  %14820 = vmatprep.mubr.msk.f32.mxu1 %vm16543_vm6, %v16542_v12 }
 0x3cc   : > { %15205 = vmatprep.mubr.msk.f32.mxu0 %vm16543_vm6, %v16542_v12  ;;  %v18796_v39 = vadd.f32 %v21453_v0, %v3527_v51  ;;  %v6112_v51 = vld [vmem:[#allocation4 + $0xdf] sm:$0xf] }
 0x3cd   : > { %v3472_v63 = vpop.f32.mrb[184].mxu1 }
 0x3ce   : > { %v5067_v3 = vpop.f32.mrb[26].mxu0  ;;  %v14505_v29 = vpop.f32.mrb[185].mxu1  ;;  %14821 = vmatmul.mubr.msk.f32.gmra.mrb[34].mxu1 %vm1453_vm4, %v4513_v6  ;;  %v5794_v63 = vld [vmem:[%s21413_s3 + $0x48] sm:$0x3f] }
 0x3cf   : > { %v14890_v9 = vpop.f32.mrb[27].mxu0  ;;  %15206 = vmatmul.mubr.msk.f32.gmra.mrb[132].mxu0 %vm1453_vm4, %v21454_v20  ;;  %14823 = vmatprep.mubr.msk.f32.mxu1 %vm16543_vm6, %v16542_v12  ;;  %v5131_v29 = vld [vmem:[#allocation4 + $0x1c] sm:$0xff] }
 0x3d0   : > { %15208 = vmatprep.mubr.msk.f32.mxu0 %vm16543_vm6, %v16542_v12  ;;  %v6726_v9 = vld [vmem:[#allocation4 + $0x2a] sm:$0xff] }
 0x3d1   : > { %v3477_v11 = vpop.f32.mrb[186].mxu1 }
 0x3d2   : > { %v5072_v27 = vpop.f32.mrb[28].mxu0  ;;  %v14508_v13 = vpop.f32.mrb[187].mxu1  ;;  %14824 = vmatmul.mubr.msk.f32.gmra.mrb[36].mxu1 %vm1453_vm4, %v4514_v46 }
 0x3d3   : > { %v14893_v19 = vpop.f32.mrb[29].mxu0  ;;  %15209 = vmatmul.mubr.msk.f32.gmra.mrb[134].mxu0 %vm1453_vm4, %v18531_v59  ;;  %14826 = vmatprep.mubr.msk.f32.mxu1 %vm16543_vm6, %v16542_v12  ;;  %v4516_v59 = vld [vmem:[#allocation4 + $0xc9] sm:$0xff] }
 0x3d4   : > { %15211 = vmatprep.mubr.msk.f32.mxu0 %vm16543_vm6, %v16542_v12  ;;  %v7389_v27 = vld [vmem:[%s21413_s3 + $0x66] sm:$0x3f]  ;;  %v5132_v13 = vld [vmem:[#allocation4 + $0x24] sm:$0xff] }
 0x3d5   : > { %v3482_v41 = vpop.f32.mrb[188].mxu1  ;;  %v6727_v19 = vld [vmem:[#allocation4 + $0x32] sm:$0xff] }
 0x3d6   : > { %v5077_v54 = vpop.f32.mrb[30].mxu0  ;;  %v14511_v34 = vpop.f32.mrb[189].mxu1  ;;  %14827 = vmatmul.mubr.msk.f32.gmra.mrb[38].mxu1 %vm1453_vm4, %v4515_v49 }
 0x3d7   : > { %v14896_v28 = vpop.f32.mrb[31].mxu0  ;;  %15212 = vmatmul.mubr.msk.f32.gmra.mrb[136].mxu0 %vm1453_vm4, %v6110_v18  ;;  %14829 = vmatprep.mubr.msk.f32.mxu1 %vm16543_vm6, %v16542_v12  ;;  %v18852_v34 = vld [vmem:[#allocation4 + $0x2c] sm:$0xff] }
 0x3d8   : > { %15214 = vmatprep.mubr.msk.f32.mxu0 %vm16543_vm6, %v16542_v12  ;;  %v6728_v28 = vld [vmem:[#allocation4 + $0x3a] sm:$0xff] }
 0x3d9   : > { %v3487_v33 = vpop.f32.mrb[190].mxu1 }
 0x3da   : > { %v5082_v14 = vpop.f32.mrb[32].mxu0  ;;  %v14514_v10 = vpop.f32.mrb[191].mxu1  ;;  %14830 = vmatmul.mubr.msk.f32.gmra.mrb[40].mxu1 %vm1453_vm4, %v4516_v59 }
 0x3db   : > { %v14899_v57 = vpop.f32.mrb[33].mxu0  ;;  %15215 = vmatmul.mubr.msk.f32.gmra.mrb[138].mxu0 %vm1453_vm4, %v6111_v53  ;;  %14832 = vmatprep.mubr.msk.f32.mxu1 %vm16543_vm6, %v16542_v12 }
 0x3dc   : > { %15217 = vmatprep.mubr.msk.f32.mxu0 %vm16543_vm6, %v16542_v12  ;;  %v18863_v57 = vld [vmem:[#allocation4 + $0x34] sm:$0xff] }
 0x3dd   : > { %v3492_v2 = vpop.f32.mrb[192].mxu1 }
 0x3de   : > { %v5087_v36 = vpop.f32.mrb[34].mxu0  ;;  %v14517_v1 = vpop.f32.mrb[193].mxu1  ;;  %14833 = vmatmul.mubr.msk.f32.gmra.mrb[42].mxu1 %vm1453_vm4, %v4517_v62  ;;  %v6729_v62 = vld [vmem:[#allocation4 + $0x42] sm:$0xff] }
 0x3df   : > { %v14902_v0 = vpop.f32.mrb[35].mxu0  ;;  %15218 = vmatmul.mubr.msk.f32.gmra.mrb[140].mxu0 %vm1453_vm4, %v6112_v51  ;;  %14914 = vmatprep.mubr.msk.f32.mxu1 %vm16543_vm6, %v16542_v12  ;;  %v21456_v1 = vld [vmem:[#allocation12_spill] sm:$0xff] }
 0x3e0   : > { %15299 = vmatprep.mubr.msk.f32.mxu0 %vm16543_vm6, %v16542_v12 }
 0x3e1   : > { %v3497_v3 = vpop.f32.mrb[194].mxu1 }
 0x3e2   : > { %v5092_v6 = vpop.f32.mrb[36].mxu0  ;;  %v14520_v20 = vpop.f32.mrb[195].mxu1  ;;  %14915 = vmatmul.mubr.msk.f32.vlgmr.msra.gmra.mrb[44].mxu1 %vm1453_vm4, %v5131_v29 }
 0x3e3   : > { %v14905_v11 = vpop.f32.mrb[37].mxu0  ;;  %15300 = vmatmul.mubr.msk.f32.vlgmr.msra.gmra.mrb[142].mxu0 %vm1453_vm4, %v6726_v9  ;;  %15067 = vmatpush3.msk.msra.mxu1 %vm2117_vm5, %v5794_v63  ;;  %v6730_v6 = vld [vmem:[#allocation4 + $0x4a] sm:$0xff] }
 0x3e4   : > { %14917 = vmatprep.mubr.msk.f32.mxu1 %vm16543_vm6, %v16542_v12  ;;  %15302 = vmatprep.mubr.msk.f32.mxu0 %vm16543_vm6, %v16542_v12  ;;  %v21458_v11 = vld [vmem:[#allocation13_spill] sm:$0xff] }
 0x3e5   : > { %15220 = vmatprep.subr.mxu1 %v16542_v12  ;;  %v3502_v46 = vpop.f32.mrb[196].mxu1  ;;  %15452 = vmatpush3.msk.msra.mxu0 %vm2117_vm5, %v7389_v27 }
 0x3e6   : > { %v5097_v18 = vpop.f32.mrb[38].mxu0  ;;  %v14523_v41 = vpop.f32.mrb[197].mxu1  ;;  %14918 = vmatmul.mubr.msk.f32.gmra.mrb[46].mxu1 %vm1453_vm4, %v5132_v13  ;;  %15605 = vmatprep.subr.mxu0 %v16542_v12 }
 0x3e7   : > { %15303 = vmatmul.mubr.msk.f32.gmra.mrb[144].mxu0 %vm1453_vm4, %v6727_v19  ;;  %v14908_v54 = vpop.f32.mrb[39].mxu0  ;;  %14920 = vmatprep.mubr.msk.f32.mxu1 %vm16543_vm6, %v16542_v12  ;;  %v6731_v19 = vld [vmem:[#allocation4 + $0x52] sm:$0xff] }
 0x3e8   : > { %15305 = vmatprep.mubr.msk.f32.mxu0 %vm16543_vm6, %v16542_v12 }
 0x3e9   : > { %v3507_v49 = vpop.f32.mrb[198].mxu1 }
 0x3ea   : > { %v5102_v59 = vpop.f32.mrb[40].mxu0  ;;  %v14526_v53 = vpop.f32.mrb[199].mxu1  ;;  %14921 = vmatmul.mubr.msk.f32.gmra.mrb[48].mxu1 %vm1453_vm4, %v18852_v34  ;;  %v21460_v49 = vld [vmem:[#allocation14_spill] sm:$0xff] }
 0x3eb   : > { %15306 = vmatmul.mubr.msk.f32.gmra.mrb[146].mxu0 %vm1453_vm4, %v6728_v28  ;;  %v14911_v33 = vpop.f32.mrb[41].mxu0  ;;  %14923 = vmatprep.mubr.msk.f32.mxu1 %vm16543_vm6, %v16542_v12 }
 0x3ec   : > { %15308 = vmatprep.mubr.msk.f32.mxu0 %vm16543_vm6, %v16542_v12  ;;  %v6732_v33 = vld [vmem:[#allocation4 + $0x5a] sm:$0xff] }
 0x3ed   : > { %v4025_v14 = vpop.f32.mrb[200].mxu1 }
 0x3ee   : > { %v18861_v10 = vpop.f32.mrb[42].mxu0  ;;  %v4149_v51 = vadd.f32 %v4025_v14, %v18588_v22  ;;  %v14608_v2 = vpop.f32.mrb[201].mxu1  ;;  %14924 = vmatmul.mubr.msk.f32.gmra.mrb[50].mxu1 %vm1453_vm4, %v18863_v57  ;;  %v18878_v22 = vld [vmem:[#allocation4 + $0x3c] sm:$0xff] }
 0x3ef   : > { %21455 = vst [vmem:[#allocation10_spill] sm:$0xff] %v18861_v10  ;;  %v14993_v36 = vpop.f32.mrb[43].mxu0  ;;  %15309 = vmatmul.mubr.msk.f32.gmra.mrb[148].mxu0 %vm1453_vm4, %v6729_v62  ;;  %14926 = vmatprep.mubr.msk.f32.mxu1 %vm16543_vm6, %v16542_v12  ;;  %v21462_v2 = vld [vmem:[#allocation15_spill] sm:$0xff] }
 0x3f0   : > { %15311 = vmatprep.mubr.msk.f32.mxu0 %vm16543_vm6, %v16542_v12  ;;  %v18874_v0 = vadd.f32 %v21456_v1, %v4149_v51 }
 0x3f1   : > { %v4030_v63 = vpop.f32.mrb[202].mxu1 }
 0x3f2   : > { %v18876_v3 = vpop.f32.mrb[44].mxu0  ;;  %v4150_v29 = vadd.f32 %v4030_v63, %v18601_v35  ;;  %v14611_v9 = vpop.f32.mrb[203].mxu1  ;;  %14927 = vmatmul.mubr.msk.f32.gmra.mrb[52].mxu1 %vm1453_vm4, %v18878_v22  ;;  %v18893_v35 = vld [vmem:[#allocation4 + $0x44] sm:$0xff] }
 0x3f3   : > { %21457 = vst [vmem:[#allocation11_spill] sm:$0xff] %v18876_v3  ;;  %v14996_v20 = vpop.f32.mrb[45].mxu0  ;;  %15312 = vmatmul.mubr.msk.f32.gmra.mrb[150].mxu0 %vm1453_vm4, %v6730_v6  ;;  %14929 = vmatprep.mubr.msk.f32.mxu1 %vm16543_vm6, %v16542_v12  ;;  %v6733_v6 = vld [vmem:[#allocation4 + $0x62] sm:$0xff] }
 0x3f4   : > { %15314 = vmatprep.mubr.msk.f32.mxu0 %vm16543_vm6, %v16542_v12  ;;  %v18889_v27 = vadd.f32 %v21458_v11, %v4150_v29  ;;  %v21464_v11 = vld [vmem:[#allocation16_spill] sm:$0xff] }
 0x3f5   : > { %v4035_v46 = vpop.f32.mrb[204].mxu1 }
 0x3f6   : > { %v18891_v13 = vpop.f32.mrb[46].mxu0  ;;  %v4151_v18 = vadd.f32 %v4035_v46, %v18614_v42  ;;  %v14614_v41 = vpop.f32.mrb[205].mxu1  ;;  %14930 = vmatmul.mubr.msk.f32.gmra.mrb[54].mxu1 %vm1453_vm4, %v18893_v35  ;;  %v18908_v42 = vld [vmem:[#allocation4 + $0x4c] sm:$0xff] }
 0x3f7   : > { %21459 = vst [vmem:[#allocation29_spill] sm:$0xff] %v18891_v13  ;;  %v14999_v54 = vpop.f32.mrb[47].mxu0  ;;  %15315 = vmatmul.mubr.msk.f32.gmra.mrb[152].mxu0 %vm1453_vm4, %v6731_v19  ;;  %14932 = vmatprep.mubr.msk.f32.mxu1 %vm16543_vm6, %v16542_v12  ;;  %v6734_v41 = vld [vmem:[#allocation4 + $0x6a] sm:$0xff] }
 0x3f8   : > { %15317 = vmatprep.mubr.msk.f32.mxu0 %vm16543_vm6, %v16542_v12  ;;  %v18904_v28 = vadd.f32 %v21460_v49, %v4151_v18 }
 0x3f9   : > { %v4040_v59 = vpop.f32.mrb[206].mxu1 }
 0x3fa   : > { %v18906_v53 = vpop.f32.mrb[48].mxu0  ;;  %v4152_v14 = vadd.f32 %v4040_v59, %v18627_v16  ;;  %v14617_v62 = vpop.f32.mrb[207].mxu1  ;;  %14933 = vmatmul.mubr.msk.f32.gmra.mrb[56].mxu1 %vm1453_vm4, %v18908_v42  ;;  %v18923_v16 = vld [vmem:[#allocation4 + $0x54] sm:$0xff] }
 0x3fb   : > { %21461 = vst [vmem:[#allocation12_spill] sm:$0xff] %v18906_v53  ;;  %v15002_v51 = vpop.f32.mrb[49].mxu0  ;;  %15318 = vmatmul.mubr.msk.f32.gmra.mrb[154].mxu0 %vm1453_vm4, %v6732_v33  ;;  %14935 = vmatprep.mubr.msk.f32.mxu1 %vm16543_vm6, %v16542_v12  ;;  %v21466_v33 = vld [vmem:[#allocation17_spill] sm:$0xff] }
 0x3fc   : > { %15320 = vmatprep.mubr.msk.f32.mxu0 %vm16543_vm6, %v16542_v12  ;;  %v18919_v36 = vadd.f32 %v21462_v2, %v4152_v14  ;;  %v6735_v2 = vld [vmem:[#allocation4 + $0x72] sm:$0xff] }
 0x3fd   : > { %v4045_v1 = vpop.f32.mrb[208].mxu1 }
 0x3fe   : > { %v18921_v63 = vpop.f32.mrb[50].mxu0  ;;  %v4153_v29 = vadd.f32 %v4045_v1, %v18640_v24  ;;  %v14620_v9 = vpop.f32.mrb[209].mxu1  ;;  %14936 = vmatmul.mubr.msk.f32.gmra.mrb[58].mxu1 %vm1453_vm4, %v18923_v16  ;;  %v18938_v24 = vld [vmem:[#allocation4 + $0x5c] sm:$0xff] }
 0x3ff   : > { %21463 = vst [vmem:[#allocation13_spill] sm:$0xff] %v18921_v63  ;;  %v15005_v20 = vpop.f32.mrb[51].mxu0  ;;  %15321 = vmatmul.mubr.msk.f32.gmra.mrb[156].mxu0 %vm1453_vm4, %v6733_v6  ;;  %14938 = vmatprep.mubr.msk.f32.mxu1 %vm16543_vm6, %v16542_v12  ;;  %v21468_v9 = vld [vmem:[#allocation18_spill] sm:$0xff] }
 0x400   : > { %15323 = vmatprep.mubr.msk.f32.mxu0 %vm16543_vm6, %v16542_v12  ;;  %v18934_v46 = vadd.f32 %v21464_v11, %v4153_v29 }
 0x401   : > { %v4050_v19 = vpop.f32.mrb[210].mxu1 }
 0x402   : > { %v18936_v18 = vpop.f32.mrb[52].mxu0  ;;  %v4154_v54 = vadd.f32 %v4050_v19, %v18653_v38  ;;  %v14623_v49 = vpop.f32.mrb[211].mxu1  ;;  %14939 = vmatmul.mubr.msk.f32.gmra.mrb[60].mxu1 %vm1453_vm4, %v18938_v24  ;;  %v18953_v38 = vld [vmem:[#allocation4 + $0x64] sm:$0xff] }
 0x403   : > { %21465 = vst [vmem:[#allocation14_spill] sm:$0xff] %v18936_v18  ;;  %v15008_v59 = vpop.f32.mrb[53].mxu0  ;;  %15324 = vmatmul.mubr.msk.f32.gmra.mrb[158].mxu0 %vm1453_vm4, %v6734_v41  ;;  %14941 = vmatprep.mubr.msk.f32.mxu1 %vm16543_vm6, %v16542_v12  ;;  %v6736_v41 = vld [vmem:[#allocation4 + $0x7a] sm:$0xff] }
 0x404   : > { %15326 = vmatprep.mubr.msk.f32.mxu0 %vm16543_vm6, %v16542_v12  ;;  %v18949_v14 = vadd.f32 %v21466_v33, %v4154_v54  ;;  %v21470_v33 = vld [vmem:[#allocation19_spill] sm:$0xff] }
 0x405   : > { %v4055_v62 = vpop.f32.mrb[212].mxu1 }
 0x406   : > { %v18951_v51 = vpop.f32.mrb[54].mxu0  ;;  %v4155_v1 = vadd.f32 %v4055_v62, %v18666_v26  ;;  %v14626_v6 = vpop.f32.mrb[213].mxu1  ;;  %14942 = vmatmul.mubr.msk.f32.gmra.mrb[62].mxu1 %vm1453_vm4, %v18953_v38  ;;  %v18968_v26 = vld [vmem:[#allocation4 + $0x6c] sm:$0xff] }
 0x407   : > { %21467 = vst [vmem:[#allocation15_spill] sm:$0xff] %v18951_v51  ;;  %v15011_v29 = vpop.f32.mrb[55].mxu0  ;;  %15327 = vmatmul.mubr.msk.f32.gmra.mrb[160].mxu0 %vm1453_vm4, %v6735_v2  ;;  %14944 = vmatprep.mubr.msk.f32.mxu1 %vm16543_vm6, %v16542_v12  ;;  %v6737_v6 = vld [vmem:[#allocation4 + $0x82] sm:$0xff] }
 0x408   : > { %15329 = vmatprep.mubr.msk.f32.mxu0 %vm16543_vm6, %v16542_v12  ;;  %v18964_v20 = vadd.f32 %v21468_v9, %v4155_v1 }
 0x409   : > { %v4060_v11 = vpop.f32.mrb[214].mxu1 }
 0x40a   : > { %v18966_v19 = vpop.f32.mrb[56].mxu0  ;;  %v4156_v54 = vadd.f32 %v4060_v11, %v18679_v45  ;;  %v14629_v49 = vpop.f32.mrb[215].mxu1  ;;  %14945 = vmatmul.mubr.msk.f32.gmra.mrb[64].mxu1 %vm1453_vm4, %v18968_v26  ;;  %v18983_v45 = vld [vmem:[#allocation4 + $0x74] sm:$0xff] }
 0x40b   : > { %21469 = vst [vmem:[#allocation16_spill] sm:$0xff] %v18966_v19  ;;  %v15014_v59 = vpop.f32.mrb[57].mxu0  ;;  %15330 = vmatmul.mubr.msk.f32.gmra.mrb[162].mxu0 %vm1453_vm4, %v6736_v41  ;;  %14947 = vmatprep.mubr.msk.f32.mxu1 %vm16543_vm6, %v16542_v12  ;;  %v21472_v41 = vld [vmem:[#allocation20_spill] sm:$0xff] }
 0x40c   : > { %15332 = vmatprep.mubr.msk.f32.mxu0 %vm16543_vm6, %v16542_v12  ;;  %v18979_v62 = vadd.f32 %v21470_v33, %v4156_v54  ;;  %v6738_v33 = vld [vmem:[#allocation4 + $0x8a] sm:$0xff] }
 0x40d   : > { %v4065_v2 = vpop.f32.mrb[216].mxu1 }
 0x40e   : > { %v18981_v1 = vpop.f32.mrb[58].mxu0  ;;  %v4157_v29 = vadd.f32 %v4065_v2, %v18692_v60  ;;  %v14632_v9 = vpop.f32.mrb[217].mxu1  ;;  %14948 = vmatmul.mubr.msk.f32.gmra.mrb[66].mxu1 %vm1453_vm4, %v18983_v45  ;;  %v18998_v60 = vld [vmem:[#allocation4 + $0x7c] sm:$0xff] }
 0x40f   : > { %21471 = vst [vmem:[#allocation17_spill] sm:$0xff] %v18981_v1  ;;  %v15017_v11 = vpop.f32.mrb[59].mxu0  ;;  %15333 = vmatmul.mubr.msk.f32.gmra.mrb[164].mxu0 %vm1453_vm4, %v6737_v6  ;;  %14950 = vmatprep.mubr.msk.f32.mxu1 %vm16543_vm6, %v16542_v12 }
 0x410   : > { %15335 = vmatprep.mubr.msk.f32.mxu0 %vm16543_vm6, %v16542_v12  ;;  %v18994_v54 = vadd.f32 %v21472_v41, %v4157_v29  ;;  %v21474_v29 = vld [vmem:[#allocation21_spill] sm:$0xff] }
 0x411   : > { %v4070_v49 = vpop.f32.mrb[218].mxu1 }
 0x412   : > { %v18996_v59 = vpop.f32.mrb[60].mxu0  ;;  %v4158_v2 = vadd.f32 %v4070_v49, %v18705_v5  ;;  %v14635_v9 = vpop.f32.mrb[219].mxu1  ;;  %14951 = vmatmul.mubr.msk.f32.gmra.mrb[68].mxu1 %vm1453_vm4, %v18998_v60  ;;  %v19013_v5 = vld [vmem:[#allocation4 + $0x84] sm:$0xff]  ;;  %v6739_v49 = vld [vmem:[#allocation4 + $0x92] sm:$0xff] }
 0x413   : > { %21473 = vst [vmem:[#allocation18_spill] sm:$0xff] %v18996_v59  ;;  %v15020_v6 = vpop.f32.mrb[61].mxu0  ;;  %15336 = vmatmul.mubr.msk.f32.gmra.mrb[166].mxu0 %vm1453_vm4, %v6738_v33  ;;  %14953 = vmatprep.mubr.msk.f32.mxu1 %vm16543_vm6, %v16542_v12 }
 0x414   : > { %15338 = vmatprep.mubr.msk.f32.mxu0 %vm16543_vm6, %v16542_v12  ;;  %v19009_v11 = vadd.f32 %v21474_v29, %v4158_v2  ;;  %v21476_v2 = vld [vmem:[#allocation22_spill] sm:$0xff] }
 0x415   : > { %v4075_v41 = vpop.f32.mrb[220].mxu1 }
 0x416   : > { %v19011_v59 = vpop.f32.mrb[62].mxu0  ;;  %v4159_v9 = vadd.f32 %v4075_v41, %v18718_v52  ;;  %v14638_v6 = vpop.f32.mrb[221].mxu1  ;;  %14954 = vmatmul.mubr.msk.f32.gmra.mrb[70].mxu1 %vm1453_vm4, %v19013_v5  ;;  %v19028_v52 = vld [vmem:[#allocation4 + $0x8c] sm:$0xff]  ;;  %v6740_v41 = vld [vmem:[#allocation4 + $0x9a] sm:$0xff] }
 0x417   : > { %21475 = vst [vmem:[#allocation19_spill] sm:$0xff] %v19011_v59  ;;  %v15023_v33 = vpop.f32.mrb[63].mxu0  ;;  %15339 = vmatmul.mubr.msk.f32.gmra.mrb[168].mxu0 %vm1453_vm4, %v6739_v49  ;;  %14956 = vmatprep.mubr.msk.f32.mxu1 %vm16543_vm6, %v16542_v12 }
 0x418   : > { %15341 = vmatprep.mubr.msk.f32.mxu0 %vm16543_vm6, %v16542_v12  ;;  %v19024_v29 = vadd.f32 %v21476_v2, %v4159_v9  ;;  %v21478_v9 = vld [vmem:[#allocation23_spill] sm:$0xff] }
 0x419   : > { %v4080_v59 = vpop.f32.mrb[222].mxu1 }
 0x41a   : > { %v19026_v1 = vpop.f32.mrb[64].mxu0  ;;  %v4160_v6 = vadd.f32 %v4080_v59, %v18731_v8  ;;  %v14641_v33 = vpop.f32.mrb[223].mxu1  ;;  %14957 = vmatmul.mubr.msk.f32.gmra.mrb[72].mxu1 %vm1453_vm4, %v19028_v52  ;;  %v19043_v8 = vld [vmem:[#allocation4 + $0x94] sm:$0xff]  ;;  %v6741_v59 = vld [vmem:[#allocation4 + $0xa2] sm:$0xff] }
 0x41b   : > { %21477 = vst [vmem:[#allocation20_spill] sm:$0xff] %v19026_v1  ;;  %v15026_v49 = vpop.f32.mrb[65].mxu0  ;;  %15342 = vmatmul.mubr.msk.f32.gmra.mrb[170].mxu0 %vm1453_vm4, %v6740_v41  ;;  %14959 = vmatprep.mubr.msk.f32.mxu1 %vm16543_vm6, %v16542_v12 }
 0x41c   : > { %15344 = vmatprep.mubr.msk.f32.mxu0 %vm16543_vm6, %v16542_v12  ;;  %v19039_v2 = vadd.f32 %v21478_v9, %v4160_v6  ;;  %v21480_v6 = vld [vmem:[#allocation24_spill] sm:$0xff] }
 0x41d   : > { %v4085_v1 = vpop.f32.mrb[224].mxu1 }
 0x41e   : > { %v19041_v19 = vpop.f32.mrb[66].mxu0  ;;  %v4161_v33 = vadd.f32 %v4085_v1, %v18744_v32  ;;  %v14644_v49 = vpop.f32.mrb[225].mxu1  ;;  %14960 = vmatmul.mubr.msk.f32.gmra.mrb[74].mxu1 %vm1453_vm4, %v19043_v8  ;;  %v19058_v32 = vld [vmem:[#allocation4 + $0x9c] sm:$0xff]  ;;  %v6742_v1 = vld [vmem:[#allocation4 + $0xaa] sm:$0xff] }
 0x41f   : > { %21479 = vst [vmem:[#allocation21_spill] sm:$0xff] %v19041_v19  ;;  %v15029_v41 = vpop.f32.mrb[67].mxu0  ;;  %15345 = vmatmul.mubr.msk.f32.gmra.mrb[172].mxu0 %vm1453_vm4, %v6741_v59  ;;  %14962 = vmatprep.mubr.msk.f32.mxu1 %vm16543_vm6, %v16542_v12 }
 0x420   : > { %15347 = vmatprep.mubr.msk.f32.mxu0 %vm16543_vm6, %v16542_v12  ;;  %v19054_v9 = vadd.f32 %v21480_v6, %v4161_v33  ;;  %v21482_v33 = vld [vmem:[#allocation25_spill] sm:$0xff] }
 0x421   : > { %v4090_v19 = vpop.f32.mrb[226].mxu1 }
 0x422   : > { %v19056_v51 = vpop.f32.mrb[68].mxu0  ;;  %v4162_v49 = vadd.f32 %v4090_v19, %v18757_v55  ;;  %v14647_v41 = vpop.f32.mrb[227].mxu1  ;;  %14963 = vmatmul.mubr.msk.f32.gmra.mrb[76].mxu1 %vm1453_vm4, %v19058_v32  ;;  %v19073_v55 = vld [vmem:[#allocation4 + $0xa4] sm:$0xff]  ;;  %v6743_v19 = vld [vmem:[#allocation4 + $0xb2] sm:$0xff] }
 0x423   : > { %21481 = vst [vmem:[#allocation22_spill] sm:$0xff] %v19056_v51  ;;  %v15032_v59 = vpop.f32.mrb[69].mxu0  ;;  %15348 = vmatmul.mubr.msk.f32.gmra.mrb[174].mxu0 %vm1453_vm4, %v6742_v1  ;;  %14965 = vmatprep.mubr.msk.f32.mxu1 %vm16543_vm6, %v16542_v12 }
 0x424   : > { %15350 = vmatprep.mubr.msk.f32.mxu0 %vm16543_vm6, %v16542_v12  ;;  %v19069_v6 = vadd.f32 %v21482_v33, %v4162_v49  ;;  %v21484_v49 = vld [vmem:[#allocation26_spill] sm:$0xff] }
 0x425   : > { %v4095_v51 = vpop.f32.mrb[228].mxu1 }
 0x426   : > { %v19071_v18 = vpop.f32.mrb[70].mxu0  ;;  %v4163_v41 = vadd.f32 %v4095_v51, %v18770_v31  ;;  %v14650_v59 = vpop.f32.mrb[229].mxu1  ;;  %14966 = vmatmul.mubr.msk.f32.gmra.mrb[78].mxu1 %vm1453_vm4, %v19073_v55  ;;  %v19088_v31 = vld [vmem:[#allocation4 + $0xac] sm:$0xff]  ;;  %v6744_v51 = vld [vmem:[#allocation4 + $0xba] sm:$0xff] }
 0x427   : > { %21483 = vst [vmem:[#allocation23_spill] sm:$0xff] %v19071_v18  ;;  %v15035_v1 = vpop.f32.mrb[71].mxu0  ;;  %15351 = vmatmul.mubr.msk.f32.gmra.mrb[176].mxu0 %vm1453_vm4, %v6743_v19  ;;  %14968 = vmatprep.mubr.msk.f32.mxu1 %vm16543_vm6, %v16542_v12 }
 0x428   : > { %15353 = vmatprep.mubr.msk.f32.mxu0 %vm16543_vm6, %v16542_v12  ;;  %v19084_v33 = vadd.f32 %v21484_v49, %v4163_v41  ;;  %v21486_v41 = vld [vmem:[#allocation27_spill] sm:$0xff] }
 0x429   : > { %v4100_v18 = vpop.f32.mrb[230].mxu1 }
 0x42a   : > { %v19086_v63 = vpop.f32.mrb[72].mxu0  ;;  %v4164_v59 = vadd.f32 %v4100_v18, %v18783_v50  ;;  %v14653_v1 = vpop.f32.mrb[231].mxu1  ;;  %14969 = vmatmul.mubr.msk.f32.gmra.mrb[80].mxu1 %vm1453_vm4, %v19088_v31  ;;  %v19103_v50 = vld [vmem:[#allocation4 + $0xb4] sm:$0xff]  ;;  %v6745_v18 = vld [vmem:[#allocation4 + $0xc2] sm:$0xff] }
 0x42b   : > { %21485 = vst [vmem:[#allocation24_spill] sm:$0xff] %v19086_v63  ;;  %v15038_v19 = vpop.f32.mrb[73].mxu0  ;;  %15354 = vmatmul.mubr.msk.f32.gmra.mrb[178].mxu0 %vm1453_vm4, %v6744_v51  ;;  %14971 = vmatprep.mubr.msk.f32.mxu1 %vm16543_vm6, %v16542_v12 }
 0x42c   : > { %15356 = vmatprep.mubr.msk.f32.mxu0 %vm16543_vm6, %v16542_v12  ;;  %v19099_v49 = vadd.f32 %v21486_v41, %v4164_v59  ;;  %v6746_v59 = vld [vmem:[#allocation4 + $0xca] sm:$0xff]  ;;  %v21488_v41 = vld [vmem:[#allocation28_spill] sm:$0xff] }
 0x42d   : > { %v4105_v63 = vpop.f32.mrb[232].mxu1 }
 0x42e   : > { %v19101_v53 = vpop.f32.mrb[74].mxu0  ;;  %v4165_v1 = vadd.f32 %v4105_v63, %v18796_v39  ;;  %v14656_v19 = vpop.f32.mrb[233].mxu1  ;;  %14972 = vmatmul.mubr.msk.f32.gmra.mrb[82].mxu1 %vm1453_vm4, %v19103_v50  ;;  %v19116_v39 = vld [vmem:[#allocation4 + $0xbc] sm:$0xff] }
 0x42f   : > { %21487 = vst [vmem:[#allocation25_spill] sm:$0xff] %v19101_v53  ;;  %v15041_v51 = vpop.f32.mrb[75].mxu0  ;;  %15357 = vmatmul.mubr.msk.f32.gmra.mrb[180].mxu0 %vm1453_vm4, %v6745_v18  ;;  %14974 = vmatprep.mubr.msk.f32.mxu1 %vm16543_vm6, %v16542_v12  ;;  %v19125_v18 = vld [vmem:[#allocation4 + $0xc4] sm:$0xff] }
 0x430   : > { %15359 = vmatprep.mubr.msk.f32.mxu0 %vm16543_vm6, %v16542_v12  ;;  %v19114_v53 = vadd.f32 %v21488_v41, %v4165_v1  ;;  %21489 = vst [vmem:[#allocation26_spill] sm:$0xff] %v19125_v18  ;;  %v6747_v1 = vld [vmem:[#allocation4 + $0xd2] sm:$0xff] }
 0x431   : > { %v4110_v13 = vpop.f32.mrb[234].mxu1 }
 0x432   : > { %v5705_v3 = vpop.f32.mrb[76].mxu0  ;;  %v14659_v63 = vpop.f32.mrb[235].mxu1  ;;  %14975 = vmatmul.mubr.msk.f32.gmra.mrb[84].mxu1 %vm1453_vm4, %v19116_v39 }
 0x433   : > { %v15044_v19 = vpop.f32.mrb[77].mxu0  ;;  %15360 = vmatmul.mubr.msk.f32.gmra.mrb[182].mxu0 %vm1453_vm4, %v6746_v59  ;;  %14977 = vmatprep.mubr.msk.f32.mxu1 %vm16543_vm6, %v16542_v12  ;;  %v19134_v59 = vld [vmem:[#allocation4 + $0xcc] sm:$0xff]  ;;  %v6748_v63 = vld [vmem:[#allocation4 + $0xda] sm:$0xff] }
 0x434   : > { %15362 = vmatprep.mubr.msk.f32.mxu0 %vm16543_vm6, %v16542_v12  ;;  %21490 = vst [vmem:[#allocation27_spill] sm:$0xff] %v19134_v59 }
 0x435   : > { %v4115_v13 = vpop.f32.mrb[236].mxu1 }
 0x436   : > { %v5710_v3 = vpop.f32.mrb[78].mxu0  ;;  %v14662_v51 = vpop.f32.mrb[237].mxu1  ;;  %14978 = vmatmul.mubr.msk.f32.gmra.mrb[86].mxu1 %vm1453_vm4, %v19125_v18 }
 0x437   : > { %v15047_v41 = vpop.f32.mrb[79].mxu0  ;;  %15363 = vmatmul.mubr.msk.f32.gmra.mrb[184].mxu0 %vm1453_vm4, %v6747_v1  ;;  %14980 = vmatprep.mubr.msk.f32.mxu1 %vm16543_vm6, %v16542_v12  ;;  %v19143_v1 = vld [vmem:[#allocation4 + $0xd4] sm:$0xff]  ;;  %v6749_v51 = vld [vmem:[#allocation4 + $0xe2] sm:$0xff] }
 0x438   : > { %15365 = vmatprep.mubr.msk.f32.mxu0 %vm16543_vm6, %v16542_v12 }
 0x439   : > { %v4120_v19 = vpop.f32.mrb[238].mxu1 }
 0x43a   : > { %v5715_v10 = vpop.f32.mrb[80].mxu0  ;;  %v14665_v13 = vpop.f32.mrb[239].mxu1  ;;  %14981 = vmatmul.mubr.msk.f32.gmra.mrb[88].mxu1 %vm1453_vm4, %v19134_v59 }
 0x43b   : > { %v15050_v3 = vpop.f32.mrb[81].mxu0  ;;  %15366 = vmatmul.mubr.msk.f32.gmra.mrb[186].mxu0 %vm1453_vm4, %v6748_v63  ;;  %14983 = vmatprep.mubr.msk.f32.mxu1 %vm16543_vm6, %v16542_v12  ;;  %v5155_v63 = vld [vmem:[#allocation4 + $0xdc] sm:$0xf]  ;;  %v6750_v13 = vld [vmem:[#allocation4 + $0xea] sm:$0xf] }
 0x43c   : > { %15368 = vmatprep.mubr.msk.f32.mxu0 %vm16543_vm6, %v16542_v12 }
 0x43d   : > { %v4125_v41 = vpop.f32.mrb[240].mxu1 }
 0x43e   : > { %v5720_v47 = vpop.f32.mrb[82].mxu0  ;;  %v14668_v19 = vpop.f32.mrb[241].mxu1  ;;  %14984 = vmatmul.mubr.msk.f32.gmra.mrb[90].mxu1 %vm1453_vm4, %v19143_v1 }
 0x43f   : > { %v15053_v10 = vpop.f32.mrb[83].mxu0  ;;  %15369 = vmatmul.mubr.msk.f32.gmra.mrb[188].mxu0 %vm1453_vm4, %v6749_v51  ;;  %14986 = vmatprep.mubr.msk.f32.mxu1 %vm16543_vm6, %v16542_v12  ;;  %v6432_v51 = vld [vmem:[%s21413_s3 + $0x54] sm:$0x3f] }
 0x440   : > { %15371 = vmatprep.mubr.msk.f32.mxu0 %vm16543_vm6, %v16542_v12  ;;  %v5769_v19 = vld [vmem:[#allocation4 + $0x1e] sm:$0xff] }
 0x441   : > { %v4130_v3 = vpop.f32.mrb[242].mxu1 }
 0x442   : > { %v5725_v59 = vpop.f32.mrb[84].mxu0  ;;  %v14671_v18 = vpop.f32.mrb[243].mxu1  ;;  %14987 = vmatmul.mubr.msk.f32.gmra.mrb[92].mxu1 %vm1453_vm4, %v5155_v63  ;;  %v8027_v63 = vld [vmem:[%s21413_s3 + $0x72] sm:$0x3f]  ;;  %v5770_v3 = vld [vmem:[#allocation4 + $0x26] sm:$0xff] }
 0x443   : > { %15372 = vmatmul.mubr.msk.f32.gmra.mrb[190].mxu0 %vm1453_vm4, %v6750_v13  ;;  %v15056_v47 = vpop.f32.mrb[85].mxu0  ;;  %15068 = vmatprep.mubr.msk.f32.mxu1 %vm16543_vm6, %v16542_v12 }
 0x444   : > { %15453 = vmatprep.mubr.msk.f32.mxu0 %vm16543_vm6, %v16542_v12 }
 0x445   : > { %v4135_v41 = vpop.f32.mrb[244].mxu1 }
 0x446   : > { %v5730_v10 = vpop.f32.mrb[86].mxu0  ;;  %v14674_v59 = vpop.f32.mrb[245].mxu1  ;;  %15069 = vmatmul.mubr.msk.f32.vlgmr.msra.gmra.mrb[94].mxu1 %vm1453_vm4, %v5769_v19  ;;  %v19182_v19 = vld [vmem:[#allocation4 + $0x2e] sm:$0xff] }
 0x447   : > { %15454 = vmatmul.mubr.msk.f32.vlgmr.msra.gmra.mrb[192].mxu0 %vm1453_vm4, %v18852_v34  ;;  %v15059_v18 = vpop.f32.mrb[87].mxu0  ;;  %15221 = vmatpush3.msk.msra.mxu1 %vm2117_vm5, %v6432_v51 }
 0x448   : > { %15071 = vmatprep.mubr.msk.f32.mxu1 %vm16543_vm6, %v16542_v12  ;;  %15456 = vmatprep.mubr.msk.f32.mxu0 %vm16543_vm6, %v16542_v12 }
 0x449   : > { %15374 = vmatprep.subr.mxu1 %v16542_v12  ;;  %v4140_v13 = vpop.f32.mrb[246].mxu1  ;;  %15606 = vmatpush3.msk.msra.mxu0 %vm2117_vm5, %v8027_v63 }
 0x44a   : > { %v5735_v47 = vpop.f32.mrb[88].mxu0  ;;  %v14677_v34 = vpop.f32.mrb[247].mxu1  ;;  %15072 = vmatmul.mubr.msk.f32.gmra.mrb[96].mxu1 %vm1453_vm4, %v5770_v3  ;;  %15759 = vmatprep.subr.mxu0 %v16542_v12  ;;  %v19194_v13 = vld [vmem:[#allocation4 + $0x36] sm:$0xff] }
 0x44b   : > { %15457 = vmatmul.mubr.msk.f32.gmra.mrb[194].mxu0 %vm1453_vm4, %v18863_v57  ;;  %v15062_v51 = vpop.f32.mrb[89].mxu0  ;;  %15074 = vmatprep.mubr.msk.f32.mxu1 %vm16543_vm6, %v16542_v12 }
 0x44c   : > { %15459 = vmatprep.mubr.msk.f32.mxu0 %vm16543_vm6, %v16542_v12 }
 0x44d   : > { %v4145_v41 = vpop.f32.mrb[248].mxu1 }
 0x44e   : > { %v5740_v10 = vpop.f32.mrb[90].mxu0  ;;  %v14680_v59 = vpop.f32.mrb[249].mxu1  ;;  %15075 = vmatmul.mubr.msk.f32.gmra.mrb[98].mxu1 %vm1453_vm4, %v19182_v19 }
 0x44f   : > { %15460 = vmatmul.mubr.msk.f32.gmra.mrb[196].mxu0 %vm1453_vm4, %v18878_v22  ;;  %v15065_v57 = vpop.f32.mrb[91].mxu0  ;;  %15077 = vmatprep.mubr.msk.f32.mxu1 %vm16543_vm6, %v16542_v12 }
 0x450   : > { %15462 = vmatprep.mubr.msk.f32.mxu0 %vm16543_vm6, %v16542_v12 }
 0x451   : > { %v4663_v18 = vpop.f32.mrb[250].mxu1 }
 0x452   : > { %v19192_v63 = vpop.f32.mrb[92].mxu0  ;;  %v4787_v3 = vadd.f32 %v4663_v18, %v18874_v0  ;;  %v14762_v47 = vpop.f32.mrb[251].mxu1  ;;  %15078 = vmatmul.mubr.msk.f32.gmra.mrb[100].mxu1 %vm1453_vm4, %v19194_v13  ;;  %v19210_v0 = vld [vmem:[#allocation4 + $0x3e] sm:$0xff] }
 0x453   : > { %v15147_v34 = vpop.f32.mrb[93].mxu0  ;;  %15463 = vmatmul.mubr.msk.f32.gmra.mrb[198].mxu0 %vm1453_vm4, %v18893_v35  ;;  %15080 = vmatprep.mubr.msk.f32.mxu1 %vm16543_vm6, %v16542_v12 }
 0x454   : > { %15465 = vmatprep.mubr.msk.f32.mxu0 %vm16543_vm6, %v16542_v12  ;;  %v19206_v22 = vadd.f32 %v18577_v25, %v4787_v3 }
 0x455   : > { %v4668_v51 = vpop.f32.mrb[252].mxu1 }
 0x456   : > { %v19208_v41 = vpop.f32.mrb[94].mxu0  ;;  %v4788_v10 = vadd.f32 %v4668_v51, %v18889_v27  ;;  %v14765_v59 = vpop.f32.mrb[253].mxu1  ;;  %15081 = vmatmul.mubr.msk.f32.gmra.mrb[102].mxu1 %vm1453_vm4, %v19210_v0  ;;  %v19226_v27 = vld [vmem:[#allocation4 + $0x46] sm:$0xff] }
 0x457   : > { %v15150_v35 = vpop.f32.mrb[95].mxu0  ;;  %15466 = vmatmul.mubr.msk.f32.gmra.mrb[200].mxu0 %vm1453_vm4, %v18908_v42  ;;  %15083 = vmatprep.mubr.msk.f32.mxu1 %vm16543_vm6, %v16542_v12 }
 0x458   : > { %15468 = vmatprep.mubr.msk.f32.mxu0 %vm16543_vm6, %v16542_v12  ;;  %v19222_v25 = vadd.f32 %v18590_v7, %v4788_v10 }
 0x459   : > { %v4673_v57 = vpop.f32.mrb[254].mxu1 }
 0x45a   : > { %v19224_v18 = vpop.f32.mrb[96].mxu0  ;;  %v4789_v3 = vadd.f32 %v4673_v57, %v18904_v28  ;;  %v14768_v47 = vpop.f32.mrb[255].mxu1  ;;  %15084 = vmatmul.mubr.msk.f32.gmra.mrb[104].mxu1 %vm1453_vm4, %v19226_v27  ;;  %v19242_v28 = vld [vmem:[#allocation4 + $0x4e] sm:$0xff] }
 0x45b   : > { %v15153_v42 = vpop.f32.mrb[97].mxu0  ;;  %15469 = vmatmul.mubr.msk.f32.gmra.mrb[202].mxu0 %vm1453_vm4, %v18923_v16  ;;  %15086 = vmatprep.mubr.msk.f32.mxu1 %vm16543_vm6, %v16542_v12 }
 0x45c   : > { %15471 = vmatprep.mubr.msk.f32.mxu0 %vm16543_vm6, %v16542_v12  ;;  %v19238_v7 = vadd.f32 %v18603_v48, %v4789_v3 }
 0x45d   : > { %v4678_v34 = vpop.f32.mrb[0].mxu1 }
 0x45e   : > { %v19240_v51 = vpop.f32.mrb[98].mxu0  ;;  %v4790_v10 = vadd.f32 %v4678_v34, %v18919_v36  ;;  %v14771_v59 = vpop.f32.mrb[1].mxu1  ;;  %15087 = vmatmul.mubr.msk.f32.gmra.mrb[106].mxu1 %vm1453_vm4, %v19242_v28  ;;  %v19258_v36 = vld [vmem:[#allocation4 + $0x56] sm:$0xff] }
 0x45f   : > { %v15156_v16 = vpop.f32.mrb[99].mxu0  ;;  %15472 = vmatmul.mubr.msk.f32.gmra.mrb[204].mxu0 %vm1453_vm4, %v18938_v24  ;;  %15089 = vmatprep.mubr.msk.f32.mxu1 %vm16543_vm6, %v16542_v12 }
 0x460   : > { %15474 = vmatprep.mubr.msk.f32.mxu0 %vm16543_vm6, %v16542_v12  ;;  %v19254_v48 = vadd.f32 %v18616_v17, %v4790_v10 }
 0x461   : > { %v4683_v35 = vpop.f32.mrb[2].mxu1 }
 0x462   : > { %v19256_v57 = vpop.f32.mrb[100].mxu0  ;;  %v4791_v3 = vadd.f32 %v4683_v35, %v18934_v46  ;;  %v14774_v47 = vpop.f32.mrb[3].mxu1  ;;  %15090 = vmatmul.mubr.msk.f32.gmra.mrb[108].mxu1 %vm1453_vm4, %v19258_v36  ;;  %v19274_v46 = vld [vmem:[#allocation4 + $0x5e] sm:$0xff] }
 0x463   : > { %v15159_v24 = vpop.f32.mrb[101].mxu0  ;;  %15475 = vmatmul.mubr.msk.f32.gmra.mrb[206].mxu0 %vm1453_vm4, %v18953_v38  ;;  %15092 = vmatprep.mubr.msk.f32.mxu1 %vm16543_vm6, %v16542_v12 }
 0x464   : > { %15477 = vmatprep.mubr.msk.f32.mxu0 %vm16543_vm6, %v16542_v12  ;;  %v19270_v17 = vadd.f32 %v18629_v21, %v4791_v3 }
 0x465   : > { %v4688_v42 = vpop.f32.mrb[4].mxu1 }
 0x466   : > { %v19272_v34 = vpop.f32.mrb[102].mxu0  ;;  %v4792_v10 = vadd.f32 %v4688_v42, %v18949_v14  ;;  %v14777_v59 = vpop.f32.mrb[5].mxu1  ;;  %15093 = vmatmul.mubr.msk.f32.gmra.mrb[110].mxu1 %vm1453_vm4, %v19274_v46  ;;  %v19290_v14 = vld [vmem:[#allocation4 + $0x66] sm:$0xff] }
 0x467   : > { %v15162_v38 = vpop.f32.mrb[103].mxu0  ;;  %15478 = vmatmul.mubr.msk.f32.gmra.mrb[208].mxu0 %vm1453_vm4, %v18968_v26  ;;  %15095 = vmatprep.mubr.msk.f32.mxu1 %vm16543_vm6, %v16542_v12 }
 0x468   : > { %15480 = vmatprep.mubr.msk.f32.mxu0 %vm16543_vm6, %v16542_v12  ;;  %v19286_v21 = vadd.f32 %v18642_v23, %v4792_v10 }
 0x469   : > { %v4693_v16 = vpop.f32.mrb[6].mxu1 }
 0x46a   : > { %v19288_v35 = vpop.f32.mrb[104].mxu0  ;;  %v4793_v3 = vadd.f32 %v4693_v16, %v18964_v20  ;;  %v14780_v47 = vpop.f32.mrb[7].mxu1  ;;  %15096 = vmatmul.mubr.msk.f32.gmra.mrb[112].mxu1 %vm1453_vm4, %v19290_v14  ;;  %v19306_v20 = vld [vmem:[#allocation4 + $0x6e] sm:$0xff] }
 0x46b   : > { %v15165_v26 = vpop.f32.mrb[105].mxu0  ;;  %15481 = vmatmul.mubr.msk.f32.gmra.mrb[210].mxu0 %vm1453_vm4, %v18983_v45  ;;  %15098 = vmatprep.mubr.msk.f32.mxu1 %vm16543_vm6, %v16542_v12 }
 0x46c   : > { %15483 = vmatprep.mubr.msk.f32.mxu0 %vm16543_vm6, %v16542_v12  ;;  %v19302_v23 = vadd.f32 %v18655_v30, %v4793_v3 }
 0x46d   : > { %v4698_v24 = vpop.f32.mrb[8].mxu1 }
 0x46e   : > { %v19304_v42 = vpop.f32.mrb[106].mxu0  ;;  %v4794_v10 = vadd.f32 %v4698_v24, %v18979_v62  ;;  %v14783_v59 = vpop.f32.mrb[9].mxu1  ;;  %15099 = vmatmul.mubr.msk.f32.gmra.mrb[114].mxu1 %vm1453_vm4, %v19306_v20  ;;  %v19322_v62 = vld [vmem:[#allocation4 + $0x76] sm:$0xff] }
 0x46f   : > { %v15168_v45 = vpop.f32.mrb[107].mxu0  ;;  %15484 = vmatmul.mubr.msk.f32.gmra.mrb[212].mxu0 %vm1453_vm4, %v18998_v60  ;;  %15101 = vmatprep.mubr.msk.f32.mxu1 %vm16543_vm6, %v16542_v12 }
 0x470   : > { %15486 = vmatprep.mubr.msk.f32.mxu0 %vm16543_vm6, %v16542_v12  ;;  %v19318_v30 = vadd.f32 %v18668_v56, %v4794_v10 }
 0x471   : > { %v4703_v38 = vpop.f32.mrb[10].mxu1 }
 0x472   : > { %v19320_v16 = vpop.f32.mrb[108].mxu0  ;;  %v4795_v3 = vadd.f32 %v4703_v38, %v18994_v54  ;;  %v14786_v47 = vpop.f32.mrb[11].mxu1  ;;  %15102 = vmatmul.mubr.msk.f32.gmra.mrb[116].mxu1 %vm1453_vm4, %v19322_v62  ;;  %v19338_v54 = vld [vmem:[#allocation4 + $0x7e] sm:$0xff] }
 0x473   : > { %v15171_v60 = vpop.f32.mrb[109].mxu0  ;;  %15487 = vmatmul.mubr.msk.f32.gmra.mrb[214].mxu0 %vm1453_vm4, %v19013_v5  ;;  %15104 = vmatprep.mubr.msk.f32.mxu1 %vm16543_vm6, %v16542_v12 }
 0x474   : > { %15489 = vmatprep.mubr.msk.f32.mxu0 %vm16543_vm6, %v16542_v12  ;;  %v19334_v56 = vadd.f32 %v18681_v4, %v4795_v3 }
 0x475   : > { %v4708_v26 = vpop.f32.mrb[12].mxu1 }
 0x476   : > { %v19336_v24 = vpop.f32.mrb[110].mxu0  ;;  %v4796_v10 = vadd.f32 %v4708_v26, %v19009_v11  ;;  %v14789_v59 = vpop.f32.mrb[13].mxu1  ;;  %15105 = vmatmul.mubr.msk.f32.gmra.mrb[118].mxu1 %vm1453_vm4, %v19338_v54  ;;  %v19354_v11 = vld [vmem:[#allocation4 + $0x86] sm:$0xff] }
 0x477   : > { %v15174_v5 = vpop.f32.mrb[111].mxu0  ;;  %15490 = vmatmul.mubr.msk.f32.gmra.mrb[216].mxu0 %vm1453_vm4, %v19028_v52  ;;  %15107 = vmatprep.mubr.msk.f32.mxu1 %vm16543_vm6, %v16542_v12 }
 0x478   : > { %15492 = vmatprep.mubr.msk.f32.mxu0 %vm16543_vm6, %v16542_v12  ;;  %v19350_v4 = vadd.f32 %v18694_v37, %v4796_v10 }
 0x479   : > { %v4713_v45 = vpop.f32.mrb[14].mxu1 }
 0x47a   : > { %v19352_v38 = vpop.f32.mrb[112].mxu0  ;;  %v4797_v3 = vadd.f32 %v4713_v45, %v19024_v29  ;;  %v14792_v47 = vpop.f32.mrb[15].mxu1  ;;  %15108 = vmatmul.mubr.msk.f32.gmra.mrb[120].mxu1 %vm1453_vm4, %v19354_v11  ;;  %v19370_v29 = vld [vmem:[#allocation4 + $0x8e] sm:$0xff] }
 0x47b   : > { %v15177_v52 = vpop.f32.mrb[113].mxu0  ;;  %15493 = vmatmul.mubr.msk.f32.gmra.mrb[218].mxu0 %vm1453_vm4, %v19043_v8  ;;  %15110 = vmatprep.mubr.msk.f32.mxu1 %vm16543_vm6, %v16542_v12 }
 0x47c   : > { %15495 = vmatprep.mubr.msk.f32.mxu0 %vm16543_vm6, %v16542_v12  ;;  %v19366_v37 = vadd.f32 %v18707_v61, %v4797_v3 }
 0x47d   : > { %v4718_v60 = vpop.f32.mrb[16].mxu1 }
 0x47e   : > { %v19368_v26 = vpop.f32.mrb[114].mxu0  ;;  %v4798_v10 = vadd.f32 %v4718_v60, %v19039_v2  ;;  %v14795_v59 = vpop.f32.mrb[17].mxu1  ;;  %15111 = vmatmul.mubr.msk.f32.gmra.mrb[122].mxu1 %vm1453_vm4, %v19370_v29  ;;  %v19386_v2 = vld [vmem:[#allocation4 + $0x96] sm:$0xff] }
 0x47f   : > { %v15180_v8 = vpop.f32.mrb[115].mxu0  ;;  %15496 = vmatmul.mubr.msk.f32.gmra.mrb[220].mxu0 %vm1453_vm4, %v19058_v32  ;;  %15113 = vmatprep.mubr.msk.f32.mxu1 %vm16543_vm6, %v16542_v12 }
 0x480   : > { %15498 = vmatprep.mubr.msk.f32.mxu0 %vm16543_vm6, %v16542_v12  ;;  %v19382_v61 = vadd.f32 %v18720_v58, %v4798_v10 }
 0x481   : > { %v4723_v5 = vpop.f32.mrb[18].mxu1 }
 0x482   : > { %v19384_v45 = vpop.f32.mrb[116].mxu0  ;;  %v4799_v3 = vadd.f32 %v4723_v5, %v19054_v9  ;;  %v14798_v47 = vpop.f32.mrb[19].mxu1  ;;  %15114 = vmatmul.mubr.msk.f32.gmra.mrb[124].mxu1 %vm1453_vm4, %v19386_v2  ;;  %v19402_v9 = vld [vmem:[#allocation4 + $0x9e] sm:$0xff] }
 0x483   : > { %v15183_v32 = vpop.f32.mrb[117].mxu0  ;;  %15499 = vmatmul.mubr.msk.f32.gmra.mrb[222].mxu0 %vm1453_vm4, %v19073_v55  ;;  %15116 = vmatprep.mubr.msk.f32.mxu1 %vm16543_vm6, %v16542_v12 }
 0x484   : > { %15501 = vmatprep.mubr.msk.f32.mxu0 %vm16543_vm6, %v16542_v12  ;;  %v19398_v58 = vadd.f32 %v18733_v15, %v4799_v3 }
 0x485   : > { %v4728_v52 = vpop.f32.mrb[20].mxu1 }
 0x486   : > { %v19400_v60 = vpop.f32.mrb[118].mxu0  ;;  %v4800_v10 = vadd.f32 %v4728_v52, %v19069_v6  ;;  %v14801_v59 = vpop.f32.mrb[21].mxu1  ;;  %15117 = vmatmul.mubr.msk.f32.gmra.mrb[126].mxu1 %vm1453_vm4, %v19402_v9  ;;  %v19418_v6 = vld [vmem:[#allocation4 + $0xa6] sm:$0xff] }
 0x487   : > { %v15186_v55 = vpop.f32.mrb[119].mxu0  ;;  %15502 = vmatmul.mubr.msk.f32.gmra.mrb[224].mxu0 %vm1453_vm4, %v19088_v31  ;;  %15119 = vmatprep.mubr.msk.f32.mxu1 %vm16543_vm6, %v16542_v12 }
 0x488   : > { %15504 = vmatprep.mubr.msk.f32.mxu0 %vm16543_vm6, %v16542_v12  ;;  %v19414_v15 = vadd.f32 %v18746_v43, %v4800_v10 }
 0x489   : > { %v4733_v8 = vpop.f32.mrb[22].mxu1 }
 0x48a   : > { %v19416_v5 = vpop.f32.mrb[120].mxu0  ;;  %v4801_v3 = vadd.f32 %v4733_v8, %v19084_v33  ;;  %v14804_v47 = vpop.f32.mrb[23].mxu1  ;;  %15120 = vmatmul.mubr.msk.f32.gmra.mrb[128].mxu1 %vm1453_vm4, %v19418_v6  ;;  %v19434_v33 = vld [vmem:[#allocation4 + $0xae] sm:$0xff] }
 0x48b   : > { %21491 = vst [vmem:[#allocation28_spill] sm:$0xff] %v19416_v5  ;;  %v15189_v31 = vpop.f32.mrb[121].mxu0  ;;  %15505 = vmatmul.mubr.msk.f32.gmra.mrb[226].mxu0 %vm1453_vm4, %v19103_v50  ;;  %15122 = vmatprep.mubr.msk.f32.mxu1 %vm16543_vm6, %v16542_v12 }
 0x48c   : > { %15507 = vmatprep.mubr.msk.f32.mxu0 %vm16543_vm6, %v16542_v12  ;;  %v19430_v43 = vadd.f32 %v18759_v44, %v4801_v3  ;;  %v21494_v31 = vld [vmem:[#allocation26_spill] sm:$0xff] }
 0x48d   : > { %v4738_v32 = vpop.f32.mrb[24].mxu1 }
 0x48e   : > { %v19432_v52 = vpop.f32.mrb[122].mxu0  ;;  %v4802_v10 = vadd.f32 %v4738_v32, %v19099_v49  ;;  %v14807_v59 = vpop.f32.mrb[25].mxu1  ;;  %15123 = vmatmul.mubr.msk.f32.gmra.mrb[130].mxu1 %vm1453_vm4, %v19434_v33  ;;  %v19450_v49 = vld [vmem:[#allocation4 + $0xb6] sm:$0xff] }
 0x48f   : > { %21492 = vst [vmem:[#allocation31_spill] sm:$0xff] %v19432_v52  ;;  %v15192_v50 = vpop.f32.mrb[123].mxu0  ;;  %15508 = vmatmul.mubr.msk.f32.gmra.mrb[228].mxu0 %vm1453_vm4, %v19116_v39  ;;  %15125 = vmatprep.mubr.msk.f32.mxu1 %vm16543_vm6, %v16542_v12 }
 0x490   : > { %15510 = vmatprep.mubr.msk.f32.mxu0 %vm16543_vm6, %v16542_v12  ;;  %v19446_v44 = vadd.f32 %v18772_v40, %v4802_v10  ;;  %v21495_v40 = vld [vmem:[#allocation30_spill] sm:$0xff] }
 0x491   : > { %v4743_v55 = vpop.f32.mrb[26].mxu1 }
 0x492   : > { %v19448_v8 = vpop.f32.mrb[124].mxu0  ;;  %v4803_v3 = vadd.f32 %v4743_v55, %v19114_v53  ;;  %v14810_v47 = vpop.f32.mrb[27].mxu1  ;;  %15126 = vmatmul.mubr.msk.f32.gmra.mrb[132].mxu1 %vm1453_vm4, %v19450_v49  ;;  %v19464_v53 = vld [vmem:[#allocation4 + $0xbe] sm:$0xff] }
 0x493   : > { %21493 = vst [vmem:[#allocation32_spill] sm:$0xff] %v19448_v8  ;;  %v15195_v39 = vpop.f32.mrb[125].mxu0  ;;  %15511 = vmatmul.mubr.msk.f32.gmra.mrb[230].mxu0 %vm1453_vm4, %v21494_v31  ;;  %15128 = vmatprep.mubr.msk.f32.mxu1 %vm16543_vm6, %v16542_v12  ;;  %v21496_v47 = vld [vmem:[#allocation27_spill] sm:$0xff] }
 0x494   : > { %15513 = vmatprep.mubr.msk.f32.mxu0 %vm16543_vm6, %v16542_v12  ;;  %v19462_v32 = vadd.f32 %v21495_v40, %v4803_v3  ;;  %v19474_v3 = vld [vmem:[#allocation4 + $0xc6] sm:$0xff] }
 0x495   : > { %v4748_v10 = vpop.f32.mrb[28].mxu1 }
 0x496   : > { %v6343_v59 = vpop.f32.mrb[126].mxu0  ;;  %v14813_v50 = vpop.f32.mrb[29].mxu1  ;;  %15129 = vmatmul.mubr.msk.f32.gmra.mrb[134].mxu1 %vm1453_vm4, %v19464_v53 }
 0x497   : > { %v15198_v55 = vpop.f32.mrb[127].mxu0  ;;  %15514 = vmatmul.mubr.msk.f32.gmra.mrb[232].mxu0 %vm1453_vm4, %v21496_v47  ;;  %15131 = vmatprep.mubr.msk.f32.mxu1 %vm16543_vm6, %v16542_v12  ;;  %v19484_v59 = vld [vmem:[#allocation4 + $0xce] sm:$0xff]  ;;  %v7386_v50 = vld [vmem:[#allocation4 + $0xdc] sm:$0xff] }
 0x498   : > { %15516 = vmatprep.mubr.msk.f32.mxu0 %vm16543_vm6, %v16542_v12 }
 0x499   : > { %v4753_v39 = vpop.f32.mrb[30].mxu1 }
 0x49a   : > { %v6348_v31 = vpop.f32.mrb[128].mxu0  ;;  %v14816_v40 = vpop.f32.mrb[31].mxu1  ;;  %15132 = vmatmul.mubr.msk.f32.gmra.mrb[136].mxu1 %vm1453_vm4, %v19474_v3 }
 0x49b   : > { %v15201_v10 = vpop.f32.mrb[129].mxu0  ;;  %15517 = vmatmul.mubr.msk.f32.gmra.mrb[234].mxu0 %vm1453_vm4, %v19143_v1  ;;  %15134 = vmatprep.mubr.msk.f32.mxu1 %vm16543_vm6, %v16542_v12  ;;  %v19493_v1 = vld [vmem:[#allocation4 + $0xd6] sm:$0xff]  ;;  %v7387_v40 = vld [vmem:[#allocation4 + $0xe4] sm:$0xff] }
 0x49c   : > { %15519 = vmatprep.mubr.msk.f32.mxu0 %vm16543_vm6, %v16542_v12 }
 0x49d   : > { %v4758_v55 = vpop.f32.mrb[32].mxu1 }
 0x49e   : > { %v6353_v47 = vpop.f32.mrb[130].mxu0  ;;  %v14819_v39 = vpop.f32.mrb[33].mxu1  ;;  %15135 = vmatmul.mubr.msk.f32.gmra.mrb[138].mxu1 %vm1453_vm4, %v19484_v59 }
 0x49f   : > { %v15204_v31 = vpop.f32.mrb[131].mxu0  ;;  %15520 = vmatmul.mubr.msk.f32.gmra.mrb[236].mxu0 %vm1453_vm4, %v7386_v50  ;;  %15137 = vmatprep.mubr.msk.f32.mxu1 %vm16543_vm6, %v16542_v12  ;;  %v5793_v50 = vld [vmem:[#allocation4 + $0xde] sm:$0xf]  ;;  %v7388_v39 = vld [vmem:[#allocation4 + $0xec] sm:$0xf] }
 0x4a0   : > { %15522 = vmatprep.mubr.msk.f32.mxu0 %vm16543_vm6, %v16542_v12 }
 0x4a1   : > { %v4763_v10 = vpop.f32.mrb[34].mxu1 }
 0x4a2   : > { %v6358_v8 = vpop.f32.mrb[132].mxu0  ;;  %v14822_v55 = vpop.f32.mrb[35].mxu1  ;;  %15138 = vmatmul.mubr.msk.f32.gmra.mrb[140].mxu1 %vm1453_vm4, %v19493_v1 }
 0x4a3   : > { %v15207_v47 = vpop.f32.mrb[133].mxu0  ;;  %15523 = vmatmul.mubr.msk.f32.gmra.mrb[238].mxu0 %vm1453_vm4, %v7387_v40  ;;  %15140 = vmatprep.mubr.msk.f32.mxu1 %vm16543_vm6, %v16542_v12  ;;  %v7070_v40 = vld [vmem:[%s21413_s3 + $0x60] sm:$0x3f]  ;;  %v6407_v55 = vld [vmem:[#allocation4 + $0x20] sm:$0xff] }
 0x4a4   : > { %15525 = vmatprep.mubr.msk.f32.mxu0 %vm16543_vm6, %v16542_v12 }
 0x4a5   : > { %v4768_v31 = vpop.f32.mrb[36].mxu1 }
 0x4a6   : > { %v6363_v52 = vpop.f32.mrb[134].mxu0  ;;  %v14825_v5 = vpop.f32.mrb[37].mxu1  ;;  %15141 = vmatmul.mubr.msk.f32.gmra.mrb[142].mxu1 %vm1453_vm4, %v5793_v50  ;;  %v8665_v50 = vld [vmem:[%s21413_s3 + $0x7e] sm:$0x3f] }
 0x4a7   : > { %15526 = vmatmul.mubr.msk.f32.gmra.mrb[240].mxu0 %vm1453_vm4, %v7388_v39  ;;  %v15210_v8 = vpop.f32.mrb[135].mxu0  ;;  %15222 = vmatprep.mubr.msk.f32.mxu1 %vm16543_vm6, %v16542_v12  ;;  %v6408_v31 = vld [vmem:[#allocation4 + $0x28] sm:$0xff] }
 0x4a8   : > { %15607 = vmatprep.mubr.msk.f32.mxu0 %vm16543_vm6, %v16542_v12 }
 0x4a9   : > { %v4773_v10 = vpop.f32.mrb[38].mxu1 }
 0x4aa   : > { %v6368_v47 = vpop.f32.mrb[136].mxu0  ;;  %v14828_v52 = vpop.f32.mrb[39].mxu1  ;;  %15223 = vmatmul.mubr.msk.f32.vlgmr.msra.gmra.mrb[144].mxu1 %vm1453_vm4, %v6407_v55  ;;  %v6409_v55 = vld [vmem:[#allocation4 + $0x30] sm:$0xff] }
 0x4ab   : > { %15608 = vmatmul.mubr.msk.f32.vlgmr.msra.gmra.mrb[242].mxu0 %vm1453_vm4, %v19182_v19  ;;  %v15213_v5 = vpop.f32.mrb[137].mxu0  ;;  %15375 = vmatpush3.msk.msra.mxu1 %vm2117_vm5, %v7070_v40 }
 0x4ac   : > { %15225 = vmatprep.mubr.msk.f32.mxu1 %vm16543_vm6, %v16542_v12  ;;  %15610 = vmatprep.mubr.msk.f32.mxu0 %vm16543_vm6, %v16542_v12 }
 0x4ad   : > { %15528 = vmatprep.subr.mxu1 %v16542_v12  ;;  %v4778_v39 = vpop.f32.mrb[40].mxu1  ;;  %15760 = vmatpush3.msk.msra.mxu0 %vm2117_vm5, %v8665_v50 }
 0x4ae   : > { %v6373_v8 = vpop.f32.mrb[138].mxu0  ;;  %v14831_v19 = vpop.f32.mrb[41].mxu1  ;;  %15226 = vmatmul.mubr.msk.f32.gmra.mrb[146].mxu1 %vm1453_vm4, %v6408_v31  ;;  %15913 = vmatprep.subr.mxu0 %v16542_v12  ;;  %v6410_v39 = vld [vmem:[#allocation4 + $0x38] sm:$0xff] }
 0x4af   : > { %15611 = vmatmul.mubr.msk.f32.gmra.mrb[244].mxu0 %vm1453_vm4, %v19194_v13  ;;  %v15216_v40 = vpop.f32.mrb[139].mxu0  ;;  %15228 = vmatprep.mubr.msk.f32.mxu1 %vm16543_vm6, %v16542_v12 }
 0x4b0   : > { %15613 = vmatprep.mubr.msk.f32.mxu0 %vm16543_vm6, %v16542_v12 }
 0x4b1   : > { %v4783_v10 = vpop.f32.mrb[42].mxu1 }
 0x4b2   : > { %v6378_v47 = vpop.f32.mrb[140].mxu0  ;;  %v14834_v52 = vpop.f32.mrb[43].mxu1  ;;  %15229 = vmatmul.mubr.msk.f32.gmra.mrb[148].mxu1 %vm1453_vm4, %v6409_v55 }
 0x4b3   : > { %15614 = vmatmul.mubr.msk.f32.gmra.mrb[246].mxu0 %vm1453_vm4, %v19210_v0  ;;  %v15219_v5 = vpop.f32.mrb[141].mxu0  ;;  %15231 = vmatprep.mubr.msk.f32.mxu1 %vm16543_vm6, %v16542_v12  ;;  %v21497_v0 = vld [vmem:[#allocation10_spill] sm:$0xff] }
 0x4b4   : > { %15616 = vmatprep.mubr.msk.f32.mxu0 %vm16543_vm6, %v16542_v12 }
 0x4b5   : > { %v5301_v13 = vpop.f32.mrb[44].mxu1 }
 0x4b6   : > { %v19539_v50 = vpop.f32.mrb[142].mxu0  ;;  %v5425_v31 = vadd.f32 %v5301_v13, %v19206_v22  ;;  %v14916_v8 = vpop.f32.mrb[45].mxu1  ;;  %15232 = vmatmul.mubr.msk.f32.gmra.mrb[150].mxu1 %vm1453_vm4, %v6410_v39  ;;  %v6411_v22 = vld [vmem:[#allocation4 + $0x40] sm:$0xff] }
 0x4b7   : > { %v15301_v19 = vpop.f32.mrb[143].mxu0  ;;  %15617 = vmatmul.mubr.msk.f32.gmra.mrb[248].mxu0 %vm1453_vm4, %v19226_v27  ;;  %15234 = vmatprep.mubr.msk.f32.mxu1 %vm16543_vm6, %v16542_v12  ;;  %v21498_v27 = vld [vmem:[#allocation11_spill] sm:$0xff] }
 0x4b8   : > { %15619 = vmatprep.mubr.msk.f32.mxu0 %vm16543_vm6, %v16542_v12  ;;  %v19550_v40 = vadd.f32 %v21497_v0, %v5425_v31 }
 0x4b9   : > { %v5306_v10 = vpop.f32.mrb[46].mxu1 }
 0x4ba   : > { %v19552_v55 = vpop.f32.mrb[144].mxu0  ;;  %v5426_v47 = vadd.f32 %v5306_v10, %v19222_v25  ;;  %v14919_v52 = vpop.f32.mrb[47].mxu1  ;;  %15235 = vmatmul.mubr.msk.f32.gmra.mrb[152].mxu1 %vm1453_vm4, %v6411_v22  ;;  %v6412_v25 = vld [vmem:[#allocation4 + $0x48] sm:$0xff] }
 0x4bb   : > { %v15304_v5 = vpop.f32.mrb[145].mxu0  ;;  %15620 = vmatmul.mubr.msk.f32.gmra.mrb[250].mxu0 %vm1453_vm4, %v19242_v28  ;;  %15237 = vmatprep.mubr.msk.f32.mxu1 %vm16543_vm6, %v16542_v12  ;;  %v21499_v28 = vld [vmem:[#allocation29_spill] sm:$0xff] }
 0x4bc   : > { %15622 = vmatprep.mubr.msk.f32.mxu0 %vm16543_vm6, %v16542_v12  ;;  %v19563_v13 = vadd.f32 %v21498_v27, %v5426_v47 }
 0x4bd   : > { %v5311_v39 = vpop.f32.mrb[48].mxu1 }
 0x4be   : > { %v19565_v31 = vpop.f32.mrb[146].mxu0  ;;  %v5427_v8 = vadd.f32 %v5311_v39, %v19238_v7  ;;  %v14922_v19 = vpop.f32.mrb[49].mxu1  ;;  %15238 = vmatmul.mubr.msk.f32.gmra.mrb[154].mxu1 %vm1453_vm4, %v6412_v25  ;;  %v6413_v7 = vld [vmem:[#allocation4 + $0x50] sm:$0xff] }
 0x4bf   : > { %v15307_v0 = vpop.f32.mrb[147].mxu0  ;;  %15623 = vmatmul.mubr.msk.f32.gmra.mrb[252].mxu0 %vm1453_vm4, %v19258_v36  ;;  %15240 = vmatprep.mubr.msk.f32.mxu1 %vm16543_vm6, %v16542_v12  ;;  %v21500_v36 = vld [vmem:[#allocation12_spill] sm:$0xff] }
 0x4c0   : > { %15625 = vmatprep.mubr.msk.f32.mxu0 %vm16543_vm6, %v16542_v12  ;;  %v19576_v10 = vadd.f32 %v21499_v28, %v5427_v8 }
 0x4c1   : > { %v5316_v22 = vpop.f32.mrb[50].mxu1 }
 0x4c2   : > { %v19578_v47 = vpop.f32.mrb[148].mxu0  ;;  %v5428_v52 = vadd.f32 %v5316_v22, %v19254_v48  ;;  %v14925_v5 = vpop.f32.mrb[51].mxu1  ;;  %15241 = vmatmul.mubr.msk.f32.gmra.mrb[156].mxu1 %vm1453_vm4, %v6413_v7  ;;  %v6414_v48 = vld [vmem:[#allocation4 + $0x58] sm:$0xff] }
 0x4c3   : > { %v15310_v27 = vpop.f32.mrb[149].mxu0  ;;  %15626 = vmatmul.mubr.msk.f32.gmra.mrb[254].mxu0 %vm1453_vm4, %v19274_v46  ;;  %15243 = vmatprep.mubr.msk.f32.mxu1 %vm16543_vm6, %v16542_v12  ;;  %v21501_v46 = vld [vmem:[#allocation13_spill] sm:$0xff] }
 0x4c4   : > { %15628 = vmatprep.mubr.msk.f32.mxu0 %vm16543_vm6, %v16542_v12  ;;  %v19589_v39 = vadd.f32 %v21500_v36, %v5428_v52 }
 0x4c5   : > { %v5321_v25 = vpop.f32.mrb[52].mxu1 }
 0x4c6   : > { %v19591_v8 = vpop.f32.mrb[150].mxu0  ;;  %v5429_v19 = vadd.f32 %v5321_v25, %v19270_v17  ;;  %v14928_v0 = vpop.f32.mrb[53].mxu1  ;;  %15244 = vmatmul.mubr.msk.f32.gmra.mrb[158].mxu1 %vm1453_vm4, %v6414_v48  ;;  %v6415_v17 = vld [vmem:[#allocation4 + $0x60] sm:$0xff] }
 0x4c7   : > { %v15313_v28 = vpop.f32.mrb[151].mxu0  ;;  %15629 = vmatmul.mubr.msk.f32.gmra.mrb[0].mxu0 %vm1453_vm4, %v19290_v14  ;;  %15246 = vmatprep.mubr.msk.f32.mxu1 %vm16543_vm6, %v16542_v12  ;;  %v21502_v14 = vld [vmem:[#allocation14_spill] sm:$0xff] }
 0x4c8   : > { %15631 = vmatprep.mubr.msk.f32.mxu0 %vm16543_vm6, %v16542_v12  ;;  %v19602_v22 = vadd.f32 %v21501_v46, %v5429_v19 }
 0x4c9   : > { %v5326_v7 = vpop.f32.mrb[54].mxu1 }
 0x4ca   : > { %v19604_v52 = vpop.f32.mrb[152].mxu0  ;;  %v5430_v5 = vadd.f32 %v5326_v7, %v19286_v21  ;;  %v14931_v27 = vpop.f32.mrb[55].mxu1  ;;  %15247 = vmatmul.mubr.msk.f32.gmra.mrb[160].mxu1 %vm1453_vm4, %v6415_v17  ;;  %v6416_v21 = vld [vmem:[#allocation4 + $0x68] sm:$0xff] }
 0x4cb   : > { %v15316_v36 = vpop.f32.mrb[153].mxu0  ;;  %15632 = vmatmul.mubr.msk.f32.gmra.mrb[2].mxu0 %vm1453_vm4, %v19306_v20  ;;  %15249 = vmatprep.mubr.msk.f32.mxu1 %vm16543_vm6, %v16542_v12  ;;  %v21503_v20 = vld [vmem:[#allocation15_spill] sm:$0xff] }
 0x4cc   : > { %15634 = vmatprep.mubr.msk.f32.mxu0 %vm16543_vm6, %v16542_v12  ;;  %v19615_v25 = vadd.f32 %v21502_v14, %v5430_v5 }
 0x4cd   : > { %v5331_v48 = vpop.f32.mrb[56].mxu1 }
 0x4ce   : > { %v19617_v19 = vpop.f32.mrb[154].mxu0  ;;  %v5431_v0 = vadd.f32 %v5331_v48, %v19302_v23  ;;  %v14934_v28 = vpop.f32.mrb[57].mxu1  ;;  %15250 = vmatmul.mubr.msk.f32.gmra.mrb[162].mxu1 %vm1453_vm4, %v6416_v21  ;;  %v6417_v23 = vld [vmem:[#allocation4 + $0x70] sm:$0xff] }
 0x4cf   : > { %v15319_v46 = vpop.f32.mrb[155].mxu0  ;;  %15635 = vmatmul.mubr.msk.f32.gmra.mrb[4].mxu0 %vm1453_vm4, %v19322_v62  ;;  %15252 = vmatprep.mubr.msk.f32.mxu1 %vm16543_vm6, %v16542_v12  ;;  %v21504_v62 = vld [vmem:[#allocation16_spill] sm:$0xff] }
 0x4d0   : > { %15637 = vmatprep.mubr.msk.f32.mxu0 %vm16543_vm6, %v16542_v12  ;;  %v19628_v7 = vadd.f32 %v21503_v20, %v5431_v0 }
 0x4d1   : > { %v5336_v17 = vpop.f32.mrb[58].mxu1 }
 0x4d2   : > { %v19630_v5 = vpop.f32.mrb[156].mxu0  ;;  %v5432_v27 = vadd.f32 %v5336_v17, %v19318_v30  ;;  %v14937_v36 = vpop.f32.mrb[59].mxu1  ;;  %15253 = vmatmul.mubr.msk.f32.gmra.mrb[164].mxu1 %vm1453_vm4, %v6417_v23  ;;  %v6418_v30 = vld [vmem:[#allocation4 + $0x78] sm:$0xff] }
 0x4d3   : > { %v15322_v14 = vpop.f32.mrb[157].mxu0  ;;  %15638 = vmatmul.mubr.msk.f32.gmra.mrb[6].mxu0 %vm1453_vm4, %v19338_v54  ;;  %15255 = vmatprep.mubr.msk.f32.mxu1 %vm16543_vm6, %v16542_v12  ;;  %v21505_v54 = vld [vmem:[#allocation17_spill] sm:$0xff] }
 0x4d4   : > { %15640 = vmatprep.mubr.msk.f32.mxu0 %vm16543_vm6, %v16542_v12  ;;  %v19641_v48 = vadd.f32 %v21504_v62, %v5432_v27 }
 0x4d5   : > { %v5341_v21 = vpop.f32.mrb[60].mxu1 }
 0x4d6   : > { %v19643_v0 = vpop.f32.mrb[158].mxu0  ;;  %v5433_v28 = vadd.f32 %v5341_v21, %v19334_v56  ;;  %v14940_v46 = vpop.f32.mrb[61].mxu1  ;;  %15256 = vmatmul.mubr.msk.f32.gmra.mrb[166].mxu1 %vm1453_vm4, %v6418_v30  ;;  %v6419_v56 = vld [vmem:[#allocation4 + $0x80] sm:$0xff] }
 0x4d7   : > { %v15325_v20 = vpop.f32.mrb[159].mxu0  ;;  %15641 = vmatmul.mubr.msk.f32.gmra.mrb[8].mxu0 %vm1453_vm4, %v19354_v11  ;;  %15258 = vmatprep.mubr.msk.f32.mxu1 %vm16543_vm6, %v16542_v12  ;;  %v21506_v11 = vld [vmem:[#allocation18_spill] sm:$0xff] }
 0x4d8   : > { %15643 = vmatprep.mubr.msk.f32.mxu0 %vm16543_vm6, %v16542_v12  ;;  %v19654_v17 = vadd.f32 %v21505_v54, %v5433_v28 }
 0x4d9   : > { %v5346_v23 = vpop.f32.mrb[62].mxu1 }
 0x4da   : > { %v19656_v27 = vpop.f32.mrb[160].mxu0  ;;  %v5434_v36 = vadd.f32 %v5346_v23, %v19350_v4  ;;  %v14943_v14 = vpop.f32.mrb[63].mxu1  ;;  %15259 = vmatmul.mubr.msk.f32.gmra.mrb[168].mxu1 %vm1453_vm4, %v6419_v56  ;;  %v6420_v4 = vld [vmem:[#allocation4 + $0x88] sm:$0xff] }
 0x4db   : > { %v15328_v62 = vpop.f32.mrb[161].mxu0  ;;  %15644 = vmatmul.mubr.msk.f32.gmra.mrb[10].mxu0 %vm1453_vm4, %v19370_v29  ;;  %15261 = vmatprep.mubr.msk.f32.mxu1 %vm16543_vm6, %v16542_v12  ;;  %v21507_v29 = vld [vmem:[#allocation19_spill] sm:$0xff] }
 0x4dc   : > { %15646 = vmatprep.mubr.msk.f32.mxu0 %vm16543_vm6, %v16542_v12  ;;  %v19667_v21 = vadd.f32 %v21506_v11, %v5434_v36 }
 0x4dd   : > { %v5351_v30 = vpop.f32.mrb[64].mxu1 }
 0x4de   : > { %v19669_v28 = vpop.f32.mrb[162].mxu0  ;;  %v5435_v46 = vadd.f32 %v5351_v30, %v19366_v37  ;;  %v14946_v20 = vpop.f32.mrb[65].mxu1  ;;  %15262 = vmatmul.mubr.msk.f32.gmra.mrb[170].mxu1 %vm1453_vm4, %v6420_v4  ;;  %v6421_v37 = vld [vmem:[#allocation4 + $0x90] sm:$0xff] }
 0x4df   : > { %v15331_v54 = vpop.f32.mrb[163].mxu0  ;;  %15647 = vmatmul.mubr.msk.f32.gmra.mrb[12].mxu0 %vm1453_vm4, %v19386_v2  ;;  %15264 = vmatprep.mubr.msk.f32.mxu1 %vm16543_vm6, %v16542_v12  ;;  %v21508_v2 = vld [vmem:[#allocation20_spill] sm:$0xff] }
 0x4e0   : > { %15649 = vmatprep.mubr.msk.f32.mxu0 %vm16543_vm6, %v16542_v12  ;;  %v19680_v23 = vadd.f32 %v21507_v29, %v5435_v46 }
 0x4e1   : > { %v5356_v56 = vpop.f32.mrb[66].mxu1 }
 0x4e2   : > { %v19682_v36 = vpop.f32.mrb[164].mxu0  ;;  %v5436_v14 = vadd.f32 %v5356_v56, %v19382_v61  ;;  %v14949_v62 = vpop.f32.mrb[67].mxu1  ;;  %15265 = vmatmul.mubr.msk.f32.gmra.mrb[172].mxu1 %vm1453_vm4, %v6421_v37  ;;  %v6422_v61 = vld [vmem:[#allocation4 + $0x98] sm:$0xff] }
 0x4e3   : > { %v15334_v11 = vpop.f32.mrb[165].mxu0  ;;  %15650 = vmatmul.mubr.msk.f32.gmra.mrb[14].mxu0 %vm1453_vm4, %v19402_v9  ;;  %15267 = vmatprep.mubr.msk.f32.mxu1 %vm16543_vm6, %v16542_v12  ;;  %v21509_v9 = vld [vmem:[#allocation21_spill] sm:$0xff] }
 0x4e4   : > { %15652 = vmatprep.mubr.msk.f32.mxu0 %vm16543_vm6, %v16542_v12  ;;  %v19693_v30 = vadd.f32 %v21508_v2, %v5436_v14 }
 0x4e5   : > { %v5361_v4 = vpop.f32.mrb[68].mxu1 }
 0x4e6   : > { %v19695_v46 = vpop.f32.mrb[166].mxu0  ;;  %v5437_v20 = vadd.f32 %v5361_v4, %v19398_v58  ;;  %v14952_v54 = vpop.f32.mrb[69].mxu1  ;;  %15268 = vmatmul.mubr.msk.f32.gmra.mrb[174].mxu1 %vm1453_vm4, %v6422_v61  ;;  %v6423_v58 = vld [vmem:[#allocation4 + $0xa0] sm:$0xff] }
 0x4e7   : > { %v15337_v29 = vpop.f32.mrb[167].mxu0  ;;  %15653 = vmatmul.mubr.msk.f32.gmra.mrb[16].mxu0 %vm1453_vm4, %v19418_v6  ;;  %15270 = vmatprep.mubr.msk.f32.mxu1 %vm16543_vm6, %v16542_v12  ;;  %v21510_v6 = vld [vmem:[#allocation22_spill] sm:$0xff] }
 0x4e8   : > { %15655 = vmatprep.mubr.msk.f32.mxu0 %vm16543_vm6, %v16542_v12  ;;  %v19706_v56 = vadd.f32 %v21509_v9, %v5437_v20 }
 0x4e9   : > { %v5366_v37 = vpop.f32.mrb[70].mxu1 }
 0x4ea   : > { %v19708_v14 = vpop.f32.mrb[168].mxu0  ;;  %v5438_v62 = vadd.f32 %v5366_v37, %v19414_v15  ;;  %v14955_v11 = vpop.f32.mrb[71].mxu1  ;;  %15271 = vmatmul.mubr.msk.f32.gmra.mrb[176].mxu1 %vm1453_vm4, %v6423_v58  ;;  %v6424_v15 = vld [vmem:[#allocation4 + $0xa8] sm:$0xff] }
 0x4eb   : > { %v15340_v2 = vpop.f32.mrb[169].mxu0  ;;  %15656 = vmatmul.mubr.msk.f32.gmra.mrb[18].mxu0 %vm1453_vm4, %v19434_v33  ;;  %15273 = vmatprep.mubr.msk.f32.mxu1 %vm16543_vm6, %v16542_v12  ;;  %v21511_v33 = vld [vmem:[#allocation23_spill] sm:$0xff] }
 0x4ec   : > { %15658 = vmatprep.mubr.msk.f32.mxu0 %vm16543_vm6, %v16542_v12  ;;  %v19719_v4 = vadd.f32 %v21510_v6, %v5438_v62 }
 0x4ed   : > { %v5371_v61 = vpop.f32.mrb[72].mxu1 }
 0x4ee   : > { %v19721_v20 = vpop.f32.mrb[170].mxu0  ;;  %v5439_v54 = vadd.f32 %v5371_v61, %v19430_v43  ;;  %v14958_v29 = vpop.f32.mrb[73].mxu1  ;;  %15274 = vmatmul.mubr.msk.f32.gmra.mrb[178].mxu1 %vm1453_vm4, %v6424_v15  ;;  %v6425_v43 = vld [vmem:[#allocation4 + $0xb0] sm:$0xff] }
 0x4ef   : > { %v15343_v9 = vpop.f32.mrb[171].mxu0  ;;  %15659 = vmatmul.mubr.msk.f32.gmra.mrb[20].mxu0 %vm1453_vm4, %v19450_v49  ;;  %15276 = vmatprep.mubr.msk.f32.mxu1 %vm16543_vm6, %v16542_v12  ;;  %v21512_v49 = vld [vmem:[#allocation24_spill] sm:$0xff] }
 0x4f0   : > { %15661 = vmatprep.mubr.msk.f32.mxu0 %vm16543_vm6, %v16542_v12  ;;  %v19732_v37 = vadd.f32 %v21511_v33, %v5439_v54 }
 0x4f1   : > { %v5376_v58 = vpop.f32.mrb[74].mxu1 }
 0x4f2   : > { %v19734_v62 = vpop.f32.mrb[172].mxu0  ;;  %v5440_v11 = vadd.f32 %v5376_v58, %v19446_v44  ;;  %v14961_v2 = vpop.f32.mrb[75].mxu1  ;;  %15277 = vmatmul.mubr.msk.f32.gmra.mrb[180].mxu1 %vm1453_vm4, %v6425_v43  ;;  %v6426_v44 = vld [vmem:[#allocation4 + $0xb8] sm:$0xff] }
 0x4f3   : > { %v15346_v6 = vpop.f32.mrb[173].mxu0  ;;  %15662 = vmatmul.mubr.msk.f32.gmra.mrb[22].mxu0 %vm1453_vm4, %v19464_v53  ;;  %15279 = vmatprep.mubr.msk.f32.mxu1 %vm16543_vm6, %v16542_v12  ;;  %v21514_v53 = vld [vmem:[#allocation25_spill] sm:$0xff] }
 0x4f4   : > { %15664 = vmatprep.mubr.msk.f32.mxu0 %vm16543_vm6, %v16542_v12  ;;  %v19745_v61 = vadd.f32 %v21512_v49, %v5440_v11  ;;  %v6427_v2 = vld [vmem:[#allocation4 + $0xc0] sm:$0xff] }
 0x4f5   : > { %v5381_v15 = vpop.f32.mrb[76].mxu1 }
 0x4f6   : > { %v19747_v54 = vpop.f32.mrb[174].mxu0  ;;  %v5441_v29 = vadd.f32 %v5381_v15, %v19462_v32  ;;  %v14964_v9 = vpop.f32.mrb[77].mxu1  ;;  %15280 = vmatmul.mubr.msk.f32.gmra.mrb[182].mxu1 %vm1453_vm4, %v6426_v44 }
 0x4f7   : > { %21513 = vst [vmem:[#allocation26_spill] sm:$0xff] %v19747_v54  ;;  %v15349_v33 = vpop.f32.mrb[175].mxu0  ;;  %15665 = vmatmul.mubr.msk.f32.gmra.mrb[24].mxu0 %vm1453_vm4, %v19474_v3  ;;  %15282 = vmatprep.mubr.msk.f32.mxu1 %vm16543_vm6, %v16542_v12  ;;  %v6428_v3 = vld [vmem:[#allocation4 + $0xc8] sm:$0xff]  ;;  %v8024_v9 = vld [vmem:[#allocation4 + $0xde] sm:$0xff] }
 0x4f8   : > { %15667 = vmatprep.mubr.msk.f32.mxu0 %vm16543_vm6, %v16542_v12  ;;  %v19758_v58 = vadd.f32 %v21514_v53, %v5441_v29 }
 0x4f9   : > { %v5386_v43 = vpop.f32.mrb[78].mxu1 }
 0x4fa   : > { %v6981_v11 = vpop.f32.mrb[176].mxu0  ;;  %v14967_v32 = vpop.f32.mrb[79].mxu1  ;;  %15283 = vmatmul.mubr.msk.f32.gmra.mrb[184].mxu1 %vm1453_vm4, %v6427_v2  ;;  %v8025_v2 = vld [vmem:[#allocation4 + $0xe6] sm:$0xff] }
 0x4fb   : > { %v15352_v6 = vpop.f32.mrb[177].mxu0  ;;  %15668 = vmatmul.mubr.msk.f32.gmra.mrb[26].mxu0 %vm1453_vm4, %v19484_v59  ;;  %15285 = vmatprep.mubr.msk.f32.mxu1 %vm16543_vm6, %v16542_v12  ;;  %v6429_v59 = vld [vmem:[#allocation4 + $0xd0] sm:$0xff] }
 0x4fc   : > { %15670 = vmatprep.mubr.msk.f32.mxu0 %vm16543_vm6, %v16542_v12 }
 0x4fd   : > { %v5391_v49 = vpop.f32.mrb[80].mxu1 }
 0x4fe   : > { %v6986_v15 = vpop.f32.mrb[178].mxu0  ;;  %v14970_v44 = vpop.f32.mrb[81].mxu1  ;;  %15286 = vmatmul.mubr.msk.f32.gmra.mrb[186].mxu1 %vm1453_vm4, %v6428_v3 }
 0x4ff   : > { %v15355_v29 = vpop.f32.mrb[179].mxu0  ;;  %15671 = vmatmul.mubr.msk.f32.gmra.mrb[28].mxu0 %vm1453_vm4, %v19493_v1  ;;  %15288 = vmatprep.mubr.msk.f32.mxu1 %vm16543_vm6, %v16542_v12  ;;  %v6430_v1 = vld [vmem:[#allocation4 + $0xd8] sm:$0xff]  ;;  %v6431_v15 = vld [vmem:[#allocation4 + $0xe0] sm:$0xf]  ;;  %v8026_v44 = vld [vmem:[#allocation4 + $0xee] sm:$0xf] }
 0x500   : > { %15673 = vmatprep.mubr.msk.f32.mxu0 %vm16543_vm6, %v16542_v12 }
 0x501   : > { %v5396_v33 = vpop.f32.mrb[82].mxu1 }
 0x502   : > { %v6991_v53 = vpop.f32.mrb[180].mxu0  ;;  %v14973_v43 = vpop.f32.mrb[83].mxu1  ;;  %15289 = vmatmul.mubr.msk.f32.gmra.mrb[188].mxu1 %vm1453_vm4, %v6429_v59 }
 0x503   : > { %v15358_v11 = vpop.f32.mrb[181].mxu0  ;;  %15674 = vmatmul.mubr.msk.f32.gmra.mrb[30].mxu0 %vm1453_vm4, %v8024_v9  ;;  %15291 = vmatprep.mubr.msk.f32.mxu1 %vm16543_vm6, %v16542_v12  ;;  %v7708_v53 = vld [vmem:[%s21413_s3 + $0x6c] sm:$0x3f] }
 0x504   : > { %15676 = vmatprep.mubr.msk.f32.mxu0 %vm16543_vm6, %v16542_v12  ;;  %v7045_v11 = vld [vmem:[#allocation4 + $0x2b] sm:$0xff] }
 0x505   : > { %v5401_v32 = vpop.f32.mrb[84].mxu1 }
 0x506   : > { %v6996_v6 = vpop.f32.mrb[182].mxu0  ;;  %v14976_v3 = vpop.f32.mrb[85].mxu1  ;;  %15292 = vmatmul.mubr.msk.f32.gmra.mrb[190].mxu1 %vm1453_vm4, %v6430_v1  ;;  %v8640_v1 = vld [vmem:[#allocation4 + $0x39] sm:$0xff] }
 0x507   : > { %15677 = vmatmul.mubr.msk.f32.gmra.mrb[32].mxu0 %vm1453_vm4, %v8025_v2  ;;  %v15361_v49 = vpop.f32.mrb[183].mxu0  ;;  %15294 = vmatprep.mubr.msk.f32.mxu1 %vm16543_vm6, %v16542_v12  ;;  %v9303_v3 = vld [vmem:[%s21413_s3 + $0x8a] sm:$0x3f] }
 0x508   : > { %15679 = vmatprep.mubr.msk.f32.mxu0 %vm16543_vm6, %v16542_v12 }
 0x509   : > { %v5406_v29 = vpop.f32.mrb[86].mxu1 }
 0x50a   : > { %v7001_v59 = vpop.f32.mrb[184].mxu0  ;;  %v14979_v9 = vpop.f32.mrb[87].mxu1  ;;  %15295 = vmatmul.mubr.msk.f32.gmra.mrb[192].mxu1 %vm1453_vm4, %v6431_v15  ;;  %v7046_v15 = vld [vmem:[#allocation4 + $0x33] sm:$0xff] }
 0x50b   : > { %15680 = vmatmul.mubr.msk.f32.gmra.mrb[34].mxu0 %vm1453_vm4, %v8026_v44  ;;  %v15364_v33 = vpop.f32.mrb[185].mxu0  ;;  %15376 = vmatprep.mubr.msk.f32.mxu1 %vm16543_vm6, %v16542_v12  ;;  %v8641_v44 = vld [vmem:[#allocation4 + $0x41] sm:$0xff] }
 0x50c   : > { %15761 = vmatprep.mubr.msk.f32.mxu0 %vm16543_vm6, %v16542_v12 }
 0x50d   : > { %v5411_v43 = vpop.f32.mrb[88].mxu1 }
 0x50e   : > { %v7006_v2 = vpop.f32.mrb[186].mxu0  ;;  %v14982_v32 = vpop.f32.mrb[89].mxu1  ;;  %15377 = vmatmul.mubr.msk.f32.vlgmr.msra.gmra.mrb[194].mxu1 %vm1453_vm4, %v7045_v11  ;;  %v8642_v43 = vld [vmem:[#allocation4 + $0x49] sm:$0xff] }
 0x50f   : > { %15762 = vmatmul.mubr.msk.f32.vlgmr.msra.gmra.mrb[36].mxu0 %vm1453_vm4, %v8640_v1  ;;  %v15367_v6 = vpop.f32.mrb[187].mxu0  ;;  %15529 = vmatpush3.msk.msra.mxu1 %vm2117_vm5, %v7708_v53  ;;  %v19813_v53 = vld [vmem:[#allocation4 + $0x3b] sm:$0xff] }
 0x510   : > { %15379 = vmatprep.mubr.msk.f32.mxu1 %vm16543_vm6, %v16542_v12  ;;  %15764 = vmatprep.mubr.msk.f32.mxu0 %vm16543_vm6, %v16542_v12 }
 0x511   : > { %15682 = vmatprep.subr.mxu1 %v16542_v12  ;;  %v5416_v49 = vpop.f32.mrb[90].mxu1  ;;  %15914 = vmatpush3.msk.msra.mxu0 %vm2117_vm5, %v9303_v3  ;;  %v19824_v3 = vld [vmem:[#allocation4 + $0x43] sm:$0xff] }
 0x512   : > { %v7011_v29 = vpop.f32.mrb[188].mxu0  ;;  %v14985_v59 = vpop.f32.mrb[91].mxu1  ;;  %15380 = vmatmul.mubr.msk.f32.gmra.mrb[196].mxu1 %vm1453_vm4, %v7046_v15  ;;  %v8643_v49 = vld [vmem:[#allocation4 + $0x51] sm:$0xff] }
 0x513   : > { %15765 = vmatmul.mubr.msk.f32.gmra.mrb[38].mxu0 %vm1453_vm4, %v8641_v44  ;;  %v15370_v9 = vpop.f32.mrb[189].mxu0  ;;  %15382 = vmatprep.mubr.msk.f32.mxu1 %vm16543_vm6, %v16542_v12 }
 0x514   : > { %15767 = vmatprep.mubr.msk.f32.mxu0 %vm16543_vm6, %v16542_v12 }
 0x515   : > { %v5421_v33 = vpop.f32.mrb[92].mxu1 }
 0x516   : > { %v7016_v11 = vpop.f32.mrb[190].mxu0  ;;  %v14988_v1 = vpop.f32.mrb[93].mxu1  ;;  %15383 = vmatmul.mubr.msk.f32.gmra.mrb[198].mxu1 %vm1453_vm4, %v19813_v53 }
 0x517   : > { %15768 = vmatmul.mubr.msk.f32.gmra.mrb[40].mxu0 %vm1453_vm4, %v8642_v43  ;;  %v15373_v2 = vpop.f32.mrb[191].mxu0  ;;  %15385 = vmatprep.mubr.msk.f32.mxu1 %vm16543_vm6, %v16542_v12  ;;  %v8644_v43 = vld [vmem:[#allocation4 + $0x59] sm:$0xff] }
 0x518   : > { %15770 = vmatprep.mubr.msk.f32.mxu0 %vm16543_vm6, %v16542_v12 }
 0x519   : > { %v5939_v32 = vpop.f32.mrb[94].mxu1 }
 0x51a   : > { %v19822_v6 = vpop.f32.mrb[192].mxu0  ;;  %v6063_v15 = vadd.f32 %v5939_v32, %v19550_v40  ;;  %v15070_v44 = vpop.f32.mrb[95].mxu1  ;;  %15386 = vmatmul.mubr.msk.f32.gmra.mrb[200].mxu1 %vm1453_vm4, %v19824_v3  ;;  %v19839_v40 = vld [vmem:[#allocation4 + $0x4b] sm:$0xff] }
 0x51b   : > { %21515 = vst [vmem:[#allocation30_spill] sm:$0xff] %v19822_v6  ;;  %v15455_v29 = vpop.f32.mrb[193].mxu0  ;;  %15771 = vmatmul.mubr.msk.f32.gmra.mrb[42].mxu0 %vm1453_vm4, %v8643_v49  ;;  %15388 = vmatprep.mubr.msk.f32.mxu1 %vm16543_vm6, %v16542_v12 }
 0x51c   : > { %15773 = vmatprep.mubr.msk.f32.mxu0 %vm16543_vm6, %v16542_v12  ;;  %v19835_v59 = vadd.f32 %v19192_v63, %v6063_v15  ;;  %v8645_v15 = vld [vmem:[#allocation4 + $0x61] sm:$0xff] }
 0x51d   : > { %v5944_v9 = vpop.f32.mrb[96].mxu1 }
 0x51e   : > { %v19837_v33 = vpop.f32.mrb[194].mxu0  ;;  %v6064_v11 = vadd.f32 %v5944_v9, %v19563_v13  ;;  %v15073_v1 = vpop.f32.mrb[97].mxu1  ;;  %15389 = vmatmul.mubr.msk.f32.gmra.mrb[202].mxu1 %vm1453_vm4, %v19839_v40  ;;  %v19854_v13 = vld [vmem:[#allocation4 + $0x53] sm:$0xff] }
 0x51f   : > { %21516 = vst [vmem:[#allocation27_spill] sm:$0xff] %v19837_v33  ;;  %v15458_v2 = vpop.f32.mrb[195].mxu0  ;;  %15774 = vmatmul.mubr.msk.f32.gmra.mrb[44].mxu0 %vm1453_vm4, %v8644_v43  ;;  %15391 = vmatprep.mubr.msk.f32.mxu1 %vm16543_vm6, %v16542_v12  ;;  %v8646_v1 = vld [vmem:[#allocation4 + $0x69] sm:$0xff] }
 0x520   : > { %15776 = vmatprep.mubr.msk.f32.mxu0 %vm16543_vm6, %v16542_v12  ;;  %v19850_v63 = vadd.f32 %v19208_v41, %v6064_v11 }
 0x521   : > { %v5949_v32 = vpop.f32.mrb[98].mxu1 }
 0x522   : > { %v19852_v49 = vpop.f32.mrb[196].mxu0  ;;  %v6065_v44 = vadd.f32 %v5949_v32, %v19576_v10  ;;  %v15076_v29 = vpop.f32.mrb[99].mxu1  ;;  %15392 = vmatmul.mubr.msk.f32.gmra.mrb[204].mxu1 %vm1453_vm4, %v19854_v13  ;;  %v19869_v10 = vld [vmem:[#allocation4 + $0x5b] sm:$0xff] }
 0x523   : > { %21517 = vst [vmem:[#allocation10_spill] sm:$0xff] %v19852_v49  ;;  %v15461_v9 = vpop.f32.mrb[197].mxu0  ;;  %15777 = vmatmul.mubr.msk.f32.gmra.mrb[46].mxu0 %vm1453_vm4, %v8645_v15  ;;  %15394 = vmatprep.mubr.msk.f32.mxu1 %vm16543_vm6, %v16542_v12 }
 0x524   : > { %15779 = vmatprep.mubr.msk.f32.mxu0 %vm16543_vm6, %v16542_v12  ;;  %v19865_v41 = vadd.f32 %v19224_v18, %v6065_v44  ;;  %v8647_v9 = vld [vmem:[#allocation4 + $0x71] sm:$0xff] }
 0x525   : > { %v5954_v43 = vpop.f32.mrb[100].mxu1 }
 0x526   : > { %v19867_v11 = vpop.f32.mrb[198].mxu0  ;;  %v6066_v2 = vadd.f32 %v5954_v43, %v19589_v39  ;;  %v15079_v32 = vpop.f32.mrb[101].mxu1  ;;  %15395 = vmatmul.mubr.msk.f32.gmra.mrb[206].mxu1 %vm1453_vm4, %v19869_v10  ;;  %v19884_v39 = vld [vmem:[#allocation4 + $0x63] sm:$0xff] }
 0x527   : > { %21518 = vst [vmem:[#allocation11_spill] sm:$0xff] %v19867_v11  ;;  %v15464_v15 = vpop.f32.mrb[199].mxu0  ;;  %15780 = vmatmul.mubr.msk.f32.gmra.mrb[48].mxu0 %vm1453_vm4, %v8646_v1  ;;  %15397 = vmatprep.mubr.msk.f32.mxu1 %vm16543_vm6, %v16542_v12 }
 0x528   : > { %15782 = vmatprep.mubr.msk.f32.mxu0 %vm16543_vm6, %v16542_v12  ;;  %v19880_v18 = vadd.f32 %v19240_v51, %v6066_v2 }
 0x529   : > { %v5959_v44 = vpop.f32.mrb[102].mxu1 }
 0x52a   : > { %v19882_v29 = vpop.f32.mrb[200].mxu0  ;;  %v6067_v43 = vadd.f32 %v5959_v44, %v19602_v22  ;;  %v15082_v32 = vpop.f32.mrb[103].mxu1  ;;  %15398 = vmatmul.mubr.msk.f32.gmra.mrb[208].mxu1 %vm1453_vm4, %v19884_v39  ;;  %v19899_v22 = vld [vmem:[#allocation4 + $0x6b] sm:$0xff]  ;;  %v8648_v44 = vld [vmem:[#allocation4 + $0x79] sm:$0xff] }
 0x52b   : > { %21519 = vst [vmem:[#allocation29_spill] sm:$0xff] %v19882_v29  ;;  %v15467_v1 = vpop.f32.mrb[201].mxu0  ;;  %15783 = vmatmul.mubr.msk.f32.gmra.mrb[50].mxu0 %vm1453_vm4, %v8647_v9  ;;  %15400 = vmatprep.mubr.msk.f32.mxu1 %vm16543_vm6, %v16542_v12 }
 0x52c   : > { %15785 = vmatprep.mubr.msk.f32.mxu0 %vm16543_vm6, %v16542_v12  ;;  %v19895_v51 = vadd.f32 %v19256_v57, %v6067_v43 }
 0x52d   : > { %v5964_v2 = vpop.f32.mrb[104].mxu1 }
 0x52e   : > { %v19897_v15 = vpop.f32.mrb[202].mxu0  ;;  %v6068_v32 = vadd.f32 %v5964_v2, %v19615_v25  ;;  %v15085_v1 = vpop.f32.mrb[105].mxu1  ;;  %15401 = vmatmul.mubr.msk.f32.gmra.mrb[210].mxu1 %vm1453_vm4, %v19899_v22  ;;  %v19914_v25 = vld [vmem:[#allocation4 + $0x73] sm:$0xff]  ;;  %v8649_v2 = vld [vmem:[#allocation4 + $0x81] sm:$0xff] }
 0x52f   : > { %21520 = vst [vmem:[#allocation12_spill] sm:$0xff] %v19897_v15  ;;  %v15470_v9 = vpop.f32.mrb[203].mxu0  ;;  %15786 = vmatmul.mubr.msk.f32.gmra.mrb[52].mxu0 %vm1453_vm4, %v8648_v44  ;;  %15403 = vmatprep.mubr.msk.f32.mxu1 %vm16543_vm6, %v16542_v12 }
 0x530   : > { %15788 = vmatprep.mubr.msk.f32.mxu0 %vm16543_vm6, %v16542_v12  ;;  %v19910_v57 = vadd.f32 %v19272_v34, %v6068_v32 }
 0x531   : > { %v5969_v43 = vpop.f32.mrb[106].mxu1 }
 0x532   : > { %v19912_v15 = vpop.f32.mrb[204].mxu0  ;;  %v6069_v1 = vadd.f32 %v5969_v43, %v19628_v7  ;;  %v15088_v9 = vpop.f32.mrb[107].mxu1  ;;  %15404 = vmatmul.mubr.msk.f32.gmra.mrb[212].mxu1 %vm1453_vm4, %v19914_v25  ;;  %v19929_v7 = vld [vmem:[#allocation4 + $0x7b] sm:$0xff]  ;;  %v8650_v43 = vld [vmem:[#allocation4 + $0x89] sm:$0xff] }
 0x533   : > { %21521 = vst [vmem:[#allocation13_spill] sm:$0xff] %v19912_v15  ;;  %v15473_v44 = vpop.f32.mrb[205].mxu0  ;;  %15789 = vmatmul.mubr.msk.f32.gmra.mrb[54].mxu0 %vm1453_vm4, %v8649_v2  ;;  %15406 = vmatprep.mubr.msk.f32.mxu1 %vm16543_vm6, %v16542_v12 }
 0x534   : > { %15791 = vmatprep.mubr.msk.f32.mxu0 %vm16543_vm6, %v16542_v12  ;;  %v19925_v34 = vadd.f32 %v19288_v35, %v6069_v1 }
 0x535   : > { %v5974_v32 = vpop.f32.mrb[108].mxu1 }
 0x536   : > { %v19927_v15 = vpop.f32.mrb[206].mxu0  ;;  %v6070_v9 = vadd.f32 %v5974_v32, %v19641_v48  ;;  %v15091_v44 = vpop.f32.mrb[109].mxu1  ;;  %15407 = vmatmul.mubr.msk.f32.gmra.mrb[214].mxu1 %vm1453_vm4, %v19929_v7  ;;  %v19944_v48 = vld [vmem:[#allocation4 + $0x83] sm:$0xff]  ;;  %v8651_v32 = vld [vmem:[#allocation4 + $0x91] sm:$0xff] }
 0x537   : > { %21522 = vst [vmem:[#allocation14_spill] sm:$0xff] %v19927_v15  ;;  %v15476_v2 = vpop.f32.mrb[207].mxu0  ;;  %15792 = vmatmul.mubr.msk.f32.gmra.mrb[56].mxu0 %vm1453_vm4, %v8650_v43  ;;  %15409 = vmatprep.mubr.msk.f32.mxu1 %vm16543_vm6, %v16542_v12 }
 0x538   : > { %15794 = vmatprep.mubr.msk.f32.mxu0 %vm16543_vm6, %v16542_v12  ;;  %v19940_v35 = vadd.f32 %v19304_v42, %v6070_v9 }
 0x539   : > { %v5979_v1 = vpop.f32.mrb[110].mxu1 }
 0x53a   : > { %v19942_v15 = vpop.f32.mrb[208].mxu0  ;;  %v6071_v44 = vadd.f32 %v5979_v1, %v19654_v17  ;;  %v15094_v2 = vpop.f32.mrb[111].mxu1  ;;  %15410 = vmatmul.mubr.msk.f32.gmra.mrb[216].mxu1 %vm1453_vm4, %v19944_v48  ;;  %v19959_v17 = vld [vmem:[#allocation4 + $0x8b] sm:$0xff]  ;;  %v8652_v1 = vld [vmem:[#allocation4 + $0x99] sm:$0xff] }
 0x53b   : > { %21523 = vst [vmem:[#allocation15_spill] sm:$0xff] %v19942_v15  ;;  %v15479_v43 = vpop.f32.mrb[209].mxu0  ;;  %15795 = vmatmul.mubr.msk.f32.gmra.mrb[58].mxu0 %vm1453_vm4, %v8651_v32  ;;  %15412 = vmatprep.mubr.msk.f32.mxu1 %vm16543_vm6, %v16542_v12 }
 0x53c   : > { %15797 = vmatprep.mubr.msk.f32.mxu0 %vm16543_vm6, %v16542_v12  ;;  %v19955_v42 = vadd.f32 %v19320_v16, %v6071_v44 }
 0x53d   : > { %v5984_v9 = vpop.f32.mrb[112].mxu1 }
 0x53e   : > { %v19957_v15 = vpop.f32.mrb[210].mxu0  ;;  %v6072_v2 = vadd.f32 %v5984_v9, %v19667_v21  ;;  %v15097_v43 = vpop.f32.mrb[113].mxu1  ;;  %15413 = vmatmul.mubr.msk.f32.gmra.mrb[218].mxu1 %vm1453_vm4, %v19959_v17  ;;  %v19974_v21 = vld [vmem:[#allocation4 + $0x93] sm:$0xff]  ;;  %v8653_v9 = vld [vmem:[#allocation4 + $0xa1] sm:$0xff] }
 0x53f   : > { %21524 = vst [vmem:[#allocation16_spill] sm:$0xff] %v19957_v15  ;;  %v15482_v32 = vpop.f32.mrb[211].mxu0  ;;  %15798 = vmatmul.mubr.msk.f32.gmra.mrb[60].mxu0 %vm1453_vm4, %v8652_v1  ;;  %15415 = vmatprep.mubr.msk.f32.mxu1 %vm16543_vm6, %v16542_v12 }
 0x540   : > { %15800 = vmatprep.mubr.msk.f32.mxu0 %vm16543_vm6, %v16542_v12  ;;  %v19970_v16 = vadd.f32 %v19336_v24, %v6072_v2 }
 0x541   : > { %v5989_v44 = vpop.f32.mrb[114].mxu1 }
 0x542   : > { %v19972_v15 = vpop.f32.mrb[212].mxu0  ;;  %v6073_v43 = vadd.f32 %v5989_v44, %v19680_v23  ;;  %v15100_v32 = vpop.f32.mrb[115].mxu1  ;;  %15416 = vmatmul.mubr.msk.f32.gmra.mrb[220].mxu1 %vm1453_vm4, %v19974_v21  ;;  %v19989_v23 = vld [vmem:[#allocation4 + $0x9b] sm:$0xff]  ;;  %v8654_v44 = vld [vmem:[#allocation4 + $0xa9] sm:$0xff] }
 0x543   : > { %21525 = vst [vmem:[#allocation17_spill] sm:$0xff] %v19972_v15  ;;  %v15485_v1 = vpop.f32.mrb[213].mxu0  ;;  %15801 = vmatmul.mubr.msk.f32.gmra.mrb[62].mxu0 %vm1453_vm4, %v8653_v9  ;;  %15418 = vmatprep.mubr.msk.f32.mxu1 %vm16543_vm6, %v16542_v12 }
 0x544   : > { %15803 = vmatprep.mubr.msk.f32.mxu0 %vm16543_vm6, %v16542_v12  ;;  %v19985_v24 = vadd.f32 %v19352_v38, %v6073_v43 }
 0x545   : > { %v5994_v2 = vpop.f32.mrb[116].mxu1 }
 0x546   : > { %v19987_v15 = vpop.f32.mrb[214].mxu0  ;;  %v6074_v32 = vadd.f32 %v5994_v2, %v19693_v30  ;;  %v15103_v1 = vpop.f32.mrb[117].mxu1  ;;  %15419 = vmatmul.mubr.msk.f32.gmra.mrb[222].mxu1 %vm1453_vm4, %v19989_v23  ;;  %v20004_v30 = vld [vmem:[#allocation4 + $0xa3] sm:$0xff]  ;;  %v8655_v2 = vld [vmem:[#allocation4 + $0xb1] sm:$0xff] }
 0x547   : > { %21526 = vst [vmem:[#allocation18_spill] sm:$0xff] %v19987_v15  ;;  %v15488_v9 = vpop.f32.mrb[215].mxu0  ;;  %15804 = vmatmul.mubr.msk.f32.gmra.mrb[64].mxu0 %vm1453_vm4, %v8654_v44  ;;  %15421 = vmatprep.mubr.msk.f32.mxu1 %vm16543_vm6, %v16542_v12 }
 0x548   : > { %15806 = vmatprep.mubr.msk.f32.mxu0 %vm16543_vm6, %v16542_v12  ;;  %v20000_v38 = vadd.f32 %v19368_v26, %v6074_v32 }
 0x549   : > { %v5999_v43 = vpop.f32.mrb[118].mxu1 }
 0x54a   : > { %v20002_v15 = vpop.f32.mrb[216].mxu0  ;;  %v6075_v1 = vadd.f32 %v5999_v43, %v19706_v56  ;;  %v15106_v9 = vpop.f32.mrb[119].mxu1  ;;  %15422 = vmatmul.mubr.msk.f32.gmra.mrb[224].mxu1 %vm1453_vm4, %v20004_v30  ;;  %v20019_v56 = vld [vmem:[#allocation4 + $0xab] sm:$0xff]  ;;  %v8656_v43 = vld [vmem:[#allocation4 + $0xb9] sm:$0xff] }
 0x54b   : > { %21527 = vst [vmem:[#allocation19_spill] sm:$0xff] %v20002_v15  ;;  %v15491_v44 = vpop.f32.mrb[217].mxu0  ;;  %15807 = vmatmul.mubr.msk.f32.gmra.mrb[66].mxu0 %vm1453_vm4, %v8655_v2  ;;  %15424 = vmatprep.mubr.msk.f32.mxu1 %vm16543_vm6, %v16542_v12 }
 0x54c   : > { %15809 = vmatprep.mubr.msk.f32.mxu0 %vm16543_vm6, %v16542_v12  ;;  %v20015_v26 = vadd.f32 %v19384_v45, %v6075_v1 }
 0x54d   : > { %v6004_v32 = vpop.f32.mrb[120].mxu1 }
 0x54e   : > { %v20017_v15 = vpop.f32.mrb[218].mxu0  ;;  %v6076_v9 = vadd.f32 %v6004_v32, %v19719_v4  ;;  %v15109_v44 = vpop.f32.mrb[121].mxu1  ;;  %15425 = vmatmul.mubr.msk.f32.gmra.mrb[226].mxu1 %vm1453_vm4, %v20019_v56  ;;  %v20034_v4 = vld [vmem:[#allocation4 + $0xb3] sm:$0xff]  ;;  %v8657_v32 = vld [vmem:[#allocation4 + $0xc1] sm:$0xff] }
 0x54f   : > { %21528 = vst [vmem:[#allocation20_spill] sm:$0xff] %v20017_v15  ;;  %v15494_v2 = vpop.f32.mrb[219].mxu0  ;;  %15810 = vmatmul.mubr.msk.f32.gmra.mrb[68].mxu0 %vm1453_vm4, %v8656_v43  ;;  %15427 = vmatprep.mubr.msk.f32.mxu1 %vm16543_vm6, %v16542_v12 }
 0x550   : > { %15812 = vmatprep.mubr.msk.f32.mxu0 %vm16543_vm6, %v16542_v12  ;;  %v20030_v45 = vadd.f32 %v19400_v60, %v6076_v9  ;;  %v8658_v60 = vld [vmem:[#allocation4 + $0xc9] sm:$0xff]  ;;  %v21530_v9 = vld [vmem:[#allocation28_spill] sm:$0xff] }
 0x551   : > { %v6009_v1 = vpop.f32.mrb[122].mxu1 }
 0x552   : > { %v20032_v15 = vpop.f32.mrb[220].mxu0  ;;  %v6077_v44 = vadd.f32 %v6009_v1, %v19732_v37  ;;  %v15112_v2 = vpop.f32.mrb[123].mxu1  ;;  %15428 = vmatmul.mubr.msk.f32.gmra.mrb[228].mxu1 %vm1453_vm4, %v20034_v4  ;;  %v20049_v37 = vld [vmem:[#allocation4 + $0xbb] sm:$0xff] }
 0x553   : > { %21529 = vst [vmem:[#allocation21_spill] sm:$0xff] %v20032_v15  ;;  %v15497_v43 = vpop.f32.mrb[221].mxu0  ;;  %15813 = vmatmul.mubr.msk.f32.gmra.mrb[70].mxu0 %vm1453_vm4, %v8657_v32  ;;  %15430 = vmatprep.mubr.msk.f32.mxu1 %vm16543_vm6, %v16542_v12 }
 0x554   : > { %15815 = vmatprep.mubr.msk.f32.mxu0 %vm16543_vm6, %v16542_v12  ;;  %v20045_v15 = vadd.f32 %v21530_v9, %v6077_v44  ;;  %v8659_v44 = vld [vmem:[#allocation4 + $0xd1] sm:$0xff] }
 0x555   : > { %v6014_v29 = vpop.f32.mrb[124].mxu1  ;;  %v21532_v43 = vld [vmem:[#allocation31_spill] sm:$0xff] }
 0x556   : > { %v20047_v11 = vpop.f32.mrb[222].mxu0  ;;  %v6078_v1 = vadd.f32 %v6014_v29, %v19745_v61  ;;  %v15115_v2 = vpop.f32.mrb[125].mxu1  ;;  %15431 = vmatmul.mubr.msk.f32.gmra.mrb[230].mxu1 %vm1453_vm4, %v20049_v37  ;;  %v20064_v61 = vld [vmem:[#allocation4 + $0xc3] sm:$0xff] }
 0x557   : > { %21531 = vst [vmem:[#allocation22_spill] sm:$0xff] %v20047_v11  ;;  %v15500_v32 = vpop.f32.mrb[223].mxu0  ;;  %15816 = vmatmul.mubr.msk.f32.gmra.mrb[72].mxu0 %vm1453_vm4, %v8658_v60  ;;  %15433 = vmatprep.mubr.msk.f32.mxu1 %vm16543_vm6, %v16542_v12 }
 0x558   : > { %15818 = vmatprep.mubr.msk.f32.mxu0 %vm16543_vm6, %v16542_v12  ;;  %v20060_v9 = vadd.f32 %v21532_v43, %v6078_v1  ;;  %v7065_v1 = vld [vmem:[#allocation4 + $0xcb] sm:$0xff]  ;;  %v8660_v32 = vld [vmem:[#allocation4 + $0xd9] sm:$0xff] }
 0x559   : > { %v6019_v11 = vpop.f32.mrb[126].mxu1  ;;  %v21534_v43 = vld [vmem:[#allocation32_spill] sm:$0xff] }
 0x55a   : > { %v20062_v49 = vpop.f32.mrb[224].mxu0  ;;  %v6079_v29 = vadd.f32 %v6019_v11, %v19758_v58  ;;  %v15118_v2 = vpop.f32.mrb[127].mxu1  ;;  %15434 = vmatmul.mubr.msk.f32.gmra.mrb[232].mxu1 %vm1453_vm4, %v20064_v61 }
 0x55b   : > { %21533 = vst [vmem:[#allocation23_spill] sm:$0xff] %v20062_v49  ;;  %v15503_v60 = vpop.f32.mrb[225].mxu0  ;;  %15819 = vmatmul.mubr.msk.f32.gmra.mrb[74].mxu0 %vm1453_vm4, %v8659_v44  ;;  %15436 = vmatprep.mubr.msk.f32.mxu1 %vm16543_vm6, %v16542_v12  ;;  %v7066_v44 = vld [vmem:[#allocation4 + $0xd3] sm:$0xff] }
 0x55c   : > { %15821 = vmatprep.mubr.msk.f32.mxu0 %vm16543_vm6, %v16542_v12  ;;  %v20075_v49 = vadd.f32 %v21534_v43, %v6079_v29  ;;  %v8661_v60 = vld [vmem:[#allocation4 + $0xe1] sm:$0xff] }
 0x55d   : > { %v6024_v33 = vpop.f32.mrb[128].mxu1 }
 0x55e   : > { %v7619_v58 = vpop.f32.mrb[226].mxu0  ;;  %v15121_v11 = vpop.f32.mrb[129].mxu1  ;;  %15437 = vmatmul.mubr.msk.f32.gmra.mrb[234].mxu1 %vm1453_vm4, %v7065_v1  ;;  %v7067_v1 = vld [vmem:[#allocation4 + $0xdb] sm:$0xff] }
 0x55f   : > { %v15506_v2 = vpop.f32.mrb[227].mxu0  ;;  %15822 = vmatmul.mubr.msk.f32.gmra.mrb[76].mxu0 %vm1453_vm4, %v8660_v32  ;;  %15439 = vmatprep.mubr.msk.f32.mxu1 %vm16543_vm6, %v16542_v12  ;;  %v8662_v32 = vld [vmem:[#allocation4 + $0xe9] sm:$0xff] }
 0x560   : > { %15824 = vmatprep.mubr.msk.f32.mxu0 %vm16543_vm6, %v16542_v12  ;;  %v8663_v2 = vld [vmem:[#allocation4 + $0xf1] sm:$0xff] }
 0x561   : > { %v6029_v6 = vpop.f32.mrb[130].mxu1 }
 0x562   : > { %v7624_v54 = vpop.f32.mrb[228].mxu0  ;;  %v15124_v29 = vpop.f32.mrb[131].mxu1  ;;  %15440 = vmatmul.mubr.msk.f32.gmra.mrb[236].mxu1 %vm1453_vm4, %v7066_v44  ;;  %v7068_v6 = vld [vmem:[#allocation4 + $0xe3] sm:$0xff] }
 0x563   : > { %v15509_v33 = vpop.f32.mrb[229].mxu0  ;;  %15825 = vmatmul.mubr.msk.f32.gmra.mrb[78].mxu0 %vm1453_vm4, %v8661_v60  ;;  %15442 = vmatprep.mubr.msk.f32.mxu1 %vm16543_vm6, %v16542_v12 }
 0x564   : > { %15827 = vmatprep.mubr.msk.f32.mxu0 %vm16543_vm6, %v16542_v12 }
 0x565   : > { %v6034_v43 = vpop.f32.mrb[132].mxu1 }
 0x566   : > { %v7629_v58 = vpop.f32.mrb[230].mxu0  ;;  %v15127_v11 = vpop.f32.mrb[133].mxu1  ;;  %15443 = vmatmul.mubr.msk.f32.gmra.mrb[238].mxu1 %vm1453_vm4, %v7067_v1  ;;  %v7069_v1 = vld [vmem:[#allocation4 + $0xeb] sm:$0xf] }
 0x567   : > { %15828 = vmatmul.mubr.msk.f32.gmra.mrb[80].mxu0 %vm1453_vm4, %v8662_v32  ;;  %v15512_v54 = vpop.f32.mrb[231].mxu0  ;;  %15445 = vmatprep.mubr.msk.f32.mxu1 %vm16543_vm6, %v16542_v12  ;;  %v8664_v32 = vld [vmem:[#allocation4 + $0xf9] sm:$0xf] }
 0x568   : > { %15830 = vmatprep.mubr.msk.f32.mxu0 %vm16543_vm6, %v16542_v12 }
 0x569   : > { %v6039_v44 = vpop.f32.mrb[134].mxu1 }
 0x56a   : > { %v7634_v60 = vpop.f32.mrb[232].mxu0  ;;  %v15130_v29 = vpop.f32.mrb[135].mxu1  ;;  %15446 = vmatmul.mubr.msk.f32.gmra.mrb[240].mxu1 %vm1453_vm4, %v7068_v6  ;;  %v8346_v6 = vld [vmem:[%s21413_s3 + $0x78] sm:$0x3f]  ;;  %v7683_v44 = vld [vmem:[#allocation4 + $0x2d] sm:$0xff] }
 0x56b   : > { %15831 = vmatmul.mubr.msk.f32.gmra.mrb[82].mxu0 %vm1453_vm4, %v8663_v2  ;;  %v15515_v33 = vpop.f32.mrb[233].mxu0  ;;  %15448 = vmatprep.mubr.msk.f32.mxu1 %vm16543_vm6, %v16542_v12 }
 0x56c   : > { %15833 = vmatprep.mubr.msk.f32.mxu0 %vm16543_vm6, %v16542_v12 }
 0x56d   : > { %v6044_v43 = vpop.f32.mrb[136].mxu1 }
 0x56e   : > { %v7639_v58 = vpop.f32.mrb[234].mxu0  ;;  %v15133_v11 = vpop.f32.mrb[137].mxu1  ;;  %15449 = vmatmul.mubr.msk.f32.gmra.mrb[242].mxu1 %vm1453_vm4, %v7069_v1 }
 0x56f   : > { %15834 = vmatmul.mubr.msk.f32.gmra.mrb[84].mxu0 %vm1453_vm4, %v8664_v32  ;;  %v15518_v54 = vpop.f32.mrb[235].mxu0  ;;  %15530 = vmatprep.mubr.msk.f32.mxu1 %vm16543_vm6, %v16542_v12  ;;  %v7684_v32 = vld [vmem:[#allocation4 + $0x35] sm:$0xff] }
 0x570   : > { %15915 = vmatprep.mubr.msk.f32.mxu0 %vm16543_vm6, %v16542_v12  ;;  %v7685_v54 = vld [vmem:[#allocation4 + $0x3d] sm:$0xff] }
 0x571   : > { %v6049_v2 = vpop.f32.mrb[138].mxu1 }
 0x572   : > { %v7644_v60 = vpop.f32.mrb[236].mxu0  ;;  %v15136_v29 = vpop.f32.mrb[139].mxu1  ;;  %15531 = vmatmul.mubr.msk.f32.vlgmr.msra.gmra.mrb[244].mxu1 %vm1453_vm4, %v7683_v44 }
 0x573   : > { %15916 = vmatmul.mubr.msk.f32.vlgmr.msra.gmra.mrb[86].mxu0 %vm1453_vm4, %v19813_v53  ;;  %v15521_v33 = vpop.f32.mrb[237].mxu0  ;;  %15683 = vmatpush3.msk.msra.mxu1 %vm2117_vm5, %v8346_v6  ;;  %v7686_v29 = vld [vmem:[#allocation4 + $0x45] sm:$0xff] }
 0x574   : > { %15533 = vmatprep.mubr.msk.f32.mxu1 %vm16543_vm6, %v16542_v12  ;;  %15918 = vmatprep.mubr.msk.f32.mxu0 %vm16543_vm6, %v16542_v12 }
 0x575   : > { %15836 = vmatprep.subr.mxu1 %v16542_v12  ;;  %v6054_v1 = vpop.f32.mrb[140].mxu1 }
 0x576   : > { %v7649_v43 = vpop.f32.mrb[238].mxu0  ;;  %v15139_v58 = vpop.f32.mrb[141].mxu1  ;;  %15534 = vmatmul.mubr.msk.f32.gmra.mrb[246].mxu1 %vm1453_vm4, %v7684_v32 }
 0x577   : > { %15919 = vmatmul.mubr.msk.f32.gmra.mrb[88].mxu0 %vm1453_vm4, %v19824_v3  ;;  %v15524_v53 = vpop.f32.mrb[239].mxu0  ;;  %15536 = vmatprep.mubr.msk.f32.mxu1 %vm16543_vm6, %v16542_v12 }
 0x578   : > { %15921 = vmatprep.mubr.msk.f32.mxu0 %vm16543_vm6, %v16542_v12 }
 0x579   : > { %v6059_v11 = vpop.f32.mrb[142].mxu1 }
 0x57a   : > { %v7654_v6 = vpop.f32.mrb[240].mxu0  ;;  %v15142_v2 = vpop.f32.mrb[143].mxu1  ;;  %15537 = vmatmul.mubr.msk.f32.gmra.mrb[248].mxu1 %vm1453_vm4, %v7685_v54 }
 0x57b   : > { %15922 = vmatmul.mubr.msk.f32.gmra.mrb[90].mxu0 %vm1453_vm4, %v19839_v40  ;;  %v15527_v44 = vpop.f32.mrb[241].mxu0  ;;  %15539 = vmatprep.mubr.msk.f32.mxu1 %vm16543_vm6, %v16542_v12 }
 0x57c   : > { %15924 = vmatprep.mubr.msk.f32.mxu0 %vm16543_vm6, %v16542_v12 }
 0x57d   : > { %v6577_v3 = vpop.f32.mrb[144].mxu1 }
 0x57e   : > { %v20133_v60 = vpop.f32.mrb[242].mxu0  ;;  %v6701_v33 = vadd.f32 %v6577_v3, %v19835_v59  ;;  %v15224_v1 = vpop.f32.mrb[145].mxu1  ;;  %15540 = vmatmul.mubr.msk.f32.gmra.mrb[250].mxu1 %vm1453_vm4, %v7686_v29  ;;  %v7687_v59 = vld [vmem:[#allocation4 + $0x4d] sm:$0xff] }
 0x57f   : > { %v15609_v32 = vpop.f32.mrb[243].mxu0  ;;  %15925 = vmatmul.mubr.msk.f32.gmra.mrb[92].mxu0 %vm1453_vm4, %v19854_v13  ;;  %15542 = vmatprep.mubr.msk.f32.mxu1 %vm16543_vm6, %v16542_v12 }
 0x580   : > { %15927 = vmatprep.mubr.msk.f32.mxu0 %vm16543_vm6, %v16542_v12  ;;  %v20144_v40 = vadd.f32 %v19539_v50, %v6701_v33 }
 0x581   : > { %v6582_v43 = vpop.f32.mrb[146].mxu1 }
 0x582   : > { %v20146_v58 = vpop.f32.mrb[244].mxu0  ;;  %v6702_v53 = vadd.f32 %v6582_v43, %v19850_v63  ;;  %v15227_v11 = vpop.f32.mrb[147].mxu1  ;;  %15543 = vmatmul.mubr.msk.f32.gmra.mrb[252].mxu1 %vm1453_vm4, %v7687_v59  ;;  %v7688_v63 = vld [vmem:[#allocation4 + $0x55] sm:$0xff] }
 0x583   : > { %v15612_v54 = vpop.f32.mrb[245].mxu0  ;;  %15928 = vmatmul.mubr.msk.f32.gmra.mrb[94].mxu0 %vm1453_vm4, %v19869_v10  ;;  %15545 = vmatprep.mubr.msk.f32.mxu1 %vm16543_vm6, %v16542_v12 }
 0x584   : > { %15930 = vmatprep.mubr.msk.f32.mxu0 %vm16543_vm6, %v16542_v12  ;;  %v20157_v50 = vadd.f32 %v19552_v55, %v6702_v53 }
 0x585   : > { %v6587_v13 = vpop.f32.mrb[148].mxu1 }
 0x586   : > { %v20159_v6 = vpop.f32.mrb[246].mxu0  ;;  %v6703_v2 = vadd.f32 %v6587_v13, %v19865_v41  ;;  %v15230_v44 = vpop.f32.mrb[149].mxu1  ;;  %15546 = vmatmul.mubr.msk.f32.gmra.mrb[254].mxu1 %vm1453_vm4, %v7688_v63  ;;  %v7689_v41 = vld [vmem:[#allocation4 + $0x5d] sm:$0xff] }
 0x587   : > { %v15615_v3 = vpop.f32.mrb[247].mxu0  ;;  %15931 = vmatmul.mubr.msk.f32.gmra.mrb[96].mxu0 %vm1453_vm4, %v19884_v39  ;;  %15548 = vmatprep.mubr.msk.f32.mxu1 %vm16543_vm6, %v16542_v12 }
 0x588   : > { %15933 = vmatprep.mubr.msk.f32.mxu0 %vm16543_vm6, %v16542_v12  ;;  %v20170_v55 = vadd.f32 %v19565_v31, %v6703_v2 }
 0x589   : > { %v6592_v10 = vpop.f32.mrb[150].mxu1 }
 0x58a   : > { %v20172_v29 = vpop.f32.mrb[248].mxu0  ;;  %v6704_v33 = vadd.f32 %v6592_v10, %v19880_v18  ;;  %v15233_v1 = vpop.f32.mrb[151].mxu1  ;;  %15549 = vmatmul.mubr.msk.f32.gmra.mrb[0].mxu1 %vm1453_vm4, %v7689_v41  ;;  %v7690_v18 = vld [vmem:[#allocation4 + $0x65] sm:$0xff] }
 0x58b   : > { %v15618_v32 = vpop.f32.mrb[249].mxu0  ;;  %15934 = vmatmul.mubr.msk.f32.gmra.mrb[98].mxu0 %vm1453_vm4, %v19899_v22  ;;  %15551 = vmatprep.mubr.msk.f32.mxu1 %vm16543_vm6, %v16542_v12 }
 0x58c   : > { %15936 = vmatprep.mubr.msk.f32.mxu0 %vm16543_vm6, %v16542_v12  ;;  %v20183_v31 = vadd.f32 %v19578_v47, %v6704_v33 }
 0x58d   : > { %v6597_v39 = vpop.f32.mrb[152].mxu1 }
 0x58e   : > { %v20185_v43 = vpop.f32.mrb[250].mxu0  ;;  %v6705_v59 = vadd.f32 %v6597_v39, %v19895_v51  ;;  %v15236_v53 = vpop.f32.mrb[153].mxu1  ;;  %15552 = vmatmul.mubr.msk.f32.gmra.mrb[2].mxu1 %vm1453_vm4, %v7690_v18  ;;  %v7691_v51 = vld [vmem:[#allocation4 + $0x6d] sm:$0xff] }
 0x58f   : > { %v15621_v11 = vpop.f32.mrb[251].mxu0  ;;  %15937 = vmatmul.mubr.msk.f32.gmra.mrb[100].mxu0 %vm1453_vm4, %v19914_v25  ;;  %15554 = vmatprep.mubr.msk.f32.mxu1 %vm16543_vm6, %v16542_v12 }
 0x590   : > { %15939 = vmatprep.mubr.msk.f32.mxu0 %vm16543_vm6, %v16542_v12  ;;  %v20196_v47 = vadd.f32 %v19591_v8, %v6705_v59 }
 0x591   : > { %v6602_v22 = vpop.f32.mrb[154].mxu1 }
 0x592   : > { %v20198_v54 = vpop.f32.mrb[252].mxu0  ;;  %v6706_v13 = vadd.f32 %v6602_v22, %v19910_v57  ;;  %v15239_v63 = vpop.f32.mrb[155].mxu1  ;;  %15555 = vmatmul.mubr.msk.f32.gmra.mrb[4].mxu1 %vm1453_vm4, %v7691_v51  ;;  %v7692_v57 = vld [vmem:[#allocation4 + $0x75] sm:$0xff] }
 0x593   : > { %v15624_v2 = vpop.f32.mrb[253].mxu0  ;;  %15940 = vmatmul.mubr.msk.f32.gmra.mrb[102].mxu0 %vm1453_vm4, %v19929_v7  ;;  %15557 = vmatprep.mubr.msk.f32.mxu1 %vm16543_vm6, %v16542_v12 }
 0x594   : > { %15942 = vmatprep.mubr.msk.f32.mxu0 %vm16543_vm6, %v16542_v12  ;;  %v20209_v8 = vadd.f32 %v19604_v52, %v6706_v13 }
 0x595   : > { %v6607_v25 = vpop.f32.mrb[156].mxu1 }
 0x596   : > { %v20211_v44 = vpop.f32.mrb[254].mxu0  ;;  %v6707_v3 = vadd.f32 %v6607_v25, %v19925_v34  ;;  %v15242_v10 = vpop.f32.mrb[157].mxu1  ;;  %15558 = vmatmul.mubr.msk.f32.gmra.mrb[6].mxu1 %vm1453_vm4, %v7692_v57  ;;  %v7693_v34 = vld [vmem:[#allocation4 + $0x7d] sm:$0xff] }
 0x597   : > { %v15627_v41 = vpop.f32.mrb[255].mxu0  ;;  %15943 = vmatmul.mubr.msk.f32.gmra.mrb[104].mxu0 %vm1453_vm4, %v19944_v48  ;;  %15560 = vmatprep.mubr.msk.f32.mxu1 %vm16543_vm6, %v16542_v12 }
 0x598   : > { %15945 = vmatprep.mubr.msk.f32.mxu0 %vm16543_vm6, %v16542_v12  ;;  %v20222_v52 = vadd.f32 %v19617_v19, %v6707_v3 }
 0x599   : > { %v6612_v7 = vpop.f32.mrb[158].mxu1 }
 0x59a   : > { %v20224_v33 = vpop.f32.mrb[0].mxu0  ;;  %v6708_v1 = vadd.f32 %v6612_v7, %v19940_v35  ;;  %v15245_v32 = vpop.f32.mrb[159].mxu1  ;;  %15561 = vmatmul.mubr.msk.f32.gmra.mrb[8].mxu1 %vm1453_vm4, %v7693_v34  ;;  %v7694_v35 = vld [vmem:[#allocation4 + $0x85] sm:$0xff] }
 0x59b   : > { %v15630_v39 = vpop.f32.mrb[1].mxu0  ;;  %15946 = vmatmul.mubr.msk.f32.gmra.mrb[106].mxu0 %vm1453_vm4, %v19959_v17  ;;  %15563 = vmatprep.mubr.msk.f32.mxu1 %vm16543_vm6, %v16542_v12 }
 0x59c   : > { %15948 = vmatprep.mubr.msk.f32.mxu0 %vm16543_vm6, %v16542_v12  ;;  %v20235_v19 = vadd.f32 %v19630_v5, %v6708_v1 }
 0x59d   : > { %v6617_v48 = vpop.f32.mrb[160].mxu1 }
 0x59e   : > { %v20237_v18 = vpop.f32.mrb[2].mxu0  ;;  %v6709_v59 = vadd.f32 %v6617_v48, %v19955_v42  ;;  %v15248_v53 = vpop.f32.mrb[161].mxu1  ;;  %15564 = vmatmul.mubr.msk.f32.gmra.mrb[10].mxu1 %vm1453_vm4, %v7694_v35  ;;  %v7695_v42 = vld [vmem:[#allocation4 + $0x8d] sm:$0xff] }
 0x59f   : > { %v15633_v11 = vpop.f32.mrb[3].mxu0  ;;  %15949 = vmatmul.mubr.msk.f32.gmra.mrb[108].mxu0 %vm1453_vm4, %v19974_v21  ;;  %15566 = vmatprep.mubr.msk.f32.mxu1 %vm16543_vm6, %v16542_v12 }
 0x5a0   : > { %15951 = vmatprep.mubr.msk.f32.mxu0 %vm16543_vm6, %v16542_v12  ;;  %v20248_v5 = vadd.f32 %v19643_v0, %v6709_v59 }
 0x5a1   : > { %v6622_v17 = vpop.f32.mrb[162].mxu1 }
 0x5a2   : > { %v20250_v22 = vpop.f32.mrb[4].mxu0  ;;  %v6710_v51 = vadd.f32 %v6622_v17, %v19970_v16  ;;  %v15251_v13 = vpop.f32.mrb[163].mxu1  ;;  %15567 = vmatmul.mubr.msk.f32.gmra.mrb[12].mxu1 %vm1453_vm4, %v7695_v42  ;;  %v7696_v16 = vld [vmem:[#allocation4 + $0x95] sm:$0xff] }
 0x5a3   : > { %v15636_v63 = vpop.f32.mrb[5].mxu0  ;;  %15952 = vmatmul.mubr.msk.f32.gmra.mrb[110].mxu0 %vm1453_vm4, %v19989_v23  ;;  %15569 = vmatprep.mubr.msk.f32.mxu1 %vm16543_vm6, %v16542_v12 }
 0x5a4   : > { %15954 = vmatprep.mubr.msk.f32.mxu0 %vm16543_vm6, %v16542_v12  ;;  %v20261_v0 = vadd.f32 %v19656_v27, %v6710_v51 }
 0x5a5   : > { %v6627_v21 = vpop.f32.mrb[164].mxu1 }
 0x5a6   : > { %v20263_v2 = vpop.f32.mrb[6].mxu0  ;;  %v6711_v25 = vadd.f32 %v6627_v21, %v19985_v24  ;;  %v15254_v57 = vpop.f32.mrb[165].mxu1  ;;  %15570 = vmatmul.mubr.msk.f32.gmra.mrb[14].mxu1 %vm1453_vm4, %v7696_v16  ;;  %v7697_v24 = vld [vmem:[#allocation4 + $0x9d] sm:$0xff] }
 0x5a7   : > { %v15639_v3 = vpop.f32.mrb[7].mxu0  ;;  %15955 = vmatmul.mubr.msk.f32.gmra.mrb[112].mxu0 %vm1453_vm4, %v20004_v30  ;;  %15572 = vmatprep.mubr.msk.f32.mxu1 %vm16543_vm6, %v16542_v12 }
 0x5a8   : > { %15957 = vmatprep.mubr.msk.f32.mxu0 %vm16543_vm6, %v16542_v12  ;;  %v20274_v27 = vadd.f32 %v19669_v28, %v6711_v25 }
 0x5a9   : > { %v6632_v23 = vpop.f32.mrb[166].mxu1 }
 0x5aa   : > { %v20276_v10 = vpop.f32.mrb[8].mxu0  ;;  %v6712_v41 = vadd.f32 %v6632_v23, %v20000_v38  ;;  %v15257_v7 = vpop.f32.mrb[167].mxu1  ;;  %15573 = vmatmul.mubr.msk.f32.gmra.mrb[16].mxu1 %vm1453_vm4, %v7697_v24  ;;  %v7698_v38 = vld [vmem:[#allocation4 + $0xa5] sm:$0xff] }
 0x5ab   : > { %v15642_v34 = vpop.f32.mrb[9].mxu0  ;;  %15958 = vmatmul.mubr.msk.f32.gmra.mrb[114].mxu0 %vm1453_vm4, %v20019_v56  ;;  %15575 = vmatprep.mubr.msk.f32.mxu1 %vm16543_vm6, %v16542_v12  ;;  %v21535_v7 = vld [vmem:[#allocation26_spill] sm:$0xff] }
 0x5ac   : > { %15960 = vmatprep.mubr.msk.f32.mxu0 %vm16543_vm6, %v16542_v12  ;;  %v20287_v28 = vadd.f32 %v19682_v36, %v6712_v41  ;;  %v7703_v41 = vld [vmem:[#allocation4 + $0xcd] sm:$0xff] }
 0x5ad   : > { %v6637_v30 = vpop.f32.mrb[168].mxu1 }
 0x5ae   : > { %v20289_v1 = vpop.f32.mrb[10].mxu0  ;;  %v6713_v32 = vadd.f32 %v6637_v30, %v20015_v26  ;;  %v15260_v39 = vpop.f32.mrb[169].mxu1  ;;  %15576 = vmatmul.mubr.msk.f32.gmra.mrb[18].mxu1 %vm1453_vm4, %v7698_v38  ;;  %v7699_v26 = vld [vmem:[#allocation4 + $0xad] sm:$0xff] }
 0x5af   : > { %v15645_v48 = vpop.f32.mrb[11].mxu0  ;;  %15961 = vmatmul.mubr.msk.f32.gmra.mrb[116].mxu0 %vm1453_vm4, %v20034_v4  ;;  %15578 = vmatprep.mubr.msk.f32.mxu1 %vm16543_vm6, %v16542_v12 }
 0x5b0   : > { %15963 = vmatprep.mubr.msk.f32.mxu0 %vm16543_vm6, %v16542_v12  ;;  %v20300_v36 = vadd.f32 %v19695_v46, %v6713_v32 }
 0x5b1   : > { %v6642_v56 = vpop.f32.mrb[170].mxu1 }
 0x5b2   : > { %v20302_v35 = vpop.f32.mrb[12].mxu0  ;;  %v6714_v59 = vadd.f32 %v6642_v56, %v20030_v45  ;;  %v15263_v53 = vpop.f32.mrb[171].mxu1  ;;  %15579 = vmatmul.mubr.msk.f32.gmra.mrb[20].mxu1 %vm1453_vm4, %v7699_v26  ;;  %v7700_v45 = vld [vmem:[#allocation4 + $0xb5] sm:$0xff] }
 0x5b3   : > { %v15648_v11 = vpop.f32.mrb[13].mxu0  ;;  %15964 = vmatmul.mubr.msk.f32.gmra.mrb[118].mxu0 %vm1453_vm4, %v20049_v37  ;;  %15581 = vmatprep.mubr.msk.f32.mxu1 %vm16543_vm6, %v16542_v12 }
 0x5b4   : > { %15966 = vmatprep.mubr.msk.f32.mxu0 %vm16543_vm6, %v16542_v12  ;;  %v20313_v46 = vadd.f32 %v19708_v14, %v6714_v59  ;;  %v7705_v59 = vld [vmem:[#allocation4 + $0xdd] sm:$0xff] }
 0x5b5   : > { %v6647_v4 = vpop.f32.mrb[172].mxu1 }
 0x5b6   : > { %v20315_v17 = vpop.f32.mrb[14].mxu0  ;;  %v6715_v42 = vadd.f32 %v6647_v4, %v20045_v15  ;;  %v15266_v51 = vpop.f32.mrb[173].mxu1  ;;  %15582 = vmatmul.mubr.msk.f32.gmra.mrb[22].mxu1 %vm1453_vm4, %v7700_v45  ;;  %v7701_v15 = vld [vmem:[#allocation4 + $0xbd] sm:$0xff] }
 0x5b7   : > { %v15651_v13 = vpop.f32.mrb[15].mxu0  ;;  %15967 = vmatmul.mubr.msk.f32.gmra.mrb[120].mxu0 %vm1453_vm4, %v20064_v61  ;;  %15584 = vmatprep.mubr.msk.f32.mxu1 %vm16543_vm6, %v16542_v12  ;;  %v7702_v61 = vld [vmem:[#allocation4 + $0xc5] sm:$0xff] }
 0x5b8   : > { %15969 = vmatprep.mubr.msk.f32.mxu0 %vm16543_vm6, %v16542_v12  ;;  %v20326_v14 = vadd.f32 %v19721_v20, %v6715_v42  ;;  %v7706_v42 = vld [vmem:[#allocation4 + $0xe5] sm:$0xff] }
 0x5b9   : > { %v6652_v37 = vpop.f32.mrb[174].mxu1 }
 0x5ba   : > { %v20328_v63 = vpop.f32.mrb[16].mxu0  ;;  %v6716_v21 = vadd.f32 %v6652_v37, %v20060_v9  ;;  %v15269_v16 = vpop.f32.mrb[175].mxu1  ;;  %15585 = vmatmul.mubr.msk.f32.gmra.mrb[24].mxu1 %vm1453_vm4, %v7701_v15 }
 0x5bb   : > { %v15654_v25 = vpop.f32.mrb[17].mxu0  ;;  %15587 = vmatprep.mubr.msk.f32.mxu1 %vm16543_vm6, %v16542_v12 }
 0x5bc   : > { %v20335_v57 = vadd.f32 %v19734_v62, %v6716_v21  ;;  %v7707_v21 = vld [vmem:[#allocation4 + $0xed] sm:$0xf] }
 0x5bd   : > { %v6657_v3 = vpop.f32.mrb[176].mxu1 }
 0x5be   : > { %v20337_v20 = vpop.f32.mrb[18].mxu0  ;;  %v6717_v23 = vadd.f32 %v6657_v3, %v20075_v49  ;;  %v15272_v24 = vpop.f32.mrb[177].mxu1  ;;  %15588 = vmatmul.mubr.msk.f32.gmra.mrb[26].mxu1 %vm1453_vm4, %v7702_v61  ;;  %v7704_v49 = vld [vmem:[#allocation4 + $0xd5] sm:$0xff] }
 0x5bf   : > { %v15657_v9 = vpop.f32.mrb[19].mxu0  ;;  %15590 = vmatprep.mubr.msk.f32.mxu1 %vm16543_vm6, %v16542_v12 }
 0x5c0   : > { %v20344_v34 = vadd.f32 %v21535_v7, %v6717_v23  ;;  %v8984_v23 = vld [vmem:[%s21413_s3 + $0x84] sm:$0x3f]  ;;  %v8321_v9 = vld [vmem:[#allocation4 + $0x38] sm:$0xff] }
 0x5c1   : > { %v6662_v30 = vpop.f32.mrb[178].mxu1 }
 0x5c2   : > { %v8257_v38 = vpop.f32.mrb[20].mxu0  ;;  %v15275_v62 = vpop.f32.mrb[179].mxu1  ;;  %15591 = vmatmul.mubr.msk.f32.gmra.mrb[28].mxu1 %vm1453_vm4, %v7703_v41 }
 0x5c3   : > { %v15660_v32 = vpop.f32.mrb[21].mxu0  ;;  %15593 = vmatprep.mubr.msk.f32.mxu1 %vm16543_vm6, %v16542_v12  ;;  %v8322_v62 = vld [vmem:[#allocation4 + $0x40] sm:$0xff] }
 0x5c5   : > { %v6667_v39 = vpop.f32.mrb[180].mxu1 }
 0x5c6   : > { %v8262_v48 = vpop.f32.mrb[22].mxu0  ;;  %v15278_v56 = vpop.f32.mrb[181].mxu1  ;;  %15594 = vmatmul.mubr.msk.f32.gmra.mrb[30].mxu1 %vm1453_vm4, %v7704_v49 }
 0x5c7   : > { %v15663_v26 = vpop.f32.mrb[23].mxu0  ;;  %15596 = vmatprep.mubr.msk.f32.mxu1 %vm16543_vm6, %v16542_v12  ;;  %v8323_v56 = vld [vmem:[#allocation4 + $0x48] sm:$0xff] }
 0x5c9   : > { %v6672_v53 = vpop.f32.mrb[182].mxu1 }
 0x5ca   : > { %v8267_v11 = vpop.f32.mrb[24].mxu0  ;;  %v15281_v4 = vpop.f32.mrb[183].mxu1  ;;  %15597 = vmatmul.mubr.msk.f32.gmra.mrb[32].mxu1 %vm1453_vm4, %v7705_v59 }
 0x5cb   : > { %v15666_v45 = vpop.f32.mrb[25].mxu0  ;;  %15599 = vmatprep.mubr.msk.f32.mxu1 %vm16543_vm6, %v16542_v12 }
 0x5cc   : > { %v8324_v45 = vld [vmem:[#allocation4 + $0x50] sm:$0xff] }
 0x5cd   : > { %v6677_v51 = vpop.f32.mrb[184].mxu1 }
 0x5ce   : > { %v8272_v13 = vpop.f32.mrb[26].mxu0  ;;  %v15284_v37 = vpop.f32.mrb[185].mxu1  ;;  %15600 = vmatmul.mubr.msk.f32.gmra.mrb[34].mxu1 %vm1453_vm4, %v7706_v42 }
 0x5cf   : > { %v15669_v15 = vpop.f32.mrb[27].mxu0  ;;  %15602 = vmatprep.mubr.msk.f32.mxu1 %vm16543_vm6, %v16542_v12  ;;  %v21536_v37 = vld [vmem:[#allocation30_spill] sm:$0xff] }
 0x5d1   : > { %v6682_v16 = vpop.f32.mrb[186].mxu1 }
 0x5d2   : > { %v8277_v25 = vpop.f32.mrb[28].mxu0  ;;  %v15287_v61 = vpop.f32.mrb[187].mxu1  ;;  %15603 = vmatmul.mubr.msk.f32.gmra.mrb[36].mxu1 %vm1453_vm4, %v7707_v21 }
 0x5d3   : > { %v15672_v3 = vpop.f32.mrb[29].mxu0  ;;  %15684 = vmatprep.mubr.msk.f32.mxu1 %vm16543_vm6, %v16542_v12  ;;  %v8325_v25 = vld [vmem:[#allocation4 + $0x58] sm:$0xff] }
 0x5d5   : > { %v6687_v24 = vpop.f32.mrb[188].mxu1 }
 0x5d6   : > { %v8282_v41 = vpop.f32.mrb[30].mxu0  ;;  %v15290_v7 = vpop.f32.mrb[189].mxu1  ;;  %15685 = vmatmul.mubr.msk.f32.vlgmr.msra.gmra.mrb[38].mxu1 %vm1453_vm4, %v8321_v9 }
 0x5d7   : > { %v15675_v30 = vpop.f32.mrb[31].mxu0  ;;  %15837 = vmatpush3.msk.msra.mxu1 %vm2117_vm5, %v8984_v23  ;;  %15687 = vmatprep.mubr.msk.f32.mxu1 %vm16543_vm6, %v16542_v12  ;;  %v21537_v23 = vld [vmem:[#allocation27_spill] sm:$0xff]  ;;  %v8326_v7 = vld [vmem:[#allocation4 + $0x60] sm:$0xff] }
 0x5d8   : > { %15990 = vmatprep.subr.mxu1 %v16542_v12 }
 0x5d9   : > { %v6692_v38 = vpop.f32.mrb[190].mxu1 }
 0x5da   : > { %v8287_v32 = vpop.f32.mrb[32].mxu0  ;;  %v15293_v49 = vpop.f32.mrb[191].mxu1  ;;  %15688 = vmatmul.mubr.msk.f32.gmra.mrb[40].mxu1 %vm1453_vm4, %v8322_v62  ;;  %v21538_v62 = vld [vmem:[#allocation10_spill] sm:$0xff] }
 0x5db   : > { %v15678_v39 = vpop.f32.mrb[33].mxu0  ;;  %15690 = vmatprep.mubr.msk.f32.mxu1 %vm16543_vm6, %v16542_v12 }
 0x5dd   : > { %v6697_v48 = vpop.f32.mrb[192].mxu1 }
 0x5de   : > { %v8292_v26 = vpop.f32.mrb[34].mxu0  ;;  %v15296_v59 = vpop.f32.mrb[193].mxu1  ;;  %15691 = vmatmul.mubr.msk.f32.gmra.mrb[42].mxu1 %vm1453_vm4, %v8323_v56  ;;  %v8327_v48 = vld [vmem:[#allocation4 + $0x68] sm:$0xff] }
 0x5df   : > { %v15681_v53 = vpop.f32.mrb[35].mxu0  ;;  %15693 = vmatprep.mubr.msk.f32.mxu1 %vm16543_vm6, %v16542_v12  ;;  %v21539_v59 = vld [vmem:[#allocation11_spill] sm:$0xff] }
 0x5e1   : > { %v7215_v11 = vpop.f32.mrb[194].mxu1 }
 0x5e2   : > { %v20375_v4 = vpop.f32.mrb[36].mxu0  ;;  %v7339_v42 = vadd.f32 %v7215_v11, %v20144_v40  ;;  %v15378_v51 = vpop.f32.mrb[195].mxu1  ;;  %15694 = vmatmul.mubr.msk.f32.gmra.mrb[44].mxu1 %vm1453_vm4, %v8324_v45 }
 0x5e3   : > { %v15763_v13 = vpop.f32.mrb[37].mxu0  ;;  %15696 = vmatprep.mubr.msk.f32.mxu1 %vm16543_vm6, %v16542_v12 }
 0x5e4   : > { %v20382_v15 = vadd.f32 %v21536_v37, %v7339_v42  ;;  %v8328_v42 = vld [vmem:[#allocation4 + $0x70] sm:$0xff]  ;;  %v21540_v37 = vld [vmem:[#allocation29_spill] sm:$0xff] }
 0x5e5   : > { %v7220_v21 = vpop.f32.mrb[196].mxu1 }
 0x5e6   : > { %v20384_v16 = vpop.f32.mrb[38].mxu0  ;;  %v7340_v61 = vadd.f32 %v7220_v21, %v20157_v50  ;;  %v15381_v3 = vpop.f32.mrb[197].mxu1  ;;  %15697 = vmatmul.mubr.msk.f32.gmra.mrb[46].mxu1 %vm1453_vm4, %v8325_v25 }
 0x5e7   : > { %v15766_v40 = vpop.f32.mrb[39].mxu0  ;;  %15699 = vmatprep.mubr.msk.f32.mxu1 %vm16543_vm6, %v16542_v12  ;;  %v8329_v3 = vld [vmem:[#allocation4 + $0x78] sm:$0xff] }
 0x5e8   : > { %v20391_v24 = vadd.f32 %v21537_v23, %v7340_v61 }
 0x5e9   : > { %v7225_v9 = vpop.f32.mrb[198].mxu1 }
 0x5ea   : > { %v20393_v41 = vpop.f32.mrb[40].mxu0  ;;  %v7341_v30 = vadd.f32 %v7225_v9, %v20170_v55  ;;  %v15384_v38 = vpop.f32.mrb[199].mxu1  ;;  %15700 = vmatmul.mubr.msk.f32.gmra.mrb[48].mxu1 %vm1453_vm4, %v8326_v7  ;;  %v21541_v9 = vld [vmem:[#allocation12_spill] sm:$0xff] }
 0x5eb   : > { %v15769_v50 = vpop.f32.mrb[41].mxu0  ;;  %15702 = vmatprep.mubr.msk.f32.mxu1 %vm16543_vm6, %v16542_v12 }
 0x5ec   : > { %v20400_v32 = vadd.f32 %v21538_v62, %v7341_v30  ;;  %v8330_v50 = vld [vmem:[#allocation4 + $0x80] sm:$0xff] }
 0x5ed   : > { %v7230_v49 = vpop.f32.mrb[200].mxu1 }
 0x5ee   : > { %v20402_v39 = vpop.f32.mrb[42].mxu0  ;;  %v7342_v56 = vadd.f32 %v7230_v49, %v20183_v31  ;;  %v15387_v26 = vpop.f32.mrb[201].mxu1  ;;  %15703 = vmatmul.mubr.msk.f32.gmra.mrb[50].mxu1 %vm1453_vm4, %v8327_v48  ;;  %v21542_v48 = vld [vmem:[#allocation13_spill] sm:$0xff] }
 0x5ef   : > { %v15772_v55 = vpop.f32.mrb[43].mxu0  ;;  %15705 = vmatprep.mubr.msk.f32.mxu1 %vm16543_vm6, %v16542_v12 }
 0x5f0   : > { %v20409_v53 = vadd.f32 %v21539_v59, %v7342_v56  ;;  %v8331_v59 = vld [vmem:[#allocation4 + $0x88] sm:$0xff] }
 0x5f1   : > { %v7235_v11 = vpop.f32.mrb[202].mxu1 }
 0x5f2   : > { %v20411_v45 = vpop.f32.mrb[44].mxu0  ;;  %v7343_v51 = vadd.f32 %v7235_v11, %v20196_v47  ;;  %v15390_v13 = vpop.f32.mrb[203].mxu1  ;;  %15706 = vmatmul.mubr.msk.f32.gmra.mrb[52].mxu1 %vm1453_vm4, %v8328_v42 }
 0x5f3   : > { %v15775_v31 = vpop.f32.mrb[45].mxu0  ;;  %15708 = vmatprep.mubr.msk.f32.mxu1 %vm16543_vm6, %v16542_v12 }
 0x5f4   : > { %v20418_v21 = vadd.f32 %v21540_v37, %v7343_v51  ;;  %v21543_v51 = vld [vmem:[#allocation14_spill] sm:$0xff] }
 0x5f5   : > { %v7240_v25 = vpop.f32.mrb[204].mxu1 }
 0x5f6   : > { %v20420_v61 = vpop.f32.mrb[46].mxu0  ;;  %v7344_v40 = vadd.f32 %v7240_v25, %v20209_v8  ;;  %v15393_v23 = vpop.f32.mrb[205].mxu1  ;;  %15709 = vmatmul.mubr.msk.f32.gmra.mrb[54].mxu1 %vm1453_vm4, %v8329_v3  ;;  %v8332_v25 = vld [vmem:[#allocation4 + $0x90] sm:$0xff] }
 0x5f7   : > { %v15778_v47 = vpop.f32.mrb[47].mxu0  ;;  %15711 = vmatprep.mubr.msk.f32.mxu1 %vm16543_vm6, %v16542_v12  ;;  %v9296_v23 = vld [vmem:[#allocation4 + $0xcb] sm:$0xff] }
 0x5f8   : > { %v20427_v7 = vadd.f32 %v21541_v9, %v7344_v40  ;;  %15970 = vmatmul.mubr.msk.f32.gmra.mrb[122].mxu0 %vm1453_vm4, %v9296_v23  ;;  %v21544_v47 = vld [vmem:[#allocation15_spill] sm:$0xff] }
 0x5f9   : > { %v7245_v30 = vpop.f32.mrb[206].mxu1  ;;  %15972 = vmatprep.mubr.msk.f32.mxu0 %vm16543_vm6, %v16542_v12 }
 0x5fa   : > { %v20429_v38 = vpop.f32.mrb[48].mxu0  ;;  %v7345_v62 = vadd.f32 %v7245_v30, %v20222_v52  ;;  %v15396_v49 = vpop.f32.mrb[207].mxu1  ;;  %15712 = vmatmul.mubr.msk.f32.gmra.mrb[56].mxu1 %vm1453_vm4, %v8330_v50 }
 0x5fb   : > { %v15781_v8 = vpop.f32.mrb[49].mxu0  ;;  %15714 = vmatprep.mubr.msk.f32.mxu1 %vm16543_vm6, %v16542_v12 }
 0x5fc   : > { %v20436_v56 = vadd.f32 %v21542_v48, %v7345_v62  ;;  %v9297_v48 = vld [vmem:[#allocation4 + $0xd3] sm:$0xff] }
 0x5fd   : > { %v7250_v26 = vpop.f32.mrb[208].mxu1  ;;  %15973 = vmatmul.mubr.msk.f32.gmra.mrb[124].mxu0 %vm1453_vm4, %v9297_v48 }
 0x5fe   : > { %v20438_v55 = vpop.f32.mrb[50].mxu0  ;;  %v7346_v11 = vadd.f32 %v7250_v26, %v20235_v19  ;;  %v15399_v42 = vpop.f32.mrb[209].mxu1  ;;  %15715 = vmatmul.mubr.msk.f32.gmra.mrb[58].mxu1 %vm1453_vm4, %v8331_v59  ;;  %v21545_v26 = vld [vmem:[#allocation16_spill] sm:$0xff]  ;;  %15975 = vmatprep.mubr.msk.f32.mxu0 %vm16543_vm6, %v16542_v12 }
 0x5ff   : > { %v15784_v52 = vpop.f32.mrb[51].mxu0  ;;  %15717 = vmatprep.mubr.msk.f32.mxu1 %vm16543_vm6, %v16542_v12 }
 0x600   : > { %v20445_v13 = vadd.f32 %v21543_v51, %v7346_v11 }
 0x601   : > { %v7255_v31 = vpop.f32.mrb[210].mxu1 }
 0x602   : > { %v20447_v37 = vpop.f32.mrb[52].mxu0  ;;  %v7347_v3 = vadd.f32 %v7255_v31, %v20248_v5  ;;  %v15402_v40 = vpop.f32.mrb[211].mxu1  ;;  %15718 = vmatmul.mubr.msk.f32.gmra.mrb[60].mxu1 %vm1453_vm4, %v8332_v25  ;;  %v8333_v5 = vld [vmem:[#allocation4 + $0x98] sm:$0xff] }
 0x603   : > { %v15787_v19 = vpop.f32.mrb[53].mxu0  ;;  %15720 = vmatprep.mubr.msk.f32.mxu1 %vm16543_vm6, %v16542_v12  ;;  %v9298_v25 = vld [vmem:[#allocation4 + $0xdb] sm:$0xff] }
 0x604   : > { %v20455_v9 = vadd.f32 %v21544_v47, %v7347_v3  ;;  %15976 = vmatmul.mubr.msk.f32.gmra.mrb[126].mxu0 %vm1453_vm4, %v9298_v25  ;;  %v21546_v3 = vld [vmem:[#allocation17_spill] sm:$0xff] }
 0x605   : > { %v7260_v30 = vpop.f32.mrb[212].mxu1  ;;  %15978 = vmatprep.mubr.msk.f32.mxu0 %vm16543_vm6, %v16542_v12 }
 0x606   : > { %v20459_v50 = vpop.f32.mrb[54].mxu0  ;;  %v7348_v62 = vadd.f32 %v7260_v30, %v20261_v0  ;;  %v15405_v49 = vpop.f32.mrb[213].mxu1  ;;  %15721 = vmatmul.mubr.msk.f32.gmra.mrb[62].mxu1 %vm1453_vm4, %v8333_v5  ;;  %v8334_v0 = vld [vmem:[#allocation4 + $0xa0] sm:$0xff] }
 0x607   : > { %v15790_v8 = vpop.f32.mrb[55].mxu0  ;;  %15723 = vmatprep.mubr.msk.f32.mxu1 %vm16543_vm6, %v16542_v12  ;;  %v21547_v49 = vld [vmem:[#allocation18_spill] sm:$0xff] }
 0x608   : > { %v20467_v59 = vadd.f32 %v21545_v26, %v7348_v62  ;;  %v9299_v62 = vld [vmem:[#allocation4 + $0xe3] sm:$0xff] }
 0x609   : > { %v7265_v11 = vpop.f32.mrb[214].mxu1  ;;  %15979 = vmatmul.mubr.msk.f32.gmra.mrb[128].mxu0 %vm1453_vm4, %v9299_v62  ;;  %v21549_v62 = vld [vmem:[#allocation20_spill] sm:$0xff] }
 0x60a   : > { %v20471_v42 = vpop.f32.mrb[56].mxu0  ;;  %v7349_v52 = vadd.f32 %v7265_v11, %v20274_v27  ;;  %v15408_v51 = vpop.f32.mrb[215].mxu1  ;;  %15724 = vmatmul.mubr.msk.f32.gmra.mrb[64].mxu1 %vm1453_vm4, %v8334_v0  ;;  %v8335_v27 = vld [vmem:[#allocation4 + $0xa8] sm:$0xff]  ;;  %15981 = vmatprep.mubr.msk.f32.mxu0 %vm16543_vm6, %v16542_v12 }
 0x60b   : > { %v15793_v31 = vpop.f32.mrb[57].mxu0  ;;  %15726 = vmatprep.mubr.msk.f32.mxu1 %vm16543_vm6, %v16542_v12  ;;  %v9300_v51 = vld [vmem:[#allocation4 + $0xeb] sm:$0xff] }
 0x60c   : > { %v20479_v40 = vadd.f32 %v21546_v3, %v7349_v52  ;;  %v21548_v31 = vld [vmem:[#allocation19_spill] sm:$0xff] }
 0x60d   : > { %v7270_v19 = vpop.f32.mrb[216].mxu1  ;;  %15982 = vmatmul.mubr.msk.f32.gmra.mrb[130].mxu0 %vm1453_vm4, %v9300_v51  ;;  %v9302_v51 = vld [vmem:[#allocation4 + $0xfb] sm:$0xf] }
 0x60e   : > { %v20483_v23 = vpop.f32.mrb[58].mxu0  ;;  %v7350_v47 = vadd.f32 %v7270_v19, %v20287_v28  ;;  %v15411_v30 = vpop.f32.mrb[217].mxu1  ;;  %15727 = vmatmul.mubr.msk.f32.gmra.mrb[66].mxu1 %vm1453_vm4, %v8335_v27  ;;  %v8336_v28 = vld [vmem:[#allocation4 + $0xb0] sm:$0xff]  ;;  %15984 = vmatprep.mubr.msk.f32.mxu0 %vm16543_vm6, %v16542_v12 }
 0x60f   : > { %v15796_v5 = vpop.f32.mrb[59].mxu0  ;;  %15729 = vmatprep.mubr.msk.f32.mxu1 %vm16543_vm6, %v16542_v12 }
 0x610   : > { %v20491_v8 = vadd.f32 %v21547_v49, %v7350_v47  ;;  %v9301_v5 = vld [vmem:[#allocation4 + $0xf3] sm:$0xff] }
 0x611   : > { %v7275_v48 = vpop.f32.mrb[218].mxu1  ;;  %15985 = vmatmul.mubr.msk.f32.gmra.mrb[132].mxu0 %vm1453_vm4, %v9301_v5 }
 0x612   : > { %v20495_v26 = vpop.f32.mrb[60].mxu0  ;;  %v7351_v11 = vadd.f32 %v7275_v48, %v20300_v36  ;;  %v15414_v0 = vpop.f32.mrb[219].mxu1  ;;  %15730 = vmatmul.mubr.msk.f32.gmra.mrb[68].mxu1 %vm1453_vm4, %v8336_v28  ;;  %v8337_v36 = vld [vmem:[#allocation4 + $0xb8] sm:$0xff]  ;;  %15987 = vmatprep.mubr.msk.f32.mxu0 %vm16543_vm6, %v16542_v12 }
 0x613   : > { %v15799_v52 = vpop.f32.mrb[61].mxu0  ;;  %15732 = vmatprep.mubr.msk.f32.mxu1 %vm16543_vm6, %v16542_v12 }
 0x614   : > { %v20503_v25 = vadd.f32 %v21548_v31, %v7351_v11  ;;  %v8339_v31 = vld [vmem:[#allocation4 + $0xc8] sm:$0xff] }
 0x615   : > { %v7280_v3 = vpop.f32.mrb[220].mxu1  ;;  %15988 = vmatmul.mubr.msk.f32.gmra.mrb[134].mxu0 %vm1453_vm4, %v9302_v51 }
 0x616   : > { %v20507_v19 = vpop.f32.mrb[62].mxu0  ;;  %v7352_v27 = vadd.f32 %v7280_v3, %v20313_v46  ;;  %v15417_v47 = vpop.f32.mrb[221].mxu1  ;;  %15733 = vmatmul.mubr.msk.f32.gmra.mrb[70].mxu1 %vm1453_vm4, %v8337_v36  ;;  %v8338_v46 = vld [vmem:[#allocation4 + $0xc0] sm:$0xff]  ;;  %16078 = vmatprep.mubr.msk.f32.mxu0 %vm16543_vm6, %v16542_v12 }
 0x617   : > { %v15802_v30 = vpop.f32.mrb[63].mxu0  ;;  %15735 = vmatprep.mubr.msk.f32.mxu1 %vm16543_vm6, %v16542_v12  ;;  %v21550_v3 = vld [vmem:[#allocation21_spill] sm:$0xff] }
 0x618   : > { %v20515_v49 = vadd.f32 %v21549_v62, %v7352_v27  ;;  %v8340_v62 = vld [vmem:[#allocation4 + $0xd0] sm:$0xff] }
 0x619   : > { %v7285_v48 = vpop.f32.mrb[222].mxu1 }
 0x61a   : > { %v20519_v28 = vpop.f32.mrb[64].mxu0  ;;  %v7353_v11 = vadd.f32 %v7285_v48, %v20326_v14  ;;  %v15420_v0 = vpop.f32.mrb[223].mxu1  ;;  %15736 = vmatmul.mubr.msk.f32.gmra.mrb[72].mxu1 %vm1453_vm4, %v8338_v46  ;;  %v21551_v48 = vld [vmem:[#allocation22_spill] sm:$0xff] }
 0x61b   : > { %v15805_v52 = vpop.f32.mrb[65].mxu0  ;;  %15738 = vmatprep.mubr.msk.f32.mxu1 %vm16543_vm6, %v16542_v12 }
 0x61c   : > { %v20527_v36 = vadd.f32 %v21550_v3, %v7353_v11  ;;  %v21552_v3 = vld [vmem:[#allocation23_spill] sm:$0xff] }
 0x61d   : > { %v7290_v27 = vpop.f32.mrb[224].mxu1 }
 0x61e   : > { %v20531_v47 = vpop.f32.mrb[66].mxu0  ;;  %v7354_v14 = vadd.f32 %v7290_v27, %v20335_v57  ;;  %v15423_v30 = vpop.f32.mrb[225].mxu1  ;;  %15739 = vmatmul.mubr.msk.f32.gmra.mrb[74].mxu1 %vm1453_vm4, %v8339_v31  ;;  %v8341_v31 = vld [vmem:[#allocation4 + $0xd8] sm:$0xff] }
 0x61f   : > { %v15808_v5 = vpop.f32.mrb[67].mxu0  ;;  %15741 = vmatprep.mubr.msk.f32.mxu1 %vm16543_vm6, %v16542_v12 }
 0x620   : > { %v20538_v46 = vadd.f32 %v21551_v48, %v7354_v14 }
 0x621   : > { %v7295_v11 = vpop.f32.mrb[226].mxu1 }
 0x622   : > { %v20540_v0 = vpop.f32.mrb[68].mxu0  ;;  %v7355_v52 = vadd.f32 %v7295_v11, %v20344_v34  ;;  %v15426_v51 = vpop.f32.mrb[227].mxu1  ;;  %15742 = vmatmul.mubr.msk.f32.gmra.mrb[76].mxu1 %vm1453_vm4, %v8340_v62  ;;  %v8342_v34 = vld [vmem:[#allocation4 + $0xe0] sm:$0xff] }
 0x623   : > { %v15811_v57 = vpop.f32.mrb[69].mxu0  ;;  %15744 = vmatprep.mubr.msk.f32.mxu1 %vm16543_vm6, %v16542_v12 }
 0x624   : > { %v20547_v27 = vadd.f32 %v21552_v3, %v7355_v52  ;;  %v8343_v52 = vld [vmem:[#allocation4 + $0xe8] sm:$0xff] }
 0x625   : > { %v7300_v30 = vpop.f32.mrb[228].mxu1 }
 0x626   : > { %v8895_v5 = vpop.f32.mrb[70].mxu0  ;;  %v15429_v14 = vpop.f32.mrb[229].mxu1  ;;  %15745 = vmatmul.mubr.msk.f32.gmra.mrb[78].mxu1 %vm1453_vm4, %v8341_v31 }
 0x627   : > { %v15814_v48 = vpop.f32.mrb[71].mxu0  ;;  %15747 = vmatprep.mubr.msk.f32.mxu1 %vm16543_vm6, %v16542_v12  ;;  %v8344_v14 = vld [vmem:[#allocation4 + $0xf0] sm:$0xff] }
 0x629   : > { %v7305_v11 = vpop.f32.mrb[230].mxu1 }
 0x62a   : > { %v8900_v62 = vpop.f32.mrb[72].mxu0  ;;  %v15432_v51 = vpop.f32.mrb[231].mxu1  ;;  %15748 = vmatmul.mubr.msk.f32.gmra.mrb[80].mxu1 %vm1453_vm4, %v8342_v34 }
 0x62b   : > { %v15817_v57 = vpop.f32.mrb[73].mxu0  ;;  %15750 = vmatprep.mubr.msk.f32.mxu1 %vm16543_vm6, %v16542_v12  ;;  %v8345_v51 = vld [vmem:[#allocation4 + $0xf8] sm:$0xf] }
 0x62d   : > { %v7310_v3 = vpop.f32.mrb[232].mxu1 }
 0x62e   : > { %v8905_v30 = vpop.f32.mrb[74].mxu0  ;;  %v15435_v5 = vpop.f32.mrb[233].mxu1  ;;  %15751 = vmatmul.mubr.msk.f32.gmra.mrb[82].mxu1 %vm1453_vm4, %v8343_v52 }
 0x62f   : > { %v15820_v31 = vpop.f32.mrb[75].mxu0  ;;  %15753 = vmatprep.mubr.msk.f32.mxu1 %vm16543_vm6, %v16542_v12  ;;  %v9622_v5 = vld [vmem:[%s21413_s3 + $0x90] sm:$0x3f] }
 0x631   : > { %v7315_v48 = vpop.f32.mrb[234].mxu1 }
 0x632   : > { %v8910_v11 = vpop.f32.mrb[76].mxu0  ;;  %v15438_v62 = vpop.f32.mrb[235].mxu1  ;;  %15754 = vmatmul.mubr.msk.f32.gmra.mrb[84].mxu1 %vm1453_vm4, %v8344_v14  ;;  %v8959_v14 = vld [vmem:[#allocation4 + $0x3a] sm:$0xff] }
 0x633   : > { %v15823_v34 = vpop.f32.mrb[77].mxu0  ;;  %15756 = vmatprep.mubr.msk.f32.mxu1 %vm16543_vm6, %v16542_v12 }
 0x635   : > { %v7320_v57 = vpop.f32.mrb[236].mxu1 }
 0x636   : > { %v8915_v3 = vpop.f32.mrb[78].mxu0  ;;  %v15441_v30 = vpop.f32.mrb[237].mxu1  ;;  %15757 = vmatmul.mubr.msk.f32.gmra.mrb[86].mxu1 %vm1453_vm4, %v8345_v51  ;;  %v8960_v51 = vld [vmem:[#allocation4 + $0x42] sm:$0xff] }
 0x637   : > { %v15826_v52 = vpop.f32.mrb[79].mxu0  ;;  %15838 = vmatprep.mubr.msk.f32.mxu1 %vm16543_vm6, %v16542_v12 }
 0x639   : > { %v7325_v31 = vpop.f32.mrb[238].mxu1 }
 0x63a   : > { %v8920_v48 = vpop.f32.mrb[80].mxu0  ;;  %v15444_v11 = vpop.f32.mrb[239].mxu1  ;;  %15839 = vmatmul.mubr.msk.f32.vlgmr.msra.gmra.mrb[88].mxu1 %vm1453_vm4, %v8959_v14  ;;  %v8961_v31 = vld [vmem:[#allocation4 + $0x4a] sm:$0xff] }
 0x63b   : > { %v15829_v62 = vpop.f32.mrb[81].mxu0  ;;  %15991 = vmatpush3.msk.msra.mxu1 %vm2117_vm5, %v9622_v5  ;;  %15841 = vmatprep.mubr.msk.f32.mxu1 %vm16543_vm6, %v16542_v12 }
 0x63d   : > { %v7330_v34 = vpop.f32.mrb[240].mxu1 }
 0x63e   : > { %v8925_v57 = vpop.f32.mrb[82].mxu0  ;;  %v15447_v3 = vpop.f32.mrb[241].mxu1  ;;  %15842 = vmatmul.mubr.msk.f32.gmra.mrb[90].mxu1 %vm1453_vm4, %v8960_v51  ;;  %v8962_v34 = vld [vmem:[#allocation4 + $0x52] sm:$0xff] }
 0x63f   : > { %v15832_v30 = vpop.f32.mrb[83].mxu0  ;;  %15844 = vmatprep.mubr.msk.f32.mxu1 %vm16543_vm6, %v16542_v12 }
 0x641   : > { %v7335_v52 = vpop.f32.mrb[242].mxu1 }
 0x642   : > { %v8930_v48 = vpop.f32.mrb[84].mxu0  ;;  %v15450_v14 = vpop.f32.mrb[243].mxu1  ;;  %15845 = vmatmul.mubr.msk.f32.gmra.mrb[92].mxu1 %vm1453_vm4, %v8961_v31 }
 0x643   : > { %v15835_v5 = vpop.f32.mrb[85].mxu0  ;;  %15847 = vmatprep.mubr.msk.f32.mxu1 %vm16543_vm6, %v16542_v12  ;;  %v8963_v48 = vld [vmem:[#allocation4 + $0x5a] sm:$0xff] }
 0x645   : > { %v7853_v11 = vpop.f32.mrb[244].mxu1 }
 0x646   : > { %v20577_v62 = vpop.f32.mrb[86].mxu0  ;;  %v7977_v51 = vadd.f32 %v7853_v11, %v20382_v15  ;;  %v15532_v57 = vpop.f32.mrb[245].mxu1  ;;  %15848 = vmatmul.mubr.msk.f32.gmra.mrb[94].mxu1 %vm1453_vm4, %v8962_v34 }
 0x647   : > { %v15917_v3 = vpop.f32.mrb[87].mxu0  ;;  %15850 = vmatprep.mubr.msk.f32.mxu1 %vm16543_vm6, %v16542_v12 }
 0x648   : > { %v20584_v30 = vadd.f32 %v20133_v60, %v7977_v51  ;;  %v8964_v60 = vld [vmem:[#allocation4 + $0x62] sm:$0xff] }
 0x649   : > { %v7858_v52 = vpop.f32.mrb[246].mxu1 }
 0x64a   : > { %v20586_v31 = vpop.f32.mrb[88].mxu0  ;;  %v7978_v14 = vadd.f32 %v7858_v52, %v20391_v24  ;;  %v15535_v5 = vpop.f32.mrb[247].mxu1  ;;  %15851 = vmatmul.mubr.msk.f32.gmra.mrb[96].mxu1 %vm1453_vm4, %v8963_v48 }
 0x64b   : > { %v15920_v15 = vpop.f32.mrb[89].mxu0  ;;  %15853 = vmatprep.mubr.msk.f32.mxu1 %vm16543_vm6, %v16542_v12 }
 0x64c   : > { %v20593_v11 = vadd.f32 %v20146_v58, %v7978_v14  ;;  %v8965_v58 = vld [vmem:[#allocation4 + $0x6a] sm:$0xff] }
 0x64d   : > { %v7863_v34 = vpop.f32.mrb[248].mxu1 }
 0x64e   : > { %v20595_v57 = vpop.f32.mrb[90].mxu0  ;;  %v7979_v51 = vadd.f32 %v7863_v34, %v20400_v32  ;;  %v15538_v3 = vpop.f32.mrb[249].mxu1  ;;  %15854 = vmatmul.mubr.msk.f32.gmra.mrb[98].mxu1 %vm1453_vm4, %v8964_v60 }
 0x64f   : > { %v15923_v24 = vpop.f32.mrb[91].mxu0  ;;  %15856 = vmatprep.mubr.msk.f32.mxu1 %vm16543_vm6, %v16542_v12 }
 0x650   : > { %v20602_v52 = vadd.f32 %v20159_v6, %v7979_v51  ;;  %v8966_v6 = vld [vmem:[#allocation4 + $0x72] sm:$0xff] }
 0x651   : > { %v7868_v48 = vpop.f32.mrb[250].mxu1 }
 0x652   : > { %v20604_v5 = vpop.f32.mrb[92].mxu0  ;;  %v7980_v14 = vadd.f32 %v7868_v48, %v20409_v53  ;;  %v15541_v15 = vpop.f32.mrb[251].mxu1  ;;  %15857 = vmatmul.mubr.msk.f32.gmra.mrb[100].mxu1 %vm1453_vm4, %v8965_v58 }
 0x653   : > { %v15926_v32 = vpop.f32.mrb[93].mxu0  ;;  %15859 = vmatprep.mubr.msk.f32.mxu1 %vm16543_vm6, %v16542_v12 }
 0x654   : > { %v20611_v34 = vadd.f32 %v20172_v29, %v7980_v14  ;;  %v8967_v29 = vld [vmem:[#allocation4 + $0x7a] sm:$0xff] }
 0x655   : > { %v7873_v60 = vpop.f32.mrb[252].mxu1 }
 0x656   : > { %v20613_v3 = vpop.f32.mrb[94].mxu0  ;;  %v7981_v51 = vadd.f32 %v7873_v60, %v20418_v21  ;;  %v15544_v24 = vpop.f32.mrb[253].mxu1  ;;  %15860 = vmatmul.mubr.msk.f32.gmra.mrb[102].mxu1 %vm1453_vm4, %v8966_v6 }
 0x657   : > { %v15929_v53 = vpop.f32.mrb[95].mxu0  ;;  %15862 = vmatprep.mubr.msk.f32.mxu1 %vm16543_vm6, %v16542_v12 }
 0x658   : > { %v20620_v48 = vadd.f32 %v20185_v43, %v7981_v51  ;;  %v8968_v43 = vld [vmem:[#allocation4 + $0x82] sm:$0xff] }
 0x659   : > { %v7878_v58 = vpop.f32.mrb[254].mxu1 }
 0x65a   : > { %v20622_v15 = vpop.f32.mrb[96].mxu0  ;;  %v7982_v14 = vadd.f32 %v7878_v58, %v20427_v7  ;;  %v15547_v32 = vpop.f32.mrb[255].mxu1  ;;  %15863 = vmatmul.mubr.msk.f32.gmra.mrb[104].mxu1 %vm1453_vm4, %v8967_v29 }
 0x65b   : > { %v15932_v21 = vpop.f32.mrb[97].mxu0  ;;  %15865 = vmatprep.mubr.msk.f32.mxu1 %vm16543_vm6, %v16542_v12 }
 0x65c   : > { %v20629_v60 = vadd.f32 %v20198_v54, %v7982_v14  ;;  %v8969_v54 = vld [vmem:[#allocation4 + $0x8a] sm:$0xff] }
 0x65d   : > { %v7883_v6 = vpop.f32.mrb[0].mxu1 }
 0x65e   : > { %v20631_v24 = vpop.f32.mrb[98].mxu0  ;;  %v7983_v51 = vadd.f32 %v7883_v6, %v20436_v56  ;;  %v15550_v53 = vpop.f32.mrb[1].mxu1  ;;  %15866 = vmatmul.mubr.msk.f32.gmra.mrb[106].mxu1 %vm1453_vm4, %v8968_v43 }
 0x65f   : > { %v15935_v7 = vpop.f32.mrb[99].mxu0  ;;  %15868 = vmatprep.mubr.msk.f32.mxu1 %vm16543_vm6, %v16542_v12 }
 0x660   : > { %v20638_v58 = vadd.f32 %v20211_v44, %v7983_v51  ;;  %v8970_v44 = vld [vmem:[#allocation4 + $0x92] sm:$0xff] }
 0x661   : > { %v7888_v29 = vpop.f32.mrb[2].mxu1 }
 0x662   : > { %v20640_v32 = vpop.f32.mrb[100].mxu0  ;;  %v7984_v14 = vadd.f32 %v7888_v29, %v20445_v13  ;;  %v15553_v21 = vpop.f32.mrb[3].mxu1  ;;  %15869 = vmatmul.mubr.msk.f32.gmra.mrb[108].mxu1 %vm1453_vm4, %v8969_v54 }
 0x663   : > { %v15938_v56 = vpop.f32.mrb[101].mxu0  ;;  %15871 = vmatprep.mubr.msk.f32.mxu1 %vm16543_vm6, %v16542_v12 }
 0x664   : > { %v20647_v6 = vadd.f32 %v20224_v33, %v7984_v14  ;;  %v8971_v33 = vld [vmem:[#allocation4 + $0x9a] sm:$0xff] }
 0x665   : > { %v7893_v43 = vpop.f32.mrb[4].mxu1 }
 0x666   : > { %v20649_v53 = vpop.f32.mrb[102].mxu0  ;;  %v7985_v51 = vadd.f32 %v7893_v43, %v20455_v9  ;;  %v15556_v7 = vpop.f32.mrb[5].mxu1  ;;  %15872 = vmatmul.mubr.msk.f32.gmra.mrb[110].mxu1 %vm1453_vm4, %v8970_v44 }
 0x667   : > { %v15941_v13 = vpop.f32.mrb[103].mxu0  ;;  %15874 = vmatprep.mubr.msk.f32.mxu1 %vm16543_vm6, %v16542_v12 }
 0x668   : > { %v20656_v29 = vadd.f32 %v20237_v18, %v7985_v51  ;;  %v8972_v18 = vld [vmem:[#allocation4 + $0xa2] sm:$0xff] }
 0x669   : > { %v7898_v54 = vpop.f32.mrb[6].mxu1 }
 0x66a   : > { %v20658_v21 = vpop.f32.mrb[104].mxu0  ;;  %v7986_v14 = vadd.f32 %v7898_v54, %v20467_v59  ;;  %v15559_v56 = vpop.f32.mrb[7].mxu1  ;;  %15875 = vmatmul.mubr.msk.f32.gmra.mrb[112].mxu1 %vm1453_vm4, %v8971_v33 }
 0x66b   : > { %v15944_v9 = vpop.f32.mrb[105].mxu0  ;;  %15877 = vmatprep.mubr.msk.f32.mxu1 %vm16543_vm6, %v16542_v12 }
 0x66c   : > { %v20665_v43 = vadd.f32 %v20250_v22, %v7986_v14  ;;  %v8973_v22 = vld [vmem:[#allocation4 + $0xaa] sm:$0xff] }
 0x66d   : > { %v7903_v44 = vpop.f32.mrb[8].mxu1 }
 0x66e   : > { %v20667_v7 = vpop.f32.mrb[106].mxu0  ;;  %v7987_v51 = vadd.f32 %v7903_v44, %v20479_v40  ;;  %v15562_v13 = vpop.f32.mrb[9].mxu1  ;;  %15878 = vmatmul.mubr.msk.f32.gmra.mrb[114].mxu1 %vm1453_vm4, %v8972_v18 }
 0x66f   : > { %v15947_v59 = vpop.f32.mrb[107].mxu0  ;;  %15880 = vmatprep.mubr.msk.f32.mxu1 %vm16543_vm6, %v16542_v12 }
 0x670   : > { %v20674_v54 = vadd.f32 %v20263_v2, %v7987_v51  ;;  %v8974_v2 = vld [vmem:[#allocation4 + $0xb2] sm:$0xff] }
 0x671   : > { %v7908_v33 = vpop.f32.mrb[10].mxu1 }
 0x672   : > { %v20676_v56 = vpop.f32.mrb[108].mxu0  ;;  %v7988_v14 = vadd.f32 %v7908_v33, %v20491_v8  ;;  %v15565_v9 = vpop.f32.mrb[11].mxu1  ;;  %15881 = vmatmul.mubr.msk.f32.gmra.mrb[116].mxu1 %vm1453_vm4, %v8973_v22 }
 0x673   : > { %v15950_v40 = vpop.f32.mrb[109].mxu0  ;;  %15883 = vmatprep.mubr.msk.f32.mxu1 %vm16543_vm6, %v16542_v12 }
 0x674   : > { %v20683_v44 = vadd.f32 %v20276_v10, %v7988_v14  ;;  %v8975_v10 = vld [vmem:[#allocation4 + $0xba] sm:$0xff] }
 0x675   : > { %v7913_v18 = vpop.f32.mrb[12].mxu1 }
 0x676   : > { %v20685_v13 = vpop.f32.mrb[110].mxu0  ;;  %v7989_v51 = vadd.f32 %v7913_v18, %v20503_v25  ;;  %v15568_v59 = vpop.f32.mrb[13].mxu1  ;;  %15884 = vmatmul.mubr.msk.f32.gmra.mrb[118].mxu1 %vm1453_vm4, %v8974_v2 }
 0x677   : > { %v15953_v8 = vpop.f32.mrb[111].mxu0  ;;  %15886 = vmatprep.mubr.msk.f32.mxu1 %vm16543_vm6, %v16542_v12 }
 0x678   : > { %v20692_v33 = vadd.f32 %v20289_v1, %v7989_v51  ;;  %v8976_v1 = vld [vmem:[#allocation4 + $0xc2] sm:$0xff] }
 0x679   : > { %v7918_v22 = vpop.f32.mrb[14].mxu1 }
 0x67a   : > { %v20694_v9 = vpop.f32.mrb[112].mxu0  ;;  %v7990_v14 = vadd.f32 %v7918_v22, %v20515_v49  ;;  %v15571_v40 = vpop.f32.mrb[15].mxu1  ;;  %15887 = vmatmul.mubr.msk.f32.gmra.mrb[120].mxu1 %vm1453_vm4, %v8975_v10  ;;  %v8977_v22 = vld [vmem:[#allocation4 + $0xca] sm:$0xff] }
 0x67b   : > { %v15956_v25 = vpop.f32.mrb[113].mxu0  ;;  %15889 = vmatprep.mubr.msk.f32.mxu1 %vm16543_vm6, %v16542_v12 }
 0x67c   : > { %v20701_v18 = vadd.f32 %v20302_v35, %v7990_v14 }
 0x67d   : > { %v7923_v2 = vpop.f32.mrb[16].mxu1 }
 0x67e   : > { %v20703_v59 = vpop.f32.mrb[114].mxu0  ;;  %v7991_v51 = vadd.f32 %v7923_v2, %v20527_v36  ;;  %v15574_v8 = vpop.f32.mrb[17].mxu1  ;;  %15890 = vmatmul.mubr.msk.f32.gmra.mrb[122].mxu1 %vm1453_vm4, %v8976_v1  ;;  %v8978_v2 = vld [vmem:[#allocation4 + $0xd2] sm:$0xff] }
 0x67f   : > { %v15959_v49 = vpop.f32.mrb[115].mxu0  ;;  %15892 = vmatprep.mubr.msk.f32.mxu1 %vm16543_vm6, %v16542_v12 }
 0x680   : > { %v20710_v10 = vadd.f32 %v20315_v17, %v7991_v51 }
 0x681   : > { %v7928_v40 = vpop.f32.mrb[18].mxu1 }
 0x682   : > { %v20712_v35 = vpop.f32.mrb[116].mxu0  ;;  %v7992_v14 = vadd.f32 %v7928_v40, %v20538_v46  ;;  %v15577_v25 = vpop.f32.mrb[19].mxu1  ;;  %15893 = vmatmul.mubr.msk.f32.gmra.mrb[124].mxu1 %vm1453_vm4, %v8977_v22  ;;  %v8979_v22 = vld [vmem:[#allocation4 + $0xda] sm:$0xff] }
 0x683   : > { %v15962_v36 = vpop.f32.mrb[117].mxu0  ;;  %15895 = vmatprep.mubr.msk.f32.mxu1 %vm16543_vm6, %v16542_v12 }
 0x684   : > { %v20719_v1 = vadd.f32 %v20328_v63, %v7992_v14 }
 0x685   : > { %v7933_v8 = vpop.f32.mrb[20].mxu1 }
 0x686   : > { %v20721_v49 = vpop.f32.mrb[118].mxu0  ;;  %v7993_v17 = vadd.f32 %v7933_v8, %v20547_v27  ;;  %v15580_v51 = vpop.f32.mrb[21].mxu1  ;;  %15896 = vmatmul.mubr.msk.f32.gmra.mrb[126].mxu1 %vm1453_vm4, %v8978_v2  ;;  %v8980_v27 = vld [vmem:[#allocation4 + $0xe2] sm:$0xff] }
 0x687   : > { %v15965_v46 = vpop.f32.mrb[119].mxu0  ;;  %15898 = vmatprep.mubr.msk.f32.mxu1 %vm16543_vm6, %v16542_v12  ;;  %v8981_v51 = vld [vmem:[#allocation4 + $0xea] sm:$0xff] }
 0x688   : > { %v20728_v40 = vadd.f32 %v20337_v20, %v7993_v17  ;;  %v8982_v46 = vld [vmem:[#allocation4 + $0xf2] sm:$0xff] }
 0x689   : > { %v7938_v25 = vpop.f32.mrb[22].mxu1 }
 0x68a   : > { %v9533_v36 = vpop.f32.mrb[120].mxu0  ;;  %v15583_v63 = vpop.f32.mrb[23].mxu1  ;;  %15899 = vmatmul.mubr.msk.f32.gmra.mrb[128].mxu1 %vm1453_vm4, %v8979_v22 }
 0x68b   : > { %v15968_v14 = vpop.f32.mrb[121].mxu0  ;;  %15901 = vmatprep.mubr.msk.f32.mxu1 %vm16543_vm6, %v16542_v12  ;;  %v8983_v36 = vld [vmem:[#allocation4 + $0xfa] sm:$0xf] }
 0x68d   : > { %v7943_v8 = vpop.f32.mrb[24].mxu1 }
 0x68e   : > { %v15586_v2 = vpop.f32.mrb[25].mxu1  ;;  %15902 = vmatmul.mubr.msk.f32.gmra.mrb[130].mxu1 %vm1453_vm4, %v8980_v27  ;;  %v9597_v8 = vld [vmem:[#allocation4 + $0x3c] sm:$0xff] }
 0x68f   : > { %15904 = vmatprep.mubr.msk.f32.mxu1 %vm16543_vm6, %v16542_v12 }
 0x691   : > { %v7948_v20 = vpop.f32.mrb[26].mxu1 }
 0x692   : > { %v15589_v17 = vpop.f32.mrb[27].mxu1  ;;  %15905 = vmatmul.mubr.msk.f32.gmra.mrb[132].mxu1 %vm1453_vm4, %v8981_v51  ;;  %v9598_v20 = vld [vmem:[#allocation4 + $0x44] sm:$0xff] }
 0x693   : > { %15907 = vmatprep.mubr.msk.f32.mxu1 %vm16543_vm6, %v16542_v12 }
 0x695   : > { %v7953_v22 = vpop.f32.mrb[28].mxu1 }
 0x696   : > { %v15592_v25 = vpop.f32.mrb[29].mxu1  ;;  %15908 = vmatmul.mubr.msk.f32.gmra.mrb[134].mxu1 %vm1453_vm4, %v8982_v46  ;;  %v10007_v46 = vld [vmem:[%s21415_s5] sm:$0xff]  ;;  %v10008_v22 = vld [vmem:[%s21415_s5 + $0x8] sm:$0xff] }
 0x697   : > { %15910 = vmatprep.mubr.msk.f32.mxu1 %vm16543_vm6, %v16542_v12  ;;  %v16544_v25 = vmov 0.0|0.0  }
 0x698   : > { %16325 = vmatprep.subr.bf16.mxu0 %v16544_v25  ;;  %16322 = vmatprep.subr.bf16.mxu1 %v16544_v25 }
 0x699   : > { %v7958_v63 = vpop.f32.mrb[30].mxu1 }
 0x69a   : > { %v15595_v14 = vpop.f32.mrb[31].mxu1  ;;  %15911 = vmatmul.mubr.msk.f32.gmra.mrb[136].mxu1 %vm1453_vm4, %v8983_v36  ;;  %v16326_v36 = vpack.c.bf16 %v10008_v22, %v10007_v46  ;;  %v9601_v22 = vld [vmem:[#allocation4 + $0x5c] sm:$0xff] }
 0x69b   : > { %15992 = vmatprep.mubr.msk.f32.mxu1 %vm16543_vm6, %v16542_v12  ;;  %v9599_v14 = vld [vmem:[#allocation4 + $0x4c] sm:$0xff] }
 0x69c   : > { %16327 = vmatpush3.bf16.msra.mxu0 %v16326_v36 }
 0x69d   : > { %v7963_v27 = vpop.f32.mrb[32].mxu1  ;;  %16328 = vmatprep.subr.bf16.mxu0 %v16544_v25 }
 0x69e   : > { %v15598_v2 = vpop.f32.mrb[33].mxu1  ;;  %15993 = vmatmul.mubr.msk.f32.vlgmr.msra.gmra.mrb[138].mxu1 %vm1453_vm4, %v9597_v8 }
 0x69f   : > { %15995 = vmatprep.mubr.msk.f32.mxu1 %vm16543_vm6, %v16542_v12  ;;  %v9600_v2 = vld [vmem:[#allocation4 + $0x54] sm:$0xff] }
 0x6a1   : > { %v7968_v51 = vpop.f32.mrb[34].mxu1 }
 0x6a2   : > { %v15601_v17 = vpop.f32.mrb[35].mxu1  ;;  %15996 = vmatmul.mubr.msk.f32.gmra.mrb[140].mxu1 %vm1453_vm4, %v9598_v20 }
 0x6a3   : > { %15998 = vmatprep.mubr.msk.f32.mxu1 %vm16543_vm6, %v16542_v12 }
 0x6a5   : > { %v7973_v63 = vpop.f32.mrb[36].mxu1 }
 0x6a6   : > { %v15604_v27 = vpop.f32.mrb[37].mxu1  ;;  %15999 = vmatmul.mubr.msk.f32.gmra.mrb[142].mxu1 %vm1453_vm4, %v9599_v14 }
 0x6a7   : > { %16001 = vmatprep.mubr.msk.f32.mxu1 %vm16543_vm6, %v16542_v12  ;;  %v9602_v27 = vld [vmem:[#allocation4 + $0x64] sm:$0xff] }
 0x6a9   : > { %v8491_v8 = vpop.f32.mrb[38].mxu1 }
 0x6aa   : > { %v8615_v51 = vadd.f32 %v8491_v8, %v20584_v30  ;;  %v15686_v20 = vpop.f32.mrb[39].mxu1  ;;  %16002 = vmatmul.mubr.msk.f32.gmra.mrb[144].mxu1 %vm1453_vm4, %v9600_v2 }
 0x6ab   : > { %16004 = vmatprep.mubr.msk.f32.mxu1 %vm16543_vm6, %v16542_v12 }
 0x6ac   : > { %v20768_v17 = vadd.f32 %v20375_v4, %v8615_v51  ;;  %v9603_v51 = vld [vmem:[#allocation4 + $0x6c] sm:$0xff] }
 0x6ad   : > { %v8496_v46 = vpop.f32.mrb[40].mxu1 }
 0x6ae   : > { %v8616_v36 = vadd.f32 %v8496_v46, %v20593_v11  ;;  %v15689_v63 = vpop.f32.mrb[41].mxu1  ;;  %16005 = vmatmul.mubr.msk.f32.gmra.mrb[146].mxu1 %vm1453_vm4, %v9601_v22  ;;  %v9604_v22 = vld [vmem:[#allocation4 + $0x74] sm:$0xff] }
 0x6af   : > { %16007 = vmatprep.mubr.msk.f32.mxu1 %vm16543_vm6, %v16542_v12 }
 0x6b0   : > { %v20775_v30 = vadd.f32 %v20384_v16, %v8616_v36 }
 0x6b1   : > { %v8501_v14 = vpop.f32.mrb[42].mxu1 }
 0x6b2   : > { %v8617_v8 = vadd.f32 %v8501_v14, %v20602_v52  ;;  %v15692_v2 = vpop.f32.mrb[43].mxu1  ;;  %16008 = vmatmul.mubr.msk.f32.gmra.mrb[148].mxu1 %vm1453_vm4, %v9602_v27  ;;  %v9605_v14 = vld [vmem:[#allocation4 + $0x7c] sm:$0xff] }
 0x6b3   : > { %16010 = vmatprep.mubr.msk.f32.mxu1 %vm16543_vm6, %v16542_v12  ;;  %v9606_v2 = vld [vmem:[#allocation4 + $0x84] sm:$0xff] }
 0x6b4   : > { %v20782_v4 = vadd.f32 %v20393_v41, %v8617_v8 }
 0x6b5   : > { %v8506_v11 = vpop.f32.mrb[44].mxu1 }
 0x6b6   : > { %v8618_v20 = vadd.f32 %v8506_v11, %v20611_v34  ;;  %v15695_v46 = vpop.f32.mrb[45].mxu1  ;;  %16011 = vmatmul.mubr.msk.f32.gmra.mrb[150].mxu1 %vm1453_vm4, %v9603_v51 }
 0x6b7   : > { %16013 = vmatprep.mubr.msk.f32.mxu1 %vm16543_vm6, %v16542_v12 }
 0x6b8   : > { %v20789_v16 = vadd.f32 %v20402_v39, %v8618_v20  ;;  %v9607_v20 = vld [vmem:[#allocation4 + $0x8c] sm:$0xff] }
 0x6b9   : > { %v8511_v52 = vpop.f32.mrb[46].mxu1 }
 0x6ba   : > { %v8619_v36 = vadd.f32 %v8511_v52, %v20620_v48  ;;  %v15698_v63 = vpop.f32.mrb[47].mxu1  ;;  %16014 = vmatmul.mubr.msk.f32.gmra.mrb[152].mxu1 %vm1453_vm4, %v9604_v22  ;;  %v9608_v22 = vld [vmem:[#allocation4 + $0x94] sm:$0xff] }
 0x6bb   : > { %16016 = vmatprep.mubr.msk.f32.mxu1 %vm16543_vm6, %v16542_v12 }
 0x6bc   : > { %v20796_v41 = vadd.f32 %v20411_v45, %v8619_v36 }
 0x6bd   : > { %v8516_v34 = vpop.f32.mrb[48].mxu1 }
 0x6be   : > { %v8620_v27 = vadd.f32 %v8516_v34, %v20629_v60  ;;  %v15701_v8 = vpop.f32.mrb[49].mxu1  ;;  %16017 = vmatmul.mubr.msk.f32.gmra.mrb[154].mxu1 %vm1453_vm4, %v9605_v14 }
 0x6bf   : > { %16019 = vmatprep.mubr.msk.f32.mxu1 %vm16543_vm6, %v16542_v12 }
 0x6c0   : > { %v20803_v39 = vadd.f32 %v20420_v61, %v8620_v27 }
 0x6c1   : > { %v8521_v48 = vpop.f32.mrb[50].mxu1 }
 0x6c2   : > { %v8621_v11 = vadd.f32 %v8521_v48, %v20638_v58  ;;  %v15704_v51 = vpop.f32.mrb[51].mxu1  ;;  %16020 = vmatmul.mubr.msk.f32.gmra.mrb[156].mxu1 %vm1453_vm4, %v9606_v2 }
 0x6c3   : > { %16022 = vmatprep.mubr.msk.f32.mxu1 %vm16543_vm6, %v16542_v12 }
 0x6c4   : > { %v20810_v45 = vadd.f32 %v20429_v38, %v8621_v11  ;;  %v10016_v38 = vld [vmem:[%s21415_s5 + $0x10] sm:$0xff]  ;;  %v9610_v11 = vld [vmem:[#allocation4 + $0xa4] sm:$0xff] }
 0x6c5   : > { %v8526_v60 = vpop.f32.mrb[52].mxu1 }
 0x6c6   : > { %v8622_v46 = vadd.f32 %v8526_v60, %v20647_v6  ;;  %v15707_v52 = vpop.f32.mrb[53].mxu1  ;;  %16023 = vmatmul.mubr.msk.f32.gmra.mrb[158].mxu1 %vm1453_vm4, %v9607_v20  ;;  %v10017_v6 = vld [vmem:[%s21415_s5 + $0x18] sm:$0xff]  ;;  %v9611_v20 = vld [vmem:[#allocation4 + $0xac] sm:$0xff] }
 0x6c7   : > { %16025 = vmatprep.mubr.msk.f32.mxu1 %vm16543_vm6, %v16542_v12 }
 0x6c8   : > { %v20817_v61 = vadd.f32 %v20438_v55, %v8622_v46  ;;  %v16323_v55 = vpack.c.bf16 %v10017_v6, %v10016_v38 }
 0x6c9   : > { %v8531_v58 = vpop.f32.mrb[54].mxu1 }
 0x6ca   : > { %v8623_v36 = vadd.f32 %v8531_v58, %v20656_v29  ;;  %v15710_v63 = vpop.f32.mrb[55].mxu1  ;;  %16026 = vmatmul.mubr.msk.f32.gmra.mrb[160].mxu1 %vm1453_vm4, %v9608_v22  ;;  %v9609_v29 = vld [vmem:[#allocation4 + $0x9c] sm:$0xff] }
 0x6cb   : > { %16028 = vmatprep.mubr.msk.f32.mxu1 %vm16543_vm6, %v16542_v12  ;;  %16324 = vmatpush3.bf16.msra.mxu1 %v16323_v55 }
 0x6cc   : > { %v20830_v34 = vadd.f32 %v20447_v37, %v8623_v36  ;;  %16388 = vmatprep.subr.bf16.mxu1 %v16544_v25  ;;  %v9612_v36 = vld [vmem:[#allocation4 + $0xb4] sm:$0xff] }
 0x6cd   : > { %v8536_v14 = vpop.f32.mrb[56].mxu1 }
 0x6ce   : > { %v8624_v27 = vadd.f32 %v8536_v14, %v20665_v43  ;;  %v15713_v8 = vpop.f32.mrb[57].mxu1  ;;  %16029 = vmatmul.mubr.msk.f32.gmra.mrb[162].mxu1 %vm1453_vm4, %v9609_v29  ;;  %v9613_v14 = vld [vmem:[#allocation4 + $0xbc] sm:$0xff] }
 0x6cf   : > { %16031 = vmatprep.mubr.msk.f32.mxu1 %vm16543_vm6, %v16542_v12 }
 0x6d0   : > { %v20838_v48 = vadd.f32 %v20459_v50, %v8624_v27  ;;  %v9538_v50 = vpop.f32.mrb[122].mxu0 }
 0x6d1   : > { %v8541_v2 = vpop.f32.mrb[58].mxu1 }
 0x6d2   : > { %v8625_v37 = vadd.f32 %v8541_v2, %v20674_v54  ;;  %v15716_v51 = vpop.f32.mrb[59].mxu1  ;;  %16032 = vmatmul.mubr.msk.f32.gmra.mrb[164].mxu1 %vm1453_vm4, %v9610_v11  ;;  %v15971_v54 = vpop.f32.mrb[123].mxu0 }
 0x6d3   : > { %16034 = vmatprep.mubr.msk.f32.mxu1 %vm16543_vm6, %v16542_v12  ;;  %v9543_v38 = vpop.f32.mrb[124].mxu0 }
 0x6d4   : > { %v20845_v43 = vadd.f32 %v20471_v42, %v8625_v37 }
 0x6d5   : > { %v8546_v60 = vpop.f32.mrb[60].mxu1 }
 0x6d6   : > { %v8626_v46 = vadd.f32 %v8546_v60, %v20683_v44  ;;  %v15719_v52 = vpop.f32.mrb[61].mxu1  ;;  %16035 = vmatmul.mubr.msk.f32.gmra.mrb[166].mxu1 %vm1453_vm4, %v9611_v20  ;;  %v15974_v44 = vpop.f32.mrb[125].mxu0 }
 0x6d7   : > { %16037 = vmatprep.mubr.msk.f32.mxu1 %vm16543_vm6, %v16542_v12  ;;  %v9548_v27 = vpop.f32.mrb[126].mxu0 }
 0x6d8   : > { %v20852_v58 = vadd.f32 %v20483_v23, %v8626_v46  ;;  %v15977_v8 = vpop.f32.mrb[127].mxu0 }
 0x6d9   : > { %v8551_v22 = vpop.f32.mrb[62].mxu1 }
 0x6da   : > { %v8627_v42 = vadd.f32 %v8551_v22, %v20692_v33  ;;  %v15722_v63 = vpop.f32.mrb[63].mxu1  ;;  %16038 = vmatmul.mubr.msk.f32.gmra.mrb[168].mxu1 %vm1453_vm4, %v9612_v36  ;;  %v9614_v33 = vld [vmem:[#allocation4 + $0xc4] sm:$0xff] }
 0x6db   : > { %16040 = vmatprep.mubr.msk.f32.mxu1 %vm16543_vm6, %v16542_v12 }
 0x6dc   : > { %v20859_v6 = vadd.f32 %v20495_v26, %v8627_v42  ;;  %v9553_v51 = vpop.f32.mrb[128].mxu0 }
 0x6dd   : > { %v8556_v55 = vpop.f32.mrb[64].mxu1  ;;  %v15980_v60 = vpop.f32.mrb[129].mxu0  ;;  %v9621_v51 = vld [vmem:[#allocation4 + $0xfc] sm:$0xf] }
 0x6de   : > { %v8628_v23 = vadd.f32 %v8556_v55, %v20701_v18  ;;  %v15725_v29 = vpop.f32.mrb[65].mxu1  ;;  %16041 = vmatmul.mubr.msk.f32.gmra.mrb[170].mxu1 %vm1453_vm4, %v9613_v14  ;;  %v9615_v18 = vld [vmem:[#allocation4 + $0xcc] sm:$0xff] }
 0x6df   : > { %16043 = vmatprep.mubr.msk.f32.mxu1 %vm16543_vm6, %v16542_v12 }
 0x6e0   : > { %v20866_v2 = vadd.f32 %v20507_v19, %v8628_v23  ;;  %v9558_v50 = vpop.f32.mrb[130].mxu0 }
 0x6e1   : > { %v8561_v11 = vpop.f32.mrb[66].mxu1  ;;  %v15983_v54 = vpop.f32.mrb[131].mxu0 }
 0x6e2   : > { %v8629_v26 = vadd.f32 %v8561_v11, %v20710_v10  ;;  %v15728_v37 = vpop.f32.mrb[67].mxu1  ;;  %16044 = vmatmul.mubr.msk.f32.gmra.mrb[172].mxu1 %vm1453_vm4, %v9614_v33  ;;  %v9616_v10 = vld [vmem:[#allocation4 + $0xd4] sm:$0xff]  ;;  %v9619_v33 = vld [vmem:[#allocation4 + $0xec] sm:$0xff] }
 0x6e3   : > { %16046 = vmatprep.mubr.msk.f32.mxu1 %vm16543_vm6, %v16542_v12  ;;  %v9620_v11 = vld [vmem:[#allocation4 + $0xf4] sm:$0xff] }
 0x6e4   : > { %v20873_v20 = vadd.f32 %v20519_v28, %v8629_v26  ;;  %v9563_v63 = vpop.f32.mrb[132].mxu0 }
 0x6e5   : > { %v8566_v46 = vpop.f32.mrb[68].mxu1  ;;  %v15986_v38 = vpop.f32.mrb[133].mxu0 }
 0x6e6   : > { %v8630_v52 = vadd.f32 %v8566_v46, %v20719_v1  ;;  %v15731_v19 = vpop.f32.mrb[69].mxu1  ;;  %16047 = vmatmul.mubr.msk.f32.gmra.mrb[174].mxu1 %vm1453_vm4, %v9615_v18  ;;  %v9617_v1 = vld [vmem:[#allocation4 + $0xdc] sm:$0xff] }
 0x6e7   : > { %16049 = vmatprep.mubr.msk.f32.mxu1 %vm16543_vm6, %v16542_v12 }
 0x6e8   : > { %v20880_v22 = vadd.f32 %v20531_v47, %v8630_v52  ;;  %v9568_v47 = vpop.f32.mrb[134].mxu0 }
 0x6e9   : > { %v8571_v36 = vpop.f32.mrb[70].mxu1  ;;  %v15989_v23 = vpop.f32.mrb[135].mxu0 }
 0x6ea   : > { %v8631_v42 = vadd.f32 %v8571_v36, %v20728_v40  ;;  %v15734_v28 = vpop.f32.mrb[71].mxu1  ;;  %16050 = vmatmul.mubr.msk.f32.gmra.mrb[176].mxu1 %vm1453_vm4, %v9616_v10  ;;  %v9618_v40 = vld [vmem:[#allocation4 + $0xe4] sm:$0xff] }
 0x6eb   : > { %16052 = vmatprep.mubr.msk.f32.mxu1 %vm16543_vm6, %v16542_v12 }
 0x6ec   : > { %v20887_v44 = vadd.f32 %v20540_v0, %v8631_v42 }
 0x6ed   : > { %v8576_v55 = vpop.f32.mrb[72].mxu1 }
 0x6ee   : > { %v15737_v14 = vpop.f32.mrb[73].mxu1  ;;  %16053 = vmatmul.mubr.msk.f32.gmra.mrb[178].mxu1 %vm1453_vm4, %v9617_v1 }
 0x6ef   : > { %16055 = vmatprep.mubr.msk.f32.mxu1 %vm16543_vm6, %v16542_v12 }
 0x6f1   : > { %v8581_v29 = vpop.f32.mrb[74].mxu1 }
 0x6f2   : > { %v15740_v27 = vpop.f32.mrb[75].mxu1  ;;  %16056 = vmatmul.mubr.msk.f32.gmra.mrb[180].mxu1 %vm1453_vm4, %v9618_v40 }
 0x6f3   : > { %16058 = vmatprep.mubr.msk.f32.mxu1 %vm16543_vm6, %v16542_v12 }
 0x6f5   : > { %v8586_v0 = vpop.f32.mrb[76].mxu1 }
 0x6f6   : > { %v15743_v8 = vpop.f32.mrb[77].mxu1  ;;  %16059 = vmatmul.mubr.msk.f32.gmra.mrb[182].mxu1 %vm1453_vm4, %v9619_v33 }
 0x6f7   : > { %16061 = vmatprep.mubr.msk.f32.mxu1 %vm16543_vm6, %v16542_v12 }
 0x6f9   : > { %v8591_v26 = vpop.f32.mrb[78].mxu1 }
 0x6fa   : > { %v15746_v37 = vpop.f32.mrb[79].mxu1  ;;  %16062 = vmatmul.mubr.msk.f32.gmra.mrb[184].mxu1 %vm1453_vm4, %v9620_v11 }
 0x6fb   : > { %16064 = vmatprep.mubr.msk.f32.mxu1 %vm16543_vm6, %v16542_v12 }
 0x6fd   : > { %v8596_v18 = vpop.f32.mrb[80].mxu1 }
 0x6fe   : > { %v15749_v60 = vpop.f32.mrb[81].mxu1  ;;  %16065 = vmatmul.mubr.msk.f32.gmra.mrb[186].mxu1 %vm1453_vm4, %v9621_v51 }
 0x6ff   : > { %16071 = vmatprep.mubr.msk.f32.mxu1 %vm16543_vm6, %v16542_v12 }
 0x701   : > { %v8601_v46 = vpop.f32.mrb[82].mxu1 }
 0x702   : > { %v15752_v52 = vpop.f32.mrb[83].mxu1 }
 0x705   : > { %v8606_v19 = vpop.f32.mrb[84].mxu1 }
 0x706   : > { %v15755_v50 = vpop.f32.mrb[85].mxu1 }
 0x709   : > { %v8611_v10 = vpop.f32.mrb[86].mxu1 }
 0x70a   : > { %v15758_v54 = vpop.f32.mrb[87].mxu1 }
 0x70d   : > { %v9129_v36 = vpop.f32.mrb[88].mxu1 }
 0x70e   : > { %v9253_v42 = vadd.f32 %v9129_v36, %v20768_v17  ;;  %v15840_v28 = vpop.f32.mrb[89].mxu1 }
 0x710   : > { %v20906_v63 = vadd.f32 %v20577_v62, %v9253_v42 }
 0x711   : > { %v9134_v1 = vpop.f32.mrb[90].mxu1 }
 0x712   : > { %v9254_v38 = vadd.f32 %v9134_v1, %v20775_v30  ;;  %v15843_v55 = vpop.f32.mrb[91].mxu1 }
 0x714   : > { %v20910_v14 = vadd.f32 %v20586_v31, %v9254_v38 }
 0x715   : > { %v9139_v47 = vpop.f32.mrb[92].mxu1 }
 0x716   : > { %v9255_v40 = vadd.f32 %v9139_v47, %v20782_v4  ;;  %v15846_v23 = vpop.f32.mrb[93].mxu1 }
 0x718   : > { %v20914_v29 = vadd.f32 %v20595_v57, %v9255_v40 }
 0x719   : > { %v9144_v27 = vpop.f32.mrb[94].mxu1 }
 0x71a   : > { %v9256_v17 = vadd.f32 %v9144_v27, %v20789_v16  ;;  %v15849_v33 = vpop.f32.mrb[95].mxu1 }
 0x71c   : > { %v20918_v62 = vadd.f32 %v20604_v5, %v9256_v17 }
 0x71d   : > { %v9149_v0 = vpop.f32.mrb[96].mxu1 }
 0x71e   : > { %v9257_v30 = vadd.f32 %v9149_v0, %v20796_v41  ;;  %v15852_v8 = vpop.f32.mrb[97].mxu1 }
 0x720   : > { %v20922_v31 = vadd.f32 %v20613_v3, %v9257_v30 }
 0x721   : > { %v9154_v11 = vpop.f32.mrb[98].mxu1 }
 0x722   : > { %v9258_v4 = vadd.f32 %v9154_v11, %v20803_v39  ;;  %v15855_v26 = vpop.f32.mrb[99].mxu1 }
 0x724   : > { %v20926_v57 = vadd.f32 %v20622_v15, %v9258_v4 }
 0x725   : > { %v9159_v37 = vpop.f32.mrb[100].mxu1 }
 0x726   : > { %v9259_v16 = vadd.f32 %v9159_v37, %v20810_v45  ;;  %v15858_v51 = vpop.f32.mrb[101].mxu1 }
 0x728   : > { %v20930_v5 = vadd.f32 %v20631_v24, %v9259_v16 }
 0x729   : > { %v9164_v18 = vpop.f32.mrb[102].mxu1 }
 0x72a   : > { %v9260_v41 = vadd.f32 %v9164_v18, %v20817_v61  ;;  %v15861_v60 = vpop.f32.mrb[103].mxu1 }
 0x72c   : > { %v20934_v3 = vadd.f32 %v20640_v32, %v9260_v41 }
 0x72d   : > { %v9169_v46 = vpop.f32.mrb[104].mxu1 }
 0x72e   : > { %v9261_v39 = vadd.f32 %v9169_v46, %v20830_v34  ;;  %v15864_v52 = vpop.f32.mrb[105].mxu1 }
 0x730   : > { %v20938_v15 = vadd.f32 %v20649_v53, %v9261_v39 }
 0x731   : > { %v9174_v19 = vpop.f32.mrb[106].mxu1 }
 0x732   : > { %v9262_v45 = vadd.f32 %v9174_v19, %v20838_v48  ;;  %v15867_v50 = vpop.f32.mrb[107].mxu1 }
 0x734   : > { %v20942_v24 = vadd.f32 %v20658_v21, %v9262_v45 }
 0x735   : > { %v9179_v10 = vpop.f32.mrb[108].mxu1 }
 0x736   : > { %v9263_v61 = vadd.f32 %v9179_v10, %v20845_v43  ;;  %v15870_v54 = vpop.f32.mrb[109].mxu1 }
 0x738   : > { %v20946_v32 = vadd.f32 %v20667_v7, %v9263_v61 }
 0x739   : > { %v9184_v36 = vpop.f32.mrb[110].mxu1 }
 0x73a   : > { %v9264_v34 = vadd.f32 %v9184_v36, %v20852_v58  ;;  %v15873_v42 = vpop.f32.mrb[111].mxu1 }
 0x73c   : > { %v20950_v53 = vadd.f32 %v20676_v56, %v9264_v34 }
 0x73d   : > { %v9189_v28 = vpop.f32.mrb[112].mxu1 }
 0x73e   : > { %v9265_v48 = vadd.f32 %v9189_v28, %v20859_v6  ;;  %v15876_v1 = vpop.f32.mrb[113].mxu1 }
 0x740   : > { %v20954_v21 = vadd.f32 %v20685_v13, %v9265_v48 }
 0x741   : > { %v9194_v38 = vpop.f32.mrb[114].mxu1 }
 0x742   : > { %v9266_v43 = vadd.f32 %v9194_v38, %v20866_v2  ;;  %v15879_v55 = vpop.f32.mrb[115].mxu1 }
 0x744   : > { %v20958_v7 = vadd.f32 %v20694_v9, %v9266_v43 }
 0x745   : > { %v9199_v47 = vpop.f32.mrb[116].mxu1 }
 0x746   : > { %v9267_v58 = vadd.f32 %v9199_v47, %v20873_v20  ;;  %v15882_v40 = vpop.f32.mrb[117].mxu1 }
 0x748   : > { %v20962_v56 = vadd.f32 %v20703_v59, %v9267_v58 }
 0x749   : > { %v9204_v23 = vpop.f32.mrb[118].mxu1 }
 0x74a   : > { %v9268_v6 = vadd.f32 %v9204_v23, %v20880_v22  ;;  %v15885_v27 = vpop.f32.mrb[119].mxu1  ;;  %v10171_v23 = vld [vmem:[%s21415_s5 + $0x20] sm:$0xff] }
 0x74c   : > { %v20966_v13 = vadd.f32 %v20712_v35, %v9268_v6 }
 0x74d   : > { %v9209_v17 = vpop.f32.mrb[120].mxu1 }
 0x74e   : > { %v9269_v2 = vadd.f32 %v9209_v17, %v20887_v44  ;;  %v15888_v33 = vpop.f32.mrb[121].mxu1 }
 0x750   : > { %v20970_v9 = vadd.f32 %v20721_v49, %v9269_v2  ;;  %v20975_v49 = vld [vmem:[%s21414_s4] ss:$0 sm:$0xff] }
 0x751   : > { %v9214_v0 = vpop.f32.mrb[122].mxu1 }
 0x752   : > { %v15891_v20 = vpop.f32.mrb[123].mxu1 }
 0x755   : > { %v9219_v30 = vpop.f32.mrb[124].mxu1 }
 0x756   : > { %v15894_v8 = vpop.f32.mrb[125].mxu1 }
 0x759   : > { %v9224_v59 = vpop.f32.mrb[126].mxu1 }
 0x75a   : > { %v15897_v11 = vpop.f32.mrb[127].mxu1  ;;  %v10254_v59 = vld [vmem:[%s21415_s5 + $0x30] sm:$0xff] }
 0x75b   : > { %v10255_v11 = vld [vmem:[%s21415_s5 + $0x38] sm:$0xff] }
 0x75d   : > { %v9229_v4 = vpop.f32.mrb[128].mxu1 }
 0x75e   : > { %v15900_v26 = vpop.f32.mrb[129].mxu1  ;;  %v11832_v4 = vld [vmem:[%s21415_s5 + $0x168] sm:$0xff] }
 0x761   : > { %v9234_v22 = vpop.f32.mrb[130].mxu1 }
 0x762   : > { %v15903_v37 = vpop.f32.mrb[131].mxu1 }
 0x765   : > { %v9239_v16 = vpop.f32.mrb[132].mxu1 }
 0x766   : > { %v15906_v35 = vpop.f32.mrb[133].mxu1 }
 0x769   : > { %v9244_v51 = vpop.f32.mrb[134].mxu1 }
 0x76a   : > { %v15909_v18 = vpop.f32.mrb[135].mxu1 }
 0x76d   : > { %v9249_v41 = vpop.f32.mrb[136].mxu1 }
 0x76e   : > { %v15912_v44 = vpop.f32.mrb[137].mxu1 }
 0x771   : > { %v9767_v60 = vpop.f32.mrb[138].mxu1 }
 0x772   : > { %v9891_v46 = vadd.f32 %v9767_v60, %v20906_v63  ;;  %v15994_v39 = vpop.f32.mrb[139].mxu1 }
 0x774   : > { %v9923_v52 = vadd.f32 %v20975_v49, %v9891_v46 }
 0x775   : > { %v9772_v19 = vpop.f32.mrb[140].mxu1 }
 0x776   : > { %v9948_v45 = vmax.f32 %v9923_v52, 0.0  ;;  %v9892_v50 = vadd.f32 %v9772_v19, %v20910_v14  ;;  %v15997_v10 = vpop.f32.mrb[141].mxu1 }
 0x778   : > { %9974 = vst.msk [vmem:[#allocation5] sm:$0xff] %vm9973_vm8, %v9948_v45  ;;  %v9924_v61 = vadd.f32 %v20975_v49, %v9892_v50 }
 0x779   : > { %v9777_v54 = vpop.f32.mrb[142].mxu1 }
 0x77a   : > { %v9949_v36 = vmax.f32 %v9924_v61, 0.0  ;;  %v9893_v34 = vadd.f32 %v9777_v54, %v20914_v29  ;;  %v16000_v42 = vpop.f32.mrb[143].mxu1 }
 0x77c   : > { %9975 = vst.msk [vmem:[#allocation5 + $0x8] sm:$0xff] %vm9973_vm8, %v9949_v36  ;;  %v9925_v63 = vadd.f32 %v20975_v49, %v9893_v34 }
 0x77d   : > { %v9782_v28 = vpop.f32.mrb[144].mxu1 }
 0x77e   : > { %v9950_v48 = vmax.f32 %v9925_v63, 0.0  ;;  %v9894_v1 = vadd.f32 %v9782_v28, %v20918_v62  ;;  %v16003_v38 = vpop.f32.mrb[145].mxu1  ;;  %v10172_v62 = vld [vmem:[%s21415_s5 + $0x28] sm:$0xff]  ;;  %v16332_v63 = vpack.c.bf16 %v10255_v11, %v10254_v59 }
 0x77f   : > { %v10000_v55 = vld [vmem:[#allocation5] sm:$0x1]  ;;  %v10001_v47 = vld [vmem:[#allocation5 + $0x1] sm:$0x1]  ;;  %v16329_v20 = vpack.c.bf16 %v10172_v62, %v10171_v23  ;;  %v10009_v30 = vld [vmem:[#allocation5 + $0x2] sm:$0x1] }
 0x780   : > { %9976 = vst.msk [vmem:[#allocation5 + $0x10] sm:$0xff] %vm9973_vm8, %v9950_v48  ;;  %v9926_v14 = vadd.f32 %v20975_v49, %v9894_v1  ;;  %v10002_v2 = vmax.f32 %v10000_v55, %v10001_v47  ;;  %v10010_v8 = vld [vmem:[#allocation5 + $0x3] sm:$0x1]  ;;  %v10164_v35 = vld [vmem:[#allocation5 + $0x4] sm:$0x1] }
 0x781   : > { %v9787_v43 = vpop.f32.mrb[146].mxu1  ;;  %v10165_v51 = vld [vmem:[#allocation5 + $0x5] sm:$0x1]  ;;  %v10011_v46 = vmax.f32 %v10009_v30, %v10010_v8  ;;  %v10247_v28 = vld [vmem:[#allocation5 + $0x6] sm:$0x1] }
 0x782   : > { %v9951_v58 = vmax.f32 %v9926_v14, 0.0  ;;  %v9895_v29 = vadd.f32 %v9787_v43, %v20922_v31  ;;  %v16006_v40 = vpop.f32.mrb[147].mxu1  ;;  %v11831_v31 = vld [vmem:[%s21415_s5 + $0x160] sm:$0xff]  ;;  %v10166_v50 = vmax.f32 %v10164_v35, %v10165_v51  ;;  %v10248_v48 = vld [vmem:[#allocation5 + $0x7] sm:$0x1]  ;;  %v10338_v43 = vld [vmem:[%s21415_s5 + $0x48] sm:$0xff] }
 0x783   : > { %v10003_v6 = vld [vmem:[#allocation5 + $0xe] sm:$0x1]  ;;  %v10004_v27 = vld [vmem:[#allocation5 + $0xf] sm:$0x1]  ;;  %v16389_v61 = vpack.c.bf16 %v11832_v4, %v11831_v31  ;;  %v10420_v31 = vld [vmem:[%s21415_s5 + $0x50] sm:$0xff] }
 0x784   : > { %9977 = vst.msk [vmem:[#allocation5 + $0x18] sm:$0xff] %vm9973_vm8, %v9951_v58  ;;  %v9927_v17 = vadd.f32 %v20975_v49, %v9895_v29  ;;  %v10005_v33 = vmax.f32 %v10003_v6, %v10004_v27  ;;  %v10337_v14 = vld [vmem:[%s21415_s5 + $0x40] sm:$0xff]  ;;  %v10249_v29 = vmax.f32 %v10247_v28, %v10248_v48 }
 0x785   : > { %v9792_v0 = vpop.f32.mrb[148].mxu1  ;;  %v16335_v6 = vpack.c.bf16 %v10338_v43, %v10337_v14  ;;  %v10330_v27 = vld [vmem:[#allocation5 + $0x8] sm:$0x1] }
 0x786   : > { %v9952_v26 = vmax.f32 %v9927_v17, 0.0  ;;  %v9896_v22 = vadd.f32 %v9792_v0, %v20926_v57  ;;  %v16009_v37 = vpop.f32.mrb[149].mxu1  ;;  %v10006_v16 = vmax.f32 %v10002_v2, %v10005_v33  ;;  %v10331_v17 = vld [vmem:[#allocation5 + $0x9] sm:$0x1]  ;;  %v10421_v0 = vld [vmem:[%s21415_s5 + $0x58] sm:$0xff] }
 0x787   : > { %v10012_v18 = vld [vmem:[#allocation5 + $0x10] sm:$0x1]  ;;  %v10013_v41 = vld [vmem:[#allocation5 + $0x11] sm:$0x1]  ;;  %v10167_v44 = vld [vmem:[#allocation5 + $0x12] sm:$0x1]  ;;  %v10332_v30 = vmax.f32 %v10330_v27, %v10331_v17 }
 0x788   : > { %9978 = vst.msk [vmem:[#allocation5 + $0x20] sm:$0xff] %vm9973_vm8, %v9952_v26  ;;  %v9928_v60 = vadd.f32 %v20975_v49, %v9896_v22  ;;  %16079 = vmatmul.mubr.msk.f32.vlgmr.msra.gmra.mrb[136].mxu0 %vm9973_vm8, %v10006_v16  ;;  %v10014_v39 = vmax.f32 %v10012_v18, %v10013_v41  ;;  %v10168_v52 = vld [vmem:[#allocation5 + $0x13] sm:$0x1]  ;;  %v10250_v19 = vld [vmem:[#allocation5 + $0x14] sm:$0x1]  ;;  %v16338_v22 = vpack.c.bf16 %v10421_v0, %v10420_v31  ;;  %v10503_v37 = vld [vmem:[%s21415_s5 + $0x60] sm:$0xff] }
 0x789   : > { %v10251_v45 = vld [vmem:[#allocation5 + $0x15] sm:$0x1]  ;;  %16330 = vmatpush3.bf16.msra.mxu0 %v16329_v20  ;;  %v9797_v57 = vpop.f32.mrb[150].mxu1  ;;  %16085 = vmatprep.mubr.msk.f32.mxu0 %vm16543_vm6, %v16542_v12  ;;  %v10169_v10 = vmax.f32 %v10167_v44, %v10168_v52  ;;  %v10333_v55 = vld [vmem:[#allocation5 + $0x16] sm:$0x1] }
 0x78a   : > { %v9953_v54 = vmax.f32 %v9928_v60, 0.0  ;;  %v9897_v36 = vadd.f32 %v9797_v57, %v20930_v5  ;;  %v16012_v34 = vpop.f32.mrb[151].mxu1  ;;  %16331 = vmatprep.subr.bf16.mxu0 %v16544_v25  ;;  %v10015_v42 = vmax.f32 %v10011_v46, %v10014_v39  ;;  %v10252_v38 = vmax.f32 %v10250_v19, %v10251_v45  ;;  %v10334_v47 = vld [vmem:[#allocation5 + $0x17] sm:$0x1] }
 0x78b   : > { %v10170_v1 = vmax.f32 %v10166_v50, %v10169_v10  ;;  %v10335_v33 = vmax.f32 %v10333_v55, %v10334_v47  ;;  %v10413_v8 = vld [vmem:[#allocation5 + $0x1c] sm:$0x1]  ;;  %v10414_v59 = vld [vmem:[#allocation5 + $0x1d] sm:$0x1]  ;;  %v10504_v18 = vld [vmem:[%s21415_s5 + $0x68] sm:$0xff] }
 0x78c   : > { %9979 = vst.msk [vmem:[#allocation5 + $0x28] sm:$0xff] %vm9973_vm8, %v9953_v54  ;;  %v9929_v5 = vadd.f32 %v20975_v49, %v9897_v36  ;;  %16072 = vmatmul.mubr.msk.f32.vlgmr.msra.gmra.mrb[188].mxu1 %vm9973_vm8, %v10015_v42  ;;  %v10253_v2 = vmax.f32 %v10249_v29, %v10252_v38  ;;  %v10415_v41 = vmax.f32 %v10413_v8, %v10414_v59  ;;  %v10496_v10 = vld [vmem:[#allocation5 + $0x1e] sm:$0x1]  ;;  %v10587_v34 = vld [vmem:[%s21415_s5 + $0x78] sm:$0xff]  ;;  %v10669_v29 = vld [vmem:[%s21415_s5 + $0x80] sm:$0xff] }
 0x78d   : > { %16086 = vmatmul.mubr.msk.f32.vlgmr.msra.gmra.mrb[138].mxu0 %vm9973_vm8, %v10170_v1  ;;  %v9802_v58 = vpop.f32.mrb[152].mxu1  ;;  %16390 = vmatpush3.bf16.msra.mxu1 %v16389_v61  ;;  %v10336_v16 = vmax.f32 %v10332_v30, %v10335_v33  ;;  %v16341_v50 = vpack.c.bf16 %v10504_v18, %v10503_v37  ;;  %v10497_v61 = vld [vmem:[#allocation5 + $0x1f] sm:$0x1]  ;;  %v10753_v59 = vld [vmem:[%s21415_s5 + $0x98] sm:$0xff] }
 0x78e   : > { %v9954_v40 = vmax.f32 %v9929_v5, 0.0  ;;  %16333 = vmatpush3.bf16.msra.mxu0 %v16332_v63  ;;  %v9898_v23 = vadd.f32 %v9802_v58, %v20934_v3  ;;  %v16015_v62 = vpop.f32.mrb[153].mxu1  ;;  %16092 = vmatprep.mubr.msk.f32.mxu0 %vm16543_vm6, %v16542_v12  ;;  %v10586_v36 = vld [vmem:[%s21415_s5 + $0x70] sm:$0xff]  ;;  %v10498_v48 = vmax.f32 %v10496_v10, %v10497_v61 }
 0x78f   : > { %16334 = vmatprep.subr.bf16.mxu0 %v16544_v25  ;;  %16225 = vmatprep.mubr.msk.f32.mxu1 %vm16543_vm6, %v16542_v12  ;;  %v16344_v43 = vpack.c.bf16 %v10587_v34, %v10586_v36  ;;  %v10579_v5 = vld [vmem:[#allocation5 + $0x20] sm:$0x1]  ;;  %v10580_v55 = vld [vmem:[#allocation5 + $0x21] sm:$0x1]  ;;  %v10662_v0 = vld [vmem:[#allocation5 + $0x22] sm:$0x1] }
 0x790   : > { %9980 = vst.msk [vmem:[#allocation5 + $0x30] sm:$0xff] %vm9973_vm8, %v9954_v40  ;;  %v9930_v3 = vadd.f32 %v20975_v49, %v9898_v23  ;;  %16394 = vmatprep.subr.bf16.mxu1 %v16544_v25  ;;  %v10670_v40 = vld [vmem:[%s21415_s5 + $0x88] sm:$0xff]  ;;  %v10581_v27 = vmax.f32 %v10579_v5, %v10580_v55  ;;  %v10752_v8 = vld [vmem:[%s21415_s5 + $0x90] sm:$0xff]  ;;  %v10745_v18 = vld [vmem:[#allocation5 + $0x24] sm:$0x1] }
 0x791   : > { %16093 = vmatmul.mubr.msk.f32.vlgmr.msra.gmra.mrb[140].mxu0 %vm9973_vm8, %v10253_v2  ;;  %v9807_v20 = vpop.f32.mrb[154].mxu1  ;;  %v16347_v31 = vpack.c.bf16 %v10670_v40, %v10669_v29 }
 0x792   : > { %v9955_v11 = vmax.f32 %v9930_v3, 0.0  ;;  %16336 = vmatpush3.bf16.msra.mxu0 %v16335_v6  ;;  %v9899_v4 = vadd.f32 %v9807_v20, %v20938_v15  ;;  %v16018_v26 = vpop.f32.mrb[155].mxu1  ;;  %16099 = vmatprep.mubr.msk.f32.mxu0 %vm16543_vm6, %v16542_v12  ;;  %v10663_v3 = vld [vmem:[#allocation5 + $0x23] sm:$0x1] }
 0x793   : > { %16337 = vmatprep.subr.bf16.mxu0 %v16544_v25  ;;  %v10416_v35 = vld [vmem:[#allocation5 + $0x2a] sm:$0x1]  ;;  %v10417_v51 = vld [vmem:[#allocation5 + $0x2b] sm:$0x1]  ;;  %v10499_v60 = vld [vmem:[#allocation5 + $0x2c] sm:$0x1] }
 0x794   : > { %9981 = vst.msk [vmem:[#allocation5 + $0x38] sm:$0xff] %vm9973_vm8, %v9955_v11  ;;  %v9931_v15 = vadd.f32 %v20975_v49, %v9899_v4  ;;  %v10418_v44 = vmax.f32 %v10416_v35, %v10417_v51  ;;  %v10500_v46 = vld [vmem:[#allocation5 + $0x2d] sm:$0x1]  ;;  %v10582_v42 = vld [vmem:[#allocation5 + $0x2e] sm:$0x1]  ;;  %v16350_v51 = vpack.c.bf16 %v10753_v59, %v10752_v8  ;;  %v11084_v59 = vld [vmem:[%s21415_s5 + $0xd0] sm:$0xff] }
 0x795   : > { %16100 = vmatmul.mubr.msk.f32.vlgmr.msra.gmra.mrb[142].mxu0 %vm9973_vm8, %v10336_v16  ;;  %v9812_v39 = vpop.f32.mrb[156].mxu1  ;;  %v10501_v54 = vmax.f32 %v10499_v60, %v10500_v46  ;;  %v10583_v63 = vld [vmem:[#allocation5 + $0x2f] sm:$0x1]  ;;  %v10836_v46 = vld [vmem:[%s21415_s5 + $0xa8] sm:$0xff] }
 0x796   : > { %v9956_v52 = vmax.f32 %v9931_v15, 0.0  ;;  %16339 = vmatpush3.bf16.msra.mxu0 %v16338_v22  ;;  %v9900_v19 = vadd.f32 %v9812_v39, %v20942_v24  ;;  %v16021_v45 = vpop.f32.mrb[157].mxu1  ;;  %16106 = vmatprep.mubr.msk.f32.mxu0 %vm16543_vm6, %v16542_v12  ;;  %v10419_v57 = vmax.f32 %v10415_v41, %v10418_v44  ;;  %v10584_v58 = vmax.f32 %v10582_v42, %v10583_v63  ;;  %v10746_v15 = vld [vmem:[#allocation5 + $0x25] sm:$0x1]  ;;  %v10835_v60 = vld [vmem:[%s21415_s5 + $0xa0] sm:$0xff]  ;;  %v10918_v42 = vld [vmem:[%s21415_s5 + $0xb0] sm:$0xff] }
 0x797   : > { %16340 = vmatprep.subr.bf16.mxu0 %v16544_v25  ;;  %v10502_v47 = vmax.f32 %v10498_v48, %v10501_v54  ;;  %v10665_v23 = vld [vmem:[#allocation5 + $0x30] sm:$0x1]  ;;  %v10666_v62 = vld [vmem:[#allocation5 + $0x31] sm:$0x1]  ;;  %v10748_v11 = vld [vmem:[#allocation5 + $0x32] sm:$0x1]  ;;  %v10664_v22 = vmax.f32 %v10662_v0, %v10663_v3  ;;  %v10747_v45 = vmax.f32 %v10745_v18, %v10746_v15  ;;  %v16353_v61 = vpack.c.bf16 %v10836_v46, %v10835_v60 }
 0x798   : > { %9982 = vst.msk [vmem:[#allocation5 + $0x40] sm:$0xff] %vm9973_vm8, %v9956_v52  ;;  %v9932_v24 = vadd.f32 %v20975_v49, %v9900_v19  ;;  %v10585_v20 = vmax.f32 %v10581_v27, %v10584_v58  ;;  %v10667_v30 = vmax.f32 %v10665_v23, %v10666_v62  ;;  %v10749_v4 = vld [vmem:[#allocation5 + $0x33] sm:$0x1]  ;;  %v10919_v63 = vld [vmem:[%s21415_s5 + $0xb8] sm:$0xff]  ;;  %v11167_v60 = vld [vmem:[%s21415_s5 + $0xe0] sm:$0xff] }
 0x799   : > { %16107 = vmatmul.mubr.msk.f32.vlgmr.msra.gmra.mrb[144].mxu0 %vm9973_vm8, %v10419_v57  ;;  %v9817_v28 = vpop.f32.mrb[158].mxu1  ;;  %v10750_v44 = vmax.f32 %v10748_v11, %v10749_v4  ;;  %v16356_v55 = vpack.c.bf16 %v10919_v63, %v10918_v42  ;;  %v11002_v23 = vld [vmem:[%s21415_s5 + $0xc8] sm:$0xff] }
 0x79a   : > { %v9957_v1 = vmax.f32 %v9932_v24, 0.0  ;;  %16342 = vmatpush3.bf16.msra.mxu0 %v16341_v50  ;;  %v9901_v38 = vadd.f32 %v9817_v28, %v20946_v32  ;;  %v16024_v14 = vpop.f32.mrb[159].mxu1  ;;  %16113 = vmatprep.mubr.msk.f32.mxu0 %vm16543_vm6, %v16542_v12  ;;  %v10668_v41 = vmax.f32 %v10664_v22, %v10667_v30  ;;  %v11168_v46 = vld [vmem:[%s21415_s5 + $0xe8] sm:$0xff] }
 0x79b   : > { %16343 = vmatprep.subr.bf16.mxu0 %v16544_v25  ;;  %v10828_v54 = vld [vmem:[#allocation5 + $0x38] sm:$0x1]  ;;  %v10829_v36 = vld [vmem:[#allocation5 + $0x39] sm:$0x1]  ;;  %v10751_v34 = vmax.f32 %v10747_v45, %v10750_v44  ;;  %v10912_v58 = vld [vmem:[#allocation5 + $0x3b] sm:$0x1] }
 0x79c   : > { %9983 = vst.msk [vmem:[#allocation5 + $0x48] sm:$0xff] %vm9973_vm8, %v9957_v1  ;;  %v9933_v32 = vadd.f32 %v20975_v49, %v9901_v38  ;;  %v10830_v38 = vmax.f32 %v10828_v54, %v10829_v36  ;;  %v10994_v3 = vld [vmem:[#allocation5 + $0x3c] sm:$0x1]  ;;  %v11077_v18 = vld [vmem:[#allocation5 + $0x3e] sm:$0x1] }
 0x79d   : > { %16114 = vmatmul.mubr.msk.f32.vlgmr.msra.gmra.mrb[146].mxu0 %vm9973_vm8, %v10502_v47  ;;  %v9822_v6 = vpop.f32.mrb[160].mxu1  ;;  %v10911_v47 = vld [vmem:[#allocation5 + $0x3a] sm:$0x1]  ;;  %v11078_v15 = vld [vmem:[#allocation5 + $0x3f] sm:$0x1] }
 0x79e   : > { %v9958_v17 = vmax.f32 %v9933_v32, 0.0  ;;  %16345 = vmatpush3.bf16.msra.mxu0 %v16344_v43  ;;  %v9902_v2 = vadd.f32 %v9822_v6, %v20950_v53  ;;  %v16027_v33 = vpop.f32.mrb[161].mxu1  ;;  %16120 = vmatprep.mubr.msk.f32.mxu0 %vm16543_vm6, %v16542_v12  ;;  %v11001_v32 = vld [vmem:[%s21415_s5 + $0xc0] sm:$0xff] }
 0x79f   : > { %16346 = vmatprep.subr.bf16.mxu0 %v16544_v25  ;;  %v10831_v39 = vld [vmem:[#allocation5 + $0x46] sm:$0x1]  ;;  %v10832_v52 = vld [vmem:[#allocation5 + $0x47] sm:$0x1]  ;;  %v16359_v0 = vpack.c.bf16 %v11002_v23, %v11001_v32  ;;  %v11997_v32 = vld [vmem:[%s21415_s5 + $0x180] sm:$0xff] }
 0x7a0   : > { %9984 = vst.msk [vmem:[#allocation5 + $0x50] sm:$0xff] %vm9973_vm8, %v9958_v17  ;;  %v9934_v53 = vadd.f32 %v20975_v49, %v9902_v2  ;;  %v10833_v24 = vmax.f32 %v10831_v39, %v10832_v52  ;;  %v10913_v17 = vmax.f32 %v10911_v47, %v10912_v58 }
 0x7a1   : > { %16121 = vmatmul.mubr.msk.f32.vlgmr.msra.gmra.mrb[148].mxu0 %vm9973_vm8, %v10585_v20  ;;  %v9827_v26 = vpop.f32.mrb[162].mxu1  ;;  %v10995_v20 = vld [vmem:[#allocation5 + $0x3d] sm:$0x1] }
 0x7a2   : > { %v9959_v37 = vmax.f32 %v9934_v53, 0.0  ;;  %16348 = vmatpush3.bf16.msra.mxu0 %v16347_v31  ;;  %v9903_v16 = vadd.f32 %v9827_v26, %v20954_v21  ;;  %v16030_v35 = vpop.f32.mrb[163].mxu1  ;;  %16127 = vmatprep.mubr.msk.f32.mxu0 %vm16543_vm6, %v16542_v12  ;;  %v10834_v29 = vmax.f32 %v10830_v38, %v10833_v24  ;;  %v11085_v53 = vld [vmem:[%s21415_s5 + $0xd8] sm:$0xff]  ;;  %v10996_v22 = vmax.f32 %v10994_v3, %v10995_v20 }
 0x7a3   : > { %16349 = vmatprep.subr.bf16.mxu0 %v16544_v25  ;;  %v10914_v28 = vld [vmem:[#allocation5 + $0x48] sm:$0x1]  ;;  %v10915_v48 = vld [vmem:[#allocation5 + $0x49] sm:$0x1]  ;;  %v10997_v62 = vld [vmem:[#allocation5 + $0x4a] sm:$0x1] }
 0x7a4   : > { %9985 = vst.msk [vmem:[#allocation5 + $0x58] sm:$0xff] %vm9973_vm8, %v9959_v37  ;;  %v9935_v21 = vadd.f32 %v20975_v49, %v9903_v16  ;;  %v10916_v40 = vmax.f32 %v10914_v28, %v10915_v48  ;;  %v10998_v6 = vld [vmem:[#allocation5 + $0x4b] sm:$0x1]  ;;  %v11080_v11 = vld [vmem:[#allocation5 + $0x4c] sm:$0x1] }
 0x7a5   : > { %16128 = vmatmul.mubr.msk.f32.vlgmr.msra.gmra.mrb[150].mxu0 %vm9973_vm8, %v10668_v41  ;;  %v9832_v19 = vpop.f32.mrb[164].mxu1  ;;  %v10999_v8 = vmax.f32 %v10997_v62, %v10998_v6  ;;  %v11081_v4 = vld [vmem:[#allocation5 + $0x4d] sm:$0x1]  ;;  %v11164_v39 = vld [vmem:[#allocation5 + $0x4f] sm:$0x1] }
 0x7a6   : > { %v9960_v57 = vmax.f32 %v9935_v21, 0.0  ;;  %16351 = vmatpush3.bf16.msra.mxu0 %v16350_v51  ;;  %v9904_v50 = vadd.f32 %v9832_v19, %v20958_v7  ;;  %v16033_v10 = vpop.f32.mrb[165].mxu1  ;;  %16134 = vmatprep.mubr.msk.f32.mxu0 %vm16543_vm6, %v16542_v12  ;;  %v10917_v30 = vmax.f32 %v10913_v17, %v10916_v40  ;;  %v16362_v51 = vpack.c.bf16 %v11085_v53, %v11084_v59  ;;  %v11163_v21 = vld [vmem:[#allocation5 + $0x4e] sm:$0x1]  ;;  %v11417_v40 = vld [vmem:[%s21415_s5 + $0x118] sm:$0xff] }
 0x7a7   : > { %16352 = vmatprep.subr.bf16.mxu0 %v16544_v25  ;;  %v11000_v41 = vmax.f32 %v10996_v22, %v10999_v8  ;;  %v11082_v44 = vmax.f32 %v11080_v11, %v11081_v4  ;;  %v11079_v19 = vmax.f32 %v11077_v18, %v11078_v15  ;;  %v11160_v10 = vld [vmem:[#allocation5 + $0x40] sm:$0x1]  ;;  %v11165_v36 = vmax.f32 %v11163_v21, %v11164_v39  ;;  %v11244_v38 = vld [vmem:[#allocation5 + $0x55] sm:$0x1]  ;;  %v11499_v21 = vld [vmem:[%s21415_s5 + $0x120] sm:$0xff] }
 0x7a8   : > { %9986 = vst.msk [vmem:[#allocation5 + $0x60] sm:$0xff] %vm9973_vm8, %v9960_v57  ;;  %v9936_v7 = vadd.f32 %v20975_v49, %v9904_v50  ;;  %v16365_v50 = vpack.c.bf16 %v11168_v46, %v11167_v60  ;;  %v11500_v39 = vld [vmem:[%s21415_s5 + $0x128] sm:$0xff] }
 0x7a9   : > { %16135 = vmatmul.mubr.msk.f32.vlgmr.msra.gmra.mrb[152].mxu0 %vm9973_vm8, %v10751_v34  ;;  %v9837_v1 = vpop.f32.mrb[166].mxu1  ;;  %v11083_v54 = vmax.f32 %v11079_v19, %v11082_v44  ;;  %v11251_v34 = vld [vmem:[%s21415_s5 + $0xf8] sm:$0xff] }
 0x7aa   : > { %v9961_v14 = vmax.f32 %v9936_v7, 0.0  ;;  %16354 = vmatpush3.bf16.msra.mxu0 %v16353_v61  ;;  %v9905_v43 = vadd.f32 %v9837_v1, %v20962_v56  ;;  %v16036_v5 = vpop.f32.mrb[167].mxu1  ;;  %16141 = vmatprep.mubr.msk.f32.mxu0 %vm16543_vm6, %v16542_v12  ;;  %v11161_v61 = vld [vmem:[#allocation5 + $0x41] sm:$0x1]  ;;  %v11243_v1 = vld [vmem:[#allocation5 + $0x54] sm:$0x1] }
 0x7ab   : > { %16355 = vmatprep.subr.bf16.mxu0 %v16544_v25  ;;  %v11162_v7 = vmax.f32 %v11160_v10, %v11161_v61  ;;  %v11333_v5 = vld [vmem:[%s21415_s5 + $0x100] sm:$0xff]  ;;  %v11410_v44 = vld [vmem:[#allocation5 + $0x59] sm:$0x1]  ;;  %v16377_v61 = vpack.c.bf16 %v11500_v39, %v11499_v21  ;;  %v12077_v39 = vld [vmem:[%s21417_s7 + $0x8] sm:$0xff] }
 0x7ac   : > { %9987 = vst.msk [vmem:[#allocation5 + $0x68] sm:$0xff] %vm9973_vm8, %v9961_v14  ;;  %v9937_v56 = vadd.f32 %v20975_v49, %v9905_v43  ;;  %v12076_v21 = vld [vmem:[%s21417_s7] sm:$0xff] }
 0x7ad   : > { %16142 = vmatmul.mubr.msk.f32.vlgmr.msra.gmra.mrb[154].mxu0 %vm9973_vm8, %v10834_v29  ;;  %v9842_v27 = vpop.f32.mrb[168].mxu1  ;;  %v11166_v14 = vmax.f32 %v11162_v7, %v11165_v36  ;;  %v11416_v29 = vld [vmem:[%s21415_s5 + $0x110] sm:$0xff] }
 0x7ae   : > { %v9962_v2 = vmax.f32 %v9937_v56, 0.0  ;;  %16357 = vmatpush3.bf16.msra.mxu0 %v16356_v55  ;;  %v9906_v33 = vadd.f32 %v9842_v27, %v20966_v13  ;;  %v16039_v31 = vpop.f32.mrb[169].mxu1  ;;  %16148 = vmatprep.mubr.msk.f32.mxu0 %vm16543_vm6, %v16542_v12  ;;  %v11334_v55 = vld [vmem:[%s21415_s5 + $0x108] sm:$0xff]  ;;  %v11245_v56 = vmax.f32 %v11243_v1, %v11244_v38  ;;  %v11492_v36 = vld [vmem:[#allocation5 + $0x5a] sm:$0x1] }
 0x7af   : > { %16358 = vmatprep.subr.bf16.mxu0 %v16544_v25  ;;  %v11246_v24 = vld [vmem:[#allocation5 + $0x62] sm:$0x1]  ;;  %v11247_v42 = vld [vmem:[#allocation5 + $0x63] sm:$0x1]  ;;  %v11329_v47 = vld [vmem:[#allocation5 + $0x64] sm:$0x1] }
 0x7b0   : > { %9988 = vst.msk [vmem:[#allocation5 + $0x70] sm:$0xff] %vm9973_vm8, %v9962_v2  ;;  %v9938_v13 = vadd.f32 %v20975_v49, %v9906_v33  ;;  %v11248_v43 = vmax.f32 %v11246_v24, %v11247_v42  ;;  %v11330_v58 = vld [vmem:[#allocation5 + $0x65] sm:$0x1]  ;;  %v11998_v27 = vld [vmem:[%s21415_s5 + $0x188] sm:$0xff]  ;;  %v16371_v2 = vpack.c.bf16 %v11334_v55, %v11333_v5  ;;  %v11413_v11 = vld [vmem:[#allocation5 + $0x67] sm:$0x1] }
 0x7b1   : > { %16149 = vmatmul.mubr.msk.f32.vlgmr.msra.gmra.mrb[156].mxu0 %vm9973_vm8, %v10917_v30  ;;  %v9847_v26 = vpop.f32.mrb[170].mxu1  ;;  %v11326_v33 = vld [vmem:[#allocation5 + $0x56] sm:$0x1]  ;;  %v11327_v31 = vld [vmem:[#allocation5 + $0x57] sm:$0x1]  ;;  %v11331_v3 = vmax.f32 %v11329_v47, %v11330_v58  ;;  %v11582_v42 = vld [vmem:[%s21415_s5 + $0x130] sm:$0xff] }
 0x7b2   : > { %v9963_v37 = vmax.f32 %v9938_v13, 0.0  ;;  %16360 = vmatpush3.bf16.msra.mxu0 %v16359_v0  ;;  %v9907_v16 = vadd.f32 %v9847_v26, %v20970_v9  ;;  %v16042_v35 = vpop.f32.mrb[171].mxu1  ;;  %16155 = vmatprep.mubr.msk.f32.mxu0 %vm16543_vm6, %v16542_v12  ;;  %v11249_v0 = vmax.f32 %v11245_v56, %v11248_v43  ;;  %v11412_v13 = vld [vmem:[#allocation5 + $0x66] sm:$0x1]  ;;  %v11328_v22 = vmax.f32 %v11326_v33, %v11327_v31  ;;  %v11575_v43 = vld [vmem:[#allocation5 + $0x5c] sm:$0x1] }
 0x7b3   : > { %16361 = vmatprep.subr.bf16.mxu0 %v16544_v25  ;;  %v11495_v19 = vld [vmem:[#allocation5 + $0x68] sm:$0x1]  ;;  %v11578_v7 = vld [vmem:[#allocation5 + $0x6a] sm:$0x1]  ;;  %v11576_v5 = vld [vmem:[#allocation5 + $0x5d] sm:$0x1] }
 0x7b4   : > { %9989 = vst.msk [vmem:[#allocation5 + $0x78] sm:$0xff] %vm9973_vm8, %v9963_v37  ;;  %v9939_v9 = vadd.f32 %v20975_v49, %v9907_v16  ;;  %v11250_v49 = vld [vmem:[%s21415_s5 + $0xf0] sm:$0xff]  ;;  %v16374_v37 = vpack.c.bf16 %v11417_v40, %v11416_v29  ;;  %v16395_v16 = vpack.c.bf16 %v11998_v27, %v11997_v32  ;;  %v11332_v46 = vmax.f32 %v11328_v22, %v11331_v3  ;;  %v11665_v58 = vld [vmem:[%s21415_s5 + $0x140] sm:$0xff]  ;;  %v11666_v29 = vld [vmem:[%s21415_s5 + $0x148] sm:$0xff] }
 0x7b5   : > { %16156 = vmatmul.mubr.msk.f32.vlgmr.msra.gmra.mrb[158].mxu0 %vm9973_vm8, %v11000_v41  ;;  %v9852_v52 = vpop.f32.mrb[172].mxu1  ;;  %v16368_v48 = vpack.c.bf16 %v11251_v34, %v11250_v49  ;;  %v11409_v41 = vld [vmem:[#allocation5 + $0x58] sm:$0x1]  ;;  %v11493_v49 = vld [vmem:[#allocation5 + $0x5b] sm:$0x1]  ;;  %v11577_v56 = vmax.f32 %v11575_v43, %v11576_v5 }
 0x7b6   : > { %v9964_v45 = vmax.f32 %v9939_v9, 0.0  ;;  %16363 = vmatpush3.bf16.msra.mxu0 %v16362_v51  ;;  %16162 = vmatprep.mubr.msk.f32.mxu0 %vm16543_vm6, %v16542_v12  ;;  %v16045_v57 = vpop.f32.mrb[173].mxu1  ;;  %v11414_v9 = vmax.f32 %v11412_v13, %v11413_v11  ;;  %v11494_v1 = vmax.f32 %v11492_v36, %v11493_v49  ;;  %v11748_v31 = vld [vmem:[%s21415_s5 + $0x150] sm:$0xff]  ;;  %v12083_v36 = vld [vmem:[%s21417_s7 + $0x38] sm:$0xff] }
 0x7b7   : > { %16364 = vmatprep.subr.bf16.mxu0 %v16544_v25  ;;  %v11824_v62 = vld [vmem:[#allocation5 + $0x74] sm:$0x1]  ;;  %v11825_v6 = vld [vmem:[#allocation5 + $0x75] sm:$0x1]  ;;  %v11658_v27 = vld [vmem:[#allocation5 + $0x70] sm:$0x1] }
 0x7b8   : > { %9990 = vst.msk [vmem:[#allocation5 + $0x80] sm:$0xff] %vm9973_vm8, %v9964_v45  ;;  %v11826_v59 = vmax.f32 %v11824_v62, %v11825_v6  ;;  %v11496_v45 = vld [vmem:[#allocation5 + $0x69] sm:$0x1]  ;;  %v16383_v6 = vpack.c.bf16 %v11666_v29, %v11665_v58  ;;  %v11742_v13 = vld [vmem:[#allocation5 + $0x73] sm:$0x1]  ;;  %v11914_v22 = vld [vmem:[%s21415_s5 + $0x170] sm:$0xff] }
 0x7b9   : > { %16163 = vmatmul.mubr.msk.f32.vlgmr.msra.gmra.mrb[160].mxu0 %vm9973_vm8, %v11083_v54  ;;  %v9857_v63 = vpop.f32.mrb[174].mxu1  ;;  %v11497_v24 = vmax.f32 %v11495_v19, %v11496_v45  ;;  %v12078_v19 = vld [vmem:[%s21417_s7 + $0x10] sm:$0xff]  ;;  %v12079_v45 = vld [vmem:[%s21417_s7 + $0x18] sm:$0xff]  ;;  %v12171_v29 = vld [vmem:[%s21419_s9 + $0x20] sm:$0xff] }
 0x7ba   : > { %16366 = vmatpush3.bf16.msra.mxu0 %v16365_v50  ;;  %16169 = vmatprep.mubr.msk.f32.mxu0 %vm16543_vm6, %v16542_v12  ;;  %v16048_v28 = vpop.f32.mrb[175].mxu1  ;;  %v11411_v50 = vmax.f32 %v11409_v41, %v11410_v44  ;;  %v11583_v63 = vld [vmem:[%s21415_s5 + $0x138] sm:$0xff]  ;;  %v11908_v41 = vld [vmem:[#allocation5 + $0x77] sm:$0x1]  ;;  %v12169_v43 = vld [vmem:[%s21419_s9 + $0x10] sm:$0xff] }
 0x7bb   : > { %16367 = vmatprep.subr.bf16.mxu0 %v16544_v25  ;;  %v11990_v35 = vld [vmem:[#allocation5 + $0x78] sm:$0x1]  ;;  %v11991_v51 = vld [vmem:[#allocation5 + $0x79] sm:$0x1]  ;;  %v11579_v28 = vld [vmem:[#allocation5 + $0x6b] sm:$0x1]  ;;  %v11498_v55 = vmax.f32 %v11494_v1, %v11497_v24 }
 0x7bc   : > { %v11992_v52 = vmax.f32 %v11990_v35, %v11991_v51  ;;  %v11415_v34 = vmax.f32 %v11411_v50, %v11414_v9  ;;  %v11580_v47 = vmax.f32 %v11578_v7, %v11579_v28  ;;  %v11661_v40 = vld [vmem:[#allocation5 + $0x7e] sm:$0x1]  ;;  %v11662_v32 = vld [vmem:[#allocation5 + $0x7f] sm:$0x1]  ;;  %v12080_v50 = vld [vmem:[%s21417_s7 + $0x20] sm:$0xff] }
 0x7bd   : > { %16170 = vmatmul.mubr.msk.f32.vlgmr.msra.gmra.mrb[162].mxu0 %vm9973_vm8, %v11166_v14  ;;  %v9862_v23 = vpop.f32.mrb[176].mxu1  ;;  %v16380_v14 = vpack.c.bf16 %v11583_v63, %v11582_v42  ;;  %v11663_v33 = vmax.f32 %v11661_v40, %v11662_v32  ;;  %v12085_v24 = vld [vmem:[%s21417_s7 + $0x48] sm:$0xff]  ;;  %v12086_v63 = vld [vmem:[%s21417_s7 + $0x50] sm:$0xff]  ;;  %v12087_v7 = vld [vmem:[%s21417_s7 + $0x58] sm:$0xff] }
 0x7be   : > { %16369 = vmatpush3.bf16.msra.mxu0 %v16368_v48  ;;  %16176 = vmatprep.mubr.msk.f32.mxu0 %vm16543_vm6, %v16542_v12  ;;  %v16051_v17 = vpop.f32.mrb[177].mxu1  ;;  %v12088_v28 = vld [vmem:[%s21417_s7 + $0x60] sm:$0xff]  ;;  %v12089_v1 = vld [vmem:[%s21417_s7 + $0x68] sm:$0xff]  ;;  %v12090_v32 = vld [vmem:[%s21417_s7 + $0x70] sm:$0xff] }
 0x7bf   : > { %16370 = vmatprep.subr.bf16.mxu0 %v16544_v25  ;;  %v11827_v20 = vld [vmem:[#allocation5 + $0x82] sm:$0x1]  ;;  %v11828_v30 = vld [vmem:[#allocation5 + $0x83] sm:$0x1]  ;;  %v11993_v8 = vld [vmem:[#allocation5 + $0x86] sm:$0x1]  ;;  %v16416_v5 = vpack.c.bf16 %v12089_v1, %v12088_v28 }
 0x7c0   : > { %v11829_v53 = vmax.f32 %v11827_v20, %v11828_v30  ;;  %v11994_v4 = vld [vmem:[#allocation5 + $0x87] sm:$0x1]  ;;  %v11659_v17 = vld [vmem:[#allocation5 + $0x71] sm:$0x1]  ;;  %v11744_v3 = vld [vmem:[#allocation5 + $0x80] sm:$0x1] }
 0x7c1   : > { %16177 = vmatmul.mubr.msk.f32.vlgmr.msra.gmra.mrb[164].mxu0 %vm9973_vm8, %v11249_v0  ;;  %v9867_v26 = vpop.f32.mrb[178].mxu1  ;;  %v11995_v60 = vmax.f32 %v11993_v8, %v11994_v4  ;;  %v11749_v0 = vld [vmem:[%s21415_s5 + $0x158] sm:$0xff]  ;;  %v11660_v8 = vmax.f32 %v11658_v27, %v11659_v17  ;;  %v12172_v40 = vld [vmem:[%s21419_s9 + $0x28] sm:$0xff] }
 0x7c2   : > { %16372 = vmatpush3.bf16.msra.mxu0 %v16371_v2  ;;  %16183 = vmatprep.mubr.msk.f32.mxu0 %vm16543_vm6, %v16542_v12  ;;  %v16054_v18 = vpop.f32.mrb[179].mxu1  ;;  %v11830_v15 = vmax.f32 %v11826_v59, %v11829_v53  ;;  %v11581_v2 = vmax.f32 %v11577_v56, %v11580_v47  ;;  %v11745_v20 = vld [vmem:[#allocation5 + $0x81] sm:$0x1]  ;;  %v16386_v59 = vpack.c.bf16 %v11749_v0, %v11748_v31  ;;  %v11741_v53 = vld [vmem:[#allocation5 + $0x72] sm:$0x1]  ;;  %v12173_v56 = vld [vmem:[%s21419_s9 + $0x30] sm:$0xff] }
 0x7c3   : > { %16373 = vmatprep.subr.bf16.mxu0 %v16544_v25  ;;  %v11996_v54 = vmax.f32 %v11992_v52, %v11995_v60  ;;  %v11664_v4 = vmax.f32 %v11660_v8, %v11663_v33  ;;  %v11746_v26 = vmax.f32 %v11744_v3, %v11745_v20  ;;  %v11911_v35 = vld [vmem:[#allocation5 + $0x85] sm:$0x1]  ;;  %v11743_v51 = vmax.f32 %v11741_v53, %v11742_v13 }
 0x7c4   : > { %16226 = vmatmul.mubr.msk.f32.vlgmr.msra.gmra.mrb[190].mxu1 %vm9973_vm8, %v11830_v15  ;;  %v11907_v15 = vld [vmem:[#allocation5 + $0x76] sm:$0x1]  ;;  %v16398_v52 = vpack.c.bf16 %v12077_v39, %v12076_v21  ;;  %v12170_v47 = vld [vmem:[%s21419_s9 + $0x18] sm:$0xff] }
 0x7c5   : > { %16184 = vmatmul.mubr.msk.f32.vlgmr.msra.gmra.mrb[166].mxu0 %vm9973_vm8, %v11332_v46  ;;  %v9872_v57 = vpop.f32.mrb[180].mxu1  ;;  %16396 = vmatpush3.bf16.msra.mxu1 %v16395_v16  ;;  %v11910_v16 = vld [vmem:[#allocation5 + $0x84] sm:$0x1]  ;;  %v11747_v44 = vmax.f32 %v11743_v51, %v11746_v26  ;;  %v11909_v46 = vmax.f32 %v11907_v15, %v11908_v41  ;;  %v16422_v58 = vpack.c.bf16 %v12170_v47, %v12169_v43 }
 0x7c6   : > { %16375 = vmatpush3.bf16.msra.mxu0 %v16374_v37  ;;  %16190 = vmatprep.mubr.msk.f32.mxu0 %vm16543_vm6, %v16542_v12  ;;  %v16057_v10 = vpop.f32.mrb[181].mxu1  ;;  %v11915_v37 = vld [vmem:[%s21415_s5 + $0x178] sm:$0xff]  ;;  %v11912_v60 = vmax.f32 %v11910_v16, %v11911_v35  ;;  %v16401_v57 = vpack.c.bf16 %v12079_v45, %v12078_v19 }
 0x7c7   : > { %16376 = vmatprep.subr.bf16.mxu0 %v16544_v25  ;;  %16239 = vmatprep.mubr.msk.f32.mxu1 %vm16543_vm6, %v16542_v12  ;;  %v16392_v18 = vpack.c.bf16 %v11915_v37, %v11914_v22  ;;  %v12081_v10 = vld [vmem:[%s21417_s7 + $0x28] sm:$0xff] }
 0x7c8   : > { %16240 = vmatmul.mubr.msk.f32.vlgmr.msra.gmra.mrb[192].mxu1 %vm9973_vm8, %v11996_v54  ;;  %16418 = vmatprep.subr.bf16.mxu1 %v16544_v25  ;;  %v11913_v9 = vmax.f32 %v11909_v46, %v11912_v60  ;;  %v12082_v54 = vld [vmem:[%s21417_s7 + $0x30] sm:$0xff] }
 0x7c9   : > { %16191 = vmatmul.mubr.msk.f32.vlgmr.msra.gmra.mrb[168].mxu0 %vm9973_vm8, %v11415_v34  ;;  %v9877_v48 = vpop.f32.mrb[182].mxu1  ;;  %16297 = vmatprep.mubr.msk.f32.mxu1 %vm16543_vm6, %v16542_v12  ;;  %v16407_v49 = vpack.c.bf16 %v12083_v36, %v12082_v54  ;;  %v12084_v34 = vld [vmem:[%s21417_s7 + $0x40] sm:$0xff] }
 0x7ca   : > { %16378 = vmatpush3.bf16.msra.mxu0 %v16377_v61  ;;  %16197 = vmatprep.mubr.msk.f32.mxu0 %vm16543_vm6, %v16542_v12  ;;  %v16060_v38 = vpop.f32.mrb[183].mxu1  ;;  %v16404_v61 = vpack.c.bf16 %v12081_v10, %v12080_v50  ;;  %v16410_v42 = vpack.c.bf16 %v12085_v24, %v12084_v34  ;;  %v16413_v48 = vpack.c.bf16 %v12087_v7, %v12086_v63 }
 0x7cb   : > { %16379 = vmatprep.subr.bf16.mxu0 %v16544_v25  ;;  %v12167_v38 = vld [vmem:[%s21419_s9] sm:$0xff] }
 0x7cd   : > { %16198 = vmatmul.mubr.msk.f32.vlgmr.msra.gmra.mrb[170].mxu0 %vm9973_vm8, %v11498_v55  ;;  %v9882_v23 = vpop.f32.mrb[184].mxu1 }
 0x7ce   : > { %16381 = vmatpush3.bf16.msra.mxu0 %v16380_v14  ;;  %16204 = vmatprep.mubr.msk.f32.mxu0 %vm16543_vm6, %v16542_v12  ;;  %v16063_v62 = vpop.f32.mrb[185].mxu1  ;;  %v12168_v14 = vld [vmem:[%s21419_s9 + $0x8] sm:$0xff]  ;;  %v16425_v23 = vpack.c.bf16 %v12172_v40, %v12171_v29 }
 0x7cf   : > { %16382 = vmatprep.subr.bf16.mxu0 %v16544_v25  ;;  %v16419_v55 = vpack.c.bf16 %v12168_v14, %v12167_v38  ;;  %v12174_v62 = vld [vmem:[%s21419_s9 + $0x38] sm:$0xff] }
 0x7d1   : > { %16205 = vmatmul.mubr.msk.f32.vlgmr.msra.gmra.mrb[172].mxu0 %vm9973_vm8, %v11581_v2  ;;  %v9887_v30 = vpop.f32.mrb[186].mxu1  ;;  %16420 = vmatpush3.bf16.msra.mxu1 %v16419_v55 }
 0x7d2   : > { %16384 = vmatpush3.bf16.msra.mxu0 %v16383_v6  ;;  %16211 = vmatprep.mubr.msk.f32.mxu0 %vm16543_vm6, %v16542_v12  ;;  %v16066_v11 = vpop.f32.mrb[187].mxu1  ;;  %v16428_v6 = vpack.c.bf16 %v12174_v62, %v12173_v56 }
 0x7d3   : > { %16385 = vmatprep.subr.bf16.mxu0 %v16544_v25  ;;  %16421 = vmatprep.subr.bf16.mxu1 %v16544_v25 }
 0x7d5   : > { %16212 = vmatmul.mubr.msk.f32.vlgmr.msra.gmra.mrb[174].mxu0 %vm9973_vm8, %v11664_v4  ;;  %16423 = vmatpush3.bf16.msra.mxu1 %v16422_v58 }
 0x7d6   : > { %16387 = vmatpush3.bf16.msra.mxu0 %v16386_v59  ;;  %16218 = vmatprep.mubr.msk.f32.mxu0 %vm16543_vm6, %v16542_v12 }
 0x7d7   : > { %16391 = vmatprep.subr.bf16.mxu0 %v16544_v25  ;;  %16424 = vmatprep.subr.bf16.mxu1 %v16544_v25 }
 0x7d9   : > { %16219 = vmatmul.mubr.msk.f32.vlgmr.msra.gmra.mrb[176].mxu0 %vm9973_vm8, %v11747_v44  ;;  %16426 = vmatpush3.bf16.msra.mxu1 %v16425_v23 }
 0x7da   : > { %16393 = vmatpush3.bf16.msra.mxu0 %v16392_v18  ;;  %16232 = vmatprep.mubr.msk.f32.mxu0 %vm16543_vm6, %v16542_v12 }
 0x7db   : > { %16397 = vmatprep.subr.bf16.mxu0 %v16544_v25  ;;  %16427 = vmatprep.subr.bf16.mxu1 %v16544_v25 }
 0x7dd   : > { %16233 = vmatmul.mubr.msk.f32.vlgmr.msra.gmra.mrb[178].mxu0 %vm9973_vm8, %v11913_v9  ;;  %16429 = vmatpush3.bf16.msra.mxu1 %v16428_v6 }
 0x7de   : > { %16272 = vmatprep.mubr.msk.f32.mxu0 %vm16543_vm6, %v16542_v12  ;;  %16399 = vmatpush3.bf16.msra.mxu0 %v16398_v52 }
 0x7df   : > { %16400 = vmatprep.subr.bf16.mxu0 %v16544_v25  ;;  %16430 = vmatprep.subr.bf16.mxu1 %v16544_v25 }
 0x7e2   : > { %16402 = vmatpush3.bf16.msra.mxu0 %v16401_v57 }
 0x7e3   : > { %16403 = vmatprep.subr.bf16.mxu0 %v16544_v25 }
 0x7e6   : > { %16405 = vmatpush3.bf16.msra.mxu0 %v16404_v61 }
 0x7e7   : > { %16406 = vmatprep.subr.bf16.mxu0 %v16544_v25 }
 0x7ea   : > { %16408 = vmatpush3.bf16.msra.mxu0 %v16407_v49 }
 0x7eb   : > { %16409 = vmatprep.subr.bf16.mxu0 %v16544_v25 }
 0x7ee   : > { %16411 = vmatpush3.bf16.msra.mxu0 %v16410_v42 }
 0x7ef   : > { %16412 = vmatprep.subr.bf16.mxu0 %v16544_v25 }
 0x7f2   : > { %16414 = vmatpush3.bf16.msra.mxu0 %v16413_v48 }
 0x7f3   : > { %16415 = vmatprep.subr.bf16.mxu0 %v16544_v25 }
 0x7f6   : > { %16417 = vmatpush3.bf16.msra.mxu0 %v16416_v5 }
 0x7f7   : > { %16270 = vmatprep.subr.mxu0 %v16542_v12 }
 0x7fa   : > { %16271 = vmatpush3.msra.mxu0 %v12090_v32 }
 0x85b   : > { %v10160_v27 = vpop.f32.mrb[136].mxu0 }
 0x85c   : > { %v16080_v17 = vpop.f32.mrb[137].mxu0 }
 0x85f   : > { %v10087_v2 = vpop.f32.mrb[188].mxu1 }
 0x860   : > { %v10161_v33 = vadd.f32 %v10160_v27, %v10087_v2  ;;  %v10242_v31 = vpop.f32.mrb[138].mxu0  ;;  %v16073_v0 = vpop.f32.mrb[189].mxu1 }
 0x861   : > { %v16087_v3 = vpop.f32.mrb[139].mxu0 }
 0x862   : > { %v10246_v20 = vadd.f32 %v10242_v31, %v10161_v33 }
 0x864   : > { %v10325_v30 = vpop.f32.mrb[140].mxu0 }
 0x865   : > { %v10329_v8 = vadd.f32 %v10325_v30, %v10246_v20  ;;  %v16094_v59 = vpop.f32.mrb[141].mxu0 }
 0x866   : > { %v12073_v59 = vld [vmem:[%s21416_s6] sm:$0x1] }
 0x868   : > { %v10408_v53 = vpop.f32.mrb[142].mxu0 }
 0x869   : > { %v10412_v13 = vadd.f32 %v10408_v53, %v10329_v8  ;;  %v16101_v11 = vpop.f32.mrb[143].mxu0 }
 0x86c   : > { %v10491_v4 = vpop.f32.mrb[144].mxu0 }
 0x86d   : > { %v10495_v26 = vadd.f32 %v10491_v4, %v10412_v13  ;;  %v16108_v22 = vpop.f32.mrb[145].mxu0  ;;  %v12175_v4 = vld [vmem:[%s21419_s9 + $0x40] sm:$0xff] }
 0x870   : > { %v10574_v37 = vpop.f32.mrb[146].mxu0 }
 0x871   : > { %v10578_v16 = vadd.f32 %v10574_v37, %v10495_v26  ;;  %v16115_v25 = vpop.f32.mrb[147].mxu0  ;;  %v12176_v26 = vld [vmem:[%s21419_s9 + $0x48] sm:$0xff]  ;;  %v12177_v37 = vld [vmem:[%s21419_s9 + $0x50] sm:$0xf] }
 0x872   : > { %v16431_v22 = vpack.c.bf16 %v12176_v26, %v12175_v4 }
 0x874   : > { %v10657_v35 = vpop.f32.mrb[148].mxu0  ;;  %16432 = vmatpush3.bf16.msra.mxu1 %v16431_v22 }
 0x875   : > { %v10661_v51 = vadd.f32 %v10657_v35, %v10578_v16  ;;  %v16122_v18 = vpop.f32.mrb[149].mxu0  ;;  %16295 = vmatprep.subr.mxu1 %v16542_v12  ;;  %v12091_v16 = vld [vmem:[%s21418_s8] sm:$0x1] }
 0x876   : > { %v12178_v12 = vld [vmem:[%s21420_s10] sm:$0x1] }
 0x878   : > { %v10740_v15 = vpop.f32.mrb[150].mxu0  ;;  %16296 = vmatpush3.msk.msra.mxu1 %vm12183_vm10, %v12177_v37 }
 0x879   : > { %v10744_v41 = vadd.f32 %v10740_v15, %v10661_v51  ;;  %v16129_v44 = vpop.f32.mrb[151].mxu0 }
 0x87c   : > { %v10823_v60 = vpop.f32.mrb[152].mxu0 }
 0x87d   : > { %v10827_v46 = vadd.f32 %v10823_v60, %v10744_v41  ;;  %v16136_v9 = vpop.f32.mrb[153].mxu0 }
 0x880   : > { %v10906_v21 = vpop.f32.mrb[154].mxu0 }
 0x881   : > { %v10910_v39 = vadd.f32 %v10906_v21, %v10827_v46  ;;  %v16143_v52 = vpop.f32.mrb[155].mxu0 }
 0x884   : > { %v10989_v19 = vpop.f32.mrb[156].mxu0 }
 0x885   : > { %v10993_v45 = vadd.f32 %v10989_v19, %v10910_v39  ;;  %v16150_v57 = vpop.f32.mrb[157].mxu0 }
 0x888   : > { %v11072_v50 = vpop.f32.mrb[158].mxu0 }
 0x889   : > { %v11076_v10 = vadd.f32 %v11072_v50, %v10993_v45  ;;  %v16157_v61 = vpop.f32.mrb[159].mxu0 }
 0x88c   : > { %v11155_v54 = vpop.f32.mrb[160].mxu0 }
 0x88d   : > { %v11159_v36 = vadd.f32 %v11155_v54, %v11076_v10  ;;  %v16164_v49 = vpop.f32.mrb[161].mxu0 }
 0x890   : > { %v11238_v34 = vpop.f32.mrb[162].mxu0 }
 0x891   : > { %v11242_v24 = vadd.f32 %v11238_v34, %v11159_v36  ;;  %v16171_v42 = vpop.f32.mrb[163].mxu0 }
 0x894   : > { %v11321_v63 = vpop.f32.mrb[164].mxu0 }
 0x895   : > { %v11325_v7 = vadd.f32 %v11321_v63, %v11242_v24  ;;  %v16178_v28 = vpop.f32.mrb[165].mxu0 }
 0x897   : > { %v11902_v48 = vpop.f32.mrb[190].mxu1 }
 0x898   : > { %v11404_v1 = vpop.f32.mrb[166].mxu0  ;;  %v16227_v38 = vpop.f32.mrb[191].mxu1 }
 0x899   : > { %v11408_v14 = vadd.f32 %v11404_v1, %v11325_v7  ;;  %v16185_v43 = vpop.f32.mrb[167].mxu0 }
 0x89b   : > { %v12068_v5 = vpop.f32.mrb[192].mxu1 }
 0x89c   : > { %v11487_v55 = vpop.f32.mrb[168].mxu0  ;;  %v16241_v47 = vpop.f32.mrb[193].mxu1 }
 0x89d   : > { %v11491_v58 = vadd.f32 %v11487_v55, %v11408_v14  ;;  %v16192_v29 = vpop.f32.mrb[169].mxu0 }
 0x8a0   : > { %v11570_v40 = vpop.f32.mrb[170].mxu0 }
 0x8a1   : > { %v11574_v32 = vadd.f32 %v11570_v40, %v11491_v58  ;;  %v16199_v23 = vpop.f32.mrb[171].mxu0 }
 0x8a4   : > { %v11653_v56 = vpop.f32.mrb[172].mxu0 }
 0x8a5   : > { %v11657_v62 = vadd.f32 %v11653_v56, %v11574_v32  ;;  %v16206_v6 = vpop.f32.mrb[173].mxu0 }
 0x8a8   : > { %v11736_v27 = vpop.f32.mrb[174].mxu0 }
 0x8a9   : > { %v11740_v17 = vadd.f32 %v11736_v27, %v11657_v62  ;;  %v16213_v2 = vpop.f32.mrb[175].mxu0 }
 0x8ac   : > { %v11819_v33 = vpop.f32.mrb[176].mxu0 }
 0x8ad   : > { %v11823_v31 = vadd.f32 %v11819_v33, %v11740_v17  ;;  %v16220_v0 = vpop.f32.mrb[177].mxu0 }
 0x8af   : > { %v11906_v3 = vadd.f32 %v11902_v48, %v11823_v31 }
 0x8b0   : > { %v11985_v20 = vpop.f32.mrb[178].mxu0 }
 0x8b1   : > { %v11989_v30 = vadd.f32 %v11985_v20, %v11906_v3  ;;  %v16234_v8 = vpop.f32.mrb[179].mxu0 }
 0x8b3   : > { %v12072_v53 = vadd.f32 %v12068_v5, %v11989_v30 }
 0x8b5   : > { %v12074_v13 = vadd.f32 %v12073_v59, %v12072_v53 }
 0x8b7   : > { %v12075_v11 = vmax.f32 %v12074_v13, 0.0 }
 0x8b9   : > { %16273 = vmatmul.mubr.msk.f32.vlgmr.msra.gmra.mrb[180].mxu0 %vm12092_vm9, %v12075_v11 }
 0x98c   : > { %v12162_v25 = vpop.f32.mrb[180].mxu0 }
 0x98d   : > { %v12163_v35 = vadd.f32 %v12162_v25, %v12091_v16  ;;  %v16274_v51 = vpop.f32.mrb[181].mxu0 }
 0x98f   : > { %v12166_v18 = vmax.f32 %v12163_v35, 0.0 }
 0x991   : > { %16298 = vmatmul.mubr.msk.f32.vlgmr.msra.gmra.mrb[194].mxu1 %vm12179_vm11, %v12166_v18 }
 0xa64   : > { %v12253_v15 = vpop.f32.mrb[194].mxu1 }
 0xa65   : > { %v12254_v41 = vadd.f32 %v12253_v15, %v12178_v12  ;;  %v16299_v44 = vpop.f32.mrb[195].mxu1 }
 0xa67   : > { %12258 = vst.msk [vmem:[%s379_s29] sm:$0x1] %vm12257_vm12, %v12254_v41 }
 0xa68   : > { %16490 = shalt.err (!%p16487_p3)
}
 0xa69   : > { %s16491_s26 = scalar_lea.hbm %s21368_s13, 16  ;;  %s16495_s16 = scalar_lea.hbm %s21421_s11, 32 }
 0xa6a   : > { %p16492_p4 = scmp.ne.s32.totalorder %s21368_s13, %s16491_s26  ;;  %p16496_p9 = scmp.lt.u32.totalorder %s21368_s13, %s21421_s11 }
 0xa6b   : > { %p16497_p10 = scmp.lt.u32.totalorder %s16495_s16, %s16491_s26  ;;  %p16499_p12 = scmp.lt.u32.totalorder %s16491_s26, %s21368_s13 }
 0xa6c   : > { %p16493_p7 = pnand %p16492_p4, %p16644_p5 }
 0xa6d   : > { %p16498_p11 = por %p16497_p10, %p16496_p9 }
 0xa6e   : > { %p16494_p8 = pneg %p16493_p7 }
 0xa6f   : > { %p16500_p13 = por %p16499_p12, %p16498_p11 }
 0xa71   : > { %p16501_p0 = pnand %p16500_p13, %p16494_p8 }
 0xa73   : > { %16504 = shalt.err (!%p16501_p0)
}
 0xa74   : > { %16433 = dma.vmem_to_hbm [thread:$0]  (%p16644_p5), %s21370_s30, 16, %s21368_s13, %s12260_s14  }
 0xa75 PF: > { %p16439_p1 = scmp.ge.s32.totalorder %s16539_s20, 2  ;;  %s12284_s15 = sand.u32 1, %s16527_s17  }
 0xa76   : > { %s12285_s22 = scalar_lea.sflag [#allocation7], %s12284_s15 }
 0xa77   : > { %p16436_p2 = pnand %p16439_p1, %p16648_p6 }
 0xa79   : > { %16522 = dma.done.wait (!%p16436_p2), %s12285_s22, 16  }
 0xa7a   : > { %16524 = vsyncadd (!%p16436_p2), %s12285_s22, 4294967280  ;;  %s21553_s24 = sld [smem:[#allocation9_spill]]  ;;  %p21_p3 = scmp.ge.s32.totalorder %s16631_s23, 4  }
 0xa7b   : > { %s21554_s17 = smov %s16531_s18  ;;  %s21555_s18 = smov %s16535_s19 }
 0xa7c   : > { %s21557_s20 = smov %s16631_s23  ;;  %23 = sbr.rel (!%p21_p3) target bundleno = 3 (0x3), region = 196 }
 0xa80   : > { %s21556_s19 = smov %s21553_s24 }
 0xa83   :  { %12289 = vsyncpa [#allocation7], 1 }
 0xa84   :  { %12291 = vsyncpa [#allocation7 + $0x1], 1 }

</bundles_post_ra>
